<compile_context>
chip_gen: v6e
topology: v6e:2x2x1
jax: 0.10.0
libtpu: 0.0.40
codegen_flags: <defaults>
</compile_context>

<pallas_src>
from functools import partial

import numpy as np
import jax
import jax.numpy as jnp
from jax.experimental import pallas as pl
from jax.experimental.pallas import tpu as pltpu

# ---------------- layout constants ----------------
C1, C2 = 10, 20           # real conv channel counts
C1P = 16                  # conv1 channels padded (lane group)
C2P = 24                  # conv2 channels padded (keeps pool-phase blocks 128-aligned)
NCLS = 2                  # real classes
NPAD = 128                # lane-dense padded class dim
NFC1 = 64                 # fc1 out padded 50 -> 64
KIN = 256                 # conv1 matmul K: 8 image rows x 32 padded cols
H1L = 2 * 12 * C1P        # 384: (rh, pw, c1) lanes per conv1 row-group
N1 = 4 * H1L              # 1536: 4 pool phases x 384
K2 = 12 * 12 * C1P        # 2304: (ph, pw, c1) conv2 K
H2L = 16 * C2P            # 384: (p2, q2, c2) lanes
N2 = 4 * H2L              # 1536: 4 pool phases x 384


# --------------------------------------------------------------------------
# Fused Pallas kernel: whole forward pass for TB samples per grid step
# --------------------------------------------------------------------------
def _net_kernel(x_ref, wc1_ref, b1_ref, wc2_ref, b2_ref,
                f1_ref, fb1_ref, f2_ref, fb2_ref, out_ref, h1_scr):
    f32 = jnp.float32
    tb = out_ref.shape[0]

    # ---- conv1(5x5) + maxpool(2) + ReLU: one matmul, pool phases in lane blocks ----
    # x_ref rows are (window u, sample) ; K = 8 image rows x 32 cols
    z1 = jnp.dot(x_ref[...], wc1_ref[...], preferred_element_type=f32)     # (6*tb, 1536)
    p1 = jnp.maximum(jnp.maximum(z1[:, 0 * H1L:1 * H1L], z1[:, 1 * H1L:2 * H1L]),
                     jnp.maximum(z1[:, 2 * H1L:3 * H1L], z1[:, 3 * H1L:4 * H1L]))
    h1_scr[...] = jnp.maximum(p1 + b1_ref[...], 0.0)                        # (6*tb, 384)

    # Move the six per-sample row groups into 384-lane-aligned blocks (contiguous row
    # reads of the scratch -> no sub-128 chunks, no strided gathers).
    c2in = jnp.concatenate(
        [h1_scr[u * tb:(u + 1) * tb, :] for u in range(6)], axis=1)         # (tb, 2304)

    # ---- conv2(5x5) + maxpool(2) + ReLU: one matmul, pool phases in lane blocks ----
    z2 = jnp.dot(c2in.astype(wc2_ref.dtype), wc2_ref[...],
                 preferred_element_type=f32)                                 # (tb, 1536)
    p2 = jnp.maximum(jnp.maximum(z2[:, 0 * H2L:1 * H2L], z2[:, 1 * H2L:2 * H2L]),
                     jnp.maximum(z2[:, 2 * H2L:3 * H2L], z2[:, 3 * H2L:4 * H2L]))
    h2 = jnp.maximum(p2 + b2_ref[...], 0.0)                                  # (tb, 384)

    # ---- fc1 + ReLU (torch NCHW flatten order folded into f1; out padded to 64) ----
    z3 = jnp.maximum(
        jnp.dot(h2.astype(f1_ref.dtype), f1_ref[...], preferred_element_type=f32)
        + fb1_ref[...], 0.0)                                                 # (tb, 64)

    # ---- fc2 + softmax (f32; padded class lanes carry -1e30 bias -> prob exactly 0) ----
    logits = jnp.dot(z3, f2_ref[...], preferred_element_type=f32) + fb2_ref[...]
    m = jnp.max(logits, axis=-1, keepdims=True)
    e = jnp.exp(logits - m)
    s = jnp.sum(e, axis=-1, keepdims=True)
    out_ref[...] = e * pl.reciprocal(s, approx=True)                         # (tb, 128)


# --------------------------------------------------------------------------
# Parameter packing: fold im2col gather / pooling phases / padding / flatten order
# into block-sparse constants built once.
# --------------------------------------------------------------------------
def pack_params(p, compute_dtype=jnp.bfloat16):
    f32 = np.float32
    w1 = np.asarray(p["w1"], f32)        # (10, 1, 5, 5)
    b1 = np.asarray(p["b1"], f32)
    w2 = np.asarray(p["w2"], f32)        # (20, 10, 5, 5)
    b2 = np.asarray(p["b2"], f32)
    fc1_w = np.asarray(p["fc1_w"], f32)  # (50, 320)
    fc1_b = np.asarray(p["fc1_b"], f32)
    fc2_w = np.asarray(p["fc2_w"], f32)  # (2, 50)
    fc2_b = np.asarray(p["fc2_b"], f32)

    # conv1 scatter weight (256, 1536).
    # Row r*32+c holds image pixel (4u+r, c) of window u; output column
    # ((dh*2+dw)*24 + rh*12 + pw)*16 + oc is conv output at oh=4u+2rh+dh, ow=2pw+dw.
    wc1 = np.zeros((KIN, N1), f32)
    for dh in range(2):
        for dw in range(2):
            for rh in range(2):
                for pw in range(12):
                    col0 = ((dh * 2 + dw) * 24 + rh * 12 + pw) * C1P
                    for kh in range(5):
                        r = 2 * rh + dh + kh
                        for kw in range(5):
                            c = 2 * pw + dw + kw
                            wc1[r * 32 + c, col0:col0 + C1] = w1[:, 0, kh, kw]
    b1t = np.zeros((1, H1L), f32)
    for rh in range(2):
        for pw in range(12):
            b1t[0, (rh * 12 + pw) * C1P:(rh * 12 + pw) * C1P + C1] = b1

    # conv2 scatter weight (2304, 1536).
    # Row ph*192 + pw*16 + ic is pooled conv1 activation h1[ph, pw, ic]; output column
    # ((d*2+e)*16 + p2*4 + q2)*24 + oc2 is conv2 output at oh2=2p2+d, ow2=2q2+e.
    wc2 = np.zeros((K2, N2), f32)
    w2t = np.transpose(w2, (1, 0, 2, 3))                 # (ic, oc2, kh, kw)
    for d in range(2):
        for e in range(2):
            for p2 in range(4):
                for q2 in range(4):
                    col0 = ((d * 2 + e) * 16 + p2 * 4 + q2) * C2P
                    for kh in range(5):
                        ph = 2 * p2 + d + kh
                        for kw in range(5):
                            pw = 2 * q2 + e + kw
                            row0 = ph * (12 * C1P) + pw * C1P
                            wc2[row0:row0 + C1, col0:col0 + C2] = w2t[:, :, kh, kw]
    b2t = np.zeros((1, H2L), f32)
    for pq in range(16):
        b2t[0, pq * C2P:pq * C2P + C2] = b2

    # fc1: rows = h2 lane order (p2, q2, oc2-padded); torch flatten (oc2, p2, q2) folded in.
    f1 = np.zeros((H2L, NFC1), f32)
    w_fc1 = fc1_w.reshape(50, C2, 4, 4)                  # (j, oc2, p2, q2)
    for p2 in range(4):
        for q2 in range(4):
            row0 = (p2 * 4 + q2) * C2P
            f1[row0:row0 + C2, :50] = w_fc1[:, :, p2, q2].T
    fb1 = np.zeros((1, NFC1), f32)
    fb1[0, :50] = fc1_b

    # fc2: 2 classes padded to 128 lanes; padded logits forced to -1e30 (softmax -> 0).
    f2 = np.zeros((NFC1, NPAD), f32)
    f2[:50, :NCLS] = fc2_w.T
    fb2 = np.full((1, NPAD), -1e30, f32)
    fb2[0, :NCLS] = fc2_b

    return (jnp.asarray(wc1, compute_dtype), jnp.asarray(b1t),
            jnp.asarray(wc2, compute_dtype), jnp.asarray(b2t),
            jnp.asarray(f1, compute_dtype), jnp.asarray(fb1),
            jnp.asarray(f2), jnp.asarray(fb2))


def _prep_input(x_nchw, tb, dtype):
    # Per sample, six overlapping 8-row windows (stride 4) of the 28x28 image, columns
    # zero-padded 28->32, flattened to 256 lanes.  Rows are ordered (block, window u,
    # sample-in-block) so the kernel can regroup them with contiguous row reads.
    x = jnp.asarray(x_nchw, jnp.float32)[:, 0]                          # (B, 28, 28)
    B = x.shape[0]
    Bp = -(-B // tb) * tb
    x = jnp.pad(x, ((0, Bp - B), (0, 0), (0, 4)))                       # (Bp, 28, 32)
    wins = jnp.stack([x[:, 4 * u:4 * u + 8, :] for u in range(6)], axis=1)  # (Bp,6,8,32)
    wins = wins.reshape(Bp // tb, tb, 6, KIN).transpose(0, 2, 1, 3)     # (G, 6, tb, 256)
    return wins.reshape(Bp * 6, KIN).astype(dtype), Bp


# --------------------------------------------------------------------------
# Forward pass
# --------------------------------------------------------------------------
@partial(jax.jit, static_argnums=(2,))
def net_forward(packed, x_nchw, batch_block):
    wc1, b1t, wc2, b2t, f1, fb1, f2, fb2 = packed
    B = x_nchw.shape[0]
    tb = min(batch_block, B)
    if B > tb:
        assert tb % 8 == 0, "batch_block must be a multiple of 8 for multi-block grids"
    x_win, Bp = _prep_input(x_nchw, tb, wc1.dtype)

    out = pl.pallas_call(
        _net_kernel,
        out_shape=jax.ShapeDtypeStruct((Bp, NPAD), jnp.float32),
        grid=(Bp // tb,),
        in_specs=[
            pl.BlockSpec((tb * 6, KIN), lambda i: (i, 0)),
            pl.BlockSpec(wc1.shape, lambda i: (0, 0)),
            pl.BlockSpec(b1t.shape, lambda i: (0, 0)),
            pl.BlockSpec(wc2.shape, lambda i: (0, 0)),
            pl.BlockSpec(b2t.shape, lambda i: (0, 0)),
            pl.BlockSpec(f1.shape, lambda i: (0, 0)),
            pl.BlockSpec(fb1.shape, lambda i: (0, 0)),
            pl.BlockSpec(f2.shape, lambda i: (0, 0)),
            pl.BlockSpec(fb2.shape, lambda i: (0, 0)),
        ],
        out_specs=pl.BlockSpec((tb, NPAD), lambda i: (i, 0)),
        scratch_shapes=[pltpu.VMEM((6 * tb, H1L), jnp.float32)],
        compiler_params=pltpu.CompilerParams(
            dimension_semantics=("parallel",),
            vmem_limit_bytes=40 * 1024 * 1024),
    )(x_win, wc1, b1t, wc2, b2t, f1, fb1, f2, fb2)

    return out[:B, :NCLS]


# --------------------------------------------------------------------------
# Parameters (deterministic, PyTorch-default-style uniform init)
# --------------------------------------------------------------------------
def init_params(key):
    ks = jax.random.split(key, 8)

    def u(k, shape, fan_in):
        bound = 1.0 / jnp.sqrt(jnp.float32(fan_in))
        return jax.random.uniform(k, shape, jnp.float32, -bound, bound)

    return {
        "w1": u(ks[0], (10, 1, 5, 5), 25),       # Conv2d(1, 10, 5)
        "b1": u(ks[1], (10,), 25),
        "w2": u(ks[2], (20, 10, 5, 5), 250),     # Conv2d(10, 20, 5)
        "b2": u(ks[3], (20,), 250),
        "fc1_w": u(ks[4], (50, 320), 320),       # Linear(320, 50)
        "fc1_b": u(ks[5], (50,), 320),
        "fc2_w": u(ks[6], (2, 50), 50),          # Linear(50, 2)
        "fc2_b": u(ks[7], (2,), 50),
    }


# --------------------------------------------------------------------------
# Pure-JAX reference of the same PyTorch forward (for correctness checking)
# --------------------------------------------------------------------------
def net_reference(params, x):
    hp = jax.lax.Precision.HIGHEST
    dn = ("NCHW", "OIHW", "NCHW")
    y = jax.lax.conv_general_dilated(x, params["w1"], (1, 1), "VALID",
                                     dimension_numbers=dn, precision=hp)
    y = y + params["b1"].reshape(1, -1, 1, 1)
    y = jax.lax.reduce_window(y, -jnp.inf, jax.lax.max, (1, 1, 2, 2), (1, 1, 2, 2), "VALID")
    y = jnp.maximum(y, 0.0)
    y = jax.lax.conv_general_dilated(y, params["w2"], (1, 1), "VALID",
                                     dimension_numbers=dn, precision=hp)
    y = y + params["b2"].reshape(1, -1, 1, 1)
    y = jax.lax.reduce_window(y, -jnp.inf, jax.lax.max, (1, 1, 2, 2), (1, 1, 2, 2), "VALID")
    y = jnp.maximum(y, 0.0)
    y = y.reshape(y.shape[0], -1)                                         # NCHW flatten
    y = jnp.maximum(jnp.dot(y, params["fc1_w"].T, precision=hp) + params["fc1_b"], 0.0)
    y = jnp.dot(y, params["fc2_w"].T, precision=hp) + params["fc2_b"]
    return jax.nn.softmax(y, axis=1)


if __name__ == "__main__":
    key = jax.random.PRNGKey(0)
    pkey, xkey, xkey2 = jax.random.split(key, 3)
    params = init_params(pkey)

    x = jax.random.normal(xkey, (2, 1, 28, 28), dtype=jnp.float32)
    ref = jax.block_until_ready(net_reference(params, x))

    # Fast path: bf16 matmul operands, f32 accumulation / pool / ReLU / softmax.
    packed_bf16 = pack_params(params, jnp.bfloat16)
    out = jax.block_until_ready(net_forward(packed_bf16, x, 32))
    assert out.shape == (2, NCLS)
    assert bool(jnp.all(jnp.isfinite(out)))
    assert bool(jnp.allclose(jnp.sum(out, axis=1), 1.0, atol=5e-3))
    assert bool(jnp.allclose(out, ref, atol=2e-2)), (out, ref)

    # Tight check of the packing/layout with f32 operands (no bf16 rounding).
    packed_f32 = pack_params(params, jnp.float32)
    out32 = jax.block_until_ready(net_forward(packed_f32, x, 32))
    assert bool(jnp.allclose(out32, ref, atol=5e-3)), (out32, ref)

    # Multi-block grid + batch padding path (TB=8 -> 3 grid steps, 4 padded samples).
    xb = jax.random.normal(xkey2, (20, 1, 28, 28), dtype=jnp.float32)
    refb = jax.block_until_ready(net_reference(params, xb))
    outb = jax.block_until_ready(net_forward(packed_bf16, xb, 8))
    assert outb.shape == (20, NCLS)
    assert bool(jnp.allclose(outb, refb, atol=2e-2)), (outb, refb)

    print("KERNEL_OK")
</pallas_src>

<mosaic_0001>
module attributes {stable_mosaic.version = 11 : i64} {
  func.func @_net_kernel(%arg0: i32, %arg1: memref<12x256xbf16, #tpu.memory_space<vmem>>, %arg2: memref<256x1536xbf16, #tpu.memory_space<vmem>>, %arg3: memref<1x384xf32, #tpu.memory_space<vmem>>, %arg4: memref<2304x1536xbf16, #tpu.memory_space<vmem>>, %arg5: memref<1x384xf32, #tpu.memory_space<vmem>>, %arg6: memref<384x64xbf16, #tpu.memory_space<vmem>>, %arg7: memref<1x64xf32, #tpu.memory_space<vmem>>, %arg8: memref<64x128xf32, #tpu.memory_space<vmem>>, %arg9: memref<1x128xf32, #tpu.memory_space<vmem>>, %arg10: memref<2x128xf32, #tpu.memory_space<vmem>>, %arg11: memref<12x384xf32, #tpu.memory_space<vmem>>) attributes {dimension_semantics = [#tpu.dimension_semantics<parallel>], iteration_bounds = array<i64: 1>, scalar_prefetch = 0 : i64, scratch_operands = 1 : i64, tpu.core_type = #tpu.core_type<tc>, window_params = [{transform_indices = @transform_0, window_bounds = array<i64: 12, 256>}, {pipeline_mode = #tpu.pipeline_mode<synchronous>, transform_indices = @transform_1, window_bounds = array<i64: 256, 1536>}, {pipeline_mode = #tpu.pipeline_mode<synchronous>, transform_indices = @transform_2, window_bounds = array<i64: 1, 384>}, {pipeline_mode = #tpu.pipeline_mode<synchronous>, transform_indices = @transform_3, window_bounds = array<i64: 2304, 1536>}, {pipeline_mode = #tpu.pipeline_mode<synchronous>, transform_indices = @transform_4, window_bounds = array<i64: 1, 384>}, {pipeline_mode = #tpu.pipeline_mode<synchronous>, transform_indices = @transform_5, window_bounds = array<i64: 384, 64>}, {pipeline_mode = #tpu.pipeline_mode<synchronous>, transform_indices = @transform_6, window_bounds = array<i64: 1, 64>}, {pipeline_mode = #tpu.pipeline_mode<synchronous>, transform_indices = @transform_7, window_bounds = array<i64: 64, 128>}, {pipeline_mode = #tpu.pipeline_mode<synchronous>, transform_indices = @transform_8, window_bounds = array<i64: 1, 128>}, {transform_indices = @transform_9, window_bounds = array<i64: 2, 128>}]} {
    %c0 = arith.constant 0 : index
    %c0_0 = arith.constant 0 : index
    %0 = vector.load %arg1[%c0, %c0_0] : memref<12x256xbf16, #tpu.memory_space<vmem>>, vector<12x256xbf16>
    %c0_1 = arith.constant 0 : index
    %c0_2 = arith.constant 0 : index
    %1 = vector.load %arg2[%c0_1, %c0_2] : memref<256x1536xbf16, #tpu.memory_space<vmem>>, vector<256x1536xbf16>
    %cst = arith.constant dense<0.000000e+00> : vector<12x1536xf32>
    %2 = tpu.matmul %0, %1, %cst {dimension_numbers = #tpu.dot_dimension_numbers<[1], [0], [0], [1], [0, 0, 1, 1], [], []>} : vector<12x256xbf16>, vector<256x1536xbf16>, vector<12x1536xf32> -> vector<12x1536xf32>
    %3 = vector.extract_strided_slice %2 {offsets = [0, 0], sizes = [12, 384], strides = [1, 1]} : vector<12x1536xf32> to vector<12x384xf32>
    %4 = vector.extract_strided_slice %2 {offsets = [0, 384], sizes = [12, 384], strides = [1, 1]} : vector<12x1536xf32> to vector<12x384xf32>
    %5 = arith.maximumf %3, %4 : vector<12x384xf32>
    %6 = vector.extract_strided_slice %2 {offsets = [0, 768], sizes = [12, 384], strides = [1, 1]} : vector<12x1536xf32> to vector<12x384xf32>
    %7 = vector.extract_strided_slice %2 {offsets = [0, 1152], sizes = [12, 384], strides = [1, 1]} : vector<12x1536xf32> to vector<12x384xf32>
    %8 = arith.maximumf %6, %7 : vector<12x384xf32>
    %9 = arith.maximumf %5, %8 : vector<12x384xf32>
    %c0_3 = arith.constant 0 : index
    %c0_4 = arith.constant 0 : index
    %10 = vector.load %arg3[%c0_3, %c0_4] : memref<1x384xf32, #tpu.memory_space<vmem>>, vector<1x384xf32>
    %11 = vector.broadcast %10 : vector<1x384xf32> to vector<12x384xf32>
    %12 = arith.addf %9, %11 : vector<12x384xf32>
    %cst_5 = arith.constant 0.000000e+00 : f32
    %13 = vector.broadcast %cst_5 : f32 to vector<12x384xf32>
    %14 = arith.maximumf %12, %13 : vector<12x384xf32>
    %c0_6 = arith.constant 0 : index
    %c0_7 = arith.constant 0 : index
    %15 = vector.load %arg11[%c0_6, %c0_7] : memref<12x384xf32, #tpu.memory_space<vmem>>, vector<12x384xf32>
    tpu.vector_store %arg11[%c0_6, %c0_7], %14 {strides = array<i32>} : memref<12x384xf32, #tpu.memory_space<vmem>>, vector<12x384xf32>,
    %c0_8 = arith.constant 0 : index
    %c0_9 = arith.constant 0 : index
    %16 = vector.load %arg11[%c0_8, %c0_9] : memref<12x384xf32, #tpu.memory_space<vmem>>, vector<2x384xf32>
    %c2 = arith.constant 2 : index
    %c0_10 = arith.constant 0 : index
    %17 = vector.load %arg11[%c2, %c0_10] : memref<12x384xf32, #tpu.memory_space<vmem>>, vector<2x384xf32>
    %c4 = arith.constant 4 : index
    %c0_11 = arith.constant 0 : index
    %18 = vector.load %arg11[%c4, %c0_11] : memref<12x384xf32, #tpu.memory_space<vmem>>, vector<2x384xf32>
    %c6 = arith.constant 6 : index
    %c0_12 = arith.constant 0 : index
    %19 = vector.load %arg11[%c6, %c0_12] : memref<12x384xf32, #tpu.memory_space<vmem>>, vector<2x384xf32>
    %c8 = arith.constant 8 : index
    %c0_13 = arith.constant 0 : index
    %20 = vector.load %arg11[%c8, %c0_13] : memref<12x384xf32, #tpu.memory_space<vmem>>, vector<2x384xf32>
    %c10 = arith.constant 10 : index
    %c0_14 = arith.constant 0 : index
    %21 = vector.load %arg11[%c10, %c0_14] : memref<12x384xf32, #tpu.memory_space<vmem>>, vector<2x384xf32>
    %22 = tpu.concatenate %16, %17, %18, %19, %20, %21 in 1 : vector<2x384xf32>, vector<2x384xf32>, vector<2x384xf32>, vector<2x384xf32>, vector<2x384xf32>, vector<2x384xf32> -> vector<2x2304xf32>
    %23 = arith.truncf %22 : vector<2x2304xf32> to vector<2x2304xbf16>
    %c0_15 = arith.constant 0 : index
    %c0_16 = arith.constant 0 : index
    %24 = vector.load %arg4[%c0_15, %c0_16] : memref<2304x1536xbf16, #tpu.memory_space<vmem>>, vector<2304x1536xbf16>
    %cst_17 = arith.constant dense<0.000000e+00> : vector<2x1536xf32>
    %25 = tpu.matmul %23, %24, %cst_17 {dimension_numbers = #tpu.dot_dimension_numbers<[1], [0], [0], [1], [0, 0, 1, 1], [], []>} : vector<2x2304xbf16>, vector<2304x1536xbf16>, vector<2x1536xf32> -> vector<2x1536xf32>
    %26 = vector.extract_strided_slice %25 {offsets = [0, 0], sizes = [2, 384], strides = [1, 1]} : vector<2x1536xf32> to vector<2x384xf32>
    %27 = vector.extract_strided_slice %25 {offsets = [0, 384], sizes = [2, 384], strides = [1, 1]} : vector<2x1536xf32> to vector<2x384xf32>
    %28 = arith.maximumf %26, %27 : vector<2x384xf32>
    %29 = vector.extract_strided_slice %25 {offsets = [0, 768], sizes = [2, 384], strides = [1, 1]} : vector<2x1536xf32> to vector<2x384xf32>
    %30 = vector.extract_strided_slice %25 {offsets = [0, 1152], sizes = [2, 384], strides = [1, 1]} : vector<2x1536xf32> to vector<2x384xf32>
    %31 = arith.maximumf %29, %30 : vector<2x384xf32>
    %32 = arith.maximumf %28, %31 : vector<2x384xf32>
    %c0_18 = arith.constant 0 : index
    %c0_19 = arith.constant 0 : index
    %33 = vector.load %arg5[%c0_18, %c0_19] : memref<1x384xf32, #tpu.memory_space<vmem>>, vector<1x384xf32>
    %34 = vector.broadcast %33 : vector<1x384xf32> to vector<2x384xf32>
    %35 = arith.addf %32, %34 : vector<2x384xf32>
    %cst_20 = arith.constant 0.000000e+00 : f32
    %36 = vector.broadcast %cst_20 : f32 to vector<2x384xf32>
    %37 = arith.maximumf %35, %36 : vector<2x384xf32>
    %38 = arith.truncf %37 : vector<2x384xf32> to vector<2x384xbf16>
    %c0_21 = arith.constant 0 : index
    %c0_22 = arith.constant 0 : index
    %39 = vector.load %arg6[%c0_21, %c0_22] : memref<384x64xbf16, #tpu.memory_space<vmem>>, vector<384x64xbf16>
    %cst_23 = arith.constant dense<0.000000e+00> : vector<2x64xf32>
    %40 = tpu.matmul %38, %39, %cst_23 {dimension_numbers = #tpu.dot_dimension_numbers<[1], [0], [0], [1], [0, 0, 1, 1], [], []>} : vector<2x384xbf16>, vector<384x64xbf16>, vector<2x64xf32> -> vector<2x64xf32>
    %c0_24 = arith.constant 0 : index
    %c0_25 = arith.constant 0 : index
    %41 = vector.load %arg7[%c0_24, %c0_25] : memref<1x64xf32, #tpu.memory_space<vmem>>, vector<1x64xf32>
    %42 = vector.broadcast %41 : vector<1x64xf32> to vector<2x64xf32>
    %43 = arith.addf %40, %42 : vector<2x64xf32>
    %cst_26 = arith.constant 0.000000e+00 : f32
    %44 = vector.broadcast %cst_26 : f32 to vector<2x64xf32>
    %45 = arith.maximumf %43, %44 : vector<2x64xf32>
    %c0_27 = arith.constant 0 : index
    %c0_28 = arith.constant 0 : index
    %46 = vector.load %arg8[%c0_27, %c0_28] : memref<64x128xf32, #tpu.memory_space<vmem>>, vector<64x128xf32>
    %cst_29 = arith.constant dense<0.000000e+00> : vector<2x128xf32>
    %47 = tpu.matmul %45, %46, %cst_29 {dimension_numbers = #tpu.dot_dimension_numbers<[1], [0], [0], [1], [0, 0, 1, 1], [], []>} : vector<2x64xf32>, vector<64x128xf32>, vector<2x128xf32> -> vector<2x128xf32>
    %c0_30 = arith.constant 0 : index
    %c0_31 = arith.constant 0 : index
    %48 = vector.load %arg9[%c0_30, %c0_31] : memref<1x128xf32, #tpu.memory_space<vmem>>, vector<1x128xf32>
    %49 = vector.broadcast %48 : vector<1x128xf32> to vector<2x128xf32>
    %50 = arith.addf %47, %49 : vector<2x128xf32>
    %cst_32 = arith.constant dense<0xFF800000> : vector<2xf32>
    %51 = vector.multi_reduction <maximumf>, %50, %cst_32 [1] : vector<2x128xf32> to vector<2xf32>
    %52 = vector.shape_cast %51 : vector<2xf32> to vector<2x1xf32>
    %53 = vector.broadcast %52 : vector<2x1xf32> to vector<2x128xf32>
    %54 = arith.subf %50, %53 : vector<2x128xf32>
    %55 = math.exp %54 : vector<2x128xf32>
    %cst_33 = arith.constant dense<0.000000e+00> : vector<2xf32>
    %56 = vector.multi_reduction <add>, %55, %cst_33 [1] : vector<2x128xf32> to vector<2xf32>
    %57 = vector.shape_cast %56 : vector<2xf32> to vector<2x1xf32>
    %58 = tpu.reciprocal %57 {approx = true} : vector<2x1xf32> -> vector<2x1xf32>
    %59 = vector.broadcast %58 : vector<2x1xf32> to vector<2x128xf32>
    %60 = arith.mulf %55, %59 : vector<2x128xf32>
    %c0_34 = arith.constant 0 : index
    %c0_35 = arith.constant 0 : index
    %61 = vector.load %arg10[%c0_34, %c0_35] : memref<2x128xf32, #tpu.memory_space<vmem>>, vector<2x128xf32>
    tpu.vector_store %arg10[%c0_34, %c0_35], %60 {strides = array<i32>} : memref<2x128xf32, #tpu.memory_space<vmem>>, vector<2x128xf32>,
    return
  }
  func.func @transform_0(%arg0: i32) -> (i32, i32) {
    %c0_i32 = arith.constant 0 : i32
    %c0_i32_0 = arith.constant 0 : i32
    return %arg0, %c0_i32 : i32, i32
  }
  func.func @transform_1(%arg0: i32) -> (i32, i32) {
    %c0_i32 = arith.constant 0 : i32
    %c0_i32_0 = arith.constant 0 : i32
    %c0_i32_1 = arith.constant 0 : i32
    return %c0_i32, %c0_i32_0 : i32, i32
  }
  func.func @transform_2(%arg0: i32) -> (i32, i32) {
    %c0_i32 = arith.constant 0 : i32
    %c0_i32_0 = arith.constant 0 : i32
    %c0_i32_1 = arith.constant 0 : i32
    return %c0_i32, %c0_i32_0 : i32, i32
  }
  func.func @transform_3(%arg0: i32) -> (i32, i32) {
    %c0_i32 = arith.constant 0 : i32
    %c0_i32_0 = arith.constant 0 : i32
    %c0_i32_1 = arith.constant 0 : i32
    return %c0_i32, %c0_i32_0 : i32, i32
  }
  func.func @transform_4(%arg0: i32) -> (i32, i32) {
    %c0_i32 = arith.constant 0 : i32
    %c0_i32_0 = arith.constant 0 : i32
    %c0_i32_1 = arith.constant 0 : i32
    return %c0_i32, %c0_i32_0 : i32, i32
  }
  func.func @transform_5(%arg0: i32) -> (i32, i32) {
    %c0_i32 = arith.constant 0 : i32
    %c0_i32_0 = arith.constant 0 : i32
    %c0_i32_1 = arith.constant 0 : i32
    return %c0_i32, %c0_i32_0 : i32, i32
  }
  func.func @transform_6(%arg0: i32) -> (i32, i32) {
    %c0_i32 = arith.constant 0 : i32
    %c0_i32_0 = arith.constant 0 : i32
    %c0_i32_1 = arith.constant 0 : i32
    return %c0_i32, %c0_i32_0 : i32, i32
  }
  func.func @transform_7(%arg0: i32) -> (i32, i32) {
    %c0_i32 = arith.constant 0 : i32
    %c0_i32_0 = arith.constant 0 : i32
    %c0_i32_1 = arith.constant 0 : i32
    return %c0_i32, %c0_i32_0 : i32, i32
  }
  func.func @transform_8(%arg0: i32) -> (i32, i32) {
    %c0_i32 = arith.constant 0 : i32
    %c0_i32_0 = arith.constant 0 : i32
    %c0_i32_1 = arith.constant 0 : i32
    return %c0_i32, %c0_i32_0 : i32, i32
  }
  func.func @transform_9(%arg0: i32) -> (i32, i32) {
    %c0_i32 = arith.constant 0 : i32
    %c0_i32_0 = arith.constant 0 : i32
    return %arg0, %c0_i32 : i32, i32
  }
}

</mosaic_0001>

<bundles_post_ra>
// kernel: net_forward.1
= control target key start
LH: loop header
LB: loop body
LE: loop exit
PB: predicated region body
PF: predicated region fallthrough
CT: control target
= control target key end

     0   :  { %14 = vsyncpa [#allocation4], 0  ;;  %s20341_s0 = inlined_call_operand.vmem [shape: bf16[12,256], index: 0, kind: input, shape index: {}]   ;;  %s20342_s1 = inlined_call_operand.hbm [shape: bf16[256,1536], index: 1, kind: input, shape index: {}]   ;;  %s20343_s2 = inlined_call_operand.hbm [shape: f32[1,384], index: 2, kind: input, shape index: {}]   ;;  %s20344_s3 = inlined_call_operand.hbm [shape: bf16[2304,1536], index: 3, kind: input, shape index: {}]   ;;  %s20345_s4 = inlined_call_operand.hbm [shape: f32[1,384], index: 4, kind: input, shape index: {}]   ;;  %s20346_s5 = inlined_call_operand.vmem [shape: bf16[384,64], index: 5, kind: input, shape index: {}]   ;;  %s20347_s6 = inlined_call_operand.hbm [shape: f32[1,64], index: 6, kind: input, shape index: {}]   ;;  %s20348_s7 = inlined_call_operand.hbm [shape: f32[64,128], index: 7, kind: input, shape index: {}]   ;;  %s20349_s8 = inlined_call_operand.hbm [shape: f32[1,128], index: 8, kind: input, shape index: {}]   ;;  %s20350_s9 = inlined_call_operand.hbm [shape: f32[2,128], index: 9, kind: output, shape index: {}]  }
   0x1   :  { %15 = vsyncpa [#allocation7], 0 }
   0x2   :  { %16 = vsyncpa [#allocation10], 0 }
   0x3   :  { %17 = vsyncpa [#allocation13], 0 }
   0x4   :  { %18 = vsyncpa [#allocation5], 0  ;;  %s19809_s30 = smov [#allocation6]   ;;  %s19810_s11 = smov [#allocation9]  }
   0x5   :  { %s39_s10 = sshll.u32 %s19809_s30, 4  ;;  %s61_s12 = sshll.u32 %s19810_s11, 4  ;;  %s40_s10 = int_to_ptr.vmem [resolvable:$true] %s39_s10  ;;  %s62_s12 = int_to_ptr.vmem [resolvable:$true] %s61_s12 }
   0x6   :  { %s19647_s13 = scalar_lea.vmem %s40_s10, 48  ;;  %s19651_s14 = scalar_lea.vmem %s40_s10, 64 }
   0x7   :  { %p19648_p0 = scmp.ne.s32.totalorder %s40_s10, %s19647_s13  ;;  %p19652_p1 = scmp.lt.s32.totalorder %s40_s10, %s40_s10 }
   0x8   :  { %p19653_p2 = scmp.lt.s32.totalorder %s19651_s14, %s19647_s13 }
   0xa   :  { %p19654_p3 = por %p19653_p2, %p19652_p1 }
   0xc   :  { %p19655_p4 = pnand %p19654_p3, %p19648_p0 }
   0xe   :  { %19658 = shalt.err (!%p19655_p4)
}
   0xf   :  { %42 = dma.hbm_to_vmem [thread:$0]  %s20343_s2, 48, %s40_s10, [#allocation7]  }
  0x10   :  { %s19667_s17 = scalar_lea.vmem %s62_s12, 48  ;;  %s19671_s18 = scalar_lea.vmem %s62_s12, 64 }
  0x11   :  { %p19668_p5 = scmp.ne.s32.totalorder %s62_s12, %s19667_s17  ;;  %p19672_p6 = scmp.lt.s32.totalorder %s62_s12, %s62_s12 }
  0x12   :  { %p19673_p7 = scmp.lt.s32.totalorder %s19671_s18, %s19667_s17 }
  0x14   :  { %p19674_p8 = por %p19673_p7, %p19672_p6 }
  0x16   :  { %p19675_p9 = pnand %p19674_p8, %p19668_p5 }
  0x18   :  { %19678 = shalt.err (!%p19675_p9)
}
  0x19   :  { %64 = dma.hbm_to_vmem [thread:$0]  %s20345_s4, 48, %s62_s12, [#allocation10]  }
  0x1a   :  { %s19811_s21 = smov [#allocation12]  }
  0x1b   :  { %s82_s22 = sshll.u32 %s19811_s21, 4  ;;  %s83_s22 = int_to_ptr.vmem [resolvable:$true] %s82_s22 }
  0x1c   :  { %s19687_s23 = scalar_lea.vmem %s83_s22, 1024  ;;  %p19692_p11 = scmp.lt.s32.totalorder %s83_s22, %s83_s22 }
  0x1d   :  { %p19688_p10 = scmp.ne.s32.totalorder %s83_s22, %s19687_s23  ;;  %p19693_p12 = scmp.lt.s32.totalorder %s19687_s23, %s19687_s23 }
  0x1f   :  { %p19694_p13 = por %p19693_p12, %p19692_p11 }
  0x21   :  { %p19695_p0 = pnand %p19694_p13, %p19688_p10 }
  0x23   :  { %19698 = shalt.err (!%p19695_p0)
}
  0x24   :  { %s19812_s2 = smov 128   ;;  %s19813_s24 = smov 8  }
  0x25   :  { %88 = dma.hbm_to_vmem [thread:$0]  %s20348_s7, 1024, %s83_s22, [#allocation13], %s19812_s2, %s19812_s2, %s19813_s24  }
  0x26   :  { %s19814_s27 = smov [#allocation3]  }
  0x27   :  { %s26_s28 = sshll.u32 %s19814_s27, 4  ;;  %s27_s28 = int_to_ptr.vmem [resolvable:$true] %s26_s28 }
  0x28   :  { %s19707_s4 = scalar_lea.vmem %s27_s28, 24576  ;;  %p19712_p2 = scmp.lt.s32.totalorder %s27_s28, %s27_s28 }
  0x29   :  { %p19708_p1 = scmp.ne.s32.totalorder %s27_s28, %s19707_s4  ;;  %p19713_p3 = scmp.lt.s32.totalorder %s19707_s4, %s19707_s4 }
  0x2b   :  { %p19714_p4 = por %p19713_p3, %p19712_p2 }
  0x2d   :  { %p19715_p5 = pnand %p19714_p4, %p19708_p1 }
  0x2f   :  { %19718 = shalt.err (!%p19715_p5)
}
  0x30   :  { %s19815_s29 = smov 768   ;;  %s19816_s30 = smov 48  }
  0x31   :  { %32 = dma.hbm_to_vmem [thread:$0]  %s20342_s1, 24576, %s27_s28, [#allocation4], %s19815_s29, %s19815_s29, %s19816_s30  }
  0x32   :  { %s19817_s12 = smov [#allocation8]   ;;  %s19818_s14 = smov [#allocation11]  }
  0x33   :  { %s48_s13 = sshll.u32 %s19817_s12, 4  ;;  %s73_s7 = sshll.u32 %s19818_s14, 4  ;;  %s49_s13 = int_to_ptr.vmem [resolvable:$true] %s48_s13  ;;  %s74_s7 = int_to_ptr.vmem [resolvable:$true] %s73_s7 }
  0x34   :  { %s19727_s15 = scalar_lea.vmem %s49_s13, 221184  ;;  %p19732_p7 = scmp.lt.s32.totalorder %s49_s13, %s49_s13 }
  0x35   :  { %p19728_p6 = scmp.ne.s32.totalorder %s49_s13, %s19727_s15  ;;  %p19733_p8 = scmp.lt.s32.totalorder %s19727_s15, %s19727_s15 }
  0x37   :  { %p19734_p9 = por %p19733_p8, %p19732_p7 }
  0x39   :  { %p19735_p10 = pnand %p19734_p9, %p19728_p6 }
  0x3b   :  { %19738 = shalt.err (!%p19735_p10)
}
  0x3c   :  { %54 = dma.hbm_to_vmem [thread:$0]  %s20344_s3, 221184, %s49_s13, [#allocation7], %s19815_s29, %s19815_s29, %s19816_s30  }
  0x3d   :  { %s19747_s18 = scalar_lea.vmem %s74_s7, 16  ;;  %s19751_s1 = scalar_lea.vmem %s74_s7, 32 }
  0x3e   :  { %p19748_p11 = scmp.ne.s32.totalorder %s74_s7, %s19747_s18  ;;  %p19752_p12 = scmp.lt.s32.totalorder %s74_s7, %s74_s7 }
  0x3f   :  { %p19753_p13 = scmp.lt.s32.totalorder %s19751_s1, %s19747_s18 }
  0x41   :  { %p19754_p0 = por %p19753_p13, %p19752_p12 }
  0x43   :  { %p19755_p1 = pnand %p19754_p0, %p19748_p11 }
  0x45   :  { %19758 = shalt.err (!%p19755_p1)
}
  0x46   :  { %76 = dma.hbm_to_vmem [thread:$0]  %s20347_s6, 16, %s74_s7, [#allocation10]  }
  0x47   :  { %s19819_s21 = smov [#allocation14]  }
  0x48   :  { %s95_s22 = sshll.u32 %s19819_s21, 4  ;;  %s96_s22 = int_to_ptr.vmem [resolvable:$true] %s95_s22 }
  0x49   :  { %s19767_s23 = scalar_lea.vmem %s96_s22, 16  ;;  %s19771_s2 = scalar_lea.vmem %s96_s22, 32 }
  0x4a   :  { %p19768_p2 = scmp.ne.s32.totalorder %s96_s22, %s19767_s23  ;;  %p19772_p3 = scmp.lt.s32.totalorder %s96_s22, %s96_s22 }
  0x4b   :  { %p19773_p4 = scmp.lt.s32.totalorder %s19771_s2, %s19767_s23 }
  0x4d   :  { %p19774_p5 = por %p19773_p4, %p19772_p3 }
  0x4f   :  { %p19775_p6 = pnand %p19774_p5, %p19768_p2 }
  0x51   :  { %19778 = shalt.err (!%p19775_p6)
}
  0x52   :  { %98 = dma.hbm_to_vmem [thread:$0]  %s20349_s8, 16, %s96_s22, [#allocation13]  }
  0x53   :  { %19799 = dma.done.wait [#allocation4], 24576  }
  0x54   :  { %19800 = vsyncadd [#allocation4], 4294942720 }
  0x55   :  { %19801 = dma.done.wait [#allocation7], 221232  }
  0x56   :  { %19802 = vsyncadd [#allocation7], 4294746064 }
  0x57   :  { %19803 = dma.done.wait [#allocation10], 64  }
  0x58   :  { %19804 = vsyncadd [#allocation10], 4294967232 }
  0x59   :  { %19805 = dma.done.wait [#allocation13], 1040  }
  0x5a   :  { %19806 = vsyncadd [#allocation13], 4294966256  ;;  %v16727_v0 = vld [vmem:[#allocation3 + $0x2a4] ss:$48 sps:$4 sm:$0xff]   ;;  %v16729_v1 = vld [vmem:[#allocation3 + $0x2ac] ss:$48 sps:$4 sm:$0xff]  }
  0x5b   :  { %1285 = vmatprep.subr.bf16.mxu0 %v16727_v0  ;;  %v16731_v2 = vld [vmem:[#allocation3 + $0x2a0] ss:$48 sps:$4 sm:$0xff]   ;;  %v16732_v3 = vld [vmem:[#allocation3 + $0x2a8] ss:$48 sps:$4 sm:$0xff]   ;;  %1328 = vmatprep.subr.bf16.mxu1 %v16729_v1  ;;  %v16733_v4 = vld [vmem:[#allocation3 + $0x244] ss:$48 sps:$4 sm:$0xff]  }
  0x5c   :  { %1286 = vmatpush1.bf16.msra.mxu0 %v16731_v2  ;;  %1329 = vmatpush1.bf16.msra.mxu1 %v16732_v3  ;;  %v16735_v5 = vld [vmem:[#allocation3 + $0x24c] ss:$48 sps:$4 sm:$0xff]   ;;  %v16737_v6 = vld [vmem:[#allocation3 + $0x240] ss:$48 sps:$4 sm:$0xff]   ;;  %v16738_v7 = vld [vmem:[#allocation3 + $0x248] ss:$48 sps:$4 sm:$0xff]  }
  0x5d   :  { %1287 = vmatprep.subr.bf16.mxu0 %v16733_v4  ;;  %1330 = vmatprep.subr.bf16.mxu1 %v16735_v5  ;;  %v16739_v8 = vld [vmem:[#allocation3 + $0x1e4] ss:$48 sps:$4 sm:$0xff]   ;;  %v16741_v9 = vld [vmem:[#allocation3 + $0x1ec] ss:$48 sps:$4 sm:$0xff]   ;;  %v16743_v10 = vld [vmem:[#allocation3 + $0x1e0] ss:$48 sps:$4 sm:$0xff]  }
  0x5e   :  { %v16744_v11 = vld [vmem:[#allocation3 + $0x1e8] ss:$48 sps:$4 sm:$0xff]   ;;  %v16745_v12 = vld [vmem:[#allocation3 + $0x184] ss:$48 sps:$4 sm:$0xff]   ;;  %v16747_v13 = vld [vmem:[#allocation3 + $0x18c] ss:$48 sps:$4 sm:$0xff]  }
  0x5f   :  { %v16749_v14 = vld [vmem:[#allocation3 + $0x180] ss:$48 sps:$4 sm:$0xff]   ;;  %v16750_v15 = vld [vmem:[#allocation3 + $0x188] ss:$48 sps:$4 sm:$0xff]   ;;  %v16751_v16 = vld [vmem:[#allocation3 + $0x124] ss:$48 sps:$4 sm:$0xff]  }
  0x60   :  { %1288 = vmatpush1.bf16.msra.mxu0 %v16737_v6  ;;  %1331 = vmatpush1.bf16.msra.mxu1 %v16738_v7  ;;  %v16753_v17 = vld [vmem:[#allocation3 + $0x12c] ss:$48 sps:$4 sm:$0xff]   ;;  %v16755_v18 = vld [vmem:[#allocation3 + $0x120] ss:$48 sps:$4 sm:$0xff]   ;;  %v16756_v19 = vld [vmem:[#allocation3 + $0x128] ss:$48 sps:$4 sm:$0xff]  }
  0x61   :  { %1289 = vmatprep.subr.bf16.mxu0 %v16739_v8  ;;  %1332 = vmatprep.subr.bf16.mxu1 %v16741_v9  ;;  %v16757_v20 = vld [vmem:[#allocation3 + $0xc4] ss:$48 sps:$4 sm:$0xff]   ;;  %v16759_v21 = vld [vmem:[#allocation3 + $0xcc] ss:$48 sps:$4 sm:$0xff]   ;;  %v16761_v22 = vld [vmem:[#allocation3 + $0xc0] ss:$48 sps:$4 sm:$0xff]  }
  0x62   :  { %v16762_v23 = vld [vmem:[#allocation3 + $0xc8] ss:$48 sps:$4 sm:$0xff]   ;;  %v16763_v24 = vld [vmem:[#allocation3 + $0x64] ss:$48 sps:$4 sm:$0xff]   ;;  %v16765_v25 = vld [vmem:[#allocation3 + $0x6c] ss:$48 sps:$4 sm:$0xff]  }
  0x63   :  { %v16767_v26 = vld [vmem:[#allocation3 + $0x60] ss:$48 sps:$4 sm:$0xff]   ;;  %v16768_v27 = vld [vmem:[#allocation3 + $0x68] ss:$48 sps:$4 sm:$0xff]   ;;  %v16769_v28 = vld [vmem:[#allocation3 + $0x4] ss:$48 sps:$4 sm:$0xff]  }
  0x64   :  { %1290 = vmatpush1.bf16.msra.mxu0 %v16743_v10  ;;  %1333 = vmatpush1.bf16.msra.mxu1 %v16744_v11  ;;  %v16771_v29 = vld [vmem:[#allocation3 + $0xc] ss:$48 sps:$4 sm:$0xff]   ;;  %v16773_v30 = vld [vmem:[#allocation3] ss:$48 sps:$4 sm:$0xff]   ;;  %v16774_v31 = vld [vmem:[#allocation3 + $0x8] ss:$48 sps:$4 sm:$0xff]  }
  0x65   :  { %1291 = vmatprep.subr.bf16.mxu0 %v16745_v12  ;;  %1334 = vmatprep.subr.bf16.mxu1 %v16747_v13  ;;  %v16775_v32 = vld [vmem:[#allocation3 + $0x5a4] ss:$48 sps:$4 sm:$0xff]   ;;  %v16777_v33 = vld [vmem:[#allocation3 + $0x5ac] ss:$48 sps:$4 sm:$0xff]   ;;  %v16779_v34 = vld [vmem:[#allocation3 + $0x5a0] ss:$48 sps:$4 sm:$0xff]  }
  0x66   :  { %v16780_v35 = vld [vmem:[#allocation3 + $0x5a8] ss:$48 sps:$4 sm:$0xff]   ;;  %v16781_v36 = vld [vmem:[#allocation3 + $0x544] ss:$48 sps:$4 sm:$0xff]   ;;  %v16783_v37 = vld [vmem:[#allocation3 + $0x54c] ss:$48 sps:$4 sm:$0xff]  }
  0x67   :  { %v16785_v38 = vld [vmem:[#allocation3 + $0x540] ss:$48 sps:$4 sm:$0xff]   ;;  %v16786_v39 = vld [vmem:[#allocation3 + $0x548] ss:$48 sps:$4 sm:$0xff]   ;;  %v16787_v40 = vld [vmem:[#allocation3 + $0x4e4] ss:$48 sps:$4 sm:$0xff]  }
  0x68   :  { %1292 = vmatpush1.bf16.msra.mxu0 %v16749_v14  ;;  %1335 = vmatpush1.bf16.msra.mxu1 %v16750_v15  ;;  %v16789_v41 = vld [vmem:[#allocation3 + $0x4ec] ss:$48 sps:$4 sm:$0xff]   ;;  %v16791_v42 = vld [vmem:[#allocation3 + $0x4e0] ss:$48 sps:$4 sm:$0xff]   ;;  %v16792_v43 = vld [vmem:[#allocation3 + $0x4e8] ss:$48 sps:$4 sm:$0xff]  }
  0x69   :  { %1293 = vmatprep.subr.bf16.mxu0 %v16751_v16  ;;  %1336 = vmatprep.subr.bf16.mxu1 %v16753_v17  ;;  %v16793_v44 = vld [vmem:[#allocation3 + $0x484] ss:$48 sps:$4 sm:$0xff]   ;;  %v16795_v45 = vld [vmem:[#allocation3 + $0x48c] ss:$48 sps:$4 sm:$0xff]   ;;  %v16797_v46 = vld [vmem:[#allocation3 + $0x480] ss:$48 sps:$4 sm:$0xff]  }
  0x6a   :  { %v19897_v47 = vld [vmem:[%s20341_s0 + $0x4] ss:$8 sps:$4 sm:$0x3f]   ;;  %v16798_v48 = vld [vmem:[#allocation3 + $0x488] ss:$48 sps:$4 sm:$0xff]   ;;  %vm19821_vm0 = vmmov 0  }
  0x6b   :  { %v16799_v49 = vld [vmem:[#allocation3 + $0x424] ss:$48 sps:$4 sm:$0xff]   ;;  %v16801_v50 = vld [vmem:[#allocation3 + $0x42c] ss:$48 sps:$4 sm:$0xff]   ;;  %1317 = vmatprep.mubr.bf16.mxu0 %v19897_v47  ;;  %1360 = vmatprep.mubr.bf16.mxu1 %v19897_v47  ;;  %v16803_v51 = vld [vmem:[#allocation3 + $0x420] ss:$48 sps:$4 sm:$0xff]  }
  0x6c   :  { %1294 = vmatpush1.bf16.msra.mxu0 %v16755_v18  ;;  %1337 = vmatpush1.bf16.msra.mxu1 %v16756_v19  ;;  %v16804_v52 = vld [vmem:[#allocation3 + $0x428] ss:$48 sps:$4 sm:$0xff]   ;;  %v16805_v53 = vld [vmem:[#allocation3 + $0x3c4] ss:$48 sps:$4 sm:$0xff]   ;;  %v16807_v54 = vld [vmem:[#allocation3 + $0x3cc] ss:$48 sps:$4 sm:$0xff]  }
  0x6d   :  { %1295 = vmatprep.subr.bf16.mxu0 %v16757_v20  ;;  %1338 = vmatprep.subr.bf16.mxu1 %v16759_v21  ;;  %v16809_v55 = vld [vmem:[#allocation3 + $0x3c0] ss:$48 sps:$4 sm:$0xff]   ;;  %v16810_v56 = vld [vmem:[#allocation3 + $0x3c8] ss:$48 sps:$4 sm:$0xff]   ;;  %v16811_v57 = vld [vmem:[#allocation3 + $0x364] ss:$48 sps:$4 sm:$0xff]  }
  0x6e   :  { %v16813_v58 = vld [vmem:[#allocation3 + $0x36c] ss:$48 sps:$4 sm:$0xff]   ;;  %v16815_v59 = vld [vmem:[#allocation3 + $0x360] ss:$48 sps:$4 sm:$0xff]   ;;  %v16816_v60 = vld [vmem:[#allocation3 + $0x368] ss:$48 sps:$4 sm:$0xff]  }
  0x6f   :  { %v16817_v61 = vld [vmem:[#allocation3 + $0x304] ss:$48 sps:$4 sm:$0xff]   ;;  %v16819_v62 = vld [vmem:[#allocation3 + $0x30c] ss:$48 sps:$4 sm:$0xff]   ;;  %v16821_v63 = vld [vmem:[#allocation3 + $0x300] ss:$48 sps:$4 sm:$0xff]  }
  0x70   :  { %1296 = vmatpush1.bf16.msra.mxu0 %v16761_v22  ;;  %1339 = vmatpush1.bf16.msra.mxu1 %v16762_v23  ;;  %v16822_v0 = vld [vmem:[#allocation3 + $0x308] ss:$48 sps:$4 sm:$0xff]   ;;  %v16828_v1 = vld [vmem:[#allocation3 + $0x2b4] ss:$48 sps:$4 sm:$0xff]   ;;  %v16831_v2 = vld [vmem:[#allocation3 + $0x2bc] ss:$48 sps:$4 sm:$0xff]  }
  0x71   :  { %1297 = vmatprep.subr.bf16.mxu0 %v16763_v24  ;;  %1340 = vmatprep.subr.bf16.mxu1 %v16765_v25  ;;  %v19904_v3 = vld [vmem:[%s20341_s0] ss:$8 sps:$4 sm:$0x3f]   ;;  %v16834_v6 = vld [vmem:[#allocation3 + $0x254] ss:$48 sps:$4 sm:$0xff]   ;;  %vm14580_vm1 = vcmask 523264  }
  0x72   :  { %v16826_v4 = vld [vmem:[#allocation3 + $0x2b0] ss:$48 sps:$4 sm:$0xff]   ;;  %v16829_v5 = vld [vmem:[#allocation3 + $0x2b8] ss:$48 sps:$4 sm:$0xff]   ;;  %v16837_v7 = vld [vmem:[#allocation3 + $0x25c] ss:$48 sps:$4 sm:$0xff]  }
  0x73   :  { %v16832_v8 = vld [vmem:[#allocation3 + $0x250] ss:$48 sps:$4 sm:$0xff]   ;;  %v16835_v9 = vld [vmem:[#allocation3 + $0x258] ss:$48 sps:$4 sm:$0xff]   ;;  %v16840_v10 = vld [vmem:[#allocation3 + $0x1f4] ss:$48 sps:$4 sm:$0xff]  }
  0x74   :  { %1298 = vmatpush1.bf16.msra.mxu0 %v16767_v26  ;;  %1341 = vmatpush1.bf16.msra.mxu1 %v16768_v27  ;;  %v16843_v11 = vld [vmem:[#allocation3 + $0x1fc] ss:$48 sps:$4 sm:$0xff]   ;;  %v16838_v12 = vld [vmem:[#allocation3 + $0x1f0] ss:$48 sps:$4 sm:$0xff]   ;;  %v16841_v13 = vld [vmem:[#allocation3 + $0x1f8] ss:$48 sps:$4 sm:$0xff]  }
  0x75   :  { %1299 = vmatprep.subr.bf16.mxu0 %v16769_v28  ;;  %1342 = vmatprep.subr.bf16.mxu1 %v16771_v29  ;;  %v16846_v14 = vld [vmem:[#allocation3 + $0x194] ss:$48 sps:$4 sm:$0xff]   ;;  %v16849_v15 = vld [vmem:[#allocation3 + $0x19c] ss:$48 sps:$4 sm:$0xff]   ;;  %v16844_v16 = vld [vmem:[#allocation3 + $0x190] ss:$48 sps:$4 sm:$0xff]  }
  0x76   :  { %v16847_v17 = vld [vmem:[#allocation3 + $0x198] ss:$48 sps:$4 sm:$0xff]   ;;  %v16852_v18 = vld [vmem:[#allocation3 + $0x134] ss:$48 sps:$4 sm:$0xff]   ;;  %v16855_v19 = vld [vmem:[#allocation3 + $0x13c] ss:$48 sps:$4 sm:$0xff]  }
  0x77   :  { %v16850_v20 = vld [vmem:[#allocation3 + $0x130] ss:$48 sps:$4 sm:$0xff]   ;;  %v16853_v21 = vld [vmem:[#allocation3 + $0x138] ss:$48 sps:$4 sm:$0xff]   ;;  %v16858_v22 = vld [vmem:[#allocation3 + $0xd4] ss:$48 sps:$4 sm:$0xff]  }
  0x78   :  { %1300 = vmatpush1.bf16.msra.mxu0 %v16773_v30  ;;  %1343 = vmatpush1.bf16.msra.mxu1 %v16774_v31  ;;  %v16861_v23 = vld [vmem:[#allocation3 + $0xdc] ss:$48 sps:$4 sm:$0xff]   ;;  %v16856_v24 = vld [vmem:[#allocation3 + $0xd0] ss:$48 sps:$4 sm:$0xff]   ;;  %v16859_v25 = vld [vmem:[#allocation3 + $0xd8] ss:$48 sps:$4 sm:$0xff]  }
  0x79   :  { %1301 = vmatprep.subr.bf16.mxu0 %v16775_v32  ;;  %1344 = vmatprep.subr.bf16.mxu1 %v16777_v33  ;;  %v16864_v26 = vld [vmem:[#allocation3 + $0x74] ss:$48 sps:$4 sm:$0xff]   ;;  %v16867_v27 = vld [vmem:[#allocation3 + $0x7c] ss:$48 sps:$4 sm:$0xff]   ;;  %v16862_v28 = vld [vmem:[#allocation3 + $0x70] ss:$48 sps:$4 sm:$0xff]  }
  0x7a   :  { %v16865_v29 = vld [vmem:[#allocation3 + $0x78] ss:$48 sps:$4 sm:$0xff]   ;;  %v16870_v30 = vld [vmem:[#allocation3 + $0x14] ss:$48 sps:$4 sm:$0xff]   ;;  %v16873_v31 = vld [vmem:[#allocation3 + $0x1c] ss:$48 sps:$4 sm:$0xff]  }
  0x7b   :  { %v16868_v32 = vld [vmem:[#allocation3 + $0x10] ss:$48 sps:$4 sm:$0xff]   ;;  %v16871_v33 = vld [vmem:[#allocation3 + $0x18] ss:$48 sps:$4 sm:$0xff]   ;;  %vm14654_vm2 = vcmask 1041408  }
  0x7c   :  { %1302 = vmatpush2.bf16.msra.mxu0 %v16779_v34  ;;  %1345 = vmatpush2.bf16.msra.mxu1 %v16780_v35  ;;  %v16876_v34 = vld [vmem:[#allocation3 + $0x5b4] ss:$48 sps:$4 sm:$0xff]   ;;  %v16879_v35 = vld [vmem:[#allocation3 + $0x5bc] ss:$48 sps:$4 sm:$0xff]  }
  0x7d   :  { %1303 = vmatprep.subr.bf16.mxu0 %v16781_v36  ;;  %1346 = vmatprep.subr.bf16.mxu1 %v16783_v37  ;;  %v16874_v36 = vld [vmem:[#allocation3 + $0x5b0] ss:$48 sps:$4 sm:$0xff]   ;;  %v16877_v37 = vld [vmem:[#allocation3 + $0x5b8] ss:$48 sps:$4 sm:$0xff]  }
  0x80   :  { %1304 = vmatpush2.bf16.msra.mxu0 %v16785_v38  ;;  %1347 = vmatpush2.bf16.msra.mxu1 %v16786_v39  ;;  %v16882_v38 = vld [vmem:[#allocation3 + $0x554] ss:$48 sps:$4 sm:$0xff]   ;;  %v16885_v39 = vld [vmem:[#allocation3 + $0x55c] ss:$48 sps:$4 sm:$0xff]  }
  0x81   :  { %1305 = vmatprep.subr.bf16.mxu0 %v16787_v40  ;;  %1348 = vmatprep.subr.bf16.mxu1 %v16789_v41  ;;  %v16880_v40 = vld [vmem:[#allocation3 + $0x550] ss:$48 sps:$4 sm:$0xff]   ;;  %v16883_v41 = vld [vmem:[#allocation3 + $0x558] ss:$48 sps:$4 sm:$0xff]  }
  0x84   :  { %1306 = vmatpush2.bf16.msra.mxu0 %v16791_v42  ;;  %1349 = vmatpush2.bf16.msra.mxu1 %v16792_v43  ;;  %v16888_v42 = vld [vmem:[#allocation3 + $0x4f4] ss:$48 sps:$4 sm:$0xff]   ;;  %v16891_v43 = vld [vmem:[#allocation3 + $0x4fc] ss:$48 sps:$4 sm:$0xff]  }
  0x85   :  { %1307 = vmatprep.subr.bf16.mxu0 %v16793_v44  ;;  %1350 = vmatprep.subr.bf16.mxu1 %v16795_v45  ;;  %v16886_v44 = vld [vmem:[#allocation3 + $0x4f0] ss:$48 sps:$4 sm:$0xff]   ;;  %v16889_v45 = vld [vmem:[#allocation3 + $0x4f8] ss:$48 sps:$4 sm:$0xff]  }
  0x88   :  { %1308 = vmatpush2.bf16.msra.mxu0 %v16797_v46  ;;  %1351 = vmatpush2.bf16.msra.mxu1 %v16798_v48  ;;  %v16894_v46 = vld [vmem:[#allocation3 + $0x494] ss:$48 sps:$4 sm:$0xff]   ;;  %v16897_v48 = vld [vmem:[#allocation3 + $0x49c] ss:$48 sps:$4 sm:$0xff]  }
  0x89   :  { %1309 = vmatprep.subr.bf16.mxu0 %v16799_v49  ;;  %1352 = vmatprep.subr.bf16.mxu1 %v16801_v50  ;;  %v16892_v49 = vld [vmem:[#allocation3 + $0x490] ss:$48 sps:$4 sm:$0xff]   ;;  %v16895_v50 = vld [vmem:[#allocation3 + $0x498] ss:$48 sps:$4 sm:$0xff]  }
  0x8c   :  { %1310 = vmatpush2.bf16.msra.mxu0 %v16803_v51  ;;  %1353 = vmatpush2.bf16.msra.mxu1 %v16804_v52  ;;  %v16900_v51 = vld [vmem:[#allocation3 + $0x434] ss:$48 sps:$4 sm:$0xff]   ;;  %v16903_v52 = vld [vmem:[#allocation3 + $0x43c] ss:$48 sps:$4 sm:$0xff]  }
  0x8d   :  { %1311 = vmatprep.subr.bf16.mxu0 %v16805_v53  ;;  %1354 = vmatprep.subr.bf16.mxu1 %v16807_v54  ;;  %v16898_v53 = vld [vmem:[#allocation3 + $0x430] ss:$48 sps:$4 sm:$0xff]   ;;  %v16901_v54 = vld [vmem:[#allocation3 + $0x438] ss:$48 sps:$4 sm:$0xff]  }
  0x90   :  { %1312 = vmatpush2.bf16.msra.mxu0 %v16809_v55  ;;  %1355 = vmatpush2.bf16.msra.mxu1 %v16810_v56  ;;  %v16906_v55 = vld [vmem:[#allocation3 + $0x3d4] ss:$48 sps:$4 sm:$0xff]   ;;  %v16909_v56 = vld [vmem:[#allocation3 + $0x3dc] ss:$48 sps:$4 sm:$0xff]  }
  0x91   :  { %1313 = vmatprep.subr.bf16.mxu0 %v16811_v57  ;;  %1356 = vmatprep.subr.bf16.mxu1 %v16813_v58  ;;  %v16904_v57 = vld [vmem:[#allocation3 + $0x3d0] ss:$48 sps:$4 sm:$0xff]   ;;  %v16907_v58 = vld [vmem:[#allocation3 + $0x3d8] ss:$48 sps:$4 sm:$0xff]  }
  0x94   :  { %1314 = vmatpush2.bf16.msra.mxu0 %v16815_v59  ;;  %1357 = vmatpush2.bf16.msra.mxu1 %v16816_v60  ;;  %v16912_v59 = vld [vmem:[#allocation3 + $0x374] ss:$48 sps:$4 sm:$0xff]   ;;  %v16915_v60 = vld [vmem:[#allocation3 + $0x37c] ss:$48 sps:$4 sm:$0xff]  }
  0x95   :  { %1315 = vmatprep.subr.bf16.mxu0 %v16817_v61  ;;  %1358 = vmatprep.subr.bf16.mxu1 %v16819_v62  ;;  %v16910_v61 = vld [vmem:[#allocation3 + $0x370] ss:$48 sps:$4 sm:$0xff]   ;;  %v16913_v62 = vld [vmem:[#allocation3 + $0x378] ss:$48 sps:$4 sm:$0xff]  }
  0x98   :  { %1316 = vmatpush2.bf16.msra.mxu0 %v16821_v63  ;;  %1359 = vmatpush2.bf16.msra.mxu1 %v16822_v0  ;;  %v16918_v63 = vld [vmem:[#allocation3 + $0x314] ss:$48 sps:$4 sm:$0xff]   ;;  %v16921_v0 = vld [vmem:[#allocation3 + $0x31c] ss:$48 sps:$4 sm:$0xff]  }
  0x99   :  { %1371 = vmatprep.subr.bf16.mxu0 %v16828_v1  ;;  %1414 = vmatprep.subr.bf16.mxu1 %v16831_v2  ;;  %v16916_v1 = vld [vmem:[#allocation3 + $0x310] ss:$48 sps:$4 sm:$0xff]   ;;  %v16919_v2 = vld [vmem:[#allocation3 + $0x318] ss:$48 sps:$4 sm:$0xff]  }
  0x9b   :  { %1318 = vmatmul.mubr.bf16.vlgmr.msra.gmra.mxu0 %v19904_v3  ;;  %1361 = vmatmul.mubr.bf16.vlgmr.msra.gmra.mxu1 %v19904_v3 }
  0x9c   :  { %1372 = vmatpush1.bf16.msra.mxu0 %v16826_v4  ;;  %1415 = vmatpush1.bf16.msra.mxu1 %v16829_v5  ;;  %v16924_v4 = vld [vmem:[#allocation3 + $0x2c4] ss:$48 sps:$4 sm:$0xff]   ;;  %v16927_v5 = vld [vmem:[#allocation3 + $0x2cc] ss:$48 sps:$4 sm:$0xff]  }
  0x9d   :  { %1373 = vmatprep.subr.bf16.mxu0 %v16834_v6  ;;  %1416 = vmatprep.subr.bf16.mxu1 %v16837_v7  ;;  %v16922_v6 = vld [vmem:[#allocation3 + $0x2c0] ss:$48 sps:$4 sm:$0xff]   ;;  %v16925_v7 = vld [vmem:[#allocation3 + $0x2c8] ss:$48 sps:$4 sm:$0xff]  }
  0x9e   :  { %1403 = vmatprep.mubr.bf16.mxu0 %v19897_v47  ;;  %1446 = vmatprep.mubr.bf16.mxu1 %v19897_v47 }
  0xa0   :  { %1374 = vmatpush1.bf16.msra.mxu0 %v16832_v8  ;;  %1417 = vmatpush1.bf16.msra.mxu1 %v16835_v9  ;;  %v16930_v8 = vld [vmem:[#allocation3 + $0x264] ss:$48 sps:$4 sm:$0xff]   ;;  %v16933_v9 = vld [vmem:[#allocation3 + $0x26c] ss:$48 sps:$4 sm:$0xff]  }
  0xa1   :  { %1375 = vmatprep.subr.bf16.mxu0 %v16840_v10  ;;  %1418 = vmatprep.subr.bf16.mxu1 %v16843_v11  ;;  %v16928_v10 = vld [vmem:[#allocation3 + $0x260] ss:$48 sps:$4 sm:$0xff]   ;;  %v16931_v11 = vld [vmem:[#allocation3 + $0x268] ss:$48 sps:$4 sm:$0xff]  }
  0xa4   :  { %1376 = vmatpush1.bf16.msra.mxu0 %v16838_v12  ;;  %1419 = vmatpush1.bf16.msra.mxu1 %v16841_v13  ;;  %v16936_v12 = vld [vmem:[#allocation3 + $0x204] ss:$48 sps:$4 sm:$0xff]   ;;  %v16939_v13 = vld [vmem:[#allocation3 + $0x20c] ss:$48 sps:$4 sm:$0xff]  }
  0xa5   :  { %1377 = vmatprep.subr.bf16.mxu0 %v16846_v14  ;;  %1420 = vmatprep.subr.bf16.mxu1 %v16849_v15  ;;  %v16934_v14 = vld [vmem:[#allocation3 + $0x200] ss:$48 sps:$4 sm:$0xff]   ;;  %v16937_v15 = vld [vmem:[#allocation3 + $0x208] ss:$48 sps:$4 sm:$0xff]  }
  0xa8   :  { %1378 = vmatpush1.bf16.msra.mxu0 %v16844_v16  ;;  %1421 = vmatpush1.bf16.msra.mxu1 %v16847_v17  ;;  %v16942_v16 = vld [vmem:[#allocation3 + $0x1a4] ss:$48 sps:$4 sm:$0xff]   ;;  %v16945_v17 = vld [vmem:[#allocation3 + $0x1ac] ss:$48 sps:$4 sm:$0xff]  }
  0xa9   :  { %1379 = vmatprep.subr.bf16.mxu0 %v16852_v18  ;;  %1422 = vmatprep.subr.bf16.mxu1 %v16855_v19  ;;  %v16940_v18 = vld [vmem:[#allocation3 + $0x1a0] ss:$48 sps:$4 sm:$0xff]   ;;  %v16948_v19 = vld [vmem:[#allocation3 + $0x144] ss:$48 sps:$4 sm:$0xff]  }
  0xac   :  { %1380 = vmatpush1.bf16.msra.mxu0 %v16850_v20  ;;  %1423 = vmatpush1.bf16.msra.mxu1 %v16853_v21  ;;  %v16951_v20 = vld [vmem:[#allocation3 + $0x14c] ss:$48 sps:$4 sm:$0xff]   ;;  %v16946_v21 = vld [vmem:[#allocation3 + $0x140] ss:$48 sps:$4 sm:$0xff]  }
  0xad   :  { %1381 = vmatprep.subr.bf16.mxu0 %v16858_v22  ;;  %1424 = vmatprep.subr.bf16.mxu1 %v16861_v23  ;;  %v16949_v22 = vld [vmem:[#allocation3 + $0x148] ss:$48 sps:$4 sm:$0xff]   ;;  %v16954_v23 = vld [vmem:[#allocation3 + $0xe4] ss:$48 sps:$4 sm:$0xff]  }
  0xb0   :  { %1382 = vmatpush1.bf16.msra.mxu0 %v16856_v24  ;;  %1425 = vmatpush1.bf16.msra.mxu1 %v16859_v25  ;;  %v16957_v24 = vld [vmem:[#allocation3 + $0xec] ss:$48 sps:$4 sm:$0xff]   ;;  %v16955_v25 = vld [vmem:[#allocation3 + $0xe8] ss:$48 sps:$4 sm:$0xff]  }
  0xb1   :  { %1383 = vmatprep.subr.bf16.mxu0 %v16864_v26  ;;  %1426 = vmatprep.subr.bf16.mxu1 %v16867_v27  ;;  %v16960_v26 = vld [vmem:[#allocation3 + $0x84] ss:$48 sps:$4 sm:$0xff]   ;;  %v16963_v27 = vld [vmem:[#allocation3 + $0x8c] ss:$48 sps:$4 sm:$0xff]  }
  0xb4   :  { %1384 = vmatpush1.bf16.msra.mxu0 %v16862_v28  ;;  %1427 = vmatpush1.bf16.msra.mxu1 %v16865_v29  ;;  %v16958_v28 = vld [vmem:[#allocation3 + $0x80] ss:$48 sps:$4 sm:$0xff]   ;;  %v16961_v29 = vld [vmem:[#allocation3 + $0x88] ss:$48 sps:$4 sm:$0xff]  }
  0xb5   :  { %1385 = vmatprep.subr.bf16.mxu0 %v16870_v30  ;;  %1428 = vmatprep.subr.bf16.mxu1 %v16873_v31  ;;  %v16966_v30 = vld [vmem:[#allocation3 + $0x24] ss:$48 sps:$4 sm:$0xff]   ;;  %v16969_v31 = vld [vmem:[#allocation3 + $0x2c] ss:$48 sps:$4 sm:$0xff]  }
  0xb8   :  { %1386 = vmatpush1.bf16.msra.mxu0 %v16868_v32  ;;  %1429 = vmatpush1.bf16.msra.mxu1 %v16871_v33  ;;  %v16964_v32 = vld [vmem:[#allocation3 + $0x20] ss:$48 sps:$4 sm:$0xff]   ;;  %v16967_v33 = vld [vmem:[#allocation3 + $0x28] ss:$48 sps:$4 sm:$0xff]  }
  0xb9   :  { %1387 = vmatprep.subr.bf16.mxu0 %v16876_v34  ;;  %1430 = vmatprep.subr.bf16.mxu1 %v16879_v35  ;;  %v16972_v34 = vld [vmem:[#allocation3 + $0x5c4] ss:$48 sps:$4 sm:$0xff]   ;;  %v16975_v35 = vld [vmem:[#allocation3 + $0x5cc] ss:$48 sps:$4 sm:$0xff]  }
  0xbc   :  { %1388 = vmatpush2.bf16.msra.mxu0 %v16874_v36  ;;  %1431 = vmatpush2.bf16.msra.mxu1 %v16877_v37  ;;  %v16970_v36 = vld [vmem:[#allocation3 + $0x5c0] ss:$48 sps:$4 sm:$0xff]   ;;  %v16973_v37 = vld [vmem:[#allocation3 + $0x5c8] ss:$48 sps:$4 sm:$0xff]  }
  0xbd   :  { %1389 = vmatprep.subr.bf16.mxu0 %v16882_v38  ;;  %1432 = vmatprep.subr.bf16.mxu1 %v16885_v39  ;;  %v16978_v38 = vld [vmem:[#allocation3 + $0x564] ss:$48 sps:$4 sm:$0xff]   ;;  %v16981_v39 = vld [vmem:[#allocation3 + $0x56c] ss:$48 sps:$4 sm:$0xff]  }
  0xc0   :  { %1390 = vmatpush2.bf16.msra.mxu0 %v16880_v40  ;;  %1433 = vmatpush2.bf16.msra.mxu1 %v16883_v41  ;;  %v16976_v40 = vld [vmem:[#allocation3 + $0x560] ss:$48 sps:$4 sm:$0xff]   ;;  %v16979_v41 = vld [vmem:[#allocation3 + $0x568] ss:$48 sps:$4 sm:$0xff]  }
  0xc1   :  { %1391 = vmatprep.subr.bf16.mxu0 %v16888_v42  ;;  %1434 = vmatprep.subr.bf16.mxu1 %v16891_v43  ;;  %v16984_v42 = vld [vmem:[#allocation3 + $0x504] ss:$48 sps:$4 sm:$0xff]   ;;  %v16987_v43 = vld [vmem:[#allocation3 + $0x50c] ss:$48 sps:$4 sm:$0xff]  }
  0xc4   :  { %1392 = vmatpush2.bf16.msra.mxu0 %v16886_v44  ;;  %1435 = vmatpush2.bf16.msra.mxu1 %v16889_v45  ;;  %v16982_v44 = vld [vmem:[#allocation3 + $0x500] ss:$48 sps:$4 sm:$0xff]   ;;  %v16985_v45 = vld [vmem:[#allocation3 + $0x508] ss:$48 sps:$4 sm:$0xff]  }
  0xc5   :  { %1393 = vmatprep.subr.bf16.mxu0 %v16894_v46  ;;  %1436 = vmatprep.subr.bf16.mxu1 %v16897_v48  ;;  %v16990_v46 = vld [vmem:[#allocation3 + $0x4a4] ss:$48 sps:$4 sm:$0xff]   ;;  %v16993_v48 = vld [vmem:[#allocation3 + $0x4ac] ss:$48 sps:$4 sm:$0xff]  }
  0xc8   :  { %1394 = vmatpush2.bf16.msra.mxu0 %v16892_v49  ;;  %1437 = vmatpush2.bf16.msra.mxu1 %v16895_v50  ;;  %v16988_v49 = vld [vmem:[#allocation3 + $0x4a0] ss:$48 sps:$4 sm:$0xff]   ;;  %v16991_v50 = vld [vmem:[#allocation3 + $0x4a8] ss:$48 sps:$4 sm:$0xff]  }
  0xc9   :  { %1395 = vmatprep.subr.bf16.mxu0 %v16900_v51  ;;  %1438 = vmatprep.subr.bf16.mxu1 %v16903_v52  ;;  %v16996_v51 = vld [vmem:[#allocation3 + $0x444] ss:$48 sps:$4 sm:$0xff]   ;;  %v16999_v52 = vld [vmem:[#allocation3 + $0x44c] ss:$48 sps:$4 sm:$0xff]  }
  0xcc   :  { %1396 = vmatpush2.bf16.msra.mxu0 %v16898_v53  ;;  %1439 = vmatpush2.bf16.msra.mxu1 %v16901_v54  ;;  %v16994_v53 = vld [vmem:[#allocation3 + $0x440] ss:$48 sps:$4 sm:$0xff]   ;;  %v16997_v54 = vld [vmem:[#allocation3 + $0x448] ss:$48 sps:$4 sm:$0xff]  }
  0xcd   :  { %1397 = vmatprep.subr.bf16.mxu0 %v16906_v55  ;;  %1440 = vmatprep.subr.bf16.mxu1 %v16909_v56  ;;  %v17002_v55 = vld [vmem:[#allocation3 + $0x3e4] ss:$48 sps:$4 sm:$0xff]   ;;  %v17005_v56 = vld [vmem:[#allocation3 + $0x3ec] ss:$48 sps:$4 sm:$0xff]  }
  0xd0   :  { %1398 = vmatpush2.bf16.msra.mxu0 %v16904_v57  ;;  %1441 = vmatpush2.bf16.msra.mxu1 %v16907_v58  ;;  %v17000_v57 = vld [vmem:[#allocation3 + $0x3e0] ss:$48 sps:$4 sm:$0xff]   ;;  %v17003_v58 = vld [vmem:[#allocation3 + $0x3e8] ss:$48 sps:$4 sm:$0xff]  }
  0xd1   :  { %1399 = vmatprep.subr.bf16.mxu0 %v16912_v59  ;;  %1442 = vmatprep.subr.bf16.mxu1 %v16915_v60  ;;  %v17008_v59 = vld [vmem:[#allocation3 + $0x384] ss:$48 sps:$4 sm:$0xff]   ;;  %v17011_v60 = vld [vmem:[#allocation3 + $0x38c] ss:$48 sps:$4 sm:$0xff]  }
  0xd4   :  { %1400 = vmatpush2.bf16.msra.mxu0 %v16910_v61  ;;  %1443 = vmatpush2.bf16.msra.mxu1 %v16913_v62  ;;  %v17006_v61 = vld [vmem:[#allocation3 + $0x380] ss:$48 sps:$4 sm:$0xff]   ;;  %v17009_v62 = vld [vmem:[#allocation3 + $0x388] ss:$48 sps:$4 sm:$0xff]  }
  0xd5   :  { %1401 = vmatprep.subr.bf16.mxu0 %v16918_v63  ;;  %1444 = vmatprep.subr.bf16.mxu1 %v16921_v0  ;;  %v17014_v63 = vld [vmem:[#allocation3 + $0x324] ss:$48 sps:$4 sm:$0xff]   ;;  %v17017_v0 = vld [vmem:[#allocation3 + $0x32c] ss:$48 sps:$4 sm:$0xff]  }
  0xd8   :  { %1402 = vmatpush2.bf16.msra.mxu0 %v16916_v1  ;;  %1445 = vmatpush2.bf16.msra.mxu1 %v16919_v2  ;;  %v17012_v1 = vld [vmem:[#allocation3 + $0x320] ss:$48 sps:$4 sm:$0xff]   ;;  %v17015_v2 = vld [vmem:[#allocation3 + $0x328] ss:$48 sps:$4 sm:$0xff]  }
  0xd9   :  { %1457 = vmatprep.subr.bf16.mxu0 %v16924_v4  ;;  %1500 = vmatprep.subr.bf16.mxu1 %v16927_v5  ;;  %v19638_v4 = vld [vmem:[%s20341_s0] ss:$8 sps:$4 sm:$0x3f]   ;;  %v17018_v5 = vld [vmem:[#allocation8 + $0x2a0] ss:$48 sps:$4 sm:$0xff]  }
  0xdb   :  { %1404 = vmatmul.mubr.bf16.vlgmr.msra.gmra.mxu0 %v19904_v3  ;;  %1447 = vmatmul.mubr.bf16.vlgmr.msra.gmra.mxu1 %v19904_v3  ;;  %v16943_v3 = vld [vmem:[#allocation3 + $0x1a8] ss:$48 sps:$4 sm:$0xff]  }
  0xdc   :  { %1458 = vmatpush1.bf16.msra.mxu0 %v16922_v6  ;;  %1501 = vmatpush1.bf16.msra.mxu1 %v16925_v7  ;;  %v17020_v6 = vld [vmem:[#allocation8 + $0x2a4] ss:$48 sps:$4 sm:$0xff]   ;;  %v17021_v7 = vld [vmem:[#allocation8 + $0x8a0] ss:$48 sps:$4 sm:$0xff]  }
  0xdd   :  { %1459 = vmatprep.subr.bf16.mxu0 %v16930_v8  ;;  %1502 = vmatprep.subr.bf16.mxu1 %v16933_v9  ;;  %v17023_v8 = vld [vmem:[#allocation8 + $0x8a4] ss:$48 sps:$4 sm:$0xff]  }
  0xde   :  { %1489 = vmatprep.mubr.bf16.mxu0 %v19897_v47  ;;  %1532 = vmatprep.mubr.bf16.mxu1 %v19897_v47  ;;  %v16952_v47 = vld [vmem:[#allocation3 + $0xe0] ss:$48 sps:$4 sm:$0xff]   ;;  %v17026_v9 = vld [vmem:[#allocation8 + $0x244] ss:$48 sps:$4 sm:$0xff]  }
  0xe0   :  { %1460 = vmatpush1.bf16.msra.mxu0 %v16928_v10  ;;  %1503 = vmatpush1.bf16.msra.mxu1 %v16931_v11  ;;  %v17029_v10 = vld [vmem:[#allocation8 + $0x844] ss:$48 sps:$4 sm:$0xff]   ;;  %v17024_v11 = vld [vmem:[#allocation8 + $0x240] ss:$48 sps:$4 sm:$0xff]  }
  0xe1   :  { %1461 = vmatprep.subr.bf16.mxu0 %v16936_v12  ;;  %1504 = vmatprep.subr.bf16.mxu1 %v16939_v13  ;;  %v17027_v12 = vld [vmem:[#allocation8 + $0x840] ss:$48 sps:$4 sm:$0xff]   ;;  %v17032_v13 = vld [vmem:[#allocation8 + $0x1e4] ss:$48 sps:$4 sm:$0xff]  }
  0xe4   :  { %1462 = vmatpush1.bf16.msra.mxu0 %v16934_v14  ;;  %1505 = vmatpush1.bf16.msra.mxu1 %v16937_v15  ;;  %v17035_v14 = vld [vmem:[#allocation8 + $0x7e4] ss:$48 sps:$4 sm:$0xff]   ;;  %v17030_v15 = vld [vmem:[#allocation8 + $0x1e0] ss:$48 sps:$4 sm:$0xff]  }
  0xe5   :  { %1463 = vmatprep.subr.bf16.mxu0 %v16942_v16  ;;  %1506 = vmatprep.subr.bf16.mxu1 %v16945_v17  ;;  %v17033_v16 = vld [vmem:[#allocation8 + $0x7e0] ss:$48 sps:$4 sm:$0xff]   ;;  %v17038_v17 = vld [vmem:[#allocation8 + $0x184] ss:$48 sps:$4 sm:$0xff]  }
  0xe8   :  { %1464 = vmatpush1.bf16.msra.mxu0 %v16940_v18  ;;  %1507 = vmatpush1.bf16.msra.mxu1 %v16943_v3  ;;  %v17041_v18 = vld [vmem:[#allocation8 + $0x784] ss:$48 sps:$4 sm:$0xff]   ;;  %v17036_v3 = vld [vmem:[#allocation8 + $0x180] ss:$48 sps:$4 sm:$0xff]  }
  0xe9   :  { %1465 = vmatprep.subr.bf16.mxu0 %v16948_v19  ;;  %1508 = vmatprep.subr.bf16.mxu1 %v16951_v20  ;;  %v17039_v19 = vld [vmem:[#allocation8 + $0x780] ss:$48 sps:$4 sm:$0xff]   ;;  %v17044_v20 = vld [vmem:[#allocation8 + $0x124] ss:$48 sps:$4 sm:$0xff]  }
  0xec   :  { %1466 = vmatpush1.bf16.msra.mxu0 %v16946_v21  ;;  %1509 = vmatpush1.bf16.msra.mxu1 %v16949_v22  ;;  %v17042_v21 = vld [vmem:[#allocation8 + $0x120] ss:$48 sps:$4 sm:$0xff]   ;;  %v17047_v22 = vld [vmem:[#allocation8 + $0x724] ss:$48 sps:$4 sm:$0xff]  }
  0xed   :  { %1467 = vmatprep.subr.bf16.mxu0 %v16954_v23  ;;  %1510 = vmatprep.subr.bf16.mxu1 %v16957_v24  ;;  %v17045_v23 = vld [vmem:[#allocation8 + $0x720] ss:$48 sps:$4 sm:$0xff]   ;;  %v17050_v24 = vld [vmem:[#allocation8 + $0xc4] ss:$48 sps:$4 sm:$0xff]  }
  0xf0   :  { %1468 = vmatpush1.bf16.msra.mxu0 %v16952_v47  ;;  %1511 = vmatpush1.bf16.msra.mxu1 %v16955_v25  ;;  %v17053_v47 = vld [vmem:[#allocation8 + $0x6c4] ss:$48 sps:$4 sm:$0xff]   ;;  %v17048_v25 = vld [vmem:[#allocation8 + $0xc0] ss:$48 sps:$4 sm:$0xff]  }
  0xf1   :  { %1469 = vmatprep.subr.bf16.mxu0 %v16960_v26  ;;  %1512 = vmatprep.subr.bf16.mxu1 %v16963_v27  ;;  %v17051_v26 = vld [vmem:[#allocation8 + $0x6c0] ss:$48 sps:$4 sm:$0xff]   ;;  %v17056_v27 = vld [vmem:[#allocation8 + $0x64] ss:$48 sps:$4 sm:$0xff]  }
  0xf4   :  { %1470 = vmatpush1.bf16.msra.mxu0 %v16958_v28  ;;  %1513 = vmatpush1.bf16.msra.mxu1 %v16961_v29  ;;  %v17059_v28 = vld [vmem:[#allocation8 + $0x664] ss:$48 sps:$4 sm:$0xff]   ;;  %v17054_v29 = vld [vmem:[#allocation8 + $0x60] ss:$48 sps:$4 sm:$0xff]  }
  0xf5   :  { %1471 = vmatprep.subr.bf16.mxu0 %v16966_v30  ;;  %1514 = vmatprep.subr.bf16.mxu1 %v16969_v31  ;;  %v17057_v30 = vld [vmem:[#allocation8 + $0x660] ss:$48 sps:$4 sm:$0xff]   ;;  %v17062_v31 = vld [vmem:[#allocation8 + $0x4] ss:$48 sps:$4 sm:$0xff]  }
  0xf8   :  { %1472 = vmatpush1.bf16.msra.mxu0 %v16964_v32  ;;  %1515 = vmatpush1.bf16.msra.mxu1 %v16967_v33  ;;  %v17065_v32 = vld [vmem:[#allocation8 + $0x604] ss:$48 sps:$4 sm:$0xff]   ;;  %v17060_v33 = vld [vmem:[#allocation8] ss:$48 sps:$4 sm:$0xff]  }
  0xf9   :  { %1473 = vmatprep.subr.bf16.mxu0 %v16972_v34  ;;  %1516 = vmatprep.subr.bf16.mxu1 %v16975_v35  ;;  %v17063_v34 = vld [vmem:[#allocation8 + $0x600] ss:$48 sps:$4 sm:$0xff]   ;;  %v17068_v35 = vld [vmem:[#allocation8 + $0x5a4] ss:$48 sps:$4 sm:$0xff]  }
  0xfc   :  { %1474 = vmatpush2.bf16.msra.mxu0 %v16970_v36  ;;  %1517 = vmatpush2.bf16.msra.mxu1 %v16973_v37  ;;  %v17071_v36 = vld [vmem:[#allocation8 + $0xba4] ss:$48 sps:$4 sm:$0xff]   ;;  %v17066_v37 = vld [vmem:[#allocation8 + $0x5a0] ss:$48 sps:$4 sm:$0xff]  }
  0xfd   :  { %1475 = vmatprep.subr.bf16.mxu0 %v16978_v38  ;;  %1518 = vmatprep.subr.bf16.mxu1 %v16981_v39  ;;  %v17069_v38 = vld [vmem:[#allocation8 + $0xba0] ss:$48 sps:$4 sm:$0xff]   ;;  %v17074_v39 = vld [vmem:[#allocation8 + $0x544] ss:$48 sps:$4 sm:$0xff]  }
 0x100   :  { %1476 = vmatpush2.bf16.msra.mxu0 %v16976_v40  ;;  %1519 = vmatpush2.bf16.msra.mxu1 %v16979_v41  ;;  %v17077_v40 = vld [vmem:[#allocation8 + $0xb44] ss:$48 sps:$4 sm:$0xff]   ;;  %v17072_v41 = vld [vmem:[#allocation8 + $0x540] ss:$48 sps:$4 sm:$0xff]  }
 0x101   :  { %1477 = vmatprep.subr.bf16.mxu0 %v16984_v42  ;;  %1520 = vmatprep.subr.bf16.mxu1 %v16987_v43  ;;  %v17075_v42 = vld [vmem:[#allocation8 + $0xb40] ss:$48 sps:$4 sm:$0xff]   ;;  %v17080_v43 = vld [vmem:[#allocation8 + $0x4e4] ss:$48 sps:$4 sm:$0xff]  }
 0x104   :  { %1478 = vmatpush2.bf16.msra.mxu0 %v16982_v44  ;;  %1521 = vmatpush2.bf16.msra.mxu1 %v16985_v45  ;;  %v17083_v44 = vld [vmem:[#allocation8 + $0xae4] ss:$48 sps:$4 sm:$0xff]   ;;  %v17078_v45 = vld [vmem:[#allocation8 + $0x4e0] ss:$48 sps:$4 sm:$0xff]  }
 0x105   :  { %1479 = vmatprep.subr.bf16.mxu0 %v16990_v46  ;;  %1522 = vmatprep.subr.bf16.mxu1 %v16993_v48  ;;  %v17081_v46 = vld [vmem:[#allocation8 + $0xae0] ss:$48 sps:$4 sm:$0xff]   ;;  %v17086_v48 = vld [vmem:[#allocation8 + $0x484] ss:$48 sps:$4 sm:$0xff]  }
 0x108   :  { %1480 = vmatpush2.bf16.msra.mxu0 %v16988_v49  ;;  %1523 = vmatpush2.bf16.msra.mxu1 %v16991_v50  ;;  %v17084_v49 = vld [vmem:[#allocation8 + $0x480] ss:$48 sps:$4 sm:$0xff]   ;;  %v17089_v50 = vld [vmem:[#allocation8 + $0xa84] ss:$48 sps:$4 sm:$0xff]  }
 0x109   :  { %1481 = vmatprep.subr.bf16.mxu0 %v16996_v51  ;;  %1524 = vmatprep.subr.bf16.mxu1 %v16999_v52  ;;  %v17087_v51 = vld [vmem:[#allocation8 + $0xa80] ss:$48 sps:$4 sm:$0xff]   ;;  %v17092_v52 = vld [vmem:[#allocation8 + $0x424] ss:$48 sps:$4 sm:$0xff]  }
 0x10c   :  { %1482 = vmatpush2.bf16.msra.mxu0 %v16994_v53  ;;  %1525 = vmatpush2.bf16.msra.mxu1 %v16997_v54  ;;  %v17090_v53 = vld [vmem:[#allocation8 + $0x420] ss:$48 sps:$4 sm:$0xff]   ;;  %v17095_v54 = vld [vmem:[#allocation8 + $0xa24] ss:$48 sps:$4 sm:$0xff]  }
 0x10d   :  { %1483 = vmatprep.subr.bf16.mxu0 %v17002_v55  ;;  %1526 = vmatprep.subr.bf16.mxu1 %v17005_v56  ;;  %v17093_v55 = vld [vmem:[#allocation8 + $0xa20] ss:$48 sps:$4 sm:$0xff]   ;;  %v17098_v56 = vld [vmem:[#allocation8 + $0x3c4] ss:$48 sps:$4 sm:$0xff]  }
 0x110   :  { %1484 = vmatpush2.bf16.msra.mxu0 %v17000_v57  ;;  %1527 = vmatpush2.bf16.msra.mxu1 %v17003_v58  ;;  %v17096_v57 = vld [vmem:[#allocation8 + $0x3c0] ss:$48 sps:$4 sm:$0xff]   ;;  %v17101_v58 = vld [vmem:[#allocation8 + $0x9c4] ss:$48 sps:$4 sm:$0xff]  }
 0x111   :  { %1485 = vmatprep.subr.bf16.mxu0 %v17008_v59  ;;  %1528 = vmatprep.subr.bf16.mxu1 %v17011_v60  ;;  %v17099_v59 = vld [vmem:[#allocation8 + $0x9c0] ss:$48 sps:$4 sm:$0xff]   ;;  %v17104_v60 = vld [vmem:[#allocation8 + $0x364] ss:$48 sps:$4 sm:$0xff]  }
 0x114   :  { %1486 = vmatpush2.bf16.msra.mxu0 %v17006_v61  ;;  %1529 = vmatpush2.bf16.msra.mxu1 %v17009_v62  ;;  %v17102_v61 = vld [vmem:[#allocation8 + $0x360] ss:$48 sps:$4 sm:$0xff]   ;;  %v17107_v62 = vld [vmem:[#allocation8 + $0x964] ss:$48 sps:$4 sm:$0xff]  }
 0x115   :  { %1487 = vmatprep.subr.bf16.mxu0 %v17014_v63  ;;  %1530 = vmatprep.subr.bf16.mxu1 %v17017_v0  ;;  %v17105_v63 = vld [vmem:[#allocation8 + $0x960] ss:$48 sps:$4 sm:$0xff]   ;;  %v17110_v0 = vld [vmem:[#allocation8 + $0x304] ss:$48 sps:$4 sm:$0xff]  }
 0x118   :  { %1488 = vmatpush2.bf16.msra.mxu0 %v17012_v1  ;;  %1531 = vmatpush2.bf16.msra.mxu1 %v17015_v2  ;;  %v17108_v1 = vld [vmem:[#allocation8 + $0x300] ss:$48 sps:$4 sm:$0xff]   ;;  %v17113_v2 = vld [vmem:[#allocation8 + $0x904] ss:$48 sps:$4 sm:$0xff]  }
 0x119   :  { %12036 = vmatprep.subr.bf16.mxu0 %v17020_v6  ;;  %12077 = vmatprep.subr.bf16.mxu1 %v17023_v8  ;;  %v17119_v6 = vld [vmem:[#allocation8 + $0x14a4] ss:$48 sps:$4 sm:$0xff]  }
 0x11b   :  { %1490 = vmatmul.mubr.bf16.vlgmr.msra.gmra.mxu0 %v19638_v4  ;;  %1533 = vmatmul.mubr.bf16.vlgmr.msra.gmra.mxu1 %v19638_v4  ;;  %v17111_v4 = vld [vmem:[#allocation8 + $0x900] ss:$48 sps:$4 sm:$0xff]  }
 0x11c   :  { %12037 = vmatpush1.bf16.msra.mxu0 %v17018_v5  ;;  %12078 = vmatpush1.bf16.msra.mxu1 %v17021_v7  ;;  %v17116_v5 = vld [vmem:[#allocation8 + $0xea4] ss:$48 sps:$4 sm:$0xff]  }
 0x11d   :  { %12038 = vmatprep.subr.bf16.mxu0 %v17026_v9  ;;  %12079 = vmatprep.subr.bf16.mxu1 %v17029_v10 }
 0x120   :  { %12039 = vmatpush1.bf16.msra.mxu0 %v17024_v11  ;;  %12080 = vmatpush1.bf16.msra.mxu1 %v17027_v12 }
 0x121   :  { %12040 = vmatprep.subr.bf16.mxu0 %v17032_v13  ;;  %12081 = vmatprep.subr.bf16.mxu1 %v17035_v14 }
 0x124   :  { %12041 = vmatpush1.bf16.msra.mxu0 %v17030_v15  ;;  %12082 = vmatpush1.bf16.msra.mxu1 %v17033_v16 }
 0x125   :  { %12042 = vmatprep.subr.bf16.mxu0 %v17038_v17  ;;  %12083 = vmatprep.subr.bf16.mxu1 %v17041_v18  ;;  %v1563_v17 = vlaneseq }
 0x128   :  { %12043 = vmatpush1.bf16.msra.mxu0 %v17036_v3  ;;  %12084 = vmatpush1.bf16.msra.mxu1 %v17039_v19  ;;  %v19917_v19 = vshrl.u32 %v1563_v17, 7 }
 0x129   :  { %12044 = vmatprep.subr.bf16.mxu0 %v17044_v20  ;;  %12085 = vmatprep.subr.bf16.mxu1 %v17047_v22 }
 0x12a   :  { %v1569_v22 = vsub.s32 1, %v19917_v19 }
 0x12c   :  { %12045 = vmatpush1.bf16.msra.mxu0 %v17042_v21  ;;  %12086 = vmatpush1.bf16.msra.mxu1 %v17045_v23 }
 0x12d   :  { %12046 = vmatprep.subr.bf16.mxu0 %v17050_v24  ;;  %12087 = vmatprep.subr.bf16.mxu1 %v17053_v47  ;;  %v1561_v47 = vld [vmem:[#allocation6] sm:$0x7] }
 0x130   :  { %12047 = vmatpush1.bf16.msra.mxu0 %v17048_v25  ;;  %12088 = vmatpush1.bf16.msra.mxu1 %v17051_v26  ;;  %v1565_v25 = vsub.s32 0, %v19917_v19  ;;  %v1573_v26 = vsub.s32 2, %v19917_v19  ;;  %v14570_v19 = vld [vmem:[#allocation12 + $0x28] sm:$0xff] }
 0x131   :  { %12048 = vmatprep.subr.bf16.mxu0 %v17056_v27  ;;  %12089 = vmatprep.subr.bf16.mxu1 %v17059_v28 }
 0x134   :  { %12049 = vmatpush1.bf16.msra.mxu0 %v17054_v29  ;;  %12090 = vmatpush1.bf16.msra.mxu1 %v17057_v30 }
 0x135   :  { %12050 = vmatprep.subr.bf16.mxu0 %v17062_v31  ;;  %12091 = vmatprep.subr.bf16.mxu1 %v17065_v32  ;;  %v1570_v31 = vrot.slane %v1561_v47, %v1569_v22 }
 0x138   :  { %12051 = vmatpush1.bf16.msra.mxu0 %v17060_v33  ;;  %12092 = vmatpush1.bf16.msra.mxu1 %v17063_v34  ;;  %v1566_v34 = vrot.slane %v1561_v47, %v1565_v25 }
 0x139   :  { %12052 = vmatprep.subr.bf16.mxu0 %v17068_v35  ;;  %12093 = vmatprep.subr.bf16.mxu1 %v17071_v36  ;;  %v1574_v36 = vrot.slane %v1561_v47, %v1573_v26  ;;  %v17125_v47 = vld [vmem:[#allocation8 + $0x1444] ss:$48 sps:$4 sm:$0xff]  }
 0x13c   :  { %12053 = vmatpush2.bf16.msra.mxu0 %v17066_v37  ;;  %12094 = vmatpush2.bf16.msra.mxu1 %v17069_v38 }
 0x13d   :  { %12054 = vmatprep.subr.bf16.mxu0 %v17074_v39  ;;  %12095 = vmatprep.subr.bf16.mxu1 %v17077_v40 }
 0x140   :  { %12055 = vmatpush2.bf16.msra.mxu0 %v17072_v41  ;;  %12096 = vmatpush2.bf16.msra.mxu1 %v17075_v42 }
 0x141   :  { %12056 = vmatprep.subr.bf16.mxu0 %v17080_v43  ;;  %12097 = vmatprep.subr.bf16.mxu1 %v17083_v44 }
 0x144   :  { %12057 = vmatpush2.bf16.msra.mxu0 %v17078_v45  ;;  %12098 = vmatpush2.bf16.msra.mxu1 %v17081_v46 }
 0x145   :  { %12058 = vmatprep.subr.bf16.mxu0 %v17086_v48  ;;  %12099 = vmatprep.subr.bf16.mxu1 %v17089_v50 }
 0x148   :  { %12059 = vmatpush2.bf16.msra.mxu0 %v17084_v49  ;;  %12100 = vmatpush2.bf16.msra.mxu1 %v17087_v51 }
 0x149   :  { %12060 = vmatprep.subr.bf16.mxu0 %v17092_v52  ;;  %12101 = vmatprep.subr.bf16.mxu1 %v17095_v54 }
 0x14c   :  { %12061 = vmatpush2.bf16.msra.mxu0 %v17090_v53  ;;  %12102 = vmatpush2.bf16.msra.mxu1 %v17093_v55 }
 0x14d   :  { %12062 = vmatprep.subr.bf16.mxu0 %v17098_v56  ;;  %12103 = vmatprep.subr.bf16.mxu1 %v17101_v58 }
 0x150   :  { %12063 = vmatpush2.bf16.msra.mxu0 %v17096_v57  ;;  %12104 = vmatpush2.bf16.msra.mxu1 %v17099_v59 }
 0x151   :  { %12064 = vmatprep.subr.bf16.mxu0 %v17104_v60  ;;  %12105 = vmatprep.subr.bf16.mxu1 %v17107_v62 }
 0x154   :  { %12065 = vmatpush2.bf16.msra.mxu0 %v17102_v61  ;;  %12106 = vmatpush2.bf16.msra.mxu1 %v17105_v63 }
 0x155   :  { %12066 = vmatprep.subr.bf16.mxu0 %v17110_v0  ;;  %12107 = vmatprep.subr.bf16.mxu1 %v17113_v2 }
 0x158   :  { %12067 = vmatpush2.bf16.msra.mxu0 %v17108_v1  ;;  %12108 = vmatpush2.bf16.msra.mxu1 %v17111_v4 }
 0x159   :  { %12118 = vmatprep.subr.bf16.mxu0 %v17116_v5  ;;  %12159 = vmatprep.subr.bf16.mxu1 %v17119_v6 }
 0x15b   :  { %v1319_v7 = vpop.f32.mrf.mxu0  ;;  %v1362_v8 = vpop.f32.mrf.mxu1 }
 0x15d   :  { %v1321_v9 = vpop.f32.mrf.mxu0  ;;  %v1364_v10 = vpop.f32.mrf.mxu1 }
 0x15e   :  { %v1543_v32 = vmax.f32 %v1319_v7, %v1364_v10 }
 0x15f   :  { %v1323_v11 = vpop.f32.mrf.mxu0  ;;  %v1366_v12 = vpop.f32.mrf.mxu1 }
 0x161   :  { %v1325_v13 = vpop.f32.mrf.mxu0  ;;  %v1368_v14 = vpop.f32.mrf.mxu1 }
 0x162   :  { %v1546_v55 = vmax.f32 %v1323_v11, %v1368_v14 }
 0x19b   :  { %v1405_v15 = vpop.f32.mrf.mxu0  ;;  %v1448_v16 = vpop.f32.mrf.mxu1 }
 0x19c   :  { %v1544_v29 = vmax.f32 %v1321_v9, %v1405_v15  ;;  %v17114_v9 = vld [vmem:[#allocation8 + $0xea0] ss:$48 sps:$4 sm:$0xff]  }
 0x19d   :  { %v1407_v18 = vpop.f32.mrf.mxu0  ;;  %v1450_v3 = vpop.f32.mrf.mxu1 }
 0x19e   :  { %v1545_v37 = vmax.f32 %v1362_v8, %v1407_v18  ;;  %v17122_v18 = vld [vmem:[#allocation8 + $0xe44] ss:$48 sps:$4 sm:$0xff]  }
 0x19f   :  { %v1409_v20 = vpop.f32.mrf.mxu0  ;;  %v1452_v21 = vpop.f32.mrf.mxu1 }
 0x1a0   :  { %v1547_v41 = vmax.f32 %v1325_v13, %v1409_v20 }
 0x1a1   :  { %v1411_v23 = vpop.f32.mrf.mxu0  ;;  %v1454_v24 = vpop.f32.mrf.mxu1 }
 0x1a2   :  { %v1548_v56 = vmax.f32 %v1366_v12, %v1411_v23 }
 0x1db   :  { %v1491_v27 = vpop.f32.mrf.mxu0  ;;  %v1534_v28 = vpop.f32.mrf.mxu1 }
 0x1dc   :  { %v1550_v30 = vmax.f32 %v1450_v3, %v1534_v28  ;;  %v17128_v28 = vld [vmem:[#allocation8 + $0xde4] ss:$48 sps:$4 sm:$0xff]  }
 0x1dd   :  { %v1493_v33 = vpop.f32.mrf.mxu0  ;;  %v1536_v35 = vpop.f32.mrf.mxu1 }
 0x1de   :  { %v1556_v38 = vmax.f32 %v1544_v29, %v1550_v30  ;;  %v1549_v39 = vmax.f32 %v1448_v16, %v1493_v33  ;;  %v1551_v40 = vmax.f32 %v1491_v27, %v1536_v35  ;;  %v17123_v29 = vld [vmem:[#allocation8 + $0x1440] ss:$48 sps:$4 sm:$0xff]   ;;  %v17137_v35 = vld [vmem:[#allocation8 + $0x1384] ss:$48 sps:$4 sm:$0xff]  }
 0x1df   :  { %v1495_v42 = vpop.f32.mrf.mxu0  ;;  %v1538_v43 = vpop.f32.mrf.mxu1  ;;  %v17126_v30 = vld [vmem:[#allocation8 + $0xde0] ss:$48 sps:$4 sm:$0xff]  }
 0x1e0   :  { %v1579_v44 = vadd.f32 %v1570_v31, %v1556_v38  ;;  %v1555_v45 = vmax.f32 %v1543_v32, %v1549_v39  ;;  %v1557_v46 = vmax.f32 %v1545_v37, %v1551_v40  ;;  %v1553_v48 = vmax.f32 %v1454_v24, %v1538_v43  ;;  %v17120_v24 = vld [vmem:[#allocation8 + $0xe40] ss:$48 sps:$4 sm:$0xff]   ;;  %v17134_v32 = vld [vmem:[#allocation8 + $0xd84] ss:$48 sps:$4 sm:$0xff]  }
 0x1e1   :  { %v1497_v49 = vpop.f32.mrf.mxu0  ;;  %v1540_v50 = vpop.f32.mrf.mxu1  ;;  %v17129_v33 = vld [vmem:[#allocation8 + $0x13e0] ss:$48 sps:$4 sm:$0xff]   ;;  %v17140_v37 = vld [vmem:[#allocation8 + $0xd24] ss:$48 sps:$4 sm:$0xff]  }
 0x1e2   :  { %v1585_v51 = vmax.f32 %v1579_v44, 0.0  ;;  %v1578_v52 = vadd.f32 %v1566_v34, %v1555_v45  ;;  %v1580_v53 = vadd.f32 %v1574_v36, %v1557_v46  ;;  %v1559_v54 = vmax.f32 %v1547_v41, %v1553_v48  ;;  %v17138_v38 = vld [vmem:[#allocation8 + $0xd20] ss:$48 sps:$4 sm:$0xff]   ;;  %v17143_v39 = vld [vmem:[#allocation8 + $0x1324] ss:$48 sps:$4 sm:$0xff]  }
 0x1e3   :  { %v1552_v57 = vmax.f32 %v1452_v21, %v1497_v49  ;;  %v1554_v58 = vmax.f32 %v1495_v42, %v1540_v50  ;;  %v17117_v21 = vld [vmem:[#allocation8 + $0x14a0] ss:$48 sps:$4 sm:$0xff]   ;;  %v17146_v41 = vld [vmem:[#allocation8 + $0xcc4] ss:$48 sps:$4 sm:$0xff]  }
 0x1e4   :  { %1591 = vst [vmem:[#allocation2 + $0x10] sm:$0xff] %v1585_v51  ;;  %v1584_v59 = vmax.f32 %v1578_v52, 0.0  ;;  %v1586_v60 = vmax.f32 %v1580_v53, 0.0  ;;  %v1582_v61 = vadd.f32 %v1570_v31, %v1559_v54  ;;  %v17131_v31 = vld [vmem:[#allocation8 + $0x13e4] ss:$48 sps:$4 sm:$0xff]  }
 0x1e5   :  { %v1558_v62 = vmax.f32 %v1546_v55, %v1552_v57  ;;  %v1560_v63 = vmax.f32 %v1548_v56, %v1554_v58  ;;  %v17141_v40 = vld [vmem:[#allocation8 + $0x1320] ss:$48 sps:$4 sm:$0xff]   ;;  %v17149_v43 = vld [vmem:[#allocation8 + $0x12c4] ss:$48 sps:$4 sm:$0xff]  }
 0x1e6   :  { %1590 = vst [vmem:[#allocation2 + $0x28] sm:$0xff] %v1584_v59  ;;  %1592 = vst [vmem:[#allocation2 + $0x8] sm:$0xff] %v1586_v60  ;;  %v1588_v0 = vmax.f32 %v1582_v61, 0.0  ;;  %v17144_v42 = vld [vmem:[#allocation8 + $0xcc0] ss:$48 sps:$4 sm:$0xff]  }
 0x1e7   :  { %v1581_v1 = vadd.f32 %v1566_v34, %v1558_v62  ;;  %v1583_v2 = vadd.f32 %v1574_v36, %v1560_v63  ;;  %v17132_v34 = vld [vmem:[#allocation8 + $0xd80] ss:$48 sps:$4 sm:$0xff]   ;;  %v17152_v45 = vld [vmem:[#allocation8 + $0xc64] ss:$48 sps:$4 sm:$0xff]  }
 0x1e8   :  { %1594 = vst [vmem:[#allocation2 + $0x18] sm:$0xf] %v1588_v0  ;;  %v17135_v36 = vld [vmem:[#allocation8 + $0x1380] ss:$48 sps:$4 sm:$0xff]   ;;  %v17155_v48 = vld [vmem:[#allocation8 + $0x1264] ss:$48 sps:$4 sm:$0xff]  }
 0x1e9   :  { %v1587_v4 = vmax.f32 %v1581_v1, 0.0  ;;  %v1589_v5 = vmax.f32 %v1583_v2, 0.0  ;;  %v17147_v44 = vld [vmem:[#allocation8 + $0x12c0] ss:$48 sps:$4 sm:$0xff]   ;;  %v17158_v50 = vld [vmem:[#allocation8 + $0xc04] ss:$48 sps:$4 sm:$0xff]  }
 0x1ea   :  { %v17150_v46 = vld [vmem:[#allocation8 + $0xc60] ss:$48 sps:$4 sm:$0xff]   ;;  %v17161_v52 = vld [vmem:[#allocation8 + $0x1204] ss:$48 sps:$4 sm:$0xff]  }
 0x1eb   :  { %1593 = vst [vmem:[#allocation2] sm:$0xf] %v1587_v4  ;;  %1595 = vst [vmem:[#allocation2 + $0x20] sm:$0xf] %v1589_v5  ;;  %v1597_v6 = vld [vmem:[#allocation2 + $0x10] sm:$0x3] }
 0x1ec   :  { %v1603_v7 = vld [vmem:[#allocation2 + $0x10] sm:$0x30]  ;;  %v19928_v8 = vpack.c.bf16 %v1597_v6, %v1597_v6  ;;  %v17164_v54 = vld [vmem:[#allocation8 + $0x11a4] ss:$48 sps:$4 sm:$0xff]  }
 0x1ed   :  { %v1596_v10 = vld [vmem:[#allocation2 + $0x28] sm:$0x3]  ;;  %v1599_v11 = vld [vmem:[#allocation2 + $0x28] sm:$0xc]  ;;  %v1627_v17 = vrot.slane %v1603_v7, 4 }
 0x1ee   :  { %v1601_v12 = vld [vmem:[#allocation2 + $0x8] sm:$0xc]  ;;  %12068 = vmatprep.mubr.bf16.mxu0 %v19928_v8  ;;  %v19931_v13 = vpack.c.bf16 %v1596_v10, %v1596_v10  ;;  %v1617_v14 = vrot.slane %v1599_v11, 2  ;;  %v1598_v16 = vld [vmem:[#allocation2 + $0x8] sm:$0x3] }
 0x1ef   :  { %v1619_v15 = vrot.slane %v1601_v12, 2  ;;  %v19938_v23 = vpack.c.bf16 %v1598_v16, %v1598_v16  ;;  %v19942_v27 = vpack.c.bf16 %v1627_v17, %v1627_v17  ;;  %v17153_v49 = vld [vmem:[#allocation8 + $0x1260] ss:$48 sps:$4 sm:$0xff]   ;;  %v17167_v56 = vld [vmem:[#allocation8 + $0x17a4] ss:$48 sps:$4 sm:$0xff]  }
 0x1f0   :  { %12069 = vmatmul.mubr.bf16.vlgmr.msra.gmra.mxu0 %v19931_v13  ;;  %v19934_v3 = vpack.c.bf16 %v1617_v14, %v1617_v14  ;;  %v17156_v51 = vld [vmem:[#allocation8 + $0xc00] ss:$48 sps:$4 sm:$0xff]   ;;  %v17170_v58 = vld [vmem:[#allocation8 + $0x1144] ss:$48 sps:$4 sm:$0xff]  }
 0x1f1   :  { %v19936_v20 = vpack.c.bf16 %v1619_v15, %v1619_v15  ;;  %12119 = vmatpush1.bf16.msra.mxu0 %v17114_v9  ;;  %v17159_v53 = vld [vmem:[#allocation8 + $0x1200] ss:$48 sps:$4 sm:$0xff]   ;;  %v17173_v60 = vld [vmem:[#allocation8 + $0x1744] ss:$48 sps:$4 sm:$0xff]  }
 0x1f2   :  { %12109 = vmatprep.mubr.bf16.mxu1 %v19934_v3  ;;  %12120 = vmatprep.subr.bf16.mxu0 %v17122_v18  ;;  %v17162_v55 = vld [vmem:[#allocation8 + $0x11a0] ss:$48 sps:$4 sm:$0xff]   ;;  %v17176_v62 = vld [vmem:[#allocation8 + $0x10e4] ss:$48 sps:$4 sm:$0xff]  }
 0x1f3   :  { %12150 = vmatprep.mubr.bf16.mxu0 %v19936_v20  ;;  %12110 = vmatmul.mubr.bf16.vlgmr.msra.gmra.mxu1 %v19938_v23  ;;  %v17165_v57 = vld [vmem:[#allocation8 + $0x17a0] ss:$48 sps:$4 sm:$0xff]   ;;  %v17179_v0 = vld [vmem:[#allocation8 + $0x16e4] ss:$48 sps:$4 sm:$0xff]  }
 0x1f4   :  { %12160 = vmatpush1.bf16.msra.mxu1 %v17117_v21  ;;  %12191 = vmatprep.mubr.bf16.mxu1 %v19942_v27  ;;  %v17168_v59 = vld [vmem:[#allocation8 + $0x1140] ss:$48 sps:$4 sm:$0xff]   ;;  %v17182_v2 = vld [vmem:[#allocation8 + $0x1084] ss:$48 sps:$4 sm:$0xff]  }
 0x1f5   :  { %12121 = vmatpush1.bf16.msra.mxu0 %v17120_v24  ;;  %12161 = vmatprep.subr.bf16.mxu1 %v17125_v47  ;;  %v17171_v61 = vld [vmem:[#allocation8 + $0x1740] ss:$48 sps:$4 sm:$0xff]   ;;  %v17185_v5 = vld [vmem:[#allocation8 + $0x1684] ss:$48 sps:$4 sm:$0xff]   ;;  %v1600_v47 = vld [vmem:[#allocation2 + $0x10] sm:$0xc] }
 0x1f6   :  { %12122 = vmatprep.subr.bf16.mxu0 %v17128_v28  ;;  %v17174_v63 = vld [vmem:[#allocation8 + $0x10e0] ss:$48 sps:$4 sm:$0xff]   ;;  %v17188_v7 = vld [vmem:[#allocation8 + $0x1024] ss:$48 sps:$4 sm:$0xff]  }
 0x1f7   :  { %v17177_v1 = vld [vmem:[#allocation8 + $0x16e0] ss:$48 sps:$4 sm:$0xff]   ;;  %v17191_v10 = vld [vmem:[#allocation8 + $0x1624] ss:$48 sps:$4 sm:$0xff]  }
 0x1f8   :  { %12162 = vmatpush1.bf16.msra.mxu1 %v17123_v29  ;;  %v17180_v4 = vld [vmem:[#allocation8 + $0x1080] ss:$48 sps:$4 sm:$0xff]   ;;  %v17194_v12 = vld [vmem:[#allocation8 + $0xfc4] ss:$48 sps:$4 sm:$0xff]   ;;  %v1605_v29 = vld [vmem:[#allocation2 + $0x28] sm:$0xc0] }
 0x1f9   :  { %12123 = vmatpush1.bf16.msra.mxu0 %v17126_v30  ;;  %12163 = vmatprep.subr.bf16.mxu1 %v17131_v31  ;;  %v17183_v6 = vld [vmem:[#allocation8 + $0x1680] ss:$48 sps:$4 sm:$0xff]   ;;  %v17197_v15 = vld [vmem:[#allocation8 + $0x15c4] ss:$48 sps:$4 sm:$0xff]  }
 0x1fa   :  { %12124 = vmatprep.subr.bf16.mxu0 %v17134_v32  ;;  %v17186_v9 = vld [vmem:[#allocation8 + $0x1020] ss:$48 sps:$4 sm:$0xff]   ;;  %v17200_v17 = vld [vmem:[#allocation8 + $0xf64] ss:$48 sps:$4 sm:$0xff]  }
 0x1fb   :  { %v17189_v11 = vld [vmem:[#allocation8 + $0x1620] ss:$48 sps:$4 sm:$0xff]   ;;  %v17203_v21 = vld [vmem:[#allocation8 + $0x1564] ss:$48 sps:$4 sm:$0xff]  }
 0x1fc   :  { %12164 = vmatpush1.bf16.msra.mxu1 %v17129_v33  ;;  %v17192_v14 = vld [vmem:[#allocation8 + $0xfc0] ss:$48 sps:$4 sm:$0xff]   ;;  %v17206_v24 = vld [vmem:[#allocation8 + $0xf04] ss:$48 sps:$4 sm:$0xff]   ;;  %v1602_v33 = vld [vmem:[#allocation2 + $0x28] sm:$0x30] }
 0x1fd   :  { %12125 = vmatpush1.bf16.msra.mxu0 %v17132_v34  ;;  %12165 = vmatprep.subr.bf16.mxu1 %v17137_v35  ;;  %v17195_v16 = vld [vmem:[#allocation8 + $0x15c0] ss:$48 sps:$4 sm:$0xff]   ;;  %v17209_v31 = vld [vmem:[#allocation8 + $0x1504] ss:$48 sps:$4 sm:$0xff]   ;;  %v1618_v35 = vrot.slane %v1600_v47, 2 }
 0x1fe   :  { %12126 = vmatprep.subr.bf16.mxu0 %v17140_v37  ;;  %v17198_v18 = vld [vmem:[#allocation8 + $0xf60] ss:$48 sps:$4 sm:$0xff]   ;;  %v17212_v32 = vld [vmem:[#allocation8 + $0x1aa4] ss:$48 sps:$4 sm:$0xff]  }
 0x1ff   :  { %v17201_v28 = vld [vmem:[#allocation8 + $0x1560] ss:$48 sps:$4 sm:$0xff]   ;;  %v17269_v47 = vld [vmem:[#allocation8 + $0x2344] ss:$48 sps:$4 sm:$0xff]  }
 0x200   :  { %12166 = vmatpush1.bf16.msra.mxu1 %v17135_v36  ;;  %v17204_v30 = vld [vmem:[#allocation8 + $0xf00] ss:$48 sps:$4 sm:$0xff]   ;;  %v1607_v36 = vld [vmem:[#allocation2 + $0x8] sm:$0xc0] }
 0x201   :  { %12127 = vmatpush1.bf16.msra.mxu0 %v17138_v38  ;;  %12167 = vmatprep.subr.bf16.mxu1 %v17143_v39  ;;  %v17207_v34 = vld [vmem:[#allocation8 + $0x1500] ss:$48 sps:$4 sm:$0xff]   ;;  %v1635_v38 = vrot.slane %v1605_v29, 6  ;;  %v1626_v39 = vrot.slane %v1602_v33, 4  ;;  %v17272_v29 = vld [vmem:[#allocation8 + $0x1ce4] ss:$48 sps:$4 sm:$0xff]  }
 0x202   :  { %12128 = vmatprep.subr.bf16.mxu0 %v17146_v41  ;;  %v17210_v37 = vld [vmem:[#allocation8 + $0x1aa0] ss:$48 sps:$4 sm:$0xff]   ;;  %v17218_v41 = vld [vmem:[#allocation8 + $0x1a44] ss:$48 sps:$4 sm:$0xff]  }
 0x203   :  { %v17278_v33 = vld [vmem:[#allocation8 + $0x1c84] ss:$48 sps:$4 sm:$0xff]  }
 0x204   :  { %12168 = vmatpush1.bf16.msra.mxu1 %v17141_v40  ;;  %v17215_v40 = vld [vmem:[#allocation8 + $0x20a4] ss:$48 sps:$4 sm:$0xff]  }
 0x205   :  { %12129 = vmatpush1.bf16.msra.mxu0 %v17144_v42  ;;  %12169 = vmatprep.subr.bf16.mxu1 %v17149_v43  ;;  %v19946_v42 = vpack.c.bf16 %v1618_v35, %v1618_v35  ;;  %v17213_v43 = vld [vmem:[#allocation8 + $0x20a0] ss:$48 sps:$4 sm:$0xff]   ;;  %v17281_v35 = vld [vmem:[#allocation8 + $0x2284] ss:$48 sps:$4 sm:$0xff]  }
 0x206   :  { %12130 = vmatprep.subr.bf16.mxu0 %v17152_v45  ;;  %v19948_v45 = vpack.c.bf16 %v1635_v38, %v1635_v38  ;;  %v17282_v38 = vld [vmem:[#allocation8 + $0x1c20] ss:$48 sps:$4 sm:$0xff]  }
 0x208   :  { %12170 = vmatpush1.bf16.msra.mxu1 %v17147_v44  ;;  %v1637_v44 = vrot.slane %v1607_v36, 6  ;;  %v17279_v36 = vld [vmem:[#allocation8 + $0x2280] ss:$48 sps:$4 sm:$0xff]  }
 0x209   :  { %12131 = vmatpush1.bf16.msra.mxu0 %v17150_v46  ;;  %12171 = vmatprep.subr.bf16.mxu1 %v17155_v48  ;;  %v17216_v46 = vld [vmem:[#allocation8 + $0x1a40] ss:$48 sps:$4 sm:$0xff]   ;;  %v17221_v48 = vld [vmem:[#allocation8 + $0x2044] ss:$48 sps:$4 sm:$0xff]  }
 0x20a   :  { %12132 = vmatprep.subr.bf16.mxu0 %v17158_v50  ;;  %v19952_v50 = vpack.c.bf16 %v1626_v39, %v1626_v39  ;;  %v17287_v39 = vld [vmem:[#allocation8 + $0x2224] ss:$48 sps:$4 sm:$0xff]  }
 0x20c   :  { %12172 = vmatpush1.bf16.msra.mxu1 %v17153_v49  ;;  %v17224_v49 = vld [vmem:[#allocation8 + $0x19e4] ss:$48 sps:$4 sm:$0xff]  }
 0x20d   :  { %12133 = vmatpush1.bf16.msra.mxu0 %v17156_v51  ;;  %12173 = vmatprep.subr.bf16.mxu1 %v17161_v52  ;;  %v19954_v51 = vpack.c.bf16 %v1637_v44, %v1637_v44  ;;  %v17219_v52 = vld [vmem:[#allocation8 + $0x2040] ss:$48 sps:$4 sm:$0xff]   ;;  %v17293_v44 = vld [vmem:[#allocation8 + $0x21c4] ss:$48 sps:$4 sm:$0xff]  }
 0x20e   :  { %12134 = vmatprep.subr.bf16.mxu0 %v17164_v54  ;;  %v17227_v54 = vld [vmem:[#allocation8 + $0x1fe4] ss:$48 sps:$4 sm:$0xff]  }
 0x210   :  { %12174 = vmatpush1.bf16.msra.mxu1 %v17159_v53  ;;  %v17222_v53 = vld [vmem:[#allocation8 + $0x19e0] ss:$48 sps:$4 sm:$0xff]  }
 0x211   :  { %12135 = vmatpush2.bf16.msra.mxu0 %v17162_v55  ;;  %12175 = vmatprep.subr.bf16.mxu1 %v17167_v56  ;;  %v17230_v55 = vld [vmem:[#allocation8 + $0x1984] ss:$48 sps:$4 sm:$0xff]   ;;  %v17225_v56 = vld [vmem:[#allocation8 + $0x1fe0] ss:$48 sps:$4 sm:$0xff]  }
 0x212   :  { %12136 = vmatprep.subr.bf16.mxu0 %v17170_v58  ;;  %v17233_v58 = vld [vmem:[#allocation8 + $0x1f84] ss:$48 sps:$4 sm:$0xff]  }
 0x214   :  { %12176 = vmatpush2.bf16.msra.mxu1 %v17165_v57  ;;  %v17228_v57 = vld [vmem:[#allocation8 + $0x1980] ss:$48 sps:$4 sm:$0xff]  }
 0x215   :  { %12137 = vmatpush2.bf16.msra.mxu0 %v17168_v59  ;;  %12177 = vmatprep.subr.bf16.mxu1 %v17173_v60  ;;  %v17231_v59 = vld [vmem:[#allocation8 + $0x1f80] ss:$48 sps:$4 sm:$0xff]   ;;  %v17236_v60 = vld [vmem:[#allocation8 + $0x1924] ss:$48 sps:$4 sm:$0xff]  }
 0x216   :  { %12138 = vmatprep.subr.bf16.mxu0 %v17176_v62  ;;  %v17239_v62 = vld [vmem:[#allocation8 + $0x1f24] ss:$48 sps:$4 sm:$0xff]  }
 0x218   :  { %12178 = vmatpush2.bf16.msra.mxu1 %v17171_v61  ;;  %v17234_v61 = vld [vmem:[#allocation8 + $0x1920] ss:$48 sps:$4 sm:$0xff]  }
 0x219   :  { %12139 = vmatpush2.bf16.msra.mxu0 %v17174_v63  ;;  %12179 = vmatprep.subr.bf16.mxu1 %v17179_v0  ;;  %v17237_v63 = vld [vmem:[#allocation8 + $0x1f20] ss:$48 sps:$4 sm:$0xff]   ;;  %v17242_v0 = vld [vmem:[#allocation8 + $0x18c4] ss:$48 sps:$4 sm:$0xff]  }
 0x21a   :  { %12140 = vmatprep.subr.bf16.mxu0 %v17182_v2  ;;  %v17245_v2 = vld [vmem:[#allocation8 + $0x1ec4] ss:$48 sps:$4 sm:$0xff]  }
 0x21c   :  { %12180 = vmatpush2.bf16.msra.mxu1 %v17177_v1  ;;  %v17240_v1 = vld [vmem:[#allocation8 + $0x18c0] ss:$48 sps:$4 sm:$0xff]  }
 0x21d   :  { %12141 = vmatpush2.bf16.msra.mxu0 %v17180_v4  ;;  %12181 = vmatprep.subr.bf16.mxu1 %v17185_v5  ;;  %v17243_v4 = vld [vmem:[#allocation8 + $0x1ec0] ss:$48 sps:$4 sm:$0xff]   ;;  %v17248_v5 = vld [vmem:[#allocation8 + $0x1864] ss:$48 sps:$4 sm:$0xff]  }
 0x21e   :  { %12142 = vmatprep.subr.bf16.mxu0 %v17188_v7  ;;  %v17251_v7 = vld [vmem:[#allocation8 + $0x1e64] ss:$48 sps:$4 sm:$0xff]  }
 0x220   :  { %12182 = vmatpush2.bf16.msra.mxu1 %v17183_v6  ;;  %v17246_v6 = vld [vmem:[#allocation8 + $0x1860] ss:$48 sps:$4 sm:$0xff]  }
 0x221   :  { %12143 = vmatpush2.bf16.msra.mxu0 %v17186_v9  ;;  %12183 = vmatprep.subr.bf16.mxu1 %v17191_v10  ;;  %v17249_v9 = vld [vmem:[#allocation8 + $0x1e60] ss:$48 sps:$4 sm:$0xff]   ;;  %v17254_v10 = vld [vmem:[#allocation8 + $0x1804] ss:$48 sps:$4 sm:$0xff]  }
 0x222   :  { %12144 = vmatprep.subr.bf16.mxu0 %v17194_v12  ;;  %v17257_v12 = vld [vmem:[#allocation8 + $0x1e04] ss:$48 sps:$4 sm:$0xff]  }
 0x224   :  { %12184 = vmatpush2.bf16.msra.mxu1 %v17189_v11  ;;  %v17252_v11 = vld [vmem:[#allocation8 + $0x1800] ss:$48 sps:$4 sm:$0xff]  }
 0x225   :  { %12145 = vmatpush2.bf16.msra.mxu0 %v17192_v14  ;;  %12185 = vmatprep.subr.bf16.mxu1 %v17197_v15  ;;  %v17255_v14 = vld [vmem:[#allocation8 + $0x1e00] ss:$48 sps:$4 sm:$0xff]   ;;  %v17260_v15 = vld [vmem:[#allocation8 + $0x1da4] ss:$48 sps:$4 sm:$0xff]  }
 0x226   :  { %12146 = vmatprep.subr.bf16.mxu0 %v17200_v17  ;;  %v17263_v17 = vld [vmem:[#allocation8 + $0x23a4] ss:$48 sps:$4 sm:$0xff]  }
 0x228   :  { %12186 = vmatpush2.bf16.msra.mxu1 %v17195_v16  ;;  %v17258_v16 = vld [vmem:[#allocation8 + $0x1da0] ss:$48 sps:$4 sm:$0xff]  }
 0x229   :  { %12147 = vmatpush2.bf16.msra.mxu0 %v17198_v18  ;;  %12187 = vmatprep.subr.bf16.mxu1 %v17203_v21  ;;  %v17261_v18 = vld [vmem:[#allocation8 + $0x23a0] ss:$48 sps:$4 sm:$0xff]   ;;  %v17266_v21 = vld [vmem:[#allocation8 + $0x1d44] ss:$48 sps:$4 sm:$0xff]  }
 0x22a   :  { %12148 = vmatprep.subr.bf16.mxu0 %v17206_v24  ;;  %v17264_v24 = vld [vmem:[#allocation8 + $0x1d40] ss:$48 sps:$4 sm:$0xff]  }
 0x22c   :  { %12188 = vmatpush2.bf16.msra.mxu1 %v17201_v28  ;;  %v17267_v28 = vld [vmem:[#allocation8 + $0x2340] ss:$48 sps:$4 sm:$0xff]  }
 0x22d   :  { %12149 = vmatpush2.bf16.msra.mxu0 %v17204_v30  ;;  %12189 = vmatprep.subr.bf16.mxu1 %v17209_v31  ;;  %v17270_v30 = vld [vmem:[#allocation8 + $0x1ce0] ss:$48 sps:$4 sm:$0xff]   ;;  %v17275_v31 = vld [vmem:[#allocation8 + $0x22e4] ss:$48 sps:$4 sm:$0xff]  }
 0x22e   :  { %12200 = vmatprep.subr.bf16.mxu0 %v17212_v32  ;;  %v17273_v32 = vld [vmem:[#allocation8 + $0x22e0] ss:$48 sps:$4 sm:$0xff]  }
 0x230   :  { %12151 = vmatmul.mubr.bf16.vlgmr.msra.gmra.mxu0 %v19946_v42  ;;  %12190 = vmatpush2.bf16.msra.mxu1 %v17207_v34  ;;  %v17276_v34 = vld [vmem:[#allocation8 + $0x1c80] ss:$48 sps:$4 sm:$0xff]  }
 0x231   :  { %12201 = vmatpush1.bf16.msra.mxu0 %v17210_v37  ;;  %12232 = vmatprep.mubr.bf16.mxu0 %v19948_v45  ;;  %v17284_v37 = vld [vmem:[#allocation8 + $0x1c24] ss:$48 sps:$4 sm:$0xff]  }
 0x232   :  { %12241 = vmatprep.subr.bf16.mxu1 %v17215_v40  ;;  %12202 = vmatprep.subr.bf16.mxu0 %v17218_v41  ;;  %v17285_v40 = vld [vmem:[#allocation8 + $0x2220] ss:$48 sps:$4 sm:$0xff]   ;;  %v17290_v41 = vld [vmem:[#allocation8 + $0x1bc4] ss:$48 sps:$4 sm:$0xff]  }
 0x233   :  { %12192 = vmatmul.mubr.bf16.vlgmr.msra.gmra.mxu1 %v19952_v50 }
 0x234   :  { %12242 = vmatpush1.bf16.msra.mxu1 %v17213_v43  ;;  %12273 = vmatprep.mubr.bf16.mxu1 %v19954_v51  ;;  %v17288_v43 = vld [vmem:[#allocation8 + $0x1bc0] ss:$48 sps:$4 sm:$0xff]  }
 0x235   :  { %12203 = vmatpush1.bf16.msra.mxu0 %v17216_v46  ;;  %12243 = vmatprep.subr.bf16.mxu1 %v17221_v48  ;;  %v17291_v46 = vld [vmem:[#allocation8 + $0x21c0] ss:$48 sps:$4 sm:$0xff]   ;;  %v17296_v48 = vld [vmem:[#allocation8 + $0x1b64] ss:$48 sps:$4 sm:$0xff]  }
 0x236   :  { %12204 = vmatprep.subr.bf16.mxu0 %v17224_v49  ;;  %v17294_v49 = vld [vmem:[#allocation8 + $0x1b60] ss:$48 sps:$4 sm:$0xff]  }
 0x238   :  { %12244 = vmatpush1.bf16.msra.mxu1 %v17219_v52  ;;  %v17299_v52 = vld [vmem:[#allocation8 + $0x2164] ss:$48 sps:$4 sm:$0xff]  }
 0x239   :  { %12205 = vmatpush1.bf16.msra.mxu0 %v17222_v53  ;;  %12245 = vmatprep.subr.bf16.mxu1 %v17227_v54  ;;  %v17302_v53 = vld [vmem:[#allocation8 + $0x1b04] ss:$48 sps:$4 sm:$0xff]   ;;  %v17297_v54 = vld [vmem:[#allocation8 + $0x2160] ss:$48 sps:$4 sm:$0xff]  }
 0x23a   :  { %12206 = vmatprep.subr.bf16.mxu0 %v17230_v55  ;;  %v1604_v55 = vld [vmem:[#allocation2 + $0x8] sm:$0x30] }
 0x23c   :  { %12246 = vmatpush1.bf16.msra.mxu1 %v17225_v56  ;;  %v17300_v56 = vld [vmem:[#allocation8 + $0x1b00] ss:$48 sps:$4 sm:$0xff]  }
 0x23d   :  { %12207 = vmatpush1.bf16.msra.mxu0 %v17228_v57  ;;  %12247 = vmatprep.subr.bf16.mxu1 %v17233_v58  ;;  %v17305_v57 = vld [vmem:[#allocation8 + $0x2104] ss:$48 sps:$4 sm:$0xff]  }
 0x23e   :  { %12208 = vmatprep.subr.bf16.mxu0 %v17236_v60  ;;  %v17308_v58 = vld [vmem:[#allocation8 + $0x26a4] ss:$48 sps:$4 sm:$0xff]   ;;  %v17303_v60 = vld [vmem:[#allocation8 + $0x2100] ss:$48 sps:$4 sm:$0xff]  }
 0x240   :  { %12248 = vmatpush1.bf16.msra.mxu1 %v17231_v59  ;;  %v1606_v59 = vld [vmem:[#allocation2 + $0x10] sm:$0xc0] }
 0x241   :  { %12209 = vmatpush1.bf16.msra.mxu0 %v17234_v61  ;;  %12249 = vmatprep.subr.bf16.mxu1 %v17239_v62  ;;  %v1628_v61 = vrot.slane %v1604_v55, 4  ;;  %v1609_v62 = vld [vmem:[#allocation2 + $0x18] sm:$0x3] }
 0x242   :  { %12210 = vmatprep.subr.bf16.mxu0 %v17242_v0  ;;  %v17306_v0 = vld [vmem:[#allocation8 + $0x26a0] ss:$48 sps:$4 sm:$0xff]   ;;  %v17362_v55 = vld [vmem:[#allocation8 + $0x2944] ss:$48 sps:$4 sm:$0xff]  }
 0x244   :  { %12250 = vmatpush1.bf16.msra.mxu1 %v17237_v63  ;;  %v1611_v63 = vld [vmem:[#allocation2] sm:$0xc] }
 0x245   :  { %12211 = vmatpush1.bf16.msra.mxu0 %v17240_v1  ;;  %12251 = vmatprep.subr.bf16.mxu1 %v17245_v2  ;;  %v1636_v1 = vrot.slane %v1606_v59, 6  ;;  %v17311_v2 = vld [vmem:[#allocation8 + $0x2ca4] ss:$48 sps:$4 sm:$0xff]  }
 0x246   :  { %12212 = vmatprep.subr.bf16.mxu0 %v17248_v5  ;;  %v19958_v5 = vpack.c.bf16 %v1628_v61, %v1628_v61  ;;  %v17368_v59 = vld [vmem:[#allocation8 + $0x28e4] ss:$48 sps:$4 sm:$0xff]  }
 0x247   :  { %v17371_v61 = vld [vmem:[#allocation8 + $0x2ee4] ss:$48 sps:$4 sm:$0xff]  }
 0x248   :  { %12252 = vmatpush1.bf16.msra.mxu1 %v17243_v4  ;;  %v17314_v4 = vld [vmem:[#allocation8 + $0x2644] ss:$48 sps:$4 sm:$0xff]  }
 0x249   :  { %12213 = vmatpush1.bf16.msra.mxu0 %v17246_v6  ;;  %12253 = vmatprep.subr.bf16.mxu1 %v17251_v7  ;;  %v17309_v6 = vld [vmem:[#allocation8 + $0x2ca0] ss:$48 sps:$4 sm:$0xff]   ;;  %v1644_v7 = vrot.slane %v1611_v63, 2  ;;  %v17374_v63 = vld [vmem:[#allocation8 + $0x2884] ss:$48 sps:$4 sm:$0xff]  }
 0x24a   :  { %12214 = vmatprep.subr.bf16.mxu0 %v17254_v10  ;;  %v17312_v10 = vld [vmem:[#allocation8 + $0x2640] ss:$48 sps:$4 sm:$0xff]  }
 0x24c   :  { %12254 = vmatpush1.bf16.msra.mxu1 %v17249_v9  ;;  %v19960_v9 = vpack.c.bf16 %v1609_v62, %v1609_v62  ;;  %v17369_v62 = vld [vmem:[#allocation8 + $0x2ee0] ss:$48 sps:$4 sm:$0xff]  }
 0x24d   :  { %12215 = vmatpush1.bf16.msra.mxu0 %v17252_v11  ;;  %12255 = vmatprep.subr.bf16.mxu1 %v17257_v12  ;;  %v19964_v11 = vpack.c.bf16 %v1636_v1, %v1636_v1  ;;  %v17317_v12 = vld [vmem:[#allocation8 + $0x2c44] ss:$48 sps:$4 sm:$0xff]  }
 0x24e   :  { %12216 = vmatprep.subr.bf16.mxu0 %v17260_v15  ;;  %v19966_v15 = vpack.c.bf16 %v1644_v7, %v1644_v7  ;;  %v17377_v1 = vld [vmem:[#allocation8 + $0x2e84] ss:$48 sps:$4 sm:$0xff]  }
 0x24f   :  { %v17383_v7 = vld [vmem:[#allocation8 + $0x2e24] ss:$48 sps:$4 sm:$0xff]  }
 0x250   :  { %12256 = vmatpush1.bf16.msra.mxu1 %v17255_v14  ;;  %v17320_v14 = vld [vmem:[#allocation8 + $0x25e4] ss:$48 sps:$4 sm:$0xff]  }
 0x251   :  { %12217 = vmatpush2.bf16.msra.mxu0 %v17258_v16  ;;  %12257 = vmatprep.subr.bf16.mxu1 %v17263_v17  ;;  %v17315_v16 = vld [vmem:[#allocation8 + $0x2c40] ss:$48 sps:$4 sm:$0xff]  }
 0x252   :  { %12218 = vmatprep.subr.bf16.mxu0 %v17266_v21  ;;  %v17318_v17 = vld [vmem:[#allocation8 + $0x25e0] ss:$48 sps:$4 sm:$0xff]   ;;  %v17326_v21 = vld [vmem:[#allocation8 + $0x2584] ss:$48 sps:$4 sm:$0xff]  }
 0x254   :  { %12258 = vmatpush2.bf16.msra.mxu1 %v17261_v18  ;;  %v17323_v18 = vld [vmem:[#allocation8 + $0x2be4] ss:$48 sps:$4 sm:$0xff]  }
 0x255   :  { %12219 = vmatpush2.bf16.msra.mxu0 %v17264_v24  ;;  %12259 = vmatprep.subr.bf16.mxu1 %v17269_v47  ;;  %v17321_v24 = vld [vmem:[#allocation8 + $0x2be0] ss:$48 sps:$4 sm:$0xff]  }
 0x256   :  { %12220 = vmatprep.subr.bf16.mxu0 %v17272_v29  ;;  %v17324_v47 = vld [vmem:[#allocation8 + $0x2580] ss:$48 sps:$4 sm:$0xff]  }
 0x257   :  { %v17327_v29 = vld [vmem:[#allocation8 + $0x2b80] ss:$48 sps:$4 sm:$0xff]  }
 0x258   :  { %12260 = vmatpush2.bf16.msra.mxu1 %v17267_v28  ;;  %v17329_v28 = vld [vmem:[#allocation8 + $0x2b84] ss:$48 sps:$4 sm:$0xff]  }
 0x259   :  { %12221 = vmatpush2.bf16.msra.mxu0 %v17270_v30  ;;  %12261 = vmatprep.subr.bf16.mxu1 %v17275_v31  ;;  %v17332_v30 = vld [vmem:[#allocation8 + $0x2524] ss:$48 sps:$4 sm:$0xff]   ;;  %v17330_v31 = vld [vmem:[#allocation8 + $0x2520] ss:$48 sps:$4 sm:$0xff]  }
 0x25a   :  { %12222 = vmatprep.subr.bf16.mxu0 %v17278_v33  ;;  %v17333_v33 = vld [vmem:[#allocation8 + $0x2b20] ss:$48 sps:$4 sm:$0xff]  }
 0x25c   :  { %12262 = vmatpush2.bf16.msra.mxu1 %v17273_v32  ;;  %v17335_v32 = vld [vmem:[#allocation8 + $0x2b24] ss:$48 sps:$4 sm:$0xff]  }
 0x25d   :  { %12223 = vmatpush2.bf16.msra.mxu0 %v17276_v34  ;;  %12263 = vmatprep.subr.bf16.mxu1 %v17281_v35  ;;  %v17338_v34 = vld [vmem:[#allocation8 + $0x24c4] ss:$48 sps:$4 sm:$0xff]   ;;  %v17336_v35 = vld [vmem:[#allocation8 + $0x24c0] ss:$48 sps:$4 sm:$0xff]  }
 0x25e   :  { %12224 = vmatprep.subr.bf16.mxu0 %v17284_v37  ;;  %v17339_v37 = vld [vmem:[#allocation8 + $0x2ac0] ss:$48 sps:$4 sm:$0xff]  }
 0x260   :  { %12264 = vmatpush2.bf16.msra.mxu1 %v17279_v36  ;;  %v17341_v36 = vld [vmem:[#allocation8 + $0x2ac4] ss:$48 sps:$4 sm:$0xff]  }
 0x261   :  { %12225 = vmatpush2.bf16.msra.mxu0 %v17282_v38  ;;  %12265 = vmatprep.subr.bf16.mxu1 %v17287_v39  ;;  %v17344_v38 = vld [vmem:[#allocation8 + $0x2464] ss:$48 sps:$4 sm:$0xff]   ;;  %v17342_v39 = vld [vmem:[#allocation8 + $0x2460] ss:$48 sps:$4 sm:$0xff]  }
 0x262   :  { %12226 = vmatprep.subr.bf16.mxu0 %v17290_v41  ;;  %v17345_v41 = vld [vmem:[#allocation8 + $0x2a60] ss:$48 sps:$4 sm:$0xff]  }
 0x264   :  { %12266 = vmatpush2.bf16.msra.mxu1 %v17285_v40  ;;  %v17347_v40 = vld [vmem:[#allocation8 + $0x2a64] ss:$48 sps:$4 sm:$0xff]  }
 0x265   :  { %12227 = vmatpush2.bf16.msra.mxu0 %v17288_v43  ;;  %12267 = vmatprep.subr.bf16.mxu1 %v17293_v44  ;;  %v17350_v43 = vld [vmem:[#allocation8 + $0x2404] ss:$48 sps:$4 sm:$0xff]   ;;  %v17348_v44 = vld [vmem:[#allocation8 + $0x2400] ss:$48 sps:$4 sm:$0xff]  }
 0x266   :  { %12228 = vmatprep.subr.bf16.mxu0 %v17296_v48  ;;  %v17351_v48 = vld [vmem:[#allocation8 + $0x2a00] ss:$48 sps:$4 sm:$0xff]  }
 0x268   :  { %12268 = vmatpush2.bf16.msra.mxu1 %v17291_v46  ;;  %v17353_v46 = vld [vmem:[#allocation8 + $0x2a04] ss:$48 sps:$4 sm:$0xff]  }
 0x269   :  { %12229 = vmatpush2.bf16.msra.mxu0 %v17294_v49  ;;  %12269 = vmatprep.subr.bf16.mxu1 %v17299_v52  ;;  %v17356_v49 = vld [vmem:[#allocation8 + $0x29a4] ss:$48 sps:$4 sm:$0xff]   ;;  %v17354_v52 = vld [vmem:[#allocation8 + $0x29a0] ss:$48 sps:$4 sm:$0xff]  }
 0x26a   :  { %12230 = vmatprep.subr.bf16.mxu0 %v17302_v53  ;;  %v17359_v53 = vld [vmem:[#allocation8 + $0x2fa4] ss:$48 sps:$4 sm:$0xff]  }
 0x26c   :  { %12270 = vmatpush2.bf16.msra.mxu1 %v17297_v54  ;;  %v17357_v54 = vld [vmem:[#allocation8 + $0x2fa0] ss:$48 sps:$4 sm:$0xff]  }
 0x26d   :  { %12231 = vmatpush2.bf16.msra.mxu0 %v17300_v56  ;;  %12271 = vmatprep.subr.bf16.mxu1 %v17305_v57  ;;  %v17360_v56 = vld [vmem:[#allocation8 + $0x2940] ss:$48 sps:$4 sm:$0xff]   ;;  %v17365_v57 = vld [vmem:[#allocation8 + $0x2f44] ss:$48 sps:$4 sm:$0xff]  }
 0x26e   :  { %12282 = vmatprep.subr.bf16.mxu0 %v17308_v58  ;;  %v17363_v58 = vld [vmem:[#allocation8 + $0x2f40] ss:$48 sps:$4 sm:$0xff]  }
 0x270   :  { %12233 = vmatmul.mubr.bf16.vlgmr.msra.gmra.mxu0 %v19958_v5  ;;  %12272 = vmatpush2.bf16.msra.mxu1 %v17303_v60  ;;  %v17366_v60 = vld [vmem:[#allocation8 + $0x28e0] ss:$48 sps:$4 sm:$0xff]  }
 0x271   :  { %12283 = vmatpush1.bf16.msra.mxu0 %v17306_v0  ;;  %12314 = vmatprep.mubr.bf16.mxu0 %v19960_v9  ;;  %v17372_v0 = vld [vmem:[#allocation8 + $0x2880] ss:$48 sps:$4 sm:$0xff]  }
 0x272   :  { %12323 = vmatprep.subr.bf16.mxu1 %v17311_v2  ;;  %12284 = vmatprep.subr.bf16.mxu0 %v17314_v4  ;;  %v17375_v2 = vld [vmem:[#allocation8 + $0x2e80] ss:$48 sps:$4 sm:$0xff]   ;;  %v17380_v4 = vld [vmem:[#allocation8 + $0x2824] ss:$48 sps:$4 sm:$0xff]  }
 0x273   :  { %12274 = vmatmul.mubr.bf16.vlgmr.msra.gmra.mxu1 %v19964_v11 }
 0x274   :  { %12324 = vmatpush1.bf16.msra.mxu1 %v17309_v6  ;;  %12355 = vmatprep.mubr.bf16.mxu1 %v19966_v15  ;;  %v17378_v6 = vld [vmem:[#allocation8 + $0x2820] ss:$48 sps:$4 sm:$0xff]  }
 0x275   :  { %12285 = vmatpush1.bf16.msra.mxu0 %v17312_v10  ;;  %12325 = vmatprep.subr.bf16.mxu1 %v17317_v12  ;;  %v17381_v10 = vld [vmem:[#allocation8 + $0x2e20] ss:$48 sps:$4 sm:$0xff]   ;;  %v17386_v12 = vld [vmem:[#allocation8 + $0x27c4] ss:$48 sps:$4 sm:$0xff]  }
 0x276   :  { %12286 = vmatprep.subr.bf16.mxu0 %v17320_v14  ;;  %v17384_v14 = vld [vmem:[#allocation8 + $0x27c0] ss:$48 sps:$4 sm:$0xff]  }
 0x278   :  { %12326 = vmatpush1.bf16.msra.mxu1 %v17315_v16  ;;  %v17389_v16 = vld [vmem:[#allocation8 + $0x2dc4] ss:$48 sps:$4 sm:$0xff]  }
 0x279   :  { %12287 = vmatpush1.bf16.msra.mxu0 %v17318_v17  ;;  %12327 = vmatprep.subr.bf16.mxu1 %v17323_v18  ;;  %v17387_v17 = vld [vmem:[#allocation8 + $0x2dc0] ss:$48 sps:$4 sm:$0xff]   ;;  %v17392_v18 = vld [vmem:[#allocation8 + $0x2764] ss:$48 sps:$4 sm:$0xff]  }
 0x27a   :  { %12288 = vmatprep.subr.bf16.mxu0 %v17326_v21  ;;  %v17390_v21 = vld [vmem:[#allocation8 + $0x2760] ss:$48 sps:$4 sm:$0xff]  }
 0x27c   :  { %12328 = vmatpush1.bf16.msra.mxu1 %v17321_v24  ;;  %v17395_v24 = vld [vmem:[#allocation8 + $0x2d64] ss:$48 sps:$4 sm:$0xff]  }
 0x27d   :  { %12289 = vmatpush1.bf16.msra.mxu0 %v17324_v47  ;;  %12329 = vmatprep.subr.bf16.mxu1 %v17329_v28  ;;  %v17393_v47 = vld [vmem:[#allocation8 + $0x2d60] ss:$48 sps:$4 sm:$0xff]   ;;  %v17398_v28 = vld [vmem:[#allocation8 + $0x2704] ss:$48 sps:$4 sm:$0xff]  }
 0x27e   :  { %12290 = vmatprep.subr.bf16.mxu0 %v17332_v30  ;;  %v17396_v30 = vld [vmem:[#allocation8 + $0x2700] ss:$48 sps:$4 sm:$0xff]  }
 0x280   :  { %12330 = vmatpush1.bf16.msra.mxu1 %v17327_v29  ;;  %v1613_v29 = vld [vmem:[#allocation2 + $0x20] sm:$0xc] }
 0x281   :  { %12291 = vmatpush1.bf16.msra.mxu0 %v17330_v31  ;;  %12331 = vmatprep.subr.bf16.mxu1 %v17335_v32  ;;  %v17401_v31 = vld [vmem:[#allocation8 + $0x2d04] ss:$48 sps:$4 sm:$0xff]   ;;  %v1608_v32 = vld [vmem:[#allocation2] sm:$0x3] }
 0x282   :  { %12292 = vmatprep.subr.bf16.mxu0 %v17338_v34  ;;  %v17404_v34 = vld [vmem:[#allocation8 + $0x32a4] ss:$48 sps:$4 sm:$0xff]  }
 0x284   :  { %12332 = vmatpush1.bf16.msra.mxu1 %v17333_v33  ;;  %v17399_v33 = vld [vmem:[#allocation8 + $0x2d00] ss:$48 sps:$4 sm:$0xff]  }
 0x285   :  { %12293 = vmatpush1.bf16.msra.mxu0 %v17336_v35  ;;  %12333 = vmatprep.subr.bf16.mxu1 %v17341_v36  ;;  %v17402_v35 = vld [vmem:[#allocation8 + $0x32a0] ss:$48 sps:$4 sm:$0xff]   ;;  %v1646_v36 = vrot.slane %v1613_v29, 2  ;;  %v17441_v29 = vld [vmem:[#allocation8 + $0x68] ss:$48 sps:$4 sm:$0xff]  }
 0x286   :  { %12294 = vmatprep.subr.bf16.mxu0 %v17344_v38  ;;  %v17407_v38 = vld [vmem:[#allocation8 + $0x2ac] ss:$48 sps:$4 sm:$0xff]  }
 0x288   :  { %12334 = vmatpush1.bf16.msra.mxu1 %v17339_v37  ;;  %v1610_v37 = vld [vmem:[#allocation2 + $0x20] sm:$0x3] }
 0x289   :  { %12295 = vmatpush1.bf16.msra.mxu0 %v17342_v39  ;;  %12335 = vmatprep.subr.bf16.mxu1 %v17347_v40  ;;  %v17410_v39 = vld [vmem:[#allocation8 + $0x3244] ss:$48 sps:$4 sm:$0xff]   ;;  %v19970_v40 = vpack.c.bf16 %v1608_v32, %v1608_v32  ;;  %v17449_v32 = vld [vmem:[#allocation8 + $0xc] ss:$48 sps:$4 sm:$0xff]  }
 0x28a   :  { %12296 = vmatprep.subr.bf16.mxu0 %v17350_v43  ;;  %v19972_v43 = vpack.c.bf16 %v1646_v36, %v1646_v36  ;;  %v17455_v36 = vld [vmem:[#allocation8 + $0x5ac] ss:$48 sps:$4 sm:$0xff]  }
 0x28c   :  { %12336 = vmatpush1.bf16.msra.mxu1 %v17345_v41  ;;  %v17405_v41 = vld [vmem:[#allocation8 + $0x2a8] ss:$48 sps:$4 sm:$0xff]  }
 0x28d   :  { %12297 = vmatpush1.bf16.msra.mxu0 %v17348_v44  ;;  %12337 = vmatprep.subr.bf16.mxu1 %v17353_v46  ;;  %v17408_v44 = vld [vmem:[#allocation8 + $0x3240] ss:$48 sps:$4 sm:$0xff]  }
 0x28e   :  { %12298 = vmatprep.subr.bf16.mxu0 %v17356_v49  ;;  %v17413_v49 = vld [vmem:[#allocation8 + $0x24c] ss:$48 sps:$4 sm:$0xff]  }
 0x290   :  { %12338 = vmatpush1.bf16.msra.mxu1 %v17351_v48  ;;  %v19976_v48 = vpack.c.bf16 %v1610_v37, %v1610_v37  ;;  %v17453_v37 = vld [vmem:[#allocation8 + $0x5a8] ss:$48 sps:$4 sm:$0xff]  }
 0x291   :  { %12299 = vmatpush2.bf16.msra.mxu0 %v17354_v52  ;;  %12339 = vmatprep.subr.bf16.mxu1 %v17359_v53  ;;  %v17416_v52 = vld [vmem:[#allocation8 + $0x31e4] ss:$48 sps:$4 sm:$0xff]  }
 0x292   :  { %12300 = vmatprep.subr.bf16.mxu0 %v17362_v55 }
 0x294   :  { %12340 = vmatpush2.bf16.msra.mxu1 %v17357_v54 }
 0x295   :  { %12301 = vmatpush2.bf16.msra.mxu0 %v17360_v56  ;;  %12341 = vmatprep.subr.bf16.mxu1 %v17365_v57  ;;  %v17411_v57 = vld [vmem:[#allocation8 + $0x248] ss:$48 sps:$4 sm:$0xff]  }
 0x296   :  { %12302 = vmatprep.subr.bf16.mxu0 %v17368_v59  ;;  %v17419_v59 = vld [vmem:[#allocation8 + $0x1ec] ss:$48 sps:$4 sm:$0xff]  }
 0x298   :  { %12342 = vmatpush2.bf16.msra.mxu1 %v17363_v58  ;;  %v17414_v58 = vld [vmem:[#allocation8 + $0x31e0] ss:$48 sps:$4 sm:$0xff]  }
 0x299   :  { %12303 = vmatpush2.bf16.msra.mxu0 %v17366_v60  ;;  %12343 = vmatprep.subr.bf16.mxu1 %v17371_v61  ;;  %v17422_v61 = vld [vmem:[#allocation8 + $0x3184] ss:$48 sps:$4 sm:$0xff]  }
 0x29a   :  { %12304 = vmatprep.subr.bf16.mxu0 %v17374_v63 }
 0x29c   :  { %12344 = vmatpush2.bf16.msra.mxu1 %v17369_v62 }
 0x29d   :  { %12305 = vmatpush2.bf16.msra.mxu0 %v17372_v0  ;;  %12345 = vmatprep.subr.bf16.mxu1 %v17377_v1  ;;  %v17417_v0 = vld [vmem:[#allocation8 + $0x1e8] ss:$48 sps:$4 sm:$0xff]  }
 0x29e   :  { %12306 = vmatprep.subr.bf16.mxu0 %v17380_v4  ;;  %v17425_v4 = vld [vmem:[#allocation8 + $0x18c] ss:$48 sps:$4 sm:$0xff]  }
 0x2a0   :  { %12346 = vmatpush2.bf16.msra.mxu1 %v17375_v2  ;;  %v17420_v2 = vld [vmem:[#allocation8 + $0x3180] ss:$48 sps:$4 sm:$0xff]  }
 0x2a1   :  { %12307 = vmatpush2.bf16.msra.mxu0 %v17378_v6  ;;  %12347 = vmatprep.subr.bf16.mxu1 %v17383_v7  ;;  %v17423_v6 = vld [vmem:[#allocation8 + $0x188] ss:$48 sps:$4 sm:$0xff]   ;;  %v17428_v7 = vld [vmem:[#allocation8 + $0x3124] ss:$48 sps:$4 sm:$0xff]  }
 0x2a2   :  { %12308 = vmatprep.subr.bf16.mxu0 %v17386_v12  ;;  %v17431_v12 = vld [vmem:[#allocation8 + $0x12c] ss:$48 sps:$4 sm:$0xff]  }
 0x2a4   :  { %12348 = vmatpush2.bf16.msra.mxu1 %v17381_v10  ;;  %v17426_v10 = vld [vmem:[#allocation8 + $0x3120] ss:$48 sps:$4 sm:$0xff]  }
 0x2a5   :  { %12309 = vmatpush2.bf16.msra.mxu0 %v17384_v14  ;;  %12349 = vmatprep.subr.bf16.mxu1 %v17389_v16  ;;  %v17429_v14 = vld [vmem:[#allocation8 + $0x128] ss:$48 sps:$4 sm:$0xff]   ;;  %v17434_v16 = vld [vmem:[#allocation8 + $0x30c4] ss:$48 sps:$4 sm:$0xff]  }
 0x2a6   :  { %12310 = vmatprep.subr.bf16.mxu0 %v17392_v18  ;;  %v17437_v18 = vld [vmem:[#allocation8 + $0xcc] ss:$48 sps:$4 sm:$0xff]  }
 0x2a8   :  { %12350 = vmatpush2.bf16.msra.mxu1 %v17387_v17  ;;  %v17432_v17 = vld [vmem:[#allocation8 + $0x30c0] ss:$48 sps:$4 sm:$0xff]  }
 0x2a9   :  { %12311 = vmatpush2.bf16.msra.mxu0 %v17390_v21  ;;  %12351 = vmatprep.subr.bf16.mxu1 %v17395_v24  ;;  %v17435_v21 = vld [vmem:[#allocation8 + $0xc8] ss:$48 sps:$4 sm:$0xff]   ;;  %v17440_v24 = vld [vmem:[#allocation8 + $0x3064] ss:$48 sps:$4 sm:$0xff]  }
 0x2aa   :  { %12312 = vmatprep.subr.bf16.mxu0 %v17398_v28  ;;  %v17443_v28 = vld [vmem:[#allocation8 + $0x6c] ss:$48 sps:$4 sm:$0xff]  }
 0x2ac   :  { %12352 = vmatpush2.bf16.msra.mxu1 %v17393_v47  ;;  %v17438_v47 = vld [vmem:[#allocation8 + $0x3060] ss:$48 sps:$4 sm:$0xff]  }
 0x2ad   :  { %12313 = vmatpush2.bf16.msra.mxu0 %v17396_v30  ;;  %12353 = vmatprep.subr.bf16.mxu1 %v17401_v31  ;;  %v17446_v30 = vld [vmem:[#allocation8 + $0x3004] ss:$48 sps:$4 sm:$0xff]   ;;  %v17444_v31 = vld [vmem:[#allocation8 + $0x3000] ss:$48 sps:$4 sm:$0xff]  }
 0x2ae   :  { %12364 = vmatprep.subr.bf16.mxu0 %v17404_v34  ;;  %v17452_v34 = vld [vmem:[#allocation8 + $0x35a4] ss:$48 sps:$4 sm:$0xff]  }
 0x2b0   :  { %12315 = vmatmul.mubr.bf16.vlgmr.msra.gmra.mxu0 %v19970_v40  ;;  %12354 = vmatpush2.bf16.msra.mxu1 %v17399_v33  ;;  %v12070_v46 = vpop.f32.mrf.mxu0  ;;  %v17447_v33 = vld [vmem:[#allocation8 + $0x8] ss:$48 sps:$4 sm:$0xff]  }
 0x2b1   :  { %12365 = vmatpush1.bf16.msra.mxu0 %v17402_v35  ;;  %12396 = vmatprep.mubr.bf16.mxu0 %v19972_v43  ;;  %v17450_v35 = vld [vmem:[#allocation8 + $0x35a0] ss:$48 sps:$4 sm:$0xff]  }
 0x2b2   :  { %v19978_v53 = vpop.f32.mrf.mxu0  ;;  %12405 = vmatprep.subr.bf16.mxu1 %v17407_v38  ;;  %12366 = vmatprep.subr.bf16.mxu0 %v17410_v39  ;;  %v17458_v38 = vld [vmem:[#allocation8 + $0x3544] ss:$48 sps:$4 sm:$0xff]   ;;  %v17456_v39 = vld [vmem:[#allocation8 + $0x3540] ss:$48 sps:$4 sm:$0xff]  }
 0x2b3   :  { %12356 = vmatmul.mubr.bf16.vlgmr.msra.gmra.mxu1 %v19976_v48  ;;  %v12111_v54 = vpop.f32.mrf.mxu1 }
 0x2b4   :  { %v19981_v55 = vadd.f32 %v12111_v54, %v12070_v46  ;;  %12406 = vmatpush1.bf16.msra.mxu1 %v17405_v41  ;;  %12437 = vmatprep.mubr.bf16.mxu1 %v19928_v8  ;;  %v12074_v56 = vpop.f32.mrf.mxu0  ;;  %v17461_v41 = vld [vmem:[#allocation8 + $0x54c] ss:$48 sps:$4 sm:$0xff]   ;;  %v17464_v46 = vld [vmem:[#allocation8 + $0x34e4] ss:$48 sps:$4 sm:$0xff]   ;;  %v17465_v54 = vld [vmem:[#allocation8 + $0x4e8] ss:$48 sps:$4 sm:$0xff]  }
 0x2b5   :  { %12367 = vmatpush1.bf16.msra.mxu0 %v17408_v44  ;;  %v19984_v60 = vpop.f32.mrf.mxu1  ;;  %12407 = vmatprep.subr.bf16.mxu1 %v17413_v49  ;;  %v17459_v44 = vld [vmem:[#allocation8 + $0x548] ss:$48 sps:$4 sm:$0xff]   ;;  %v17462_v49 = vld [vmem:[#allocation8 + $0x34e0] ss:$48 sps:$4 sm:$0xff]   ;;  %v17470_v56 = vld [vmem:[#allocation8 + $0x3484] ss:$48 sps:$4 sm:$0xff]  }
 0x2b6   :  { %v12075_v62 = vpop.f32.mrf.mxu0  ;;  %12368 = vmatprep.subr.bf16.mxu0 %v17416_v52  ;;  %v17467_v52 = vld [vmem:[#allocation8 + $0x4ec] ss:$48 sps:$4 sm:$0xff]  }
 0x2b7   :  { %v12115_v63 = vpop.f32.mrf.mxu1  ;;  %v17474_v62 = vld [vmem:[#allocation8 + $0x3420] ss:$48 sps:$4 sm:$0xff]  }
 0x2b8   :  { %12408 = vmatpush1.bf16.msra.mxu1 %v17411_v57  ;;  %v17468_v57 = vld [vmem:[#allocation8 + $0x3480] ss:$48 sps:$4 sm:$0xff]   ;;  %v17479_v63 = vld [vmem:[#allocation8 + $0x42c] ss:$48 sps:$4 sm:$0xff]  }
 0x2b9   :  { %12369 = vmatpush1.bf16.msra.mxu0 %v17414_v58  ;;  %v12116_v1 = vpop.f32.mrf.mxu1  ;;  %12409 = vmatprep.subr.bf16.mxu1 %v17419_v59  ;;  %v17473_v58 = vld [vmem:[#allocation8 + $0x48c] ss:$48 sps:$4 sm:$0xff]   ;;  %v17471_v59 = vld [vmem:[#allocation8 + $0x488] ss:$48 sps:$4 sm:$0xff]  }
 0x2ba   :  { %12370 = vmatprep.subr.bf16.mxu0 %v17422_v61  ;;  %v17476_v61 = vld [vmem:[#allocation8 + $0x3424] ss:$48 sps:$4 sm:$0xff]  }
 0x2bb   :  { %v17482_v1 = vld [vmem:[#allocation8 + $0x33c4] ss:$48 sps:$4 sm:$0xff]  }
 0x2bc   :  { %12410 = vmatpush1.bf16.msra.mxu1 %v17417_v0  ;;  %v17477_v0 = vld [vmem:[#allocation8 + $0x428] ss:$48 sps:$4 sm:$0xff]  }
 0x2bd   :  { %12371 = vmatpush1.bf16.msra.mxu0 %v17420_v2  ;;  %12411 = vmatprep.subr.bf16.mxu1 %v17425_v4  ;;  %v17480_v2 = vld [vmem:[#allocation8 + $0x33c0] ss:$48 sps:$4 sm:$0xff]   ;;  %v17485_v4 = vld [vmem:[#allocation8 + $0x3cc] ss:$48 sps:$4 sm:$0xff]  }
 0x2be   :  { %12372 = vmatprep.subr.bf16.mxu0 %v17428_v7  ;;  %v17488_v7 = vld [vmem:[#allocation8 + $0x3364] ss:$48 sps:$4 sm:$0xff]  }
 0x2c0   :  { %12412 = vmatpush1.bf16.msra.mxu1 %v17423_v6  ;;  %v17483_v6 = vld [vmem:[#allocation8 + $0x3c8] ss:$48 sps:$4 sm:$0xff]  }
 0x2c1   :  { %12373 = vmatpush1.bf16.msra.mxu0 %v17426_v10  ;;  %12413 = vmatprep.subr.bf16.mxu1 %v17431_v12  ;;  %v17486_v10 = vld [vmem:[#allocation8 + $0x3360] ss:$48 sps:$4 sm:$0xff]   ;;  %v17491_v12 = vld [vmem:[#allocation8 + $0x36c] ss:$48 sps:$4 sm:$0xff]  }
 0x2c2   :  { %12374 = vmatprep.subr.bf16.mxu0 %v17434_v16  ;;  %v17489_v16 = vld [vmem:[#allocation8 + $0x368] ss:$48 sps:$4 sm:$0xff]  }
 0x2c4   :  { %12414 = vmatpush1.bf16.msra.mxu1 %v17429_v14  ;;  %v1612_v14 = vld [vmem:[#allocation2 + $0x18] sm:$0xc] }
 0x2c5   :  { %12375 = vmatpush1.bf16.msra.mxu0 %v17432_v17  ;;  %12415 = vmatprep.subr.bf16.mxu1 %v17437_v18  ;;  %v17494_v17 = vld [vmem:[#allocation8 + $0x3304] ss:$48 sps:$4 sm:$0xff]   ;;  %v17492_v18 = vld [vmem:[#allocation8 + $0x3300] ss:$48 sps:$4 sm:$0xff]  }
 0x2c6   :  { %12376 = vmatprep.subr.bf16.mxu0 %v17440_v24  ;;  %v17495_v24 = vld [vmem:[#allocation8 + $0x308] ss:$48 sps:$4 sm:$0xff]  }
 0x2c8   :  { %12416 = vmatpush1.bf16.msra.mxu1 %v17435_v21  ;;  %v17497_v21 = vld [vmem:[#allocation8 + $0x30c] ss:$48 sps:$4 sm:$0xff]  }
 0x2c9   :  { %12377 = vmatpush1.bf16.msra.mxu0 %v17438_v47  ;;  %12417 = vmatprep.subr.bf16.mxu1 %v17443_v28  ;;  %v1645_v47 = vrot.slane %v1612_v14, 2  ;;  %v17500_v28 = vld [vmem:[#allocation8 + $0x8ac] ss:$48 sps:$4 sm:$0xff]  }
 0x2ca   :  { %12378 = vmatprep.subr.bf16.mxu0 %v17446_v30  ;;  %v17503_v30 = vld [vmem:[#allocation8 + $0xeac] ss:$48 sps:$4 sm:$0xff]  }
 0x2cb   :  { %v17533_v14 = vld [vmem:[#allocation8 + $0xccc] ss:$48 sps:$4 sm:$0xff]  }
 0x2cc   :  { %12418 = vmatpush1.bf16.msra.mxu1 %v17441_v29  ;;  %v17498_v29 = vld [vmem:[#allocation8 + $0x8a8] ss:$48 sps:$4 sm:$0xff]  }
 0x2cd   :  { %12379 = vmatpush1.bf16.msra.mxu0 %v17444_v31  ;;  %12419 = vmatprep.subr.bf16.mxu1 %v17449_v32  ;;  %v17506_v31 = vld [vmem:[#allocation8 + $0x84c] ss:$48 sps:$4 sm:$0xff]   ;;  %v19986_v32 = vpack.c.bf16 %v1645_v47, %v1645_v47 }
 0x2ce   :  { %12380 = vmatprep.subr.bf16.mxu0 %v17452_v34  ;;  %v17504_v34 = vld [vmem:[#allocation8 + $0x848] ss:$48 sps:$4 sm:$0xff]   ;;  %v17542_v47 = vld [vmem:[#allocation8 + $0x60c] ss:$48 sps:$4 sm:$0xff]  }
 0x2d0   :  { %12420 = vmatpush1.bf16.msra.mxu1 %v17447_v33  ;;  %v17501_v33 = vld [vmem:[#allocation8 + $0xea8] ss:$48 sps:$4 sm:$0xff]  }
 0x2d1   :  { %12381 = vmatpush2.bf16.msra.mxu0 %v17450_v35  ;;  %12421 = vmatprep.subr.bf16.mxu1 %v17455_v36  ;;  %v12114_v36 = vadd.f32 %v19984_v60, %v19978_v53  ;;  %v17507_v53 = vld [vmem:[#allocation8 + $0xe48] ss:$48 sps:$4 sm:$0xff]   ;;  %v17515_v60 = vld [vmem:[#allocation8 + $0xdec] ss:$48 sps:$4 sm:$0xff]  }
 0x2d2   :  { %12382 = vmatprep.subr.bf16.mxu0 %v17458_v38  ;;  %v17509_v38 = vld [vmem:[#allocation8 + $0xe4c] ss:$48 sps:$4 sm:$0xff]  }
 0x2d4   :  { %12422 = vmatpush2.bf16.msra.mxu1 %v17453_v37 }
 0x2d5   :  { %12383 = vmatpush2.bf16.msra.mxu0 %v17456_v39  ;;  %12423 = vmatprep.subr.bf16.mxu1 %v17461_v41  ;;  %v17512_v39 = vld [vmem:[#allocation8 + $0x7ec] ss:$48 sps:$4 sm:$0xff]  }
 0x2d6   :  { %12384 = vmatprep.subr.bf16.mxu0 %v17464_v46 }
 0x2d8   :  { %12424 = vmatpush2.bf16.msra.mxu1 %v17459_v44 }
 0x2d9   :  { %12385 = vmatpush2.bf16.msra.mxu0 %v17462_v49  ;;  %12425 = vmatprep.subr.bf16.mxu1 %v17467_v52 }
 0x2da   :  { %12386 = vmatprep.subr.bf16.mxu0 %v17470_v56  ;;  %v17518_v56 = vld [vmem:[#allocation8 + $0x78c] ss:$48 sps:$4 sm:$0xff]  }
 0x2dc   :  { %12426 = vmatpush2.bf16.msra.mxu1 %v17465_v54 }
 0x2dd   :  { %12387 = vmatpush2.bf16.msra.mxu0 %v17468_v57  ;;  %12427 = vmatprep.subr.bf16.mxu1 %v17473_v58 }
 0x2de   :  { %12388 = vmatprep.subr.bf16.mxu0 %v17476_v61  ;;  %v17513_v61 = vld [vmem:[#allocation8 + $0xde8] ss:$48 sps:$4 sm:$0xff]  }
 0x2e0   :  { %12428 = vmatpush2.bf16.msra.mxu1 %v17471_v59 }
 0x2e1   :  { %12389 = vmatpush2.bf16.msra.mxu0 %v17474_v62  ;;  %12429 = vmatprep.subr.bf16.mxu1 %v17479_v63  ;;  %v17516_v63 = vld [vmem:[#allocation8 + $0x788] ss:$48 sps:$4 sm:$0xff]  }
 0x2e2   :  { %12390 = vmatprep.subr.bf16.mxu0 %v17482_v1  ;;  %v17519_v1 = vld [vmem:[#allocation8 + $0xd88] ss:$48 sps:$4 sm:$0xff]  }
 0x2e4   :  { %12430 = vmatpush2.bf16.msra.mxu1 %v17477_v0  ;;  %v17521_v0 = vld [vmem:[#allocation8 + $0xd8c] ss:$48 sps:$4 sm:$0xff]  }
 0x2e5   :  { %12391 = vmatpush2.bf16.msra.mxu0 %v17480_v2  ;;  %12431 = vmatprep.subr.bf16.mxu1 %v17485_v4  ;;  %v17524_v2 = vld [vmem:[#allocation8 + $0x72c] ss:$48 sps:$4 sm:$0xff]   ;;  %v17522_v4 = vld [vmem:[#allocation8 + $0x728] ss:$48 sps:$4 sm:$0xff]  }
 0x2e6   :  { %12392 = vmatprep.subr.bf16.mxu0 %v17488_v7  ;;  %v17525_v7 = vld [vmem:[#allocation8 + $0xd28] ss:$48 sps:$4 sm:$0xff]  }
 0x2e8   :  { %12432 = vmatpush2.bf16.msra.mxu1 %v17483_v6  ;;  %v17527_v6 = vld [vmem:[#allocation8 + $0xd2c] ss:$48 sps:$4 sm:$0xff]  }
 0x2e9   :  { %12393 = vmatpush2.bf16.msra.mxu0 %v17486_v10  ;;  %12433 = vmatprep.subr.bf16.mxu1 %v17491_v12  ;;  %v17530_v10 = vld [vmem:[#allocation8 + $0x6cc] ss:$48 sps:$4 sm:$0xff]   ;;  %v17528_v12 = vld [vmem:[#allocation8 + $0x6c8] ss:$48 sps:$4 sm:$0xff]  }
 0x2ea   :  { %12394 = vmatprep.subr.bf16.mxu0 %v17494_v17  ;;  %v17536_v17 = vld [vmem:[#allocation8 + $0x66c] ss:$48 sps:$4 sm:$0xff]  }
 0x2ec   :  { %12434 = vmatpush2.bf16.msra.mxu1 %v17489_v16  ;;  %v17531_v16 = vld [vmem:[#allocation8 + $0xcc8] ss:$48 sps:$4 sm:$0xff]  }
 0x2ed   :  { %12395 = vmatpush2.bf16.msra.mxu0 %v17492_v18  ;;  %12435 = vmatprep.subr.bf16.mxu1 %v17497_v21  ;;  %v17534_v18 = vld [vmem:[#allocation8 + $0x668] ss:$48 sps:$4 sm:$0xff]   ;;  %v17539_v21 = vld [vmem:[#allocation8 + $0xc6c] ss:$48 sps:$4 sm:$0xff]  }
 0x2ee   :  { %12446 = vmatprep.subr.bf16.mxu0 %v17500_v28  ;;  %v17540_v28 = vld [vmem:[#allocation8 + $0x608] ss:$48 sps:$4 sm:$0xff]  }
 0x2f0   :  { %v12152_v35 = vpop.f32.mrf.mxu0  ;;  %12397 = vmatmul.mubr.bf16.vlgmr.msra.gmra.mxu0 %v19986_v32  ;;  %12436 = vmatpush2.bf16.msra.mxu1 %v17495_v24  ;;  %v17537_v24 = vld [vmem:[#allocation8 + $0xc68] ss:$48 sps:$4 sm:$0xff]  }
 0x2f1   :  { %v12153_v37 = vadd.f32 %v12152_v35, %v19981_v55  ;;  %12447 = vmatpush1.bf16.msra.mxu0 %v17498_v29  ;;  %12478 = vmatprep.mubr.bf16.mxu0 %v19934_v3  ;;  %v17510_v55 = vld [vmem:[#allocation8 + $0x7e8] ss:$48 sps:$4 sm:$0xff]   ;;  %v17545_v29 = vld [vmem:[#allocation8 + $0xc0c] ss:$48 sps:$4 sm:$0xff]  }
 0x2f2   :  { %v12154_v41 = vpop.f32.mrf.mxu0  ;;  %12487 = vmatprep.subr.bf16.mxu1 %v17503_v30  ;;  %12448 = vmatprep.subr.bf16.mxu0 %v17506_v31  ;;  %v17543_v30 = vld [vmem:[#allocation8 + $0xc08] ss:$48 sps:$4 sm:$0xff]   ;;  %v17548_v31 = vld [vmem:[#allocation8 + $0xbac] ss:$48 sps:$4 sm:$0xff]  }
 0x2f3   :  { %v12155_v44 = vadd.f32 %v12154_v41, %v12114_v36  ;;  %v12193_v46 = vpop.f32.mrf.mxu1  ;;  %12438 = vmatmul.mubr.bf16.vlgmr.msra.gmra.mxu1 %v19931_v13  ;;  %v17549_v35 = vld [vmem:[#allocation8 + $0x11a8] ss:$48 sps:$4 sm:$0xff]   ;;  %v17554_v36 = vld [vmem:[#allocation8 + $0xb4c] ss:$48 sps:$4 sm:$0xff]  }
 0x2f4   :  { %v19994_v49 = vadd.f32 %v12193_v46, %v12153_v37  ;;  %v12156_v52 = vpop.f32.mrf.mxu0  ;;  %12488 = vmatpush1.bf16.msra.mxu1 %v17501_v33  ;;  %12519 = vmatprep.mubr.bf16.mxu1 %v19936_v20  ;;  %v17546_v33 = vld [vmem:[#allocation8 + $0xba8] ss:$48 sps:$4 sm:$0xff]   ;;  %v17560_v41 = vld [vmem:[#allocation8 + $0xaec] ss:$48 sps:$4 sm:$0xff]  }
 0x2f5   :  { %v12195_v54 = vpop.f32.mrf.mxu1  ;;  %12449 = vmatpush1.bf16.msra.mxu0 %v17504_v34  ;;  %12489 = vmatprep.subr.bf16.mxu1 %v17509_v38  ;;  %v17551_v34 = vld [vmem:[#allocation8 + $0x11ac] ss:$48 sps:$4 sm:$0xff]   ;;  %v17552_v37 = vld [vmem:[#allocation8 + $0xb48] ss:$48 sps:$4 sm:$0xff]  }
 0x2f6   :  { %v19997_v57 = vadd.f32 %v12195_v54, %v12155_v44  ;;  %v12157_v58 = vpop.f32.mrf.mxu0  ;;  %12450 = vmatprep.subr.bf16.mxu0 %v17512_v39  ;;  %v17557_v38 = vld [vmem:[#allocation8 + $0x114c] ss:$48 sps:$4 sm:$0xff]   ;;  %v17555_v39 = vld [vmem:[#allocation8 + $0x1148] ss:$48 sps:$4 sm:$0xff]  }
 0x2f7   :  { %v12197_v59 = vpop.f32.mrf.mxu1  ;;  %v17558_v44 = vld [vmem:[#allocation8 + $0xae8] ss:$48 sps:$4 sm:$0xff]   ;;  %v17563_v46 = vld [vmem:[#allocation8 + $0x10ec] ss:$48 sps:$4 sm:$0xff]  }
 0x2f8   :  { %12490 = vmatpush1.bf16.msra.mxu1 %v17507_v53  ;;  %v17561_v52 = vld [vmem:[#allocation8 + $0x10e8] ss:$48 sps:$4 sm:$0xff]   ;;  %v17566_v53 = vld [vmem:[#allocation8 + $0xa8c] ss:$48 sps:$4 sm:$0xff]  }
 0x2f9   :  { %v12198_v62 = vpop.f32.mrf.mxu1  ;;  %12451 = vmatpush1.bf16.msra.mxu0 %v17510_v55  ;;  %12491 = vmatprep.subr.bf16.mxu1 %v17515_v60  ;;  %v17564_v55 = vld [vmem:[#allocation8 + $0xa88] ss:$48 sps:$4 sm:$0xff]   ;;  %v17569_v60 = vld [vmem:[#allocation8 + $0x108c] ss:$48 sps:$4 sm:$0xff]  }
 0x2fa   :  { %12452 = vmatprep.subr.bf16.mxu0 %v17518_v56  ;;  %v17567_v54 = vld [vmem:[#allocation8 + $0x1088] ss:$48 sps:$4 sm:$0xff]   ;;  %v17572_v56 = vld [vmem:[#allocation8 + $0xa2c] ss:$48 sps:$4 sm:$0xff]  }
 0x2fb   :  { %v17570_v58 = vld [vmem:[#allocation8 + $0xa28] ss:$48 sps:$4 sm:$0xff]   ;;  %v17575_v59 = vld [vmem:[#allocation8 + $0x102c] ss:$48 sps:$4 sm:$0xff]  }
 0x2fc   :  { %12492 = vmatpush1.bf16.msra.mxu1 %v17513_v61  ;;  %v17573_v61 = vld [vmem:[#allocation8 + $0x1028] ss:$48 sps:$4 sm:$0xff]   ;;  %v17578_v62 = vld [vmem:[#allocation8 + $0x9cc] ss:$48 sps:$4 sm:$0xff]  }
 0x2fd   :  { %12453 = vmatpush1.bf16.msra.mxu0 %v17516_v63  ;;  %12493 = vmatprep.subr.bf16.mxu1 %v17521_v0  ;;  %v17576_v63 = vld [vmem:[#allocation8 + $0x9c8] ss:$48 sps:$4 sm:$0xff]   ;;  %v17581_v0 = vld [vmem:[#allocation8 + $0xfcc] ss:$48 sps:$4 sm:$0xff]  }
 0x2fe   :  { %12454 = vmatprep.subr.bf16.mxu0 %v17524_v2  ;;  %v17584_v2 = vld [vmem:[#allocation8 + $0x96c] ss:$48 sps:$4 sm:$0xff]  }
 0x300   :  { %12494 = vmatpush1.bf16.msra.mxu1 %v17519_v1  ;;  %v17579_v1 = vld [vmem:[#allocation8 + $0xfc8] ss:$48 sps:$4 sm:$0xff]  }
 0x301   :  { %12455 = vmatpush1.bf16.msra.mxu0 %v17522_v4  ;;  %12495 = vmatprep.subr.bf16.mxu1 %v17527_v6  ;;  %v17582_v4 = vld [vmem:[#allocation8 + $0x968] ss:$48 sps:$4 sm:$0xff]   ;;  %v17587_v6 = vld [vmem:[#allocation8 + $0xf6c] ss:$48 sps:$4 sm:$0xff]  }
 0x302   :  { %12456 = vmatprep.subr.bf16.mxu0 %v17530_v10  ;;  %v17590_v10 = vld [vmem:[#allocation8 + $0x90c] ss:$48 sps:$4 sm:$0xff]  }
 0x304   :  { %12496 = vmatpush1.bf16.msra.mxu1 %v17525_v7  ;;  %v17585_v7 = vld [vmem:[#allocation8 + $0xf68] ss:$48 sps:$4 sm:$0xff]  }
 0x305   :  { %12457 = vmatpush1.bf16.msra.mxu0 %v17528_v12  ;;  %12497 = vmatprep.subr.bf16.mxu1 %v17533_v14  ;;  %v17588_v12 = vld [vmem:[#allocation8 + $0x908] ss:$48 sps:$4 sm:$0xff]   ;;  %v17593_v14 = vld [vmem:[#allocation8 + $0xf0c] ss:$48 sps:$4 sm:$0xff]  }
 0x306   :  { %12458 = vmatprep.subr.bf16.mxu0 %v17536_v17  ;;  %v17596_v17 = vld [vmem:[#allocation8 + $0x14ac] ss:$48 sps:$4 sm:$0xff]  }
 0x308   :  { %12498 = vmatpush1.bf16.msra.mxu1 %v17531_v16  ;;  %v17591_v16 = vld [vmem:[#allocation8 + $0xf08] ss:$48 sps:$4 sm:$0xff]  }
 0x309   :  { %12459 = vmatpush1.bf16.msra.mxu0 %v17534_v18  ;;  %12499 = vmatprep.subr.bf16.mxu1 %v17539_v21  ;;  %v17594_v18 = vld [vmem:[#allocation8 + $0x14a8] ss:$48 sps:$4 sm:$0xff]   ;;  %v17599_v21 = vld [vmem:[#allocation8 + $0x1aac] ss:$48 sps:$4 sm:$0xff]  }
 0x30a   :  { %12460 = vmatprep.subr.bf16.mxu0 %v17542_v47  ;;  %v17597_v47 = vld [vmem:[#allocation8 + $0x1aa8] ss:$48 sps:$4 sm:$0xff]  }
 0x30c   :  { %12500 = vmatpush1.bf16.msra.mxu1 %v17537_v24  ;;  %v17602_v24 = vld [vmem:[#allocation8 + $0x144c] ss:$48 sps:$4 sm:$0xff]  }
 0x30d   :  { %12461 = vmatpush1.bf16.msra.mxu0 %v17540_v28  ;;  %12501 = vmatprep.subr.bf16.mxu1 %v17545_v29  ;;  %v17600_v28 = vld [vmem:[#allocation8 + $0x1448] ss:$48 sps:$4 sm:$0xff]  }
 0x30e   :  { %12462 = vmatprep.subr.bf16.mxu0 %v17548_v31  ;;  %v17605_v31 = vld [vmem:[#allocation8 + $0x1a4c] ss:$48 sps:$4 sm:$0xff]  }
 0x310   :  { %12502 = vmatpush1.bf16.msra.mxu1 %v17543_v30 }
 0x311   :  { %12463 = vmatpush2.bf16.msra.mxu0 %v17546_v33  ;;  %12503 = vmatprep.subr.bf16.mxu1 %v17551_v34  ;;  %v17608_v33 = vld [vmem:[#allocation8 + $0x13ec] ss:$48 sps:$4 sm:$0xff]  }
 0x312   :  { %12464 = vmatprep.subr.bf16.mxu0 %v17554_v36 }
 0x314   :  { %12504 = vmatpush2.bf16.msra.mxu1 %v17549_v35 }
 0x315   :  { %12465 = vmatpush2.bf16.msra.mxu0 %v17552_v37  ;;  %12505 = vmatprep.subr.bf16.mxu1 %v17557_v38  ;;  %v17603_v37 = vld [vmem:[#allocation8 + $0x1a48] ss:$48 sps:$4 sm:$0xff]  }
 0x316   :  { %12466 = vmatprep.subr.bf16.mxu0 %v17560_v41  ;;  %v17606_v38 = vld [vmem:[#allocation8 + $0x13e8] ss:$48 sps:$4 sm:$0xff]  }
 0x318   :  { %12506 = vmatpush2.bf16.msra.mxu1 %v17555_v39 }
 0x319   :  { %12467 = vmatpush2.bf16.msra.mxu0 %v17558_v44  ;;  %12507 = vmatprep.subr.bf16.mxu1 %v17563_v46  ;;  %v17614_v44 = vld [vmem:[#allocation8 + $0x138c] ss:$48 sps:$4 sm:$0xff]  }
 0x31a   :  { %12468 = vmatprep.subr.bf16.mxu0 %v17566_v53 }
 0x31c   :  { %12508 = vmatpush2.bf16.msra.mxu1 %v17561_v52 }
 0x31d   :  { %12469 = vmatpush2.bf16.msra.mxu0 %v17564_v55  ;;  %12509 = vmatprep.subr.bf16.mxu1 %v17569_v60  ;;  %v17609_v55 = vld [vmem:[#allocation8 + $0x19e8] ss:$48 sps:$4 sm:$0xff]  }
 0x31e   :  { %12470 = vmatprep.subr.bf16.mxu0 %v17572_v56  ;;  %v17617_v56 = vld [vmem:[#allocation8 + $0x198c] ss:$48 sps:$4 sm:$0xff]  }
 0x320   :  { %12510 = vmatpush2.bf16.msra.mxu1 %v17567_v54  ;;  %v17612_v54 = vld [vmem:[#allocation8 + $0x1388] ss:$48 sps:$4 sm:$0xff]  }
 0x321   :  { %12471 = vmatpush2.bf16.msra.mxu0 %v17570_v58  ;;  %12511 = vmatprep.subr.bf16.mxu1 %v17575_v59  ;;  %v17615_v58 = vld [vmem:[#allocation8 + $0x1988] ss:$48 sps:$4 sm:$0xff]   ;;  %v17620_v59 = vld [vmem:[#allocation8 + $0x132c] ss:$48 sps:$4 sm:$0xff]  }
 0x322   :  { %12472 = vmatprep.subr.bf16.mxu0 %v17578_v62  ;;  %v17623_v62 = vld [vmem:[#allocation8 + $0x192c] ss:$48 sps:$4 sm:$0xff]  }
 0x324   :  { %12512 = vmatpush2.bf16.msra.mxu1 %v17573_v61  ;;  %v17618_v61 = vld [vmem:[#allocation8 + $0x1328] ss:$48 sps:$4 sm:$0xff]  }
 0x325   :  { %12473 = vmatpush2.bf16.msra.mxu0 %v17576_v63  ;;  %12513 = vmatprep.subr.bf16.mxu1 %v17581_v0  ;;  %v17621_v63 = vld [vmem:[#allocation8 + $0x1928] ss:$48 sps:$4 sm:$0xff]   ;;  %v17626_v0 = vld [vmem:[#allocation8 + $0x12cc] ss:$48 sps:$4 sm:$0xff]  }
 0x326   :  { %12474 = vmatprep.subr.bf16.mxu0 %v17584_v2  ;;  %v17629_v2 = vld [vmem:[#allocation8 + $0x18cc] ss:$48 sps:$4 sm:$0xff]  }
 0x328   :  { %12514 = vmatpush2.bf16.msra.mxu1 %v17579_v1  ;;  %v17624_v1 = vld [vmem:[#allocation8 + $0x12c8] ss:$48 sps:$4 sm:$0xff]  }
 0x329   :  { %12475 = vmatpush2.bf16.msra.mxu0 %v17582_v4  ;;  %12515 = vmatprep.subr.bf16.mxu1 %v17587_v6  ;;  %v17627_v4 = vld [vmem:[#allocation8 + $0x18c8] ss:$48 sps:$4 sm:$0xff]   ;;  %v17632_v6 = vld [vmem:[#allocation8 + $0x126c] ss:$48 sps:$4 sm:$0xff]  }
 0x32a   :  { %12476 = vmatprep.subr.bf16.mxu0 %v17590_v10  ;;  %v17635_v10 = vld [vmem:[#allocation8 + $0x186c] ss:$48 sps:$4 sm:$0xff]  }
 0x32c   :  { %12516 = vmatpush2.bf16.msra.mxu1 %v17585_v7  ;;  %v17630_v7 = vld [vmem:[#allocation8 + $0x1268] ss:$48 sps:$4 sm:$0xff]  }
 0x32d   :  { %12477 = vmatpush2.bf16.msra.mxu0 %v17588_v12  ;;  %12517 = vmatprep.subr.bf16.mxu1 %v17593_v14  ;;  %v17633_v12 = vld [vmem:[#allocation8 + $0x1868] ss:$48 sps:$4 sm:$0xff]   ;;  %v17638_v14 = vld [vmem:[#allocation8 + $0x120c] ss:$48 sps:$4 sm:$0xff]  }
 0x32e   :  { %12528 = vmatprep.subr.bf16.mxu0 %v17596_v17  ;;  %v17641_v17 = vld [vmem:[#allocation8 + $0x180c] ss:$48 sps:$4 sm:$0xff]  }
 0x330   :  { %v12234_v29 = vpop.f32.mrf.mxu0  ;;  %12479 = vmatmul.mubr.bf16.vlgmr.msra.gmra.mxu0 %v19938_v23  ;;  %12518 = vmatpush2.bf16.msra.mxu1 %v17591_v16  ;;  %v17636_v16 = vld [vmem:[#allocation8 + $0x1208] ss:$48 sps:$4 sm:$0xff]  }
 0x331   :  { %v12235_v30 = vadd.f32 %v12234_v29, %v19994_v49  ;;  %12529 = vmatpush1.bf16.msra.mxu0 %v17594_v18  ;;  %12560 = vmatprep.mubr.bf16.mxu0 %v19942_v27  ;;  %v17611_v49 = vld [vmem:[#allocation8 + $0x19ec] ss:$48 sps:$4 sm:$0xff]   ;;  %v17639_v18 = vld [vmem:[#allocation8 + $0x1808] ss:$48 sps:$4 sm:$0xff]  }
 0x332   :  { %v12236_v34 = vpop.f32.mrf.mxu0  ;;  %12569 = vmatprep.subr.bf16.mxu1 %v17599_v21  ;;  %12530 = vmatprep.subr.bf16.mxu0 %v17602_v24  ;;  %v17644_v21 = vld [vmem:[#allocation8 + $0x17ac] ss:$48 sps:$4 sm:$0xff]   ;;  %v17642_v24 = vld [vmem:[#allocation8 + $0x17a8] ss:$48 sps:$4 sm:$0xff]  }
 0x333   :  { %v12237_v35 = vadd.f32 %v12236_v34, %v19997_v57  ;;  %v12275_v36 = vpop.f32.mrf.mxu1  ;;  %12520 = vmatmul.mubr.bf16.vlgmr.msra.gmra.mxu1 %v19946_v42  ;;  %v17650_v29 = vld [vmem:[#allocation8 + $0x174c] ss:$48 sps:$4 sm:$0xff]  }
 0x334   :  { %v20004_v39 = vadd.f32 %v12275_v36, %v12235_v30  ;;  %v12238_v41 = vpop.f32.mrf.mxu0  ;;  %12570 = vmatpush1.bf16.msra.mxu1 %v17597_v47  ;;  %12601 = vmatprep.mubr.bf16.mxu1 %v19948_v45  ;;  %v17647_v47 = vld [vmem:[#allocation8 + $0x1dac] ss:$48 sps:$4 sm:$0xff]   ;;  %v17648_v30 = vld [vmem:[#allocation8 + $0x1748] ss:$48 sps:$4 sm:$0xff]  }
 0x335   :  { %v12277_v46 = vpop.f32.mrf.mxu1  ;;  %12531 = vmatpush1.bf16.msra.mxu0 %v17600_v28  ;;  %12571 = vmatprep.subr.bf16.mxu1 %v17605_v31  ;;  %v17645_v28 = vld [vmem:[#allocation8 + $0x1da8] ss:$48 sps:$4 sm:$0xff]   ;;  %v17653_v31 = vld [vmem:[#allocation8 + $0x1d4c] ss:$48 sps:$4 sm:$0xff]  }
 0x336   :  { %v20007_v52 = vadd.f32 %v12277_v46, %v12237_v35  ;;  %v12239_v53 = vpop.f32.mrf.mxu0  ;;  %12532 = vmatprep.subr.bf16.mxu0 %v17608_v33  ;;  %v17651_v33 = vld [vmem:[#allocation8 + $0x1d48] ss:$48 sps:$4 sm:$0xff]   ;;  %v17656_v34 = vld [vmem:[#allocation8 + $0x16ec] ss:$48 sps:$4 sm:$0xff]  }
 0x337   :  { %v12279_v57 = vpop.f32.mrf.mxu1  ;;  %v17654_v35 = vld [vmem:[#allocation8 + $0x16e8] ss:$48 sps:$4 sm:$0xff]   ;;  %v17659_v36 = vld [vmem:[#allocation8 + $0x1cec] ss:$48 sps:$4 sm:$0xff]  }
 0x338   :  { %12572 = vmatpush1.bf16.msra.mxu1 %v17603_v37  ;;  %v17657_v37 = vld [vmem:[#allocation8 + $0x1ce8] ss:$48 sps:$4 sm:$0xff]   ;;  %v17668_v46 = vld [vmem:[#allocation8 + $0x162c] ss:$48 sps:$4 sm:$0xff]  }
 0x339   :  { %v12280_v60 = vpop.f32.mrf.mxu1  ;;  %12533 = vmatpush1.bf16.msra.mxu0 %v17606_v38  ;;  %12573 = vmatprep.subr.bf16.mxu1 %v17611_v49  ;;  %v17662_v38 = vld [vmem:[#allocation8 + $0x168c] ss:$48 sps:$4 sm:$0xff]   ;;  %v17660_v41 = vld [vmem:[#allocation8 + $0x1688] ss:$48 sps:$4 sm:$0xff]  }
 0x33a   :  { %12534 = vmatprep.subr.bf16.mxu0 %v17614_v44  ;;  %v17665_v49 = vld [vmem:[#allocation8 + $0x1c8c] ss:$48 sps:$4 sm:$0xff]   ;;  %v17663_v44 = vld [vmem:[#allocation8 + $0x1c88] ss:$48 sps:$4 sm:$0xff]  }
 0x33b   :  { %v17666_v53 = vld [vmem:[#allocation8 + $0x1628] ss:$48 sps:$4 sm:$0xff]   ;;  %v17671_v57 = vld [vmem:[#allocation8 + $0x1c2c] ss:$48 sps:$4 sm:$0xff]  }
 0x33c   :  { %12574 = vmatpush1.bf16.msra.mxu1 %v17609_v55  ;;  %v17669_v55 = vld [vmem:[#allocation8 + $0x1c28] ss:$48 sps:$4 sm:$0xff]   ;;  %v17674_v60 = vld [vmem:[#allocation8 + $0x15cc] ss:$48 sps:$4 sm:$0xff]  }
 0x33d   :  { %12535 = vmatpush1.bf16.msra.mxu0 %v17612_v54  ;;  %12575 = vmatprep.subr.bf16.mxu1 %v17617_v56  ;;  %v17672_v54 = vld [vmem:[#allocation8 + $0x15c8] ss:$48 sps:$4 sm:$0xff]   ;;  %v17677_v56 = vld [vmem:[#allocation8 + $0x1bcc] ss:$48 sps:$4 sm:$0xff]  }
 0x33e   :  { %12536 = vmatprep.subr.bf16.mxu0 %v17620_v59  ;;  %v17680_v59 = vld [vmem:[#allocation8 + $0x156c] ss:$48 sps:$4 sm:$0xff]  }
 0x340   :  { %12576 = vmatpush1.bf16.msra.mxu1 %v17615_v58  ;;  %v17675_v58 = vld [vmem:[#allocation8 + $0x1bc8] ss:$48 sps:$4 sm:$0xff]  }
 0x341   :  { %12537 = vmatpush1.bf16.msra.mxu0 %v17618_v61  ;;  %12577 = vmatprep.subr.bf16.mxu1 %v17623_v62  ;;  %v17678_v61 = vld [vmem:[#allocation8 + $0x1568] ss:$48 sps:$4 sm:$0xff]   ;;  %v17683_v62 = vld [vmem:[#allocation8 + $0x1b6c] ss:$48 sps:$4 sm:$0xff]  }
 0x342   :  { %12538 = vmatprep.subr.bf16.mxu0 %v17626_v0  ;;  %v17686_v0 = vld [vmem:[#allocation8 + $0x150c] ss:$48 sps:$4 sm:$0xff]  }
 0x344   :  { %12578 = vmatpush1.bf16.msra.mxu1 %v17621_v63  ;;  %v17681_v63 = vld [vmem:[#allocation8 + $0x1b68] ss:$48 sps:$4 sm:$0xff]  }
 0x345   :  { %12539 = vmatpush1.bf16.msra.mxu0 %v17624_v1  ;;  %12579 = vmatprep.subr.bf16.mxu1 %v17629_v2  ;;  %v17684_v1 = vld [vmem:[#allocation8 + $0x1508] ss:$48 sps:$4 sm:$0xff]   ;;  %v17689_v2 = vld [vmem:[#allocation8 + $0x1b0c] ss:$48 sps:$4 sm:$0xff]  }
 0x346   :  { %12540 = vmatprep.subr.bf16.mxu0 %v17632_v6  ;;  %v17692_v6 = vld [vmem:[#allocation8 + $0x20ac] ss:$48 sps:$4 sm:$0xff]  }
 0x348   :  { %12580 = vmatpush1.bf16.msra.mxu1 %v17627_v4  ;;  %v17687_v4 = vld [vmem:[#allocation8 + $0x1b08] ss:$48 sps:$4 sm:$0xff]  }
 0x349   :  { %12541 = vmatpush1.bf16.msra.mxu0 %v17630_v7  ;;  %12581 = vmatprep.subr.bf16.mxu1 %v17635_v10  ;;  %v17690_v7 = vld [vmem:[#allocation8 + $0x20a8] ss:$48 sps:$4 sm:$0xff]   ;;  %v17695_v10 = vld [vmem:[#allocation8 + $0x26ac] ss:$48 sps:$4 sm:$0xff]  }
 0x34a   :  { %12542 = vmatprep.subr.bf16.mxu0 %v17638_v14  ;;  %v17693_v14 = vld [vmem:[#allocation8 + $0x26a8] ss:$48 sps:$4 sm:$0xff]  }
 0x34c   :  { %12582 = vmatpush1.bf16.msra.mxu1 %v17633_v12  ;;  %v17698_v12 = vld [vmem:[#allocation8 + $0x204c] ss:$48 sps:$4 sm:$0xff]  }
 0x34d   :  { %12543 = vmatpush1.bf16.msra.mxu0 %v17636_v16  ;;  %12583 = vmatprep.subr.bf16.mxu1 %v17641_v17  ;;  %v17696_v16 = vld [vmem:[#allocation8 + $0x2048] ss:$48 sps:$4 sm:$0xff]  }
 0x34e   :  { %12544 = vmatprep.subr.bf16.mxu0 %v17644_v21  ;;  %v17701_v21 = vld [vmem:[#allocation8 + $0x264c] ss:$48 sps:$4 sm:$0xff]  }
 0x350   :  { %12584 = vmatpush1.bf16.msra.mxu1 %v17639_v18 }
 0x351   :  { %12545 = vmatpush2.bf16.msra.mxu0 %v17642_v24  ;;  %12585 = vmatprep.subr.bf16.mxu1 %v17647_v47  ;;  %v17704_v24 = vld [vmem:[#allocation8 + $0x1fec] ss:$48 sps:$4 sm:$0xff]  }
 0x352   :  { %12546 = vmatprep.subr.bf16.mxu0 %v17650_v29 }
 0x354   :  { %12586 = vmatpush2.bf16.msra.mxu1 %v17645_v28 }
 0x355   :  { %12547 = vmatpush2.bf16.msra.mxu0 %v17648_v30  ;;  %12587 = vmatprep.subr.bf16.mxu1 %v17653_v31 }
 0x356   :  { %12548 = vmatprep.subr.bf16.mxu0 %v17656_v34  ;;  %v17707_v34 = vld [vmem:[#allocation8 + $0x25ec] ss:$48 sps:$4 sm:$0xff]  }
 0x358   :  { %12588 = vmatpush2.bf16.msra.mxu1 %v17651_v33  ;;  %v17702_v33 = vld [vmem:[#allocation8 + $0x1fe8] ss:$48 sps:$4 sm:$0xff]  }
 0x359   :  { %12549 = vmatpush2.bf16.msra.mxu0 %v17654_v35  ;;  %12589 = vmatprep.subr.bf16.mxu1 %v17659_v36  ;;  %v17710_v36 = vld [vmem:[#allocation8 + $0x1f8c] ss:$48 sps:$4 sm:$0xff]  }
 0x35a   :  { %12550 = vmatprep.subr.bf16.mxu0 %v17662_v38 }
 0x35c   :  { %12590 = vmatpush2.bf16.msra.mxu1 %v17657_v37 }
 0x35d   :  { %12551 = vmatpush2.bf16.msra.mxu0 %v17660_v41  ;;  %12591 = vmatprep.subr.bf16.mxu1 %v17665_v49  ;;  %v17705_v41 = vld [vmem:[#allocation8 + $0x25e8] ss:$48 sps:$4 sm:$0xff]  }
 0x35e   :  { %12552 = vmatprep.subr.bf16.mxu0 %v17668_v46  ;;  %v17713_v46 = vld [vmem:[#allocation8 + $0x258c] ss:$48 sps:$4 sm:$0xff]  }
 0x360   :  { %12592 = vmatpush2.bf16.msra.mxu1 %v17663_v44  ;;  %v17708_v44 = vld [vmem:[#allocation8 + $0x1f88] ss:$48 sps:$4 sm:$0xff]  }
 0x361   :  { %12553 = vmatpush2.bf16.msra.mxu0 %v17666_v53  ;;  %12593 = vmatprep.subr.bf16.mxu1 %v17671_v57  ;;  %v17711_v53 = vld [vmem:[#allocation8 + $0x2588] ss:$48 sps:$4 sm:$0xff]   ;;  %v17716_v57 = vld [vmem:[#allocation8 + $0x1f2c] ss:$48 sps:$4 sm:$0xff]  }
 0x362   :  { %12554 = vmatprep.subr.bf16.mxu0 %v17674_v60  ;;  %v17719_v60 = vld [vmem:[#allocation8 + $0x252c] ss:$48 sps:$4 sm:$0xff]  }
 0x364   :  { %12594 = vmatpush2.bf16.msra.mxu1 %v17669_v55  ;;  %v17714_v55 = vld [vmem:[#allocation8 + $0x1f28] ss:$48 sps:$4 sm:$0xff]  }
 0x365   :  { %12555 = vmatpush2.bf16.msra.mxu0 %v17672_v54  ;;  %12595 = vmatprep.subr.bf16.mxu1 %v17677_v56  ;;  %v17717_v54 = vld [vmem:[#allocation8 + $0x2528] ss:$48 sps:$4 sm:$0xff]   ;;  %v17722_v56 = vld [vmem:[#allocation8 + $0x1ecc] ss:$48 sps:$4 sm:$0xff]  }
 0x366   :  { %12556 = vmatprep.subr.bf16.mxu0 %v17680_v59  ;;  %v17725_v59 = vld [vmem:[#allocation8 + $0x24cc] ss:$48 sps:$4 sm:$0xff]  }
 0x368   :  { %12596 = vmatpush2.bf16.msra.mxu1 %v17675_v58  ;;  %v17720_v58 = vld [vmem:[#allocation8 + $0x1ec8] ss:$48 sps:$4 sm:$0xff]  }
 0x369   :  { %12557 = vmatpush2.bf16.msra.mxu0 %v17678_v61  ;;  %12597 = vmatprep.subr.bf16.mxu1 %v17683_v62  ;;  %v17723_v61 = vld [vmem:[#allocation8 + $0x24c8] ss:$48 sps:$4 sm:$0xff]   ;;  %v17728_v62 = vld [vmem:[#allocation8 + $0x1e6c] ss:$48 sps:$4 sm:$0xff]  }
 0x36a   :  { %12558 = vmatprep.subr.bf16.mxu0 %v17686_v0  ;;  %v17731_v0 = vld [vmem:[#allocation8 + $0x246c] ss:$48 sps:$4 sm:$0xff]  }
 0x36c   :  { %12598 = vmatpush2.bf16.msra.mxu1 %v17681_v63  ;;  %v17726_v63 = vld [vmem:[#allocation8 + $0x1e68] ss:$48 sps:$4 sm:$0xff]  }
 0x36d   :  { %12559 = vmatpush2.bf16.msra.mxu0 %v17684_v1  ;;  %12599 = vmatprep.subr.bf16.mxu1 %v17689_v2  ;;  %v17729_v1 = vld [vmem:[#allocation8 + $0x2468] ss:$48 sps:$4 sm:$0xff]   ;;  %v17734_v2 = vld [vmem:[#allocation8 + $0x1e0c] ss:$48 sps:$4 sm:$0xff]  }
 0x36e   :  { %12610 = vmatprep.subr.bf16.mxu0 %v17692_v6  ;;  %v17737_v6 = vld [vmem:[#allocation8 + $0x240c] ss:$48 sps:$4 sm:$0xff]  }
 0x370   :  { %v12316_v17 = vpop.f32.mrf.mxu0  ;;  %12561 = vmatmul.mubr.bf16.vlgmr.msra.gmra.mxu0 %v19952_v50  ;;  %12600 = vmatpush2.bf16.msra.mxu1 %v17687_v4  ;;  %v17732_v4 = vld [vmem:[#allocation8 + $0x1e08] ss:$48 sps:$4 sm:$0xff]  }
 0x371   :  { %v12317_v18 = vadd.f32 %v12316_v17, %v20004_v39  ;;  %12611 = vmatpush1.bf16.msra.mxu0 %v17690_v7  ;;  %12642 = vmatprep.mubr.bf16.mxu0 %v19954_v51  ;;  %v17699_v39 = vld [vmem:[#allocation8 + $0x2648] ss:$48 sps:$4 sm:$0xff]   ;;  %v17746_v17 = vld [vmem:[#allocation8 + $0x234c] ss:$48 sps:$4 sm:$0xff]  }
 0x372   :  { %v12318_v47 = vpop.f32.mrf.mxu0  ;;  %12651 = vmatprep.subr.bf16.mxu1 %v17695_v10  ;;  %12612 = vmatprep.subr.bf16.mxu0 %v17698_v12  ;;  %v17735_v7 = vld [vmem:[#allocation8 + $0x2408] ss:$48 sps:$4 sm:$0xff]   ;;  %v17740_v10 = vld [vmem:[#allocation8 + $0x23ac] ss:$48 sps:$4 sm:$0xff]  }
 0x373   :  { %v12319_v28 = vadd.f32 %v12318_v47, %v20007_v52  ;;  %v12357_v29 = vpop.f32.mrf.mxu1  ;;  %12602 = vmatmul.mubr.bf16.vlgmr.msra.gmra.mxu1 %v19958_v5  ;;  %v17738_v12 = vld [vmem:[#allocation8 + $0x23a8] ss:$48 sps:$4 sm:$0xff]   ;;  %v17752_v47 = vld [vmem:[#allocation8 + $0x22ec] ss:$48 sps:$4 sm:$0xff]  }
 0x374   :  { %v20014_v30 = vadd.f32 %v12357_v29, %v12317_v18  ;;  %v12320_v31 = vpop.f32.mrf.mxu0  ;;  %12652 = vmatpush1.bf16.msra.mxu1 %v17693_v14  ;;  %12683 = vmatprep.mubr.bf16.mxu1 %v19960_v9  ;;  %v17743_v14 = vld [vmem:[#allocation8 + $0x29ac] ss:$48 sps:$4 sm:$0xff]   ;;  %v17744_v18 = vld [vmem:[#allocation8 + $0x2348] ss:$48 sps:$4 sm:$0xff]  }
 0x375   :  { %v12359_v35 = vpop.f32.mrf.mxu1  ;;  %12613 = vmatpush1.bf16.msra.mxu0 %v17696_v16  ;;  %12653 = vmatprep.subr.bf16.mxu1 %v17701_v21  ;;  %v17741_v16 = vld [vmem:[#allocation8 + $0x29a8] ss:$48 sps:$4 sm:$0xff]   ;;  %v17749_v21 = vld [vmem:[#allocation8 + $0x294c] ss:$48 sps:$4 sm:$0xff]  }
 0x376   :  { %v20017_v37 = vadd.f32 %v12359_v35, %v12319_v28  ;;  %v12321_v38 = vpop.f32.mrf.mxu0  ;;  %12614 = vmatprep.subr.bf16.mxu0 %v17704_v24  ;;  %v17747_v24 = vld [vmem:[#allocation8 + $0x2948] ss:$48 sps:$4 sm:$0xff]   ;;  %v17755_v29 = vld [vmem:[#allocation8 + $0x28ec] ss:$48 sps:$4 sm:$0xff]  }
 0x377   :  { %v12361_v52 = vpop.f32.mrf.mxu1  ;;  %v17750_v28 = vld [vmem:[#allocation8 + $0x22e8] ss:$48 sps:$4 sm:$0xff]  }
 0x378   :  { %12654 = vmatpush1.bf16.msra.mxu1 %v17699_v39  ;;  %v17753_v31 = vld [vmem:[#allocation8 + $0x28e8] ss:$48 sps:$4 sm:$0xff]   ;;  %v17758_v39 = vld [vmem:[#allocation8 + $0x228c] ss:$48 sps:$4 sm:$0xff]  }
 0x379   :  { %v12362_v49 = vpop.f32.mrf.mxu1  ;;  %12615 = vmatpush1.bf16.msra.mxu0 %v17702_v33  ;;  %12655 = vmatprep.subr.bf16.mxu1 %v17707_v34  ;;  %v17756_v33 = vld [vmem:[#allocation8 + $0x2288] ss:$48 sps:$4 sm:$0xff]   ;;  %v17761_v34 = vld [vmem:[#allocation8 + $0x288c] ss:$48 sps:$4 sm:$0xff]  }
 0x37a   :  { %12616 = vmatprep.subr.bf16.mxu0 %v17710_v36  ;;  %v17759_v35 = vld [vmem:[#allocation8 + $0x2888] ss:$48 sps:$4 sm:$0xff]   ;;  %v17764_v36 = vld [vmem:[#allocation8 + $0x222c] ss:$48 sps:$4 sm:$0xff]  }
 0x37b   :  { %v17762_v38 = vld [vmem:[#allocation8 + $0x2228] ss:$48 sps:$4 sm:$0xff]   ;;  %v17767_v52 = vld [vmem:[#allocation8 + $0x282c] ss:$48 sps:$4 sm:$0xff]  }
 0x37c   :  { %12656 = vmatpush1.bf16.msra.mxu1 %v17705_v41  ;;  %v17765_v41 = vld [vmem:[#allocation8 + $0x2828] ss:$48 sps:$4 sm:$0xff]   ;;  %v17770_v49 = vld [vmem:[#allocation8 + $0x21cc] ss:$48 sps:$4 sm:$0xff]  }
 0x37d   :  { %12617 = vmatpush1.bf16.msra.mxu0 %v17708_v44  ;;  %12657 = vmatprep.subr.bf16.mxu1 %v17713_v46  ;;  %v17768_v44 = vld [vmem:[#allocation8 + $0x21c8] ss:$48 sps:$4 sm:$0xff]   ;;  %v17773_v46 = vld [vmem:[#allocation8 + $0x27cc] ss:$48 sps:$4 sm:$0xff]  }
 0x37e   :  { %12618 = vmatprep.subr.bf16.mxu0 %v17716_v57  ;;  %v17776_v57 = vld [vmem:[#allocation8 + $0x216c] ss:$48 sps:$4 sm:$0xff]  }
 0x380   :  { %12658 = vmatpush1.bf16.msra.mxu1 %v17711_v53  ;;  %v17771_v53 = vld [vmem:[#allocation8 + $0x27c8] ss:$48 sps:$4 sm:$0xff]  }
 0x381   :  { %12619 = vmatpush1.bf16.msra.mxu0 %v17714_v55  ;;  %12659 = vmatprep.subr.bf16.mxu1 %v17719_v60  ;;  %v17774_v55 = vld [vmem:[#allocation8 + $0x2168] ss:$48 sps:$4 sm:$0xff]   ;;  %v17779_v60 = vld [vmem:[#allocation8 + $0x276c] ss:$48 sps:$4 sm:$0xff]  }
 0x382   :  { %12620 = vmatprep.subr.bf16.mxu0 %v17722_v56  ;;  %v17782_v56 = vld [vmem:[#allocation8 + $0x210c] ss:$48 sps:$4 sm:$0xff]  }
 0x384   :  { %12660 = vmatpush1.bf16.msra.mxu1 %v17717_v54  ;;  %v17777_v54 = vld [vmem:[#allocation8 + $0x2768] ss:$48 sps:$4 sm:$0xff]  }
 0x385   :  { %12621 = vmatpush1.bf16.msra.mxu0 %v17720_v58  ;;  %12661 = vmatprep.subr.bf16.mxu1 %v17725_v59  ;;  %v17780_v58 = vld [vmem:[#allocation8 + $0x2108] ss:$48 sps:$4 sm:$0xff]   ;;  %v17785_v59 = vld [vmem:[#allocation8 + $0x270c] ss:$48 sps:$4 sm:$0xff]  }
 0x386   :  { %12622 = vmatprep.subr.bf16.mxu0 %v17728_v62  ;;  %v17788_v62 = vld [vmem:[#allocation8 + $0x2cac] ss:$48 sps:$4 sm:$0xff]  }
 0x388   :  { %12662 = vmatpush1.bf16.msra.mxu1 %v17723_v61  ;;  %v17783_v61 = vld [vmem:[#allocation8 + $0x2708] ss:$48 sps:$4 sm:$0xff]  }
 0x389   :  { %12623 = vmatpush1.bf16.msra.mxu0 %v17726_v63  ;;  %12663 = vmatprep.subr.bf16.mxu1 %v17731_v0  ;;  %v17786_v63 = vld [vmem:[#allocation8 + $0x2ca8] ss:$48 sps:$4 sm:$0xff]   ;;  %v17791_v0 = vld [vmem:[#allocation8 + $0x32ac] ss:$48 sps:$4 sm:$0xff]  }
 0x38a   :  { %12624 = vmatprep.subr.bf16.mxu0 %v17734_v2  ;;  %v17789_v2 = vld [vmem:[#allocation8 + $0x32a8] ss:$48 sps:$4 sm:$0xff]  }
 0x38c   :  { %12664 = vmatpush1.bf16.msra.mxu1 %v17729_v1  ;;  %v17794_v1 = vld [vmem:[#allocation8 + $0x2c4c] ss:$48 sps:$4 sm:$0xff]  }
 0x38d   :  { %12625 = vmatpush1.bf16.msra.mxu0 %v17732_v4  ;;  %12665 = vmatprep.subr.bf16.mxu1 %v17737_v6  ;;  %v17792_v4 = vld [vmem:[#allocation8 + $0x2c48] ss:$48 sps:$4 sm:$0xff]  }
 0x38e   :  { %12626 = vmatprep.subr.bf16.mxu0 %v17740_v10  ;;  %v17797_v10 = vld [vmem:[#allocation8 + $0x324c] ss:$48 sps:$4 sm:$0xff]  }
 0x390   :  { %12666 = vmatpush1.bf16.msra.mxu1 %v17735_v7 }
 0x391   :  { %12627 = vmatpush2.bf16.msra.mxu0 %v17738_v12  ;;  %12667 = vmatprep.subr.bf16.mxu1 %v17743_v14  ;;  %v17800_v12 = vld [vmem:[#allocation8 + $0x2bec] ss:$48 sps:$4 sm:$0xff]  }
 0x392   :  { %12628 = vmatprep.subr.bf16.mxu0 %v17746_v17 }
 0x394   :  { %12668 = vmatpush2.bf16.msra.mxu1 %v17741_v16 }
 0x395   :  { %12629 = vmatpush2.bf16.msra.mxu0 %v17744_v18  ;;  %12669 = vmatprep.subr.bf16.mxu1 %v17749_v21  ;;  %v17798_v21 = vld [vmem:[#allocation8 + $0x2be8] ss:$48 sps:$4 sm:$0xff]  }
 0x396   :  { %12630 = vmatprep.subr.bf16.mxu0 %v17752_v47 }
 0x398   :  { %12670 = vmatpush2.bf16.msra.mxu1 %v17747_v24  ;;  %v17803_v24 = vld [vmem:[#allocation8 + $0x31ec] ss:$48 sps:$4 sm:$0xff]  }
 0x399   :  { %12631 = vmatpush2.bf16.msra.mxu0 %v17750_v28  ;;  %12671 = vmatprep.subr.bf16.mxu1 %v17755_v29  ;;  %v17806_v28 = vld [vmem:[#allocation8 + $0x2b8c] ss:$48 sps:$4 sm:$0xff]  }
 0x39a   :  { %12632 = vmatprep.subr.bf16.mxu0 %v17758_v39 }
 0x39c   :  { %12672 = vmatpush2.bf16.msra.mxu1 %v17753_v31  ;;  %v17801_v31 = vld [vmem:[#allocation8 + $0x31e8] ss:$48 sps:$4 sm:$0xff]  }
 0x39d   :  { %12633 = vmatpush2.bf16.msra.mxu0 %v17756_v33  ;;  %12673 = vmatprep.subr.bf16.mxu1 %v17761_v34  ;;  %v17804_v33 = vld [vmem:[#allocation8 + $0x2b88] ss:$48 sps:$4 sm:$0xff]   ;;  %v17809_v34 = vld [vmem:[#allocation8 + $0x318c] ss:$48 sps:$4 sm:$0xff]  }
 0x39e   :  { %12634 = vmatprep.subr.bf16.mxu0 %v17764_v36  ;;  %v17812_v36 = vld [vmem:[#allocation8 + $0x2b2c] ss:$48 sps:$4 sm:$0xff]  }
 0x3a0   :  { %12674 = vmatpush2.bf16.msra.mxu1 %v17759_v35  ;;  %v17807_v35 = vld [vmem:[#allocation8 + $0x3188] ss:$48 sps:$4 sm:$0xff]  }
 0x3a1   :  { %12635 = vmatpush2.bf16.msra.mxu0 %v17762_v38  ;;  %12675 = vmatprep.subr.bf16.mxu1 %v17767_v52  ;;  %v17810_v38 = vld [vmem:[#allocation8 + $0x2b28] ss:$48 sps:$4 sm:$0xff]   ;;  %v17815_v52 = vld [vmem:[#allocation8 + $0x312c] ss:$48 sps:$4 sm:$0xff]  }
 0x3a2   :  { %12636 = vmatprep.subr.bf16.mxu0 %v17770_v49  ;;  %v17818_v49 = vld [vmem:[#allocation8 + $0x2acc] ss:$48 sps:$4 sm:$0xff]  }
 0x3a4   :  { %12676 = vmatpush2.bf16.msra.mxu1 %v17765_v41  ;;  %v17813_v41 = vld [vmem:[#allocation8 + $0x3128] ss:$48 sps:$4 sm:$0xff]  }
 0x3a5   :  { %12637 = vmatpush2.bf16.msra.mxu0 %v17768_v44  ;;  %12677 = vmatprep.subr.bf16.mxu1 %v17773_v46  ;;  %v17816_v44 = vld [vmem:[#allocation8 + $0x2ac8] ss:$48 sps:$4 sm:$0xff]   ;;  %v17821_v46 = vld [vmem:[#allocation8 + $0x30cc] ss:$48 sps:$4 sm:$0xff]  }
 0x3a6   :  { %12638 = vmatprep.subr.bf16.mxu0 %v17776_v57  ;;  %v17824_v57 = vld [vmem:[#allocation8 + $0x2a6c] ss:$48 sps:$4 sm:$0xff]  }
 0x3a8   :  { %12678 = vmatpush2.bf16.msra.mxu1 %v17771_v53  ;;  %v17819_v53 = vld [vmem:[#allocation8 + $0x30c8] ss:$48 sps:$4 sm:$0xff]  }
 0x3a9   :  { %12639 = vmatpush2.bf16.msra.mxu0 %v17774_v55  ;;  %12679 = vmatprep.subr.bf16.mxu1 %v17779_v60  ;;  %v17822_v55 = vld [vmem:[#allocation8 + $0x2a68] ss:$48 sps:$4 sm:$0xff]   ;;  %v17827_v60 = vld [vmem:[#allocation8 + $0x306c] ss:$48 sps:$4 sm:$0xff]  }
 0x3aa   :  { %12640 = vmatprep.subr.bf16.mxu0 %v17782_v56  ;;  %v17830_v56 = vld [vmem:[#allocation8 + $0x2a0c] ss:$48 sps:$4 sm:$0xff]  }
 0x3ac   :  { %12680 = vmatpush2.bf16.msra.mxu1 %v17777_v54  ;;  %v17825_v54 = vld [vmem:[#allocation8 + $0x3068] ss:$48 sps:$4 sm:$0xff]  }
 0x3ad   :  { %12641 = vmatpush2.bf16.msra.mxu0 %v17780_v58  ;;  %12681 = vmatprep.subr.bf16.mxu1 %v17785_v59  ;;  %v17828_v58 = vld [vmem:[#allocation8 + $0x2a08] ss:$48 sps:$4 sm:$0xff]   ;;  %v17833_v59 = vld [vmem:[#allocation8 + $0x300c] ss:$48 sps:$4 sm:$0xff]  }
 0x3ae   :  { %12692 = vmatprep.subr.bf16.mxu0 %v17788_v62  ;;  %v17836_v62 = vld [vmem:[#allocation8 + $0x2fac] ss:$48 sps:$4 sm:$0xff]  }
 0x3b0   :  { %v12398_v6 = vpop.f32.mrf.mxu0  ;;  %12643 = vmatmul.mubr.bf16.vlgmr.msra.gmra.mxu0 %v19964_v11  ;;  %12682 = vmatpush2.bf16.msra.mxu1 %v17783_v61  ;;  %v17831_v61 = vld [vmem:[#allocation8 + $0x3008] ss:$48 sps:$4 sm:$0xff]  }
 0x3b1   :  { %v20021_v7 = vadd.f32 %v12398_v6, %v20014_v30  ;;  %12693 = vmatpush1.bf16.msra.mxu0 %v17786_v63  ;;  %12724 = vmatprep.mubr.bf16.mxu0 %v19966_v15  ;;  %v17795_v30 = vld [vmem:[#allocation8 + $0x3248] ss:$48 sps:$4 sm:$0xff]   ;;  %v17845_v6 = vld [vmem:[#allocation8 + $0x354c] ss:$48 sps:$4 sm:$0xff]  }
 0x3b2   :  { %v12400_v14 = vpop.f32.mrf.mxu0  ;;  %12733 = vmatprep.subr.bf16.mxu1 %v17791_v0  ;;  %12694 = vmatprep.subr.bf16.mxu0 %v17794_v1  ;;  %v17834_v63 = vld [vmem:[#allocation8 + $0x2fa8] ss:$48 sps:$4 sm:$0xff]   ;;  %v17839_v0 = vld [vmem:[#allocation8 + $0x35ac] ss:$48 sps:$4 sm:$0xff]  }
 0x3b3   :  { %v20025_v16 = vadd.f32 %v12400_v14, %v20017_v37  ;;  %v20027_v17 = vpop.f32.mrf.mxu1  ;;  %12684 = vmatmul.mubr.bf16.vlgmr.msra.gmra.mxu1 %v19970_v40  ;;  %v17837_v1 = vld [vmem:[#allocation8 + $0x35a8] ss:$48 sps:$4 sm:$0xff]  }
 0x3b4   :  { %v12402_v18 = vpop.f32.mrf.mxu0  ;;  %12734 = vmatpush1.bf16.msra.mxu1 %v17789_v2  ;;  %12765 = vmatprep.mubr.bf16.mxu1 %v19972_v43  ;;  %v17842_v2 = vld [vmem:[#allocation8 + $0x2f4c] ss:$48 sps:$4 sm:$0xff]   ;;  %v17846_v14 = vld [vmem:[#allocation8 + $0x2ee8] ss:$48 sps:$4 sm:$0xff]  }
 0x3b5   :  { %v20031_v47 = vpop.f32.mrf.mxu1  ;;  %12695 = vmatpush1.bf16.msra.mxu0 %v17792_v4  ;;  %12735 = vmatprep.subr.bf16.mxu1 %v17797_v10  ;;  %v17840_v4 = vld [vmem:[#allocation8 + $0x2f48] ss:$48 sps:$4 sm:$0xff]   ;;  %v17851_v18 = vld [vmem:[#allocation8 + $0x34ec] ss:$48 sps:$4 sm:$0xff]  }
 0x3b6   :  { %v12403_v29 = vpop.f32.mrf.mxu0  ;;  %12696 = vmatprep.subr.bf16.mxu0 %v17800_v12  ;;  %v17843_v10 = vld [vmem:[#allocation8 + $0x3548] ss:$48 sps:$4 sm:$0xff]   ;;  %v17848_v12 = vld [vmem:[#allocation8 + $0x2eec] ss:$48 sps:$4 sm:$0xff]  }
 0x3b7   :  { %v12443_v37 = vpop.f32.mrf.mxu1  ;;  %v17855_v29 = vld [vmem:[#allocation8 + $0x3488] ss:$48 sps:$4 sm:$0xff]  }
 0x3b8   :  { %12736 = vmatpush1.bf16.msra.mxu1 %v17795_v30  ;;  %v17849_v30 = vld [vmem:[#allocation8 + $0x34e8] ss:$48 sps:$4 sm:$0xff]   ;;  %v17860_v37 = vld [vmem:[#allocation8 + $0x2e2c] ss:$48 sps:$4 sm:$0xff]  }
 0x3b9   :  { %v12444_v39 = vpop.f32.mrf.mxu1  ;;  %12697 = vmatpush1.bf16.msra.mxu0 %v17798_v21  ;;  %12737 = vmatprep.subr.bf16.mxu1 %v17803_v24  ;;  %v17854_v21 = vld [vmem:[#allocation8 + $0x2e8c] ss:$48 sps:$4 sm:$0xff]   ;;  %v17852_v24 = vld [vmem:[#allocation8 + $0x2e88] ss:$48 sps:$4 sm:$0xff]  }
 0x3ba   :  { %12698 = vmatprep.subr.bf16.mxu0 %v17806_v28  ;;  %v17857_v28 = vld [vmem:[#allocation8 + $0x348c] ss:$48 sps:$4 sm:$0xff]  }
 0x3bb   :  { %v17863_v39 = vld [vmem:[#allocation8 + $0x342c] ss:$48 sps:$4 sm:$0xff]  }
 0x3bc   :  { %12738 = vmatpush1.bf16.msra.mxu1 %v17801_v31  ;;  %v17858_v31 = vld [vmem:[#allocation8 + $0x2e28] ss:$48 sps:$4 sm:$0xff]  }
 0x3bd   :  { %12699 = vmatpush1.bf16.msra.mxu0 %v17804_v33  ;;  %12739 = vmatprep.subr.bf16.mxu1 %v17809_v34  ;;  %v17861_v33 = vld [vmem:[#allocation8 + $0x3428] ss:$48 sps:$4 sm:$0xff]   ;;  %v17866_v34 = vld [vmem:[#allocation8 + $0x2dcc] ss:$48 sps:$4 sm:$0xff]  }
 0x3be   :  { %12700 = vmatprep.subr.bf16.mxu0 %v17812_v36  ;;  %v17869_v36 = vld [vmem:[#allocation8 + $0x33cc] ss:$48 sps:$4 sm:$0xff]  }
 0x3c0   :  { %12740 = vmatpush1.bf16.msra.mxu1 %v17807_v35  ;;  %v17864_v35 = vld [vmem:[#allocation8 + $0x2dc8] ss:$48 sps:$4 sm:$0xff]  }
 0x3c1   :  { %12701 = vmatpush1.bf16.msra.mxu0 %v17810_v38  ;;  %12741 = vmatprep.subr.bf16.mxu1 %v17815_v52  ;;  %v17867_v38 = vld [vmem:[#allocation8 + $0x33c8] ss:$48 sps:$4 sm:$0xff]   ;;  %v17872_v52 = vld [vmem:[#allocation8 + $0x2d6c] ss:$48 sps:$4 sm:$0xff]  }
 0x3c2   :  { %12702 = vmatprep.subr.bf16.mxu0 %v17818_v49  ;;  %v17875_v49 = vld [vmem:[#allocation8 + $0x336c] ss:$48 sps:$4 sm:$0xff]  }
 0x3c4   :  { %12742 = vmatpush1.bf16.msra.mxu1 %v17813_v41  ;;  %v17870_v41 = vld [vmem:[#allocation8 + $0x2d68] ss:$48 sps:$4 sm:$0xff]  }
 0x3c5   :  { %12703 = vmatpush1.bf16.msra.mxu0 %v17816_v44  ;;  %12743 = vmatprep.subr.bf16.mxu1 %v17821_v46  ;;  %v17873_v44 = vld [vmem:[#allocation8 + $0x3368] ss:$48 sps:$4 sm:$0xff]   ;;  %v17878_v46 = vld [vmem:[#allocation8 + $0x2d0c] ss:$48 sps:$4 sm:$0xff]  }
 0x3c6   :  { %12704 = vmatprep.subr.bf16.mxu0 %v17824_v57  ;;  %v17881_v57 = vld [vmem:[#allocation8 + $0x330c] ss:$48 sps:$4 sm:$0xff]  }
 0x3c8   :  { %12744 = vmatpush1.bf16.msra.mxu1 %v17819_v53  ;;  %v17876_v53 = vld [vmem:[#allocation8 + $0x2d08] ss:$48 sps:$4 sm:$0xff]  }
 0x3c9   :  { %12705 = vmatpush1.bf16.msra.mxu0 %v17822_v55  ;;  %12745 = vmatprep.subr.bf16.mxu1 %v17827_v60  ;;  %v17879_v55 = vld [vmem:[#allocation8 + $0x3308] ss:$48 sps:$4 sm:$0xff]   ;;  %v17884_v60 = vld [vmem:[#allocation8 + $0x2b4] ss:$48 sps:$4 sm:$0xff]  }
 0x3ca   :  { %12706 = vmatprep.subr.bf16.mxu0 %v17830_v56  ;;  %v17887_v56 = vld [vmem:[#allocation8 + $0x8b4] ss:$48 sps:$4 sm:$0xff]  }
 0x3cc   :  { %12746 = vmatpush1.bf16.msra.mxu1 %v17825_v54  ;;  %v17882_v54 = vld [vmem:[#allocation8 + $0x2b0] ss:$48 sps:$4 sm:$0xff]  }
 0x3cd   :  { %12707 = vmatpush1.bf16.msra.mxu0 %v17828_v58  ;;  %12747 = vmatprep.subr.bf16.mxu1 %v17833_v59  ;;  %v17890_v58 = vld [vmem:[#allocation8 + $0x254] ss:$48 sps:$4 sm:$0xff]   ;;  %v17885_v59 = vld [vmem:[#allocation8 + $0x8b0] ss:$48 sps:$4 sm:$0xff]  }
 0x3ce   :  { %12708 = vmatprep.subr.bf16.mxu0 %v17836_v62 }
 0x3d0   :  { %12748 = vmatpush1.bf16.msra.mxu1 %v17831_v61  ;;  %v17888_v61 = vld [vmem:[#allocation8 + $0x250] ss:$48 sps:$4 sm:$0xff]  }
 0x3d1   :  { %12709 = vmatpush2.bf16.msra.mxu0 %v17834_v63  ;;  %12749 = vmatprep.subr.bf16.mxu1 %v17839_v0  ;;  %v17893_v0 = vld [vmem:[#allocation8 + $0x854] ss:$48 sps:$4 sm:$0xff]  }
 0x3d2   :  { %12710 = vmatprep.subr.bf16.mxu0 %v17842_v2 }
 0x3d4   :  { %12750 = vmatpush2.bf16.msra.mxu1 %v17837_v1  ;;  %v17896_v1 = vld [vmem:[#allocation8 + $0x1f4] ss:$48 sps:$4 sm:$0xff]  }
 0x3d5   :  { %12711 = vmatpush2.bf16.msra.mxu0 %v17840_v4  ;;  %12751 = vmatprep.subr.bf16.mxu1 %v17845_v6 }
 0x3d6   :  { %12712 = vmatprep.subr.bf16.mxu0 %v17848_v12 }
 0x3d8   :  { %12752 = vmatpush2.bf16.msra.mxu1 %v17843_v10 }
 0x3d9   :  { %12713 = vmatpush2.bf16.msra.mxu0 %v17846_v14  ;;  %12753 = vmatprep.subr.bf16.mxu1 %v17851_v18  ;;  %v17894_v14 = vld [vmem:[#allocation8 + $0x1f0] ss:$48 sps:$4 sm:$0xff]   ;;  %v17899_v18 = vld [vmem:[#allocation8 + $0x7f4] ss:$48 sps:$4 sm:$0xff]  }
 0x3da   :  { %12714 = vmatprep.subr.bf16.mxu0 %v17854_v21  ;;  %v17902_v21 = vld [vmem:[#allocation8 + $0x194] ss:$48 sps:$4 sm:$0xff]  }
 0x3dc   :  { %12754 = vmatpush2.bf16.msra.mxu1 %v17849_v30 }
 0x3dd   :  { %12715 = vmatpush2.bf16.msra.mxu0 %v17852_v24  ;;  %12755 = vmatprep.subr.bf16.mxu1 %v17857_v28 }
 0x3de   :  { %12716 = vmatprep.subr.bf16.mxu0 %v17860_v37 }
 0x3e0   :  { %12756 = vmatpush2.bf16.msra.mxu1 %v17855_v29  ;;  %v17897_v29 = vld [vmem:[#allocation8 + $0x7f0] ss:$48 sps:$4 sm:$0xff]  }
 0x3e1   :  { %12717 = vmatpush2.bf16.msra.mxu0 %v17858_v31  ;;  %12757 = vmatprep.subr.bf16.mxu1 %v17863_v39  ;;  %v17900_v31 = vld [vmem:[#allocation8 + $0x190] ss:$48 sps:$4 sm:$0xff]   ;;  %v17905_v39 = vld [vmem:[#allocation8 + $0x794] ss:$48 sps:$4 sm:$0xff]  }
 0x3e2   :  { %12718 = vmatprep.subr.bf16.mxu0 %v17866_v34  ;;  %v17908_v34 = vld [vmem:[#allocation8 + $0x134] ss:$48 sps:$4 sm:$0xff]  }
 0x3e4   :  { %12758 = vmatpush2.bf16.msra.mxu1 %v17861_v33  ;;  %v17903_v33 = vld [vmem:[#allocation8 + $0x790] ss:$48 sps:$4 sm:$0xff]  }
 0x3e5   :  { %12719 = vmatpush2.bf16.msra.mxu0 %v17864_v35  ;;  %12759 = vmatprep.subr.bf16.mxu1 %v17869_v36  ;;  %v17906_v35 = vld [vmem:[#allocation8 + $0x130] ss:$48 sps:$4 sm:$0xff]   ;;  %v17911_v36 = vld [vmem:[#allocation8 + $0x734] ss:$48 sps:$4 sm:$0xff]  }
 0x3e6   :  { %12720 = vmatprep.subr.bf16.mxu0 %v17872_v52  ;;  %v17914_v52 = vld [vmem:[#allocation8 + $0xd4] ss:$48 sps:$4 sm:$0xff]  }
 0x3e8   :  { %12760 = vmatpush2.bf16.msra.mxu1 %v17867_v38  ;;  %v17909_v38 = vld [vmem:[#allocation8 + $0x730] ss:$48 sps:$4 sm:$0xff]  }
 0x3e9   :  { %12721 = vmatpush2.bf16.msra.mxu0 %v17870_v41  ;;  %12761 = vmatprep.subr.bf16.mxu1 %v17875_v49  ;;  %v17912_v41 = vld [vmem:[#allocation8 + $0xd0] ss:$48 sps:$4 sm:$0xff]   ;;  %v17917_v49 = vld [vmem:[#allocation8 + $0x6d4] ss:$48 sps:$4 sm:$0xff]  }
 0x3ea   :  { %12722 = vmatprep.subr.bf16.mxu0 %v17878_v46  ;;  %v17920_v46 = vld [vmem:[#allocation8 + $0x74] ss:$48 sps:$4 sm:$0xff]  }
 0x3ec   :  { %12762 = vmatpush2.bf16.msra.mxu1 %v17873_v44  ;;  %v17915_v44 = vld [vmem:[#allocation8 + $0x6d0] ss:$48 sps:$4 sm:$0xff]  }
 0x3ed   :  { %12723 = vmatpush2.bf16.msra.mxu0 %v17876_v53  ;;  %12763 = vmatprep.subr.bf16.mxu1 %v17881_v57  ;;  %v17918_v53 = vld [vmem:[#allocation8 + $0x70] ss:$48 sps:$4 sm:$0xff]   ;;  %v17923_v57 = vld [vmem:[#allocation8 + $0x674] ss:$48 sps:$4 sm:$0xff]  }
 0x3ee   :  { %12774 = vmatprep.subr.bf16.mxu0 %v17884_v60  ;;  %v17926_v60 = vld [vmem:[#allocation8 + $0x14] ss:$48 sps:$4 sm:$0xff]  }
 0x3f0   :  { %v12480_v62 = vpop.f32.mrf.mxu0  ;;  %12725 = vmatmul.mubr.bf16.vlgmr.msra.gmra.mxu0 %v19976_v48  ;;  %12764 = vmatpush2.bf16.msra.mxu1 %v17879_v55  ;;  %v17921_v55 = vld [vmem:[#allocation8 + $0x670] ss:$48 sps:$4 sm:$0xff]  }
 0x3f1   :  { %v12481_v63 = vadd.f32 %v12480_v62, %v20027_v17  ;;  %12775 = vmatpush1.bf16.msra.mxu0 %v17882_v54  ;;  %12806 = vmatprep.mubr.bf16.mxu0 %v19928_v8  ;;  %v17891_v17 = vld [vmem:[#allocation8 + $0x850] ss:$48 sps:$4 sm:$0xff]   ;;  %v17935_v62 = vld [vmem:[#allocation8 + $0xbb4] ss:$48 sps:$4 sm:$0xff]  }
 0x3f2   :  { %v12482_v2 = vpop.f32.mrf.mxu0  ;;  %12815 = vmatprep.subr.bf16.mxu1 %v17887_v56  ;;  %12776 = vmatprep.subr.bf16.mxu0 %v17890_v58  ;;  %v17924_v54 = vld [vmem:[#allocation8 + $0x10] ss:$48 sps:$4 sm:$0xff]   ;;  %v17929_v56 = vld [vmem:[#allocation8 + $0x614] ss:$48 sps:$4 sm:$0xff]  }
 0x3f3   :  { %v12483_v4 = vadd.f32 %v12482_v2, %v20031_v47  ;;  %v12521_v6 = vpop.f32.mrf.mxu1  ;;  %12766 = vmatmul.mubr.bf16.vlgmr.msra.gmra.mxu1 %v19986_v32  ;;  %v17927_v58 = vld [vmem:[#allocation8 + $0x610] ss:$48 sps:$4 sm:$0xff]   ;;  %v17941_v2 = vld [vmem:[#allocation8 + $0xb54] ss:$48 sps:$4 sm:$0xff]  }
 0x3f4   :  { %v20038_v10 = vadd.f32 %v12521_v6, %v12481_v63  ;;  %v12484_v12 = vpop.f32.mrf.mxu0  ;;  %12816 = vmatpush1.bf16.msra.mxu1 %v17885_v59  ;;  %12847 = vmatprep.mubr.bf16.mxu1 %v19934_v3  ;;  %v17932_v59 = vld [vmem:[#allocation8 + $0x5b4] ss:$48 sps:$4 sm:$0xff]   ;;  %v17933_v63 = vld [vmem:[#allocation8 + $0xbb0] ss:$48 sps:$4 sm:$0xff]  }
 0x3f5   :  { %v12523_v30 = vpop.f32.mrf.mxu1  ;;  %12777 = vmatpush1.bf16.msra.mxu0 %v17888_v61  ;;  %12817 = vmatprep.subr.bf16.mxu1 %v17893_v0  ;;  %v17930_v61 = vld [vmem:[#allocation8 + $0x5b0] ss:$48 sps:$4 sm:$0xff]   ;;  %v17938_v0 = vld [vmem:[#allocation8 + $0x554] ss:$48 sps:$4 sm:$0xff]  }
 0x3f6   :  { %v20041_v24 = vadd.f32 %v12523_v30, %v12483_v4  ;;  %v12485_v28 = vpop.f32.mrf.mxu0  ;;  %12778 = vmatprep.subr.bf16.mxu0 %v17896_v1  ;;  %v17936_v1 = vld [vmem:[#allocation8 + $0x550] ss:$48 sps:$4 sm:$0xff]   ;;  %v17944_v6 = vld [vmem:[#allocation8 + $0x4f4] ss:$48 sps:$4 sm:$0xff]  }
 0x3f7   :  { %v12525_v47 = vpop.f32.mrf.mxu1  ;;  %v17939_v4 = vld [vmem:[#allocation8 + $0xb50] ss:$48 sps:$4 sm:$0xff]  }
 0x3f8   :  { %12818 = vmatpush1.bf16.msra.mxu1 %v17891_v17  ;;  %v17942_v12 = vld [vmem:[#allocation8 + $0x4f0] ss:$48 sps:$4 sm:$0xff]   ;;  %v17947_v17 = vld [vmem:[#allocation8 + $0xaf4] ss:$48 sps:$4 sm:$0xff]  }
 0x3f9   :  { %v12526_v37 = vpop.f32.mrf.mxu1  ;;  %12779 = vmatpush1.bf16.msra.mxu0 %v17894_v14  ;;  %12819 = vmatprep.subr.bf16.mxu1 %v17899_v18  ;;  %v17945_v14 = vld [vmem:[#allocation8 + $0xaf0] ss:$48 sps:$4 sm:$0xff]   ;;  %v17950_v18 = vld [vmem:[#allocation8 + $0x494] ss:$48 sps:$4 sm:$0xff]  }
 0x3fa   :  { %12780 = vmatprep.subr.bf16.mxu0 %v17902_v21  ;;  %v17948_v30 = vld [vmem:[#allocation8 + $0x490] ss:$48 sps:$4 sm:$0xff]   ;;  %v17953_v21 = vld [vmem:[#allocation8 + $0xa94] ss:$48 sps:$4 sm:$0xff]  }
 0x3fb   :  { %v17951_v28 = vld [vmem:[#allocation8 + $0xa90] ss:$48 sps:$4 sm:$0xff]   ;;  %v17956_v47 = vld [vmem:[#allocation8 + $0x434] ss:$48 sps:$4 sm:$0xff]  }
 0x3fc   :  { %12820 = vmatpush1.bf16.msra.mxu1 %v17897_v29  ;;  %v17954_v29 = vld [vmem:[#allocation8 + $0x430] ss:$48 sps:$4 sm:$0xff]   ;;  %v17959_v37 = vld [vmem:[#allocation8 + $0xa34] ss:$48 sps:$4 sm:$0xff]  }
 0x3fd   :  { %12781 = vmatpush1.bf16.msra.mxu0 %v17900_v31  ;;  %12821 = vmatprep.subr.bf16.mxu1 %v17905_v39  ;;  %v17957_v31 = vld [vmem:[#allocation8 + $0xa30] ss:$48 sps:$4 sm:$0xff]   ;;  %v17962_v39 = vld [vmem:[#allocation8 + $0x3d4] ss:$48 sps:$4 sm:$0xff]  }
 0x3fe   :  { %12782 = vmatprep.subr.bf16.mxu0 %v17908_v34  ;;  %v17965_v34 = vld [vmem:[#allocation8 + $0x9d4] ss:$48 sps:$4 sm:$0xff]  }
 0x400   :  { %12822 = vmatpush1.bf16.msra.mxu1 %v17903_v33  ;;  %v17960_v33 = vld [vmem:[#allocation8 + $0x3d0] ss:$48 sps:$4 sm:$0xff]  }
 0x401   :  { %12783 = vmatpush1.bf16.msra.mxu0 %v17906_v35  ;;  %12823 = vmatprep.subr.bf16.mxu1 %v17911_v36  ;;  %v17963_v35 = vld [vmem:[#allocation8 + $0x9d0] ss:$48 sps:$4 sm:$0xff]   ;;  %v17968_v36 = vld [vmem:[#allocation8 + $0x374] ss:$48 sps:$4 sm:$0xff]  }
 0x402   :  { %12784 = vmatprep.subr.bf16.mxu0 %v17914_v52  ;;  %v17971_v52 = vld [vmem:[#allocation8 + $0x974] ss:$48 sps:$4 sm:$0xff]  }
 0x404   :  { %12824 = vmatpush1.bf16.msra.mxu1 %v17909_v38  ;;  %v17966_v38 = vld [vmem:[#allocation8 + $0x370] ss:$48 sps:$4 sm:$0xff]  }
 0x405   :  { %12785 = vmatpush1.bf16.msra.mxu0 %v17912_v41  ;;  %12825 = vmatprep.subr.bf16.mxu1 %v17917_v49  ;;  %v17969_v41 = vld [vmem:[#allocation8 + $0x970] ss:$48 sps:$4 sm:$0xff]   ;;  %v17974_v49 = vld [vmem:[#allocation8 + $0x314] ss:$48 sps:$4 sm:$0xff]  }
 0x406   :  { %12786 = vmatprep.subr.bf16.mxu0 %v17920_v46  ;;  %v17977_v46 = vld [vmem:[#allocation8 + $0x914] ss:$48 sps:$4 sm:$0xff]  }
 0x408   :  { %12826 = vmatpush1.bf16.msra.mxu1 %v17915_v44  ;;  %v17972_v44 = vld [vmem:[#allocation8 + $0x310] ss:$48 sps:$4 sm:$0xff]  }
 0x409   :  { %12787 = vmatpush1.bf16.msra.mxu0 %v17918_v53  ;;  %12827 = vmatprep.subr.bf16.mxu1 %v17923_v57  ;;  %v17975_v53 = vld [vmem:[#allocation8 + $0x910] ss:$48 sps:$4 sm:$0xff]   ;;  %v17980_v57 = vld [vmem:[#allocation8 + $0xeb4] ss:$48 sps:$4 sm:$0xff]  }
 0x40a   :  { %12788 = vmatprep.subr.bf16.mxu0 %v17926_v60  ;;  %v17983_v60 = vld [vmem:[#allocation8 + $0x14b4] ss:$48 sps:$4 sm:$0xff]  }
 0x40c   :  { %12828 = vmatpush1.bf16.msra.mxu1 %v17921_v55  ;;  %v17978_v55 = vld [vmem:[#allocation8 + $0xeb0] ss:$48 sps:$4 sm:$0xff]  }
 0x40d   :  { %12789 = vmatpush1.bf16.msra.mxu0 %v17924_v54  ;;  %12829 = vmatprep.subr.bf16.mxu1 %v17929_v56  ;;  %v17986_v54 = vld [vmem:[#allocation8 + $0xe54] ss:$48 sps:$4 sm:$0xff]   ;;  %v17981_v56 = vld [vmem:[#allocation8 + $0x14b0] ss:$48 sps:$4 sm:$0xff]  }
 0x40e   :  { %12790 = vmatprep.subr.bf16.mxu0 %v17932_v59 }
 0x410   :  { %12830 = vmatpush1.bf16.msra.mxu1 %v17927_v58 }
 0x411   :  { %12791 = vmatpush2.bf16.msra.mxu0 %v17930_v61  ;;  %12831 = vmatprep.subr.bf16.mxu1 %v17935_v62  ;;  %v17984_v61 = vld [vmem:[#allocation8 + $0xe50] ss:$48 sps:$4 sm:$0xff]   ;;  %v17989_v62 = vld [vmem:[#allocation8 + $0x1454] ss:$48 sps:$4 sm:$0xff]  }
 0x412   :  { %12792 = vmatprep.subr.bf16.mxu0 %v17938_v0  ;;  %v17992_v0 = vld [vmem:[#allocation8 + $0xdf4] ss:$48 sps:$4 sm:$0xff]  }
 0x414   :  { %12832 = vmatpush2.bf16.msra.mxu1 %v17933_v63 }
 0x415   :  { %12793 = vmatpush2.bf16.msra.mxu0 %v17936_v1  ;;  %12833 = vmatprep.subr.bf16.mxu1 %v17941_v2 }
 0x416   :  { %12794 = vmatprep.subr.bf16.mxu0 %v17944_v6 }
 0x418   :  { %12834 = vmatpush2.bf16.msra.mxu1 %v17939_v4 }
 0x419   :  { %12795 = vmatpush2.bf16.msra.mxu0 %v17942_v12  ;;  %12835 = vmatprep.subr.bf16.mxu1 %v17947_v17  ;;  %v17990_v17 = vld [vmem:[#allocation8 + $0xdf0] ss:$48 sps:$4 sm:$0xff]  }
 0x41a   :  { %12796 = vmatprep.subr.bf16.mxu0 %v17950_v18 }
 0x41c   :  { %12836 = vmatpush2.bf16.msra.mxu1 %v17945_v14  ;;  %v17995_v14 = vld [vmem:[#allocation8 + $0x13f4] ss:$48 sps:$4 sm:$0xff]  }
 0x41d   :  { %12797 = vmatpush2.bf16.msra.mxu0 %v17948_v30  ;;  %12837 = vmatprep.subr.bf16.mxu1 %v17953_v21 }
 0x41e   :  { %12798 = vmatprep.subr.bf16.mxu0 %v17956_v47 }
 0x420   :  { %12838 = vmatpush2.bf16.msra.mxu1 %v17951_v28  ;;  %v17993_v28 = vld [vmem:[#allocation8 + $0x13f0] ss:$48 sps:$4 sm:$0xff]  }
 0x421   :  { %12799 = vmatpush2.bf16.msra.mxu0 %v17954_v29  ;;  %12839 = vmatprep.subr.bf16.mxu1 %v17959_v37  ;;  %v17996_v29 = vld [vmem:[#allocation8 + $0xd90] ss:$48 sps:$4 sm:$0xff]   ;;  %v18001_v37 = vld [vmem:[#allocation8 + $0x1394] ss:$48 sps:$4 sm:$0xff]  }
 0x422   :  { %12800 = vmatprep.subr.bf16.mxu0 %v17962_v39  ;;  %v17999_v39 = vld [vmem:[#allocation8 + $0x1390] ss:$48 sps:$4 sm:$0xff]  }
 0x424   :  { %12840 = vmatpush2.bf16.msra.mxu1 %v17957_v31  ;;  %v18004_v31 = vld [vmem:[#allocation8 + $0xd34] ss:$48 sps:$4 sm:$0xff]  }
 0x425   :  { %12801 = vmatpush2.bf16.msra.mxu0 %v17960_v33  ;;  %12841 = vmatprep.subr.bf16.mxu1 %v17965_v34  ;;  %v18002_v33 = vld [vmem:[#allocation8 + $0xd30] ss:$48 sps:$4 sm:$0xff]   ;;  %v18007_v34 = vld [vmem:[#allocation8 + $0x1334] ss:$48 sps:$4 sm:$0xff]  }
 0x426   :  { %12802 = vmatprep.subr.bf16.mxu0 %v17968_v36  ;;  %v18005_v36 = vld [vmem:[#allocation8 + $0x1330] ss:$48 sps:$4 sm:$0xff]  }
 0x428   :  { %12842 = vmatpush2.bf16.msra.mxu1 %v17963_v35  ;;  %v18010_v35 = vld [vmem:[#allocation8 + $0xcd4] ss:$48 sps:$4 sm:$0xff]  }
 0x429   :  { %12803 = vmatpush2.bf16.msra.mxu0 %v17966_v38  ;;  %12843 = vmatprep.subr.bf16.mxu1 %v17971_v52  ;;  %v18008_v38 = vld [vmem:[#allocation8 + $0xcd0] ss:$48 sps:$4 sm:$0xff]   ;;  %v18013_v52 = vld [vmem:[#allocation8 + $0x12d4] ss:$48 sps:$4 sm:$0xff]  }
 0x42a   :  { %12804 = vmatprep.subr.bf16.mxu0 %v17974_v49  ;;  %v18011_v49 = vld [vmem:[#allocation8 + $0x12d0] ss:$48 sps:$4 sm:$0xff]  }
 0x42c   :  { %12844 = vmatpush2.bf16.msra.mxu1 %v17969_v41  ;;  %v18016_v41 = vld [vmem:[#allocation8 + $0xc74] ss:$48 sps:$4 sm:$0xff]  }
 0x42d   :  { %12805 = vmatpush2.bf16.msra.mxu0 %v17972_v44  ;;  %12845 = vmatprep.subr.bf16.mxu1 %v17977_v46  ;;  %v18014_v44 = vld [vmem:[#allocation8 + $0xc70] ss:$48 sps:$4 sm:$0xff]   ;;  %v18019_v46 = vld [vmem:[#allocation8 + $0x1274] ss:$48 sps:$4 sm:$0xff]  }
 0x42e   :  { %12856 = vmatprep.subr.bf16.mxu0 %v17980_v57  ;;  %v18017_v57 = vld [vmem:[#allocation8 + $0x1270] ss:$48 sps:$4 sm:$0xff]  }
 0x430   :  { %v12562_v58 = vpop.f32.mrf.mxu0  ;;  %12807 = vmatmul.mubr.bf16.vlgmr.msra.gmra.mxu0 %v19931_v13  ;;  %12846 = vmatpush2.bf16.msra.mxu1 %v17975_v53  ;;  %v18022_v53 = vld [vmem:[#allocation8 + $0xc14] ss:$48 sps:$4 sm:$0xff]  }
 0x431   :  { %v12563_v59 = vadd.f32 %v12562_v58, %v20038_v10  ;;  %12857 = vmatpush1.bf16.msra.mxu0 %v17978_v55  ;;  %12888 = vmatprep.mubr.bf16.mxu0 %v19936_v20  ;;  %v17987_v10 = vld [vmem:[#allocation8 + $0x1450] ss:$48 sps:$4 sm:$0xff]  }
 0x432   :  { %v12564_v63 = vpop.f32.mrf.mxu0  ;;  %12897 = vmatprep.subr.bf16.mxu1 %v17983_v60  ;;  %12858 = vmatprep.subr.bf16.mxu0 %v17986_v54  ;;  %v18020_v55 = vld [vmem:[#allocation8 + $0xc10] ss:$48 sps:$4 sm:$0xff]   ;;  %v18025_v60 = vld [vmem:[#allocation8 + $0x1214] ss:$48 sps:$4 sm:$0xff]  }
 0x433   :  { %v12565_v1 = vadd.f32 %v12564_v63, %v20041_v24  ;;  %v12603_v2 = vpop.f32.mrf.mxu1  ;;  %12848 = vmatmul.mubr.bf16.vlgmr.msra.gmra.mxu1 %v19938_v23  ;;  %v17998_v24 = vld [vmem:[#allocation8 + $0xd94] ss:$48 sps:$4 sm:$0xff]   ;;  %v18026_v58 = vld [vmem:[#allocation8 + $0x11b0] ss:$48 sps:$4 sm:$0xff]  }
 0x434   :  { %v20048_v4 = vadd.f32 %v12603_v2, %v12563_v59  ;;  %v12566_v6 = vpop.f32.mrf.mxu0  ;;  %12898 = vmatpush1.bf16.msra.mxu1 %v17981_v56  ;;  %12929 = vmatprep.mubr.bf16.mxu1 %v19942_v27  ;;  %v18028_v54 = vld [vmem:[#allocation8 + $0x11b4] ss:$48 sps:$4 sm:$0xff]   ;;  %v18023_v56 = vld [vmem:[#allocation8 + $0x1210] ss:$48 sps:$4 sm:$0xff]  }
 0x435   :  { %v12605_v12 = vpop.f32.mrf.mxu1  ;;  %12859 = vmatpush1.bf16.msra.mxu0 %v17984_v61  ;;  %12899 = vmatprep.subr.bf16.mxu1 %v17989_v62  ;;  %v18031_v59 = vld [vmem:[#allocation8 + $0x17b4] ss:$48 sps:$4 sm:$0xff]   ;;  %v18029_v62 = vld [vmem:[#allocation8 + $0x17b0] ss:$48 sps:$4 sm:$0xff]  }
 0x436   :  { %v20051_v18 = vadd.f32 %v12605_v12, %v12565_v1  ;;  %v12567_v30 = vpop.f32.mrf.mxu0  ;;  %12860 = vmatprep.subr.bf16.mxu0 %v17992_v0  ;;  %v18034_v61 = vld [vmem:[#allocation8 + $0x1154] ss:$48 sps:$4 sm:$0xff]   ;;  %v18032_v63 = vld [vmem:[#allocation8 + $0x1150] ss:$48 sps:$4 sm:$0xff]  }
 0x437   :  { %v12607_v21 = vpop.f32.mrf.mxu1  ;;  %v18037_v0 = vld [vmem:[#allocation8 + $0x1754] ss:$48 sps:$4 sm:$0xff]   ;;  %v18035_v2 = vld [vmem:[#allocation8 + $0x1750] ss:$48 sps:$4 sm:$0xff]  }
 0x438   :  { %12900 = vmatpush1.bf16.msra.mxu1 %v17987_v10  ;;  %v18040_v1 = vld [vmem:[#allocation8 + $0x10f4] ss:$48 sps:$4 sm:$0xff]   ;;  %v18038_v6 = vld [vmem:[#allocation8 + $0x10f0] ss:$48 sps:$4 sm:$0xff]  }
 0x439   :  { %v12608_v47 = vpop.f32.mrf.mxu1  ;;  %12861 = vmatpush1.bf16.msra.mxu0 %v17990_v17  ;;  %12901 = vmatprep.subr.bf16.mxu1 %v17995_v14  ;;  %v18043_v10 = vld [vmem:[#allocation8 + $0x16f4] ss:$48 sps:$4 sm:$0xff]   ;;  %v18041_v17 = vld [vmem:[#allocation8 + $0x16f0] ss:$48 sps:$4 sm:$0xff]  }
 0x43a   :  { %12862 = vmatprep.subr.bf16.mxu0 %v17998_v24  ;;  %v18046_v12 = vld [vmem:[#allocation8 + $0x1094] ss:$48 sps:$4 sm:$0xff]   ;;  %v18044_v14 = vld [vmem:[#allocation8 + $0x1090] ss:$48 sps:$4 sm:$0xff]  }
 0x43b   :  { %v18049_v30 = vld [vmem:[#allocation8 + $0x1694] ss:$48 sps:$4 sm:$0xff]   ;;  %v18047_v21 = vld [vmem:[#allocation8 + $0x1690] ss:$48 sps:$4 sm:$0xff]  }
 0x43c   :  { %12902 = vmatpush1.bf16.msra.mxu1 %v17993_v28  ;;  %v18052_v24 = vld [vmem:[#allocation8 + $0x1034] ss:$48 sps:$4 sm:$0xff]   ;;  %v18050_v28 = vld [vmem:[#allocation8 + $0x1030] ss:$48 sps:$4 sm:$0xff]  }
 0x43d   :  { %12863 = vmatpush1.bf16.msra.mxu0 %v17996_v29  ;;  %12903 = vmatprep.subr.bf16.mxu1 %v18001_v37  ;;  %v18055_v47 = vld [vmem:[#allocation8 + $0x1634] ss:$48 sps:$4 sm:$0xff]   ;;  %v18053_v37 = vld [vmem:[#allocation8 + $0x1630] ss:$48 sps:$4 sm:$0xff]  }
 0x43e   :  { %12864 = vmatprep.subr.bf16.mxu0 %v18004_v31  ;;  %v18058_v29 = vld [vmem:[#allocation8 + $0xfd4] ss:$48 sps:$4 sm:$0xff]   ;;  %v18056_v31 = vld [vmem:[#allocation8 + $0xfd0] ss:$48 sps:$4 sm:$0xff]  }
 0x440   :  { %12904 = vmatpush1.bf16.msra.mxu1 %v17999_v39  ;;  %v18061_v39 = vld [vmem:[#allocation8 + $0x15d4] ss:$48 sps:$4 sm:$0xff]  }
 0x441   :  { %12865 = vmatpush1.bf16.msra.mxu0 %v18002_v33  ;;  %12905 = vmatprep.subr.bf16.mxu1 %v18007_v34  ;;  %v18064_v33 = vld [vmem:[#allocation8 + $0xf74] ss:$48 sps:$4 sm:$0xff]   ;;  %v18059_v34 = vld [vmem:[#allocation8 + $0x15d0] ss:$48 sps:$4 sm:$0xff]  }
 0x442   :  { %12866 = vmatprep.subr.bf16.mxu0 %v18010_v35  ;;  %v18062_v35 = vld [vmem:[#allocation8 + $0xf70] ss:$48 sps:$4 sm:$0xff]  }
 0x444   :  { %12906 = vmatpush1.bf16.msra.mxu1 %v18005_v36  ;;  %v18067_v36 = vld [vmem:[#allocation8 + $0x1574] ss:$48 sps:$4 sm:$0xff]  }
 0x445   :  { %12867 = vmatpush1.bf16.msra.mxu0 %v18008_v38  ;;  %12907 = vmatprep.subr.bf16.mxu1 %v18013_v52  ;;  %v18070_v38 = vld [vmem:[#allocation8 + $0xf14] ss:$48 sps:$4 sm:$0xff]   ;;  %v18065_v52 = vld [vmem:[#allocation8 + $0x1570] ss:$48 sps:$4 sm:$0xff]  }
 0x446   :  { %12868 = vmatprep.subr.bf16.mxu0 %v18016_v41  ;;  %v18068_v41 = vld [vmem:[#allocation8 + $0xf10] ss:$48 sps:$4 sm:$0xff]  }
 0x448   :  { %12908 = vmatpush1.bf16.msra.mxu1 %v18011_v49  ;;  %v18073_v49 = vld [vmem:[#allocation8 + $0x1514] ss:$48 sps:$4 sm:$0xff]  }
 0x449   :  { %12869 = vmatpush1.bf16.msra.mxu0 %v18014_v44  ;;  %12909 = vmatprep.subr.bf16.mxu1 %v18019_v46  ;;  %v18076_v44 = vld [vmem:[#allocation8 + $0x1ab4] ss:$48 sps:$4 sm:$0xff]   ;;  %v18071_v46 = vld [vmem:[#allocation8 + $0x1510] ss:$48 sps:$4 sm:$0xff]  }
 0x44a   :  { %12870 = vmatprep.subr.bf16.mxu0 %v18022_v53  ;;  %v18074_v53 = vld [vmem:[#allocation8 + $0x1ab0] ss:$48 sps:$4 sm:$0xff]  }
 0x44c   :  { %12910 = vmatpush1.bf16.msra.mxu1 %v18017_v57  ;;  %v18079_v57 = vld [vmem:[#allocation8 + $0x20b4] ss:$48 sps:$4 sm:$0xff]  }
 0x44d   :  { %12871 = vmatpush1.bf16.msra.mxu0 %v18020_v55  ;;  %12911 = vmatprep.subr.bf16.mxu1 %v18025_v60  ;;  %v18082_v55 = vld [vmem:[#allocation8 + $0x1a54] ss:$48 sps:$4 sm:$0xff]  }
 0x44e   :  { %12872 = vmatprep.subr.bf16.mxu0 %v18028_v54  ;;  %v18077_v54 = vld [vmem:[#allocation8 + $0x20b0] ss:$48 sps:$4 sm:$0xff]  }
 0x450   :  { %12912 = vmatpush1.bf16.msra.mxu1 %v18023_v56 }
 0x451   :  { %12873 = vmatpush2.bf16.msra.mxu0 %v18026_v58  ;;  %12913 = vmatprep.subr.bf16.mxu1 %v18031_v59  ;;  %v18080_v58 = vld [vmem:[#allocation8 + $0x1a50] ss:$48 sps:$4 sm:$0xff]   ;;  %v18085_v59 = vld [vmem:[#allocation8 + $0x2054] ss:$48 sps:$4 sm:$0xff]  }
 0x452   :  { %12874 = vmatprep.subr.bf16.mxu0 %v18034_v61 }
 0x454   :  { %12914 = vmatpush2.bf16.msra.mxu1 %v18029_v62  ;;  %v18088_v62 = vld [vmem:[#allocation8 + $0x19f4] ss:$48 sps:$4 sm:$0xff]  }
 0x455   :  { %12875 = vmatpush2.bf16.msra.mxu0 %v18032_v63  ;;  %12915 = vmatprep.subr.bf16.mxu1 %v18037_v0 }
 0x456   :  { %12876 = vmatprep.subr.bf16.mxu0 %v18040_v1 }
 0x458   :  { %12916 = vmatpush2.bf16.msra.mxu1 %v18035_v2 }
 0x459   :  { %12877 = vmatpush2.bf16.msra.mxu0 %v18038_v6  ;;  %12917 = vmatprep.subr.bf16.mxu1 %v18043_v10  ;;  %v18086_v10 = vld [vmem:[#allocation8 + $0x19f0] ss:$48 sps:$4 sm:$0xff]  }
 0x45a   :  { %12878 = vmatprep.subr.bf16.mxu0 %v18046_v12  ;;  %v18091_v12 = vld [vmem:[#allocation8 + $0x1ff4] ss:$48 sps:$4 sm:$0xff]  }
 0x45c   :  { %12918 = vmatpush2.bf16.msra.mxu1 %v18041_v17 }
 0x45d   :  { %12879 = vmatpush2.bf16.msra.mxu0 %v18044_v14  ;;  %12919 = vmatprep.subr.bf16.mxu1 %v18049_v30 }
 0x45e   :  { %12880 = vmatprep.subr.bf16.mxu0 %v18052_v24  ;;  %v18089_v24 = vld [vmem:[#allocation8 + $0x1ff0] ss:$48 sps:$4 sm:$0xff]  }
 0x460   :  { %12920 = vmatpush2.bf16.msra.mxu1 %v18047_v21 }
 0x461   :  { %12881 = vmatpush2.bf16.msra.mxu0 %v18050_v28  ;;  %12921 = vmatprep.subr.bf16.mxu1 %v18055_v47  ;;  %v18092_v28 = vld [vmem:[#allocation8 + $0x1990] ss:$48 sps:$4 sm:$0xff]   ;;  %v18097_v47 = vld [vmem:[#allocation8 + $0x1f94] ss:$48 sps:$4 sm:$0xff]  }
 0x462   :  { %12882 = vmatprep.subr.bf16.mxu0 %v18058_v29  ;;  %v18100_v29 = vld [vmem:[#allocation8 + $0x1934] ss:$48 sps:$4 sm:$0xff]  }
 0x464   :  { %12922 = vmatpush2.bf16.msra.mxu1 %v18053_v37  ;;  %v18095_v37 = vld [vmem:[#allocation8 + $0x1f90] ss:$48 sps:$4 sm:$0xff]  }
 0x465   :  { %12883 = vmatpush2.bf16.msra.mxu0 %v18056_v31  ;;  %12923 = vmatprep.subr.bf16.mxu1 %v18061_v39  ;;  %v18098_v31 = vld [vmem:[#allocation8 + $0x1930] ss:$48 sps:$4 sm:$0xff]   ;;  %v18103_v39 = vld [vmem:[#allocation8 + $0x1f34] ss:$48 sps:$4 sm:$0xff]  }
 0x466   :  { %12884 = vmatprep.subr.bf16.mxu0 %v18064_v33  ;;  %v18106_v33 = vld [vmem:[#allocation8 + $0x18d4] ss:$48 sps:$4 sm:$0xff]  }
 0x468   :  { %12924 = vmatpush2.bf16.msra.mxu1 %v18059_v34  ;;  %v18101_v34 = vld [vmem:[#allocation8 + $0x1f30] ss:$48 sps:$4 sm:$0xff]  }
 0x469   :  { %12885 = vmatpush2.bf16.msra.mxu0 %v18062_v35  ;;  %12925 = vmatprep.subr.bf16.mxu1 %v18067_v36  ;;  %v18104_v35 = vld [vmem:[#allocation8 + $0x18d0] ss:$48 sps:$4 sm:$0xff]   ;;  %v18109_v36 = vld [vmem:[#allocation8 + $0x1ed4] ss:$48 sps:$4 sm:$0xff]  }
 0x46a   :  { %12886 = vmatprep.subr.bf16.mxu0 %v18070_v38  ;;  %v18112_v38 = vld [vmem:[#allocation8 + $0x1874] ss:$48 sps:$4 sm:$0xff]  }
 0x46c   :  { %12926 = vmatpush2.bf16.msra.mxu1 %v18065_v52  ;;  %v18107_v52 = vld [vmem:[#allocation8 + $0x1ed0] ss:$48 sps:$4 sm:$0xff]  }
 0x46d   :  { %12887 = vmatpush2.bf16.msra.mxu0 %v18068_v41  ;;  %12927 = vmatprep.subr.bf16.mxu1 %v18073_v49  ;;  %v18110_v41 = vld [vmem:[#allocation8 + $0x1870] ss:$48 sps:$4 sm:$0xff]   ;;  %v18115_v49 = vld [vmem:[#allocation8 + $0x1e74] ss:$48 sps:$4 sm:$0xff]  }
 0x46e   :  { %12938 = vmatprep.subr.bf16.mxu0 %v18076_v44  ;;  %v18118_v44 = vld [vmem:[#allocation8 + $0x1814] ss:$48 sps:$4 sm:$0xff]  }
 0x470   :  { %v12644_v60 = vpop.f32.mrf.mxu0  ;;  %12889 = vmatmul.mubr.bf16.vlgmr.msra.gmra.mxu0 %v19946_v42  ;;  %12928 = vmatpush2.bf16.msra.mxu1 %v18071_v46  ;;  %v18113_v46 = vld [vmem:[#allocation8 + $0x1e70] ss:$48 sps:$4 sm:$0xff]  }
 0x471   :  { %v12645_v56 = vadd.f32 %v12644_v60, %v20048_v4  ;;  %12939 = vmatpush1.bf16.msra.mxu0 %v18074_v53  ;;  %12970 = vmatprep.mubr.bf16.mxu0 %v19948_v45  ;;  %v18083_v4 = vld [vmem:[#allocation8 + $0x2050] ss:$48 sps:$4 sm:$0xff]  }
 0x472   :  { %v12646_v61 = vpop.f32.mrf.mxu0  ;;  %12979 = vmatprep.subr.bf16.mxu1 %v18079_v57  ;;  %12940 = vmatprep.subr.bf16.mxu0 %v18082_v55  ;;  %v18116_v53 = vld [vmem:[#allocation8 + $0x1810] ss:$48 sps:$4 sm:$0xff]   ;;  %v18121_v57 = vld [vmem:[#allocation8 + $0x1e14] ss:$48 sps:$4 sm:$0xff]  }
 0x473   :  { %v12647_v63 = vadd.f32 %v12646_v61, %v20051_v18  ;;  %v12685_v0 = vpop.f32.mrf.mxu1  ;;  %12930 = vmatmul.mubr.bf16.vlgmr.msra.gmra.mxu1 %v19952_v50  ;;  %v18094_v18 = vld [vmem:[#allocation8 + $0x1994] ss:$48 sps:$4 sm:$0xff]   ;;  %v18119_v60 = vld [vmem:[#allocation8 + $0x1e10] ss:$48 sps:$4 sm:$0xff]  }
 0x474   :  { %v20058_v1 = vadd.f32 %v12685_v0, %v12645_v56  ;;  %v12648_v2 = vpop.f32.mrf.mxu0  ;;  %12980 = vmatpush1.bf16.msra.mxu1 %v18077_v54  ;;  %13011 = vmatprep.mubr.bf16.mxu1 %v19954_v51  ;;  %v18124_v55 = vld [vmem:[#allocation8 + $0x1db4] ss:$48 sps:$4 sm:$0xff]   ;;  %v18122_v54 = vld [vmem:[#allocation8 + $0x1db0] ss:$48 sps:$4 sm:$0xff]  }
 0x475   :  { %v12687_v6 = vpop.f32.mrf.mxu1  ;;  %12941 = vmatpush1.bf16.msra.mxu0 %v18080_v58  ;;  %12981 = vmatprep.subr.bf16.mxu1 %v18085_v59  ;;  %v18127_v56 = vld [vmem:[#allocation8 + $0x23b4] ss:$48 sps:$4 sm:$0xff]   ;;  %v18125_v59 = vld [vmem:[#allocation8 + $0x23b0] ss:$48 sps:$4 sm:$0xff]  }
 0x476   :  { %v20061_v17 = vadd.f32 %v12687_v6, %v12647_v63  ;;  %v12649_v14 = vpop.f32.mrf.mxu0  ;;  %12942 = vmatprep.subr.bf16.mxu0 %v18088_v62  ;;  %v18130_v58 = vld [vmem:[#allocation8 + $0x1d54] ss:$48 sps:$4 sm:$0xff]   ;;  %v18128_v61 = vld [vmem:[#allocation8 + $0x1d50] ss:$48 sps:$4 sm:$0xff]  }
 0x477   :  { %v12689_v30 = vpop.f32.mrf.mxu1  ;;  %v18133_v62 = vld [vmem:[#allocation8 + $0x2354] ss:$48 sps:$4 sm:$0xff]   ;;  %v18131_v0 = vld [vmem:[#allocation8 + $0x2350] ss:$48 sps:$4 sm:$0xff]  }
 0x478   :  { %12982 = vmatpush1.bf16.msra.mxu1 %v18083_v4  ;;  %v18136_v63 = vld [vmem:[#allocation8 + $0x1cf4] ss:$48 sps:$4 sm:$0xff]   ;;  %v18134_v2 = vld [vmem:[#allocation8 + $0x1cf0] ss:$48 sps:$4 sm:$0xff]  }
 0x479   :  { %v12690_v21 = vpop.f32.mrf.mxu1  ;;  %12943 = vmatpush1.bf16.msra.mxu0 %v18086_v10  ;;  %12983 = vmatprep.subr.bf16.mxu1 %v18091_v12  ;;  %v18139_v4 = vld [vmem:[#allocation8 + $0x22f4] ss:$48 sps:$4 sm:$0xff]   ;;  %v18137_v10 = vld [vmem:[#allocation8 + $0x22f0] ss:$48 sps:$4 sm:$0xff]  }
 0x47a   :  { %12944 = vmatprep.subr.bf16.mxu0 %v18094_v18  ;;  %v18142_v6 = vld [vmem:[#allocation8 + $0x1c94] ss:$48 sps:$4 sm:$0xff]   ;;  %v18140_v12 = vld [vmem:[#allocation8 + $0x1c90] ss:$48 sps:$4 sm:$0xff]  }
 0x47b   :  { %v18145_v14 = vld [vmem:[#allocation8 + $0x2294] ss:$48 sps:$4 sm:$0xff]   ;;  %v18143_v30 = vld [vmem:[#allocation8 + $0x2290] ss:$48 sps:$4 sm:$0xff]  }
 0x47c   :  { %12984 = vmatpush1.bf16.msra.mxu1 %v18089_v24  ;;  %v18148_v18 = vld [vmem:[#allocation8 + $0x1c34] ss:$48 sps:$4 sm:$0xff]   ;;  %v18146_v24 = vld [vmem:[#allocation8 + $0x1c30] ss:$48 sps:$4 sm:$0xff]  }
 0x47d   :  { %12945 = vmatpush1.bf16.msra.mxu0 %v18092_v28  ;;  %12985 = vmatprep.subr.bf16.mxu1 %v18097_v47  ;;  %v18151_v21 = vld [vmem:[#allocation8 + $0x2234] ss:$48 sps:$4 sm:$0xff]   ;;  %v18149_v47 = vld [vmem:[#allocation8 + $0x2230] ss:$48 sps:$4 sm:$0xff]  }
 0x47e   :  { %12946 = vmatprep.subr.bf16.mxu0 %v18100_v29  ;;  %v18154_v28 = vld [vmem:[#allocation8 + $0x1bd4] ss:$48 sps:$4 sm:$0xff]   ;;  %v18152_v29 = vld [vmem:[#allocation8 + $0x1bd0] ss:$48 sps:$4 sm:$0xff]  }
 0x480   :  { %12986 = vmatpush1.bf16.msra.mxu1 %v18095_v37  ;;  %v18157_v37 = vld [vmem:[#allocation8 + $0x21d4] ss:$48 sps:$4 sm:$0xff]  }
 0x481   :  { %12947 = vmatpush1.bf16.msra.mxu0 %v18098_v31  ;;  %12987 = vmatprep.subr.bf16.mxu1 %v18103_v39  ;;  %v18160_v31 = vld [vmem:[#allocation8 + $0x1b74] ss:$48 sps:$4 sm:$0xff]   ;;  %v18155_v39 = vld [vmem:[#allocation8 + $0x21d0] ss:$48 sps:$4 sm:$0xff]  }
 0x482   :  { %12948 = vmatprep.subr.bf16.mxu0 %v18106_v33  ;;  %v18158_v33 = vld [vmem:[#allocation8 + $0x1b70] ss:$48 sps:$4 sm:$0xff]  }
 0x484   :  { %12988 = vmatpush1.bf16.msra.mxu1 %v18101_v34  ;;  %v18163_v34 = vld [vmem:[#allocation8 + $0x2174] ss:$48 sps:$4 sm:$0xff]  }
 0x485   :  { %12949 = vmatpush1.bf16.msra.mxu0 %v18104_v35  ;;  %12989 = vmatprep.subr.bf16.mxu1 %v18109_v36  ;;  %v18166_v35 = vld [vmem:[#allocation8 + $0x1b14] ss:$48 sps:$4 sm:$0xff]   ;;  %v18161_v36 = vld [vmem:[#allocation8 + $0x2170] ss:$48 sps:$4 sm:$0xff]  }
 0x486   :  { %12950 = vmatprep.subr.bf16.mxu0 %v18112_v38  ;;  %v18164_v38 = vld [vmem:[#allocation8 + $0x1b10] ss:$48 sps:$4 sm:$0xff]  }
 0x488   :  { %12990 = vmatpush1.bf16.msra.mxu1 %v18107_v52  ;;  %v18169_v52 = vld [vmem:[#allocation8 + $0x2114] ss:$48 sps:$4 sm:$0xff]  }
 0x489   :  { %12951 = vmatpush1.bf16.msra.mxu0 %v18110_v41  ;;  %12991 = vmatprep.subr.bf16.mxu1 %v18115_v49  ;;  %v18172_v41 = vld [vmem:[#allocation8 + $0x26b4] ss:$48 sps:$4 sm:$0xff]   ;;  %v18167_v49 = vld [vmem:[#allocation8 + $0x2110] ss:$48 sps:$4 sm:$0xff]  }
 0x48a   :  { %12952 = vmatprep.subr.bf16.mxu0 %v18118_v44  ;;  %v18170_v44 = vld [vmem:[#allocation8 + $0x26b0] ss:$48 sps:$4 sm:$0xff]  }
 0x48c   :  { %12992 = vmatpush1.bf16.msra.mxu1 %v18113_v46  ;;  %v18175_v46 = vld [vmem:[#allocation8 + $0x2cb4] ss:$48 sps:$4 sm:$0xff]  }
 0x48d   :  { %12953 = vmatpush1.bf16.msra.mxu0 %v18116_v53  ;;  %12993 = vmatprep.subr.bf16.mxu1 %v18121_v57  ;;  %v18178_v53 = vld [vmem:[#allocation8 + $0x2654] ss:$48 sps:$4 sm:$0xff]  }
 0x48e   :  { %12954 = vmatprep.subr.bf16.mxu0 %v18124_v55  ;;  %v18173_v55 = vld [vmem:[#allocation8 + $0x2cb0] ss:$48 sps:$4 sm:$0xff]  }
 0x490   :  { %12994 = vmatpush1.bf16.msra.mxu1 %v18119_v60 }
 0x491   :  { %12955 = vmatpush2.bf16.msra.mxu0 %v18122_v54  ;;  %12995 = vmatprep.subr.bf16.mxu1 %v18127_v56  ;;  %v18176_v54 = vld [vmem:[#allocation8 + $0x2650] ss:$48 sps:$4 sm:$0xff]   ;;  %v18181_v56 = vld [vmem:[#allocation8 + $0x2c54] ss:$48 sps:$4 sm:$0xff]  }
 0x492   :  { %12956 = vmatprep.subr.bf16.mxu0 %v18130_v58 }
 0x494   :  { %12996 = vmatpush2.bf16.msra.mxu1 %v18125_v59  ;;  %v18184_v59 = vld [vmem:[#allocation8 + $0x25f4] ss:$48 sps:$4 sm:$0xff]  }
 0x495   :  { %12957 = vmatpush2.bf16.msra.mxu0 %v18128_v61  ;;  %12997 = vmatprep.subr.bf16.mxu1 %v18133_v62 }
 0x496   :  { %12958 = vmatprep.subr.bf16.mxu0 %v18136_v63 }
 0x498   :  { %12998 = vmatpush2.bf16.msra.mxu1 %v18131_v0 }
 0x499   :  { %12959 = vmatpush2.bf16.msra.mxu0 %v18134_v2  ;;  %12999 = vmatprep.subr.bf16.mxu1 %v18139_v4  ;;  %v18182_v4 = vld [vmem:[#allocation8 + $0x25f0] ss:$48 sps:$4 sm:$0xff]  }
 0x49a   :  { %12960 = vmatprep.subr.bf16.mxu0 %v18142_v6  ;;  %v18187_v6 = vld [vmem:[#allocation8 + $0x2bf4] ss:$48 sps:$4 sm:$0xff]  }
 0x49c   :  { %13000 = vmatpush2.bf16.msra.mxu1 %v18137_v10 }
 0x49d   :  { %12961 = vmatpush2.bf16.msra.mxu0 %v18140_v12  ;;  %13001 = vmatprep.subr.bf16.mxu1 %v18145_v14 }
 0x49e   :  { %12962 = vmatprep.subr.bf16.mxu0 %v18148_v18 }
 0x4a0   :  { %13002 = vmatpush2.bf16.msra.mxu1 %v18143_v30  ;;  %v18185_v30 = vld [vmem:[#allocation8 + $0x2bf0] ss:$48 sps:$4 sm:$0xff]  }
 0x4a1   :  { %12963 = vmatpush2.bf16.msra.mxu0 %v18146_v24  ;;  %13003 = vmatprep.subr.bf16.mxu1 %v18151_v21  ;;  %v18188_v21 = vld [vmem:[#allocation8 + $0x2590] ss:$48 sps:$4 sm:$0xff]  }
 0x4a2   :  { %12964 = vmatprep.subr.bf16.mxu0 %v18154_v28  ;;  %v18193_v28 = vld [vmem:[#allocation8 + $0x2b94] ss:$48 sps:$4 sm:$0xff]  }
 0x4a4   :  { %13004 = vmatpush2.bf16.msra.mxu1 %v18149_v47  ;;  %v18196_v47 = vld [vmem:[#allocation8 + $0x2534] ss:$48 sps:$4 sm:$0xff]  }
 0x4a5   :  { %12965 = vmatpush2.bf16.msra.mxu0 %v18152_v29  ;;  %13005 = vmatprep.subr.bf16.mxu1 %v18157_v37  ;;  %v18191_v29 = vld [vmem:[#allocation8 + $0x2b90] ss:$48 sps:$4 sm:$0xff]  }
 0x4a6   :  { %12966 = vmatprep.subr.bf16.mxu0 %v18160_v31  ;;  %v18194_v37 = vld [vmem:[#allocation8 + $0x2530] ss:$48 sps:$4 sm:$0xff]   ;;  %v18199_v31 = vld [vmem:[#allocation8 + $0x2b34] ss:$48 sps:$4 sm:$0xff]  }
 0x4a8   :  { %13006 = vmatpush2.bf16.msra.mxu1 %v18155_v39  ;;  %v18202_v39 = vld [vmem:[#allocation8 + $0x24d4] ss:$48 sps:$4 sm:$0xff]  }
 0x4a9   :  { %12967 = vmatpush2.bf16.msra.mxu0 %v18158_v33  ;;  %13007 = vmatprep.subr.bf16.mxu1 %v18163_v34  ;;  %v18197_v33 = vld [vmem:[#allocation8 + $0x2b30] ss:$48 sps:$4 sm:$0xff]  }
 0x4aa   :  { %12968 = vmatprep.subr.bf16.mxu0 %v18166_v35  ;;  %v18200_v34 = vld [vmem:[#allocation8 + $0x24d0] ss:$48 sps:$4 sm:$0xff]   ;;  %v18205_v35 = vld [vmem:[#allocation8 + $0x2ad4] ss:$48 sps:$4 sm:$0xff]  }
 0x4ac   :  { %13008 = vmatpush2.bf16.msra.mxu1 %v18161_v36  ;;  %v18208_v36 = vld [vmem:[#allocation8 + $0x2474] ss:$48 sps:$4 sm:$0xff]  }
 0x4ad   :  { %12969 = vmatpush2.bf16.msra.mxu0 %v18164_v38  ;;  %13009 = vmatprep.subr.bf16.mxu1 %v18169_v52  ;;  %v18203_v38 = vld [vmem:[#allocation8 + $0x2ad0] ss:$48 sps:$4 sm:$0xff]  }
 0x4ae   :  { %13020 = vmatprep.subr.bf16.mxu0 %v18172_v41  ;;  %v18206_v52 = vld [vmem:[#allocation8 + $0x2470] ss:$48 sps:$4 sm:$0xff]   ;;  %v18211_v41 = vld [vmem:[#allocation8 + $0x2a74] ss:$48 sps:$4 sm:$0xff]  }
 0x4b0   :  { %v12726_v57 = vpop.f32.mrf.mxu0  ;;  %12971 = vmatmul.mubr.bf16.vlgmr.msra.gmra.mxu0 %v19958_v5  ;;  %13010 = vmatpush2.bf16.msra.mxu1 %v18167_v49  ;;  %v18214_v49 = vld [vmem:[#allocation8 + $0x2414] ss:$48 sps:$4 sm:$0xff]  }
 0x4b1   :  { %v12727_v60 = vadd.f32 %v12726_v57, %v20058_v1  ;;  %13021 = vmatpush1.bf16.msra.mxu0 %v18170_v44  ;;  %13052 = vmatprep.mubr.bf16.mxu0 %v19960_v9  ;;  %v18179_v1 = vld [vmem:[#allocation8 + $0x2c50] ss:$48 sps:$4 sm:$0xff]   ;;  %v18220_v57 = vld [vmem:[#allocation8 + $0x29b4] ss:$48 sps:$4 sm:$0xff]  }
 0x4b2   :  { %v12728_v58 = vpop.f32.mrf.mxu0  ;;  %13061 = vmatprep.subr.bf16.mxu1 %v18175_v46  ;;  %13022 = vmatprep.subr.bf16.mxu0 %v18178_v53  ;;  %v18209_v44 = vld [vmem:[#allocation8 + $0x2a70] ss:$48 sps:$4 sm:$0xff]   ;;  %v18217_v53 = vld [vmem:[#allocation8 + $0x2a14] ss:$48 sps:$4 sm:$0xff]  }
 0x4b3   :  { %v12729_v61 = vadd.f32 %v12728_v58, %v20061_v17  ;;  %v12767_v62 = vpop.f32.mrf.mxu1  ;;  %13012 = vmatmul.mubr.bf16.vlgmr.msra.gmra.mxu1 %v19964_v11  ;;  %v18190_v17 = vld [vmem:[#allocation8 + $0x2594] ss:$48 sps:$4 sm:$0xff]   ;;  %v18212_v46 = vld [vmem:[#allocation8 + $0x2410] ss:$48 sps:$4 sm:$0xff]  }
 0x4b4   :  { %v20068_v63 = vadd.f32 %v12767_v62, %v12727_v60  ;;  %v12730_v0 = vpop.f32.mrf.mxu0  ;;  %13062 = vmatpush1.bf16.msra.mxu1 %v18173_v55  ;;  %13093 = vmatprep.mubr.bf16.mxu1 %v19966_v15  ;;  %v18215_v55 = vld [vmem:[#allocation8 + $0x2a10] ss:$48 sps:$4 sm:$0xff]   ;;  %v18232_v62 = vld [vmem:[#allocation8 + $0x28f4] ss:$48 sps:$4 sm:$0xff]  }
 0x4b5   :  { %v12769_v2 = vpop.f32.mrf.mxu1  ;;  %13023 = vmatpush1.bf16.msra.mxu0 %v18176_v54  ;;  %13063 = vmatprep.subr.bf16.mxu1 %v18181_v56  ;;  %v18218_v60 = vld [vmem:[#allocation8 + $0x29b0] ss:$48 sps:$4 sm:$0xff]   ;;  %v18223_v54 = vld [vmem:[#allocation8 + $0x2fb4] ss:$48 sps:$4 sm:$0xff]  }
 0x4b6   :  { %v20071_v10 = vadd.f32 %v12769_v2, %v12729_v61  ;;  %v12731_v12 = vpop.f32.mrf.mxu0  ;;  %13024 = vmatprep.subr.bf16.mxu0 %v18184_v59  ;;  %v18226_v56 = vld [vmem:[#allocation8 + $0x2954] ss:$48 sps:$4 sm:$0xff]   ;;  %v18221_v58 = vld [vmem:[#allocation8 + $0x2fb0] ss:$48 sps:$4 sm:$0xff]  }
 0x4b7   :  { %v12771_v14 = vpop.f32.mrf.mxu1  ;;  %v18224_v59 = vld [vmem:[#allocation8 + $0x2950] ss:$48 sps:$4 sm:$0xff]   ;;  %v18229_v61 = vld [vmem:[#allocation8 + $0x2f54] ss:$48 sps:$4 sm:$0xff]  }
 0x4b8   :  { %v14250_v18 = vmax.f32 %v20021_v7, %v20071_v10  ;;  %13064 = vmatpush1.bf16.msra.mxu1 %v18179_v1  ;;  %v18227_v0 = vld [vmem:[#allocation8 + $0x2f50] ss:$48 sps:$4 sm:$0xff]   ;;  %v18235_v2 = vld [vmem:[#allocation8 + $0x2ef4] ss:$48 sps:$4 sm:$0xff]   ;;  %v19546_v7 = vld [vmem:[#allocation8 + $0x2aec] ss:$48 sps:$4 sm:$0xff]  }
 0x4b9   :  { %v12772_v24 = vpop.f32.mrf.mxu1  ;;  %13025 = vmatpush1.bf16.msra.mxu0 %v18182_v4  ;;  %13065 = vmatprep.subr.bf16.mxu1 %v18187_v6  ;;  %v18230_v1 = vld [vmem:[#allocation8 + $0x28f0] ss:$48 sps:$4 sm:$0xff]   ;;  %v18238_v4 = vld [vmem:[#allocation8 + $0x2894] ss:$48 sps:$4 sm:$0xff]   ;;  %v19541_v10 = vld [vmem:[#allocation8 + $0x3148] ss:$48 sps:$4 sm:$0xff]  }
 0x4ba   :  { %13026 = vmatprep.subr.bf16.mxu0 %v18190_v17  ;;  %v18233_v6 = vld [vmem:[#allocation8 + $0x2ef0] ss:$48 sps:$4 sm:$0xff]   ;;  %v18241_v17 = vld [vmem:[#allocation8 + $0x2e94] ss:$48 sps:$4 sm:$0xff]  }
 0x4bb   :  { %v18236_v12 = vld [vmem:[#allocation8 + $0x2890] ss:$48 sps:$4 sm:$0xff]   ;;  %v18244_v14 = vld [vmem:[#allocation8 + $0x2834] ss:$48 sps:$4 sm:$0xff]  }
 0x4bc   :  { %13066 = vmatpush1.bf16.msra.mxu1 %v18185_v30  ;;  %v18239_v30 = vld [vmem:[#allocation8 + $0x2e90] ss:$48 sps:$4 sm:$0xff]  }
 0x4bd   :  { %13027 = vmatpush1.bf16.msra.mxu0 %v18188_v21  ;;  %13067 = vmatprep.subr.bf16.mxu1 %v18193_v28  ;;  %v18242_v24 = vld [vmem:[#allocation8 + $0x2830] ss:$48 sps:$4 sm:$0xff]   ;;  %v18247_v21 = vld [vmem:[#allocation8 + $0x2e34] ss:$48 sps:$4 sm:$0xff]  }
 0x4be   :  { %13028 = vmatprep.subr.bf16.mxu0 %v18196_v47  ;;  %v18250_v28 = vld [vmem:[#allocation8 + $0x27d4] ss:$48 sps:$4 sm:$0xff]   ;;  %v18245_v47 = vld [vmem:[#allocation8 + $0x2e30] ss:$48 sps:$4 sm:$0xff]  }
 0x4c0   :  { %13068 = vmatpush1.bf16.msra.mxu1 %v18191_v29  ;;  %v18248_v29 = vld [vmem:[#allocation8 + $0x27d0] ss:$48 sps:$4 sm:$0xff]  }
 0x4c1   :  { %13029 = vmatpush1.bf16.msra.mxu0 %v18194_v37  ;;  %13069 = vmatprep.subr.bf16.mxu1 %v18199_v31  ;;  %v18253_v37 = vld [vmem:[#allocation8 + $0x2dd4] ss:$48 sps:$4 sm:$0xff]  }
 0x4c2   :  { %13030 = vmatprep.subr.bf16.mxu0 %v18202_v39  ;;  %v18256_v31 = vld [vmem:[#allocation8 + $0x2774] ss:$48 sps:$4 sm:$0xff]   ;;  %v18251_v39 = vld [vmem:[#allocation8 + $0x2dd0] ss:$48 sps:$4 sm:$0xff]  }
 0x4c4   :  { %13070 = vmatpush1.bf16.msra.mxu1 %v18197_v33  ;;  %v18254_v33 = vld [vmem:[#allocation8 + $0x2770] ss:$48 sps:$4 sm:$0xff]  }
 0x4c5   :  { %13031 = vmatpush1.bf16.msra.mxu0 %v18200_v34  ;;  %13071 = vmatprep.subr.bf16.mxu1 %v18205_v35  ;;  %v18259_v34 = vld [vmem:[#allocation8 + $0x2d74] ss:$48 sps:$4 sm:$0xff]  }
 0x4c6   :  { %13032 = vmatprep.subr.bf16.mxu0 %v18208_v36  ;;  %v18262_v35 = vld [vmem:[#allocation8 + $0x2714] ss:$48 sps:$4 sm:$0xff]   ;;  %v18257_v36 = vld [vmem:[#allocation8 + $0x2d70] ss:$48 sps:$4 sm:$0xff]  }
 0x4c8   :  { %13072 = vmatpush1.bf16.msra.mxu1 %v18203_v38  ;;  %v18260_v38 = vld [vmem:[#allocation8 + $0x2710] ss:$48 sps:$4 sm:$0xff]  }
 0x4c9   :  { %13033 = vmatpush1.bf16.msra.mxu0 %v18206_v52  ;;  %13073 = vmatprep.subr.bf16.mxu1 %v18211_v41  ;;  %v18265_v52 = vld [vmem:[#allocation8 + $0x2d14] ss:$48 sps:$4 sm:$0xff]  }
 0x4ca   :  { %13034 = vmatprep.subr.bf16.mxu0 %v18214_v49  ;;  %v18268_v41 = vld [vmem:[#allocation8 + $0x32b4] ss:$48 sps:$4 sm:$0xff]   ;;  %v18263_v49 = vld [vmem:[#allocation8 + $0x2d10] ss:$48 sps:$4 sm:$0xff]  }
 0x4cc   :  { %13074 = vmatpush1.bf16.msra.mxu1 %v18209_v44  ;;  %v18266_v44 = vld [vmem:[#allocation8 + $0x32b0] ss:$48 sps:$4 sm:$0xff]  }
 0x4cd   :  { %13035 = vmatpush1.bf16.msra.mxu0 %v18212_v46  ;;  %13075 = vmatprep.subr.bf16.mxu1 %v18217_v53  ;;  %v18271_v46 = vld [vmem:[#allocation8 + $0x2bc] ss:$48 sps:$4 sm:$0xff]   ;;  %v18274_v53 = vld [vmem:[#allocation8 + $0x3254] ss:$48 sps:$4 sm:$0xff]  }
 0x4ce   :  { %13036 = vmatprep.subr.bf16.mxu0 %v18220_v57 }
 0x4d0   :  { %13076 = vmatpush1.bf16.msra.mxu1 %v18215_v55  ;;  %v18269_v55 = vld [vmem:[#allocation8 + $0x2b8] ss:$48 sps:$4 sm:$0xff]  }
 0x4d1   :  { %13037 = vmatpush2.bf16.msra.mxu0 %v18218_v60  ;;  %13077 = vmatprep.subr.bf16.mxu1 %v18223_v54  ;;  %v18272_v60 = vld [vmem:[#allocation8 + $0x3250] ss:$48 sps:$4 sm:$0xff]   ;;  %v18277_v54 = vld [vmem:[#allocation8 + $0x25c] ss:$48 sps:$4 sm:$0xff]  }
 0x4d2   :  { %13038 = vmatprep.subr.bf16.mxu0 %v18226_v56 }
 0x4d4   :  { %13078 = vmatpush2.bf16.msra.mxu1 %v18221_v58  ;;  %v18280_v58 = vld [vmem:[#allocation8 + $0x31f4] ss:$48 sps:$4 sm:$0xff]  }
 0x4d5   :  { %13039 = vmatpush2.bf16.msra.mxu0 %v18224_v59  ;;  %13079 = vmatprep.subr.bf16.mxu1 %v18229_v61 }
 0x4d6   :  { %13040 = vmatprep.subr.bf16.mxu0 %v18232_v62 }
 0x4d8   :  { %13080 = vmatpush2.bf16.msra.mxu1 %v18227_v0  ;;  %v18275_v0 = vld [vmem:[#allocation8 + $0x258] ss:$48 sps:$4 sm:$0xff]  }
 0x4d9   :  { %13041 = vmatpush2.bf16.msra.mxu0 %v18230_v1  ;;  %13081 = vmatprep.subr.bf16.mxu1 %v18235_v2  ;;  %v18278_v2 = vld [vmem:[#allocation8 + $0x31f0] ss:$48 sps:$4 sm:$0xff]  }
 0x4da   :  { %13042 = vmatprep.subr.bf16.mxu0 %v18238_v4  ;;  %v18283_v4 = vld [vmem:[#allocation8 + $0x1fc] ss:$48 sps:$4 sm:$0xff]  }
 0x4dc   :  { %13082 = vmatpush2.bf16.msra.mxu1 %v18233_v6 }
 0x4dd   :  { %13043 = vmatpush2.bf16.msra.mxu0 %v18236_v12  ;;  %13083 = vmatprep.subr.bf16.mxu1 %v18241_v17  ;;  %v18286_v17 = vld [vmem:[#allocation8 + $0x3194] ss:$48 sps:$4 sm:$0xff]  }
 0x4de   :  { %13044 = vmatprep.subr.bf16.mxu0 %v18244_v14 }
 0x4e0   :  { %13084 = vmatpush2.bf16.msra.mxu1 %v18239_v30  ;;  %v18281_v30 = vld [vmem:[#allocation8 + $0x1f8] ss:$48 sps:$4 sm:$0xff]  }
 0x4e1   :  { %13045 = vmatpush2.bf16.msra.mxu0 %v18242_v24  ;;  %13085 = vmatprep.subr.bf16.mxu1 %v18247_v21  ;;  %v18284_v21 = vld [vmem:[#allocation8 + $0x3190] ss:$48 sps:$4 sm:$0xff]  }
 0x4e2   :  { %13046 = vmatprep.subr.bf16.mxu0 %v18250_v28  ;;  %v18289_v28 = vld [vmem:[#allocation8 + $0x19c] ss:$48 sps:$4 sm:$0xff]  }
 0x4e4   :  { %13086 = vmatpush2.bf16.msra.mxu1 %v18245_v47  ;;  %v18292_v47 = vld [vmem:[#allocation8 + $0x3134] ss:$48 sps:$4 sm:$0xff]  }
 0x4e5   :  { %13047 = vmatpush2.bf16.msra.mxu0 %v18248_v29  ;;  %13087 = vmatprep.subr.bf16.mxu1 %v18253_v37  ;;  %v18287_v29 = vld [vmem:[#allocation8 + $0x198] ss:$48 sps:$4 sm:$0xff]   ;;  %v18290_v37 = vld [vmem:[#allocation8 + $0x3130] ss:$48 sps:$4 sm:$0xff]  }
 0x4e6   :  { %13048 = vmatprep.subr.bf16.mxu0 %v18256_v31  ;;  %v18295_v31 = vld [vmem:[#allocation8 + $0x13c] ss:$48 sps:$4 sm:$0xff]  }
 0x4e8   :  { %13088 = vmatpush2.bf16.msra.mxu1 %v18251_v39  ;;  %v18298_v39 = vld [vmem:[#allocation8 + $0x30d4] ss:$48 sps:$4 sm:$0xff]  }
 0x4e9   :  { %13049 = vmatpush2.bf16.msra.mxu0 %v18254_v33  ;;  %13089 = vmatprep.subr.bf16.mxu1 %v18259_v34  ;;  %v18293_v33 = vld [vmem:[#allocation8 + $0x138] ss:$48 sps:$4 sm:$0xff]   ;;  %v18296_v34 = vld [vmem:[#allocation8 + $0x30d0] ss:$48 sps:$4 sm:$0xff]  }
 0x4ea   :  { %13050 = vmatprep.subr.bf16.mxu0 %v18262_v35  ;;  %v18301_v35 = vld [vmem:[#allocation8 + $0xdc] ss:$48 sps:$4 sm:$0xff]  }
 0x4ec   :  { %13090 = vmatpush2.bf16.msra.mxu1 %v18257_v36  ;;  %v18304_v36 = vld [vmem:[#allocation8 + $0x3074] ss:$48 sps:$4 sm:$0xff]  }
 0x4ed   :  { %13051 = vmatpush2.bf16.msra.mxu0 %v18260_v38  ;;  %13091 = vmatprep.subr.bf16.mxu1 %v18265_v52  ;;  %v18299_v38 = vld [vmem:[#allocation8 + $0xd8] ss:$48 sps:$4 sm:$0xff]   ;;  %v18302_v52 = vld [vmem:[#allocation8 + $0x3070] ss:$48 sps:$4 sm:$0xff]  }
 0x4ee   :  { %13102 = vmatprep.subr.bf16.mxu0 %v18268_v41  ;;  %v18307_v41 = vld [vmem:[#allocation8 + $0x7c] ss:$48 sps:$4 sm:$0xff]  }
 0x4f0   :  { %v12808_v57 = vpop.f32.mrf.mxu0  ;;  %13053 = vmatmul.mubr.bf16.vlgmr.msra.gmra.mxu0 %v19970_v40  ;;  %13092 = vmatpush2.bf16.msra.mxu1 %v18263_v49  ;;  %v18310_v49 = vld [vmem:[#allocation8 + $0x3014] ss:$48 sps:$4 sm:$0xff]  }
 0x4f1   :  { %13103 = vmatpush1.bf16.msra.mxu0 %v18266_v44  ;;  %13134 = vmatprep.mubr.bf16.mxu0 %v19972_v43  ;;  %v18305_v44 = vld [vmem:[#allocation8 + $0x78] ss:$48 sps:$4 sm:$0xff]  }
 0x4f2   :  { %v12810_v56 = vpop.f32.mrf.mxu0  ;;  %13143 = vmatprep.subr.bf16.mxu1 %v18271_v46  ;;  %13104 = vmatprep.subr.bf16.mxu0 %v18274_v53  ;;  %v18308_v46 = vld [vmem:[#allocation8 + $0x3010] ss:$48 sps:$4 sm:$0xff]   ;;  %v18313_v53 = vld [vmem:[#allocation8 + $0x1c] ss:$48 sps:$4 sm:$0xff]  }
 0x4f3   :  { %v12849_v59 = vpop.f32.mrf.mxu1  ;;  %13094 = vmatmul.mubr.bf16.vlgmr.msra.gmra.mxu1 %v19976_v48 }
 0x4f4   :  { %v20078_v61 = vadd.f32 %v12849_v59, %v12808_v57  ;;  %v12812_v62 = vpop.f32.mrf.mxu0  ;;  %13144 = vmatpush1.bf16.msra.mxu1 %v18269_v55  ;;  %13175 = vmatprep.mubr.bf16.mxu1 %v19928_v8  ;;  %v18316_v57 = vld [vmem:[#allocation8 + $0x35b4] ss:$48 sps:$4 sm:$0xff]   ;;  %v18311_v55 = vld [vmem:[#allocation8 + $0x18] ss:$48 sps:$4 sm:$0xff]   ;;  %v18320_v59 = vld [vmem:[#allocation8 + $0x3550] ss:$48 sps:$4 sm:$0xff]  }
 0x4f5   :  { %v12851_v1 = vpop.f32.mrf.mxu1  ;;  %13105 = vmatpush1.bf16.msra.mxu0 %v18272_v60  ;;  %13145 = vmatprep.subr.bf16.mxu1 %v18277_v54  ;;  %v18314_v60 = vld [vmem:[#allocation8 + $0x35b0] ss:$48 sps:$4 sm:$0xff]   ;;  %v18319_v54 = vld [vmem:[#allocation8 + $0x5bc] ss:$48 sps:$4 sm:$0xff]  }
 0x4f6   :  { %v20081_v6 = vadd.f32 %v12851_v1, %v12810_v56  ;;  %v12813_v12 = vpop.f32.mrf.mxu0  ;;  %13106 = vmatprep.subr.bf16.mxu0 %v18280_v58  ;;  %v18322_v56 = vld [vmem:[#allocation8 + $0x3554] ss:$48 sps:$4 sm:$0xff]   ;;  %v18317_v58 = vld [vmem:[#allocation8 + $0x5b8] ss:$48 sps:$4 sm:$0xff]   ;;  %v18325_v62 = vld [vmem:[#allocation8 + $0x55c] ss:$48 sps:$4 sm:$0xff]  }
 0x4f7   :  { %v12853_v14 = vpop.f32.mrf.mxu1  ;;  %v18323_v1 = vld [vmem:[#allocation8 + $0x558] ss:$48 sps:$4 sm:$0xff]   ;;  %v18334_v12 = vld [vmem:[#allocation8 + $0x3494] ss:$48 sps:$4 sm:$0xff]  }
 0x4f8   :  { %13146 = vmatpush1.bf16.msra.mxu1 %v18275_v0  ;;  %v18328_v0 = vld [vmem:[#allocation8 + $0x34f4] ss:$48 sps:$4 sm:$0xff]   ;;  %v18332_v14 = vld [vmem:[#allocation8 + $0x3490] ss:$48 sps:$4 sm:$0xff]  }
 0x4f9   :  { %v12854_v24 = vpop.f32.mrf.mxu1  ;;  %13107 = vmatpush1.bf16.msra.mxu0 %v18278_v2  ;;  %13147 = vmatprep.subr.bf16.mxu1 %v18283_v4  ;;  %v18326_v2 = vld [vmem:[#allocation8 + $0x34f0] ss:$48 sps:$4 sm:$0xff]   ;;  %v18331_v4 = vld [vmem:[#allocation8 + $0x4fc] ss:$48 sps:$4 sm:$0xff]  }
 0x4fa   :  { %13108 = vmatprep.subr.bf16.mxu0 %v18286_v17  ;;  %v18329_v17 = vld [vmem:[#allocation8 + $0x4f8] ss:$48 sps:$4 sm:$0xff]   ;;  %v18340_v24 = vld [vmem:[#allocation8 + $0x3434] ss:$48 sps:$4 sm:$0xff]  }
 0x4fc   :  { %13148 = vmatpush1.bf16.msra.mxu1 %v18281_v30  ;;  %v18337_v30 = vld [vmem:[#allocation8 + $0x49c] ss:$48 sps:$4 sm:$0xff]  }
 0x4fd   :  { %13109 = vmatpush1.bf16.msra.mxu0 %v18284_v21  ;;  %13149 = vmatprep.subr.bf16.mxu1 %v18289_v28  ;;  %v18335_v21 = vld [vmem:[#allocation8 + $0x498] ss:$48 sps:$4 sm:$0xff]   ;;  %v18338_v28 = vld [vmem:[#allocation8 + $0x3430] ss:$48 sps:$4 sm:$0xff]  }
 0x4fe   :  { %13110 = vmatprep.subr.bf16.mxu0 %v18292_v47  ;;  %v18343_v47 = vld [vmem:[#allocation8 + $0x43c] ss:$48 sps:$4 sm:$0xff]  }
 0x500   :  { %13150 = vmatpush1.bf16.msra.mxu1 %v18287_v29  ;;  %v18346_v29 = vld [vmem:[#allocation8 + $0x33d4] ss:$48 sps:$4 sm:$0xff]  }
 0x501   :  { %13111 = vmatpush1.bf16.msra.mxu0 %v18290_v37  ;;  %13151 = vmatprep.subr.bf16.mxu1 %v18295_v31  ;;  %v18341_v37 = vld [vmem:[#allocation8 + $0x438] ss:$48 sps:$4 sm:$0xff]   ;;  %v18344_v31 = vld [vmem:[#allocation8 + $0x33d0] ss:$48 sps:$4 sm:$0xff]  }
 0x502   :  { %13112 = vmatprep.subr.bf16.mxu0 %v18298_v39  ;;  %v18349_v39 = vld [vmem:[#allocation8 + $0x3dc] ss:$48 sps:$4 sm:$0xff]  }
 0x504   :  { %13152 = vmatpush1.bf16.msra.mxu1 %v18293_v33  ;;  %v18352_v33 = vld [vmem:[#allocation8 + $0x3374] ss:$48 sps:$4 sm:$0xff]  }
 0x505   :  { %13113 = vmatpush1.bf16.msra.mxu0 %v18296_v34  ;;  %13153 = vmatprep.subr.bf16.mxu1 %v18301_v35  ;;  %v18347_v34 = vld [vmem:[#allocation8 + $0x3d8] ss:$48 sps:$4 sm:$0xff]   ;;  %v18350_v35 = vld [vmem:[#allocation8 + $0x3370] ss:$48 sps:$4 sm:$0xff]  }
 0x506   :  { %13114 = vmatprep.subr.bf16.mxu0 %v18304_v36  ;;  %v18355_v36 = vld [vmem:[#allocation8 + $0x37c] ss:$48 sps:$4 sm:$0xff]  }
 0x508   :  { %13154 = vmatpush1.bf16.msra.mxu1 %v18299_v38  ;;  %v18358_v38 = vld [vmem:[#allocation8 + $0x3314] ss:$48 sps:$4 sm:$0xff]  }
 0x509   :  { %13115 = vmatpush1.bf16.msra.mxu0 %v18302_v52  ;;  %13155 = vmatprep.subr.bf16.mxu1 %v18307_v41  ;;  %v18353_v52 = vld [vmem:[#allocation8 + $0x378] ss:$48 sps:$4 sm:$0xff]   ;;  %v18356_v41 = vld [vmem:[#allocation8 + $0x3310] ss:$48 sps:$4 sm:$0xff]  }
 0x50a   :  { %13116 = vmatprep.subr.bf16.mxu0 %v18310_v49  ;;  %v18361_v49 = vld [vmem:[#allocation8 + $0x31c] ss:$48 sps:$4 sm:$0xff]  }
 0x50c   :  { %13156 = vmatpush1.bf16.msra.mxu1 %v18305_v44  ;;  %v18364_v44 = vld [vmem:[#allocation8 + $0x8bc] ss:$48 sps:$4 sm:$0xff]  }
 0x50d   :  { %13117 = vmatpush1.bf16.msra.mxu0 %v18308_v46  ;;  %13157 = vmatprep.subr.bf16.mxu1 %v18313_v53  ;;  %v18359_v46 = vld [vmem:[#allocation8 + $0x318] ss:$48 sps:$4 sm:$0xff]  }
 0x50e   :  { %13118 = vmatprep.subr.bf16.mxu0 %v18316_v57  ;;  %v18362_v53 = vld [vmem:[#allocation8 + $0x8b8] ss:$48 sps:$4 sm:$0xff]   ;;  %v18367_v57 = vld [vmem:[#allocation8 + $0xebc] ss:$48 sps:$4 sm:$0xff]  }
 0x510   :  { %13158 = vmatpush1.bf16.msra.mxu1 %v18311_v55  ;;  %v18370_v55 = vld [vmem:[#allocation8 + $0x85c] ss:$48 sps:$4 sm:$0xff]  }
 0x511   :  { %13119 = vmatpush2.bf16.msra.mxu0 %v18314_v60  ;;  %13159 = vmatprep.subr.bf16.mxu1 %v18319_v54  ;;  %v18365_v54 = vld [vmem:[#allocation8 + $0xeb8] ss:$48 sps:$4 sm:$0xff]  }
 0x512   :  { %13120 = vmatprep.subr.bf16.mxu0 %v18322_v56 }
 0x514   :  { %13160 = vmatpush2.bf16.msra.mxu1 %v18317_v58  ;;  %v18368_v58 = vld [vmem:[#allocation8 + $0x858] ss:$48 sps:$4 sm:$0xff]  }
 0x515   :  { %13121 = vmatpush2.bf16.msra.mxu0 %v18320_v59  ;;  %13161 = vmatprep.subr.bf16.mxu1 %v18325_v62  ;;  %v18373_v59 = vld [vmem:[#allocation8 + $0xe5c] ss:$48 sps:$4 sm:$0xff]  }
 0x516   :  { %13122 = vmatprep.subr.bf16.mxu0 %v18328_v0  ;;  %v18376_v0 = vld [vmem:[#allocation8 + $0x7fc] ss:$48 sps:$4 sm:$0xff]  }
 0x518   :  { %13162 = vmatpush2.bf16.msra.mxu1 %v18323_v1 }
 0x519   :  { %13123 = vmatpush2.bf16.msra.mxu0 %v18326_v2  ;;  %13163 = vmatprep.subr.bf16.mxu1 %v18331_v4 }
 0x51a   :  { %13124 = vmatprep.subr.bf16.mxu0 %v18334_v12 }
 0x51c   :  { %13164 = vmatpush2.bf16.msra.mxu1 %v18329_v17 }
 0x51d   :  { %13125 = vmatpush2.bf16.msra.mxu0 %v18332_v14  ;;  %13165 = vmatprep.subr.bf16.mxu1 %v18337_v30  ;;  %v18374_v14 = vld [vmem:[#allocation8 + $0x7f8] ss:$48 sps:$4 sm:$0xff]   ;;  %v18379_v30 = vld [vmem:[#allocation8 + $0xdfc] ss:$48 sps:$4 sm:$0xff]  }
 0x51e   :  { %13126 = vmatprep.subr.bf16.mxu0 %v18340_v24 }
 0x520   :  { %13166 = vmatpush2.bf16.msra.mxu1 %v18335_v21 }
 0x521   :  { %13127 = vmatpush2.bf16.msra.mxu0 %v18338_v28  ;;  %13167 = vmatprep.subr.bf16.mxu1 %v18343_v47  ;;  %v18377_v47 = vld [vmem:[#allocation8 + $0xdf8] ss:$48 sps:$4 sm:$0xff]  }
 0x522   :  { %13128 = vmatprep.subr.bf16.mxu0 %v18346_v29 }
 0x524   :  { %13168 = vmatpush2.bf16.msra.mxu1 %v18341_v37  ;;  %v18380_v37 = vld [vmem:[#allocation8 + $0x798] ss:$48 sps:$4 sm:$0xff]  }
 0x525   :  { %13129 = vmatpush2.bf16.msra.mxu0 %v18344_v31  ;;  %13169 = vmatprep.subr.bf16.mxu1 %v18349_v39  ;;  %v18385_v31 = vld [vmem:[#allocation8 + $0xd9c] ss:$48 sps:$4 sm:$0xff]  }
 0x526   :  { %13130 = vmatprep.subr.bf16.mxu0 %v18352_v33  ;;  %v18388_v39 = vld [vmem:[#allocation8 + $0x73c] ss:$48 sps:$4 sm:$0xff]   ;;  %v18383_v33 = vld [vmem:[#allocation8 + $0xd98] ss:$48 sps:$4 sm:$0xff]  }
 0x528   :  { %13170 = vmatpush2.bf16.msra.mxu1 %v18347_v34  ;;  %v18386_v34 = vld [vmem:[#allocation8 + $0x738] ss:$48 sps:$4 sm:$0xff]  }
 0x529   :  { %13131 = vmatpush2.bf16.msra.mxu0 %v18350_v35  ;;  %13171 = vmatprep.subr.bf16.mxu1 %v18355_v36  ;;  %v18391_v35 = vld [vmem:[#allocation8 + $0xd3c] ss:$48 sps:$4 sm:$0xff]  }
 0x52a   :  { %13132 = vmatprep.subr.bf16.mxu0 %v18358_v38  ;;  %v18394_v36 = vld [vmem:[#allocation8 + $0x6dc] ss:$48 sps:$4 sm:$0xff]   ;;  %v18389_v38 = vld [vmem:[#allocation8 + $0xd38] ss:$48 sps:$4 sm:$0xff]  }
 0x52c   :  { %13172 = vmatpush2.bf16.msra.mxu1 %v18353_v52  ;;  %v18392_v52 = vld [vmem:[#allocation8 + $0x6d8] ss:$48 sps:$4 sm:$0xff]  }
 0x52d   :  { %13133 = vmatpush2.bf16.msra.mxu0 %v18356_v41  ;;  %13173 = vmatprep.subr.bf16.mxu1 %v18361_v49  ;;  %v18397_v41 = vld [vmem:[#allocation8 + $0xcdc] ss:$48 sps:$4 sm:$0xff]  }
 0x52e   :  { %13184 = vmatprep.subr.bf16.mxu0 %v18364_v44  ;;  %v18400_v49 = vld [vmem:[#allocation8 + $0x67c] ss:$48 sps:$4 sm:$0xff]   ;;  %v18395_v44 = vld [vmem:[#allocation8 + $0xcd8] ss:$48 sps:$4 sm:$0xff]  }
 0x530   :  { %v12890_v60 = vpop.f32.mrf.mxu0  ;;  %13135 = vmatmul.mubr.bf16.vlgmr.msra.gmra.mxu0 %v19986_v32  ;;  %13174 = vmatpush2.bf16.msra.mxu1 %v18359_v46  ;;  %v18398_v46 = vld [vmem:[#allocation8 + $0x678] ss:$48 sps:$4 sm:$0xff]  }
 0x531   :  { %v12891_v56 = vadd.f32 %v12890_v60, %v20078_v61  ;;  %13185 = vmatpush1.bf16.msra.mxu0 %v18362_v53  ;;  %13216 = vmatprep.mubr.bf16.mxu0 %v19934_v3  ;;  %v18371_v61 = vld [vmem:[#allocation8 + $0xe58] ss:$48 sps:$4 sm:$0xff]   ;;  %v18403_v53 = vld [vmem:[#allocation8 + $0xc7c] ss:$48 sps:$4 sm:$0xff]  }
 0x532   :  { %v12892_v62 = vpop.f32.mrf.mxu0  ;;  %13225 = vmatprep.subr.bf16.mxu1 %v18367_v57  ;;  %13186 = vmatprep.subr.bf16.mxu0 %v18370_v55  ;;  %v18406_v57 = vld [vmem:[#allocation8 + $0x61c] ss:$48 sps:$4 sm:$0xff]   ;;  %v18401_v55 = vld [vmem:[#allocation8 + $0xc78] ss:$48 sps:$4 sm:$0xff]  }
 0x533   :  { %v12893_v1 = vadd.f32 %v12892_v62, %v20081_v6  ;;  %v12931_v2 = vpop.f32.mrf.mxu1  ;;  %13176 = vmatmul.mubr.bf16.vlgmr.msra.gmra.mxu1 %v19931_v13  ;;  %v18382_v6 = vld [vmem:[#allocation8 + $0x79c] ss:$48 sps:$4 sm:$0xff]   ;;  %v18404_v60 = vld [vmem:[#allocation8 + $0x618] ss:$48 sps:$4 sm:$0xff]  }
 0x534   :  { %v20088_v4 = vadd.f32 %v12931_v2, %v12891_v56  ;;  %v12894_v12 = vpop.f32.mrf.mxu0  ;;  %13226 = vmatpush1.bf16.msra.mxu1 %v18365_v54  ;;  %13257 = vmatprep.mubr.bf16.mxu1 %v19936_v20  ;;  %v18409_v54 = vld [vmem:[#allocation8 + $0xc1c] ss:$48 sps:$4 sm:$0xff]   ;;  %v18416_v2 = vld [vmem:[#allocation8 + $0xb58] ss:$48 sps:$4 sm:$0xff]  }
 0x535   :  { %v12933_v17 = vpop.f32.mrf.mxu1  ;;  %13187 = vmatpush1.bf16.msra.mxu0 %v18368_v58  ;;  %13227 = vmatprep.subr.bf16.mxu1 %v18373_v59  ;;  %v18412_v56 = vld [vmem:[#allocation8 + $0xbbc] ss:$48 sps:$4 sm:$0xff]   ;;  %v18407_v58 = vld [vmem:[#allocation8 + $0xc18] ss:$48 sps:$4 sm:$0xff]  }
 0x536   :  { %v20091_v24 = vadd.f32 %v12933_v17, %v12893_v1  ;;  %v12895_v21 = vpop.f32.mrf.mxu0  ;;  %13188 = vmatprep.subr.bf16.mxu0 %v18376_v0  ;;  %v18410_v59 = vld [vmem:[#allocation8 + $0xbb8] ss:$48 sps:$4 sm:$0xff]   ;;  %v18415_v62 = vld [vmem:[#allocation8 + $0x11bc] ss:$48 sps:$4 sm:$0xff]  }
 0x537   :  { %v12935_v28 = vpop.f32.mrf.mxu1  ;;  %v18418_v0 = vld [vmem:[#allocation8 + $0xb5c] ss:$48 sps:$4 sm:$0xff]   ;;  %v18413_v1 = vld [vmem:[#allocation8 + $0x11b8] ss:$48 sps:$4 sm:$0xff]  }
 0x538   :  { %13228 = vmatpush1.bf16.msra.mxu1 %v18371_v61  ;;  %v18421_v12 = vld [vmem:[#allocation8 + $0x115c] ss:$48 sps:$4 sm:$0xff]   ;;  %v18419_v17 = vld [vmem:[#allocation8 + $0x1158] ss:$48 sps:$4 sm:$0xff]  }
 0x539   :  { %v12936_v29 = vpop.f32.mrf.mxu1  ;;  %13189 = vmatpush1.bf16.msra.mxu0 %v18374_v14  ;;  %13229 = vmatprep.subr.bf16.mxu1 %v18379_v30  ;;  %v18424_v61 = vld [vmem:[#allocation8 + $0xafc] ss:$48 sps:$4 sm:$0xff]   ;;  %v18422_v14 = vld [vmem:[#allocation8 + $0xaf8] ss:$48 sps:$4 sm:$0xff]  }
 0x53a   :  { %13190 = vmatprep.subr.bf16.mxu0 %v18382_v6  ;;  %v18427_v30 = vld [vmem:[#allocation8 + $0x10fc] ss:$48 sps:$4 sm:$0xff]   ;;  %v18425_v6 = vld [vmem:[#allocation8 + $0x10f8] ss:$48 sps:$4 sm:$0xff]  }
 0x53b   :  { %v18430_v21 = vld [vmem:[#allocation8 + $0xa9c] ss:$48 sps:$4 sm:$0xff]   ;;  %v18428_v28 = vld [vmem:[#allocation8 + $0xa98] ss:$48 sps:$4 sm:$0xff]  }
 0x53c   :  { %13230 = vmatpush1.bf16.msra.mxu1 %v18377_v47  ;;  %v18433_v47 = vld [vmem:[#allocation8 + $0x109c] ss:$48 sps:$4 sm:$0xff]  }
 0x53d   :  { %13191 = vmatpush1.bf16.msra.mxu0 %v18380_v37  ;;  %13231 = vmatprep.subr.bf16.mxu1 %v18385_v31  ;;  %v18436_v29 = vld [vmem:[#allocation8 + $0xa3c] ss:$48 sps:$4 sm:$0xff]   ;;  %v18431_v37 = vld [vmem:[#allocation8 + $0x1098] ss:$48 sps:$4 sm:$0xff]  }
 0x53e   :  { %13192 = vmatprep.subr.bf16.mxu0 %v18388_v39  ;;  %v18434_v31 = vld [vmem:[#allocation8 + $0xa38] ss:$48 sps:$4 sm:$0xff]   ;;  %v18439_v39 = vld [vmem:[#allocation8 + $0x103c] ss:$48 sps:$4 sm:$0xff]  }
 0x540   :  { %13232 = vmatpush1.bf16.msra.mxu1 %v18383_v33  ;;  %v18442_v33 = vld [vmem:[#allocation8 + $0x9dc] ss:$48 sps:$4 sm:$0xff]  }
 0x541   :  { %13193 = vmatpush1.bf16.msra.mxu0 %v18386_v34  ;;  %13233 = vmatprep.subr.bf16.mxu1 %v18391_v35  ;;  %v18437_v34 = vld [vmem:[#allocation8 + $0x1038] ss:$48 sps:$4 sm:$0xff]  }
 0x542   :  { %13194 = vmatprep.subr.bf16.mxu0 %v18394_v36  ;;  %v18440_v35 = vld [vmem:[#allocation8 + $0x9d8] ss:$48 sps:$4 sm:$0xff]   ;;  %v18445_v36 = vld [vmem:[#allocation8 + $0xfdc] ss:$48 sps:$4 sm:$0xff]  }
 0x544   :  { %13234 = vmatpush1.bf16.msra.mxu1 %v18389_v38  ;;  %v18448_v38 = vld [vmem:[#allocation8 + $0x97c] ss:$48 sps:$4 sm:$0xff]  }
 0x545   :  { %13195 = vmatpush1.bf16.msra.mxu0 %v18392_v52  ;;  %13235 = vmatprep.subr.bf16.mxu1 %v18397_v41  ;;  %v18443_v52 = vld [vmem:[#allocation8 + $0xfd8] ss:$48 sps:$4 sm:$0xff]  }
 0x546   :  { %13196 = vmatprep.subr.bf16.mxu0 %v18400_v49  ;;  %v18446_v41 = vld [vmem:[#allocation8 + $0x978] ss:$48 sps:$4 sm:$0xff]   ;;  %v18451_v49 = vld [vmem:[#allocation8 + $0xf7c] ss:$48 sps:$4 sm:$0xff]  }
 0x548   :  { %13236 = vmatpush1.bf16.msra.mxu1 %v18395_v44  ;;  %v18454_v44 = vld [vmem:[#allocation8 + $0x91c] ss:$48 sps:$4 sm:$0xff]  }
 0x549   :  { %13197 = vmatpush1.bf16.msra.mxu0 %v18398_v46  ;;  %13237 = vmatprep.subr.bf16.mxu1 %v18403_v53  ;;  %v18449_v46 = vld [vmem:[#allocation8 + $0xf78] ss:$48 sps:$4 sm:$0xff]  }
 0x54a   :  { %13198 = vmatprep.subr.bf16.mxu0 %v18406_v57  ;;  %v18452_v53 = vld [vmem:[#allocation8 + $0x918] ss:$48 sps:$4 sm:$0xff]   ;;  %v18457_v57 = vld [vmem:[#allocation8 + $0xf1c] ss:$48 sps:$4 sm:$0xff]  }
 0x54c   :  { %13238 = vmatpush1.bf16.msra.mxu1 %v18401_v55  ;;  %v18460_v55 = vld [vmem:[#allocation8 + $0x14bc] ss:$48 sps:$4 sm:$0xff]  }
 0x54d   :  { %13199 = vmatpush1.bf16.msra.mxu0 %v18404_v60  ;;  %13239 = vmatprep.subr.bf16.mxu1 %v18409_v54  ;;  %v18455_v60 = vld [vmem:[#allocation8 + $0xf18] ss:$48 sps:$4 sm:$0xff]  }
 0x54e   :  { %13200 = vmatprep.subr.bf16.mxu0 %v18412_v56  ;;  %v18458_v54 = vld [vmem:[#allocation8 + $0x14b8] ss:$48 sps:$4 sm:$0xff]   ;;  %v18463_v56 = vld [vmem:[#allocation8 + $0x1abc] ss:$48 sps:$4 sm:$0xff]  }
 0x550   :  { %13240 = vmatpush1.bf16.msra.mxu1 %v18407_v58  ;;  %v18466_v58 = vld [vmem:[#allocation8 + $0x145c] ss:$48 sps:$4 sm:$0xff]  }
 0x551   :  { %13201 = vmatpush2.bf16.msra.mxu0 %v18410_v59  ;;  %13241 = vmatprep.subr.bf16.mxu1 %v18415_v62  ;;  %v18461_v62 = vld [vmem:[#allocation8 + $0x1ab8] ss:$48 sps:$4 sm:$0xff]  }
 0x552   :  { %13202 = vmatprep.subr.bf16.mxu0 %v18418_v0 }
 0x554   :  { %13242 = vmatpush2.bf16.msra.mxu1 %v18413_v1  ;;  %v18464_v1 = vld [vmem:[#allocation8 + $0x1458] ss:$48 sps:$4 sm:$0xff]  }
 0x555   :  { %13203 = vmatpush2.bf16.msra.mxu0 %v18416_v2  ;;  %13243 = vmatprep.subr.bf16.mxu1 %v18421_v12  ;;  %v18469_v2 = vld [vmem:[#allocation8 + $0x1a5c] ss:$48 sps:$4 sm:$0xff]  }
 0x556   :  { %13204 = vmatprep.subr.bf16.mxu0 %v18424_v61  ;;  %v18472_v61 = vld [vmem:[#allocation8 + $0x13fc] ss:$48 sps:$4 sm:$0xff]  }
 0x558   :  { %13244 = vmatpush2.bf16.msra.mxu1 %v18419_v17 }
 0x559   :  { %13205 = vmatpush2.bf16.msra.mxu0 %v18422_v14  ;;  %13245 = vmatprep.subr.bf16.mxu1 %v18427_v30 }
 0x55a   :  { %13206 = vmatprep.subr.bf16.mxu0 %v18430_v21 }
 0x55c   :  { %13246 = vmatpush2.bf16.msra.mxu1 %v18425_v6 }
 0x55d   :  { %13207 = vmatpush2.bf16.msra.mxu0 %v18428_v28  ;;  %13247 = vmatprep.subr.bf16.mxu1 %v18433_v47  ;;  %v18470_v28 = vld [vmem:[#allocation8 + $0x13f8] ss:$48 sps:$4 sm:$0xff]   ;;  %v18475_v47 = vld [vmem:[#allocation8 + $0x19fc] ss:$48 sps:$4 sm:$0xff]  }
 0x55e   :  { %13208 = vmatprep.subr.bf16.mxu0 %v18436_v29 }
 0x560   :  { %13248 = vmatpush2.bf16.msra.mxu1 %v18431_v37 }
 0x561   :  { %13209 = vmatpush2.bf16.msra.mxu0 %v18434_v31  ;;  %13249 = vmatprep.subr.bf16.mxu1 %v18439_v39  ;;  %v18473_v39 = vld [vmem:[#allocation8 + $0x19f8] ss:$48 sps:$4 sm:$0xff]  }
 0x562   :  { %13210 = vmatprep.subr.bf16.mxu0 %v18442_v33 }
 0x564   :  { %13250 = vmatpush2.bf16.msra.mxu1 %v18437_v34  ;;  %v18476_v34 = vld [vmem:[#allocation8 + $0x1398] ss:$48 sps:$4 sm:$0xff]  }
 0x565   :  { %13211 = vmatpush2.bf16.msra.mxu0 %v18440_v35  ;;  %13251 = vmatprep.subr.bf16.mxu1 %v18445_v36  ;;  %v18481_v35 = vld [vmem:[#allocation8 + $0x199c] ss:$48 sps:$4 sm:$0xff]  }
 0x566   :  { %13212 = vmatprep.subr.bf16.mxu0 %v18448_v38  ;;  %v18484_v36 = vld [vmem:[#allocation8 + $0x133c] ss:$48 sps:$4 sm:$0xff]   ;;  %v18479_v38 = vld [vmem:[#allocation8 + $0x1998] ss:$48 sps:$4 sm:$0xff]  }
 0x568   :  { %13252 = vmatpush2.bf16.msra.mxu1 %v18443_v52  ;;  %v18482_v52 = vld [vmem:[#allocation8 + $0x1338] ss:$48 sps:$4 sm:$0xff]  }
 0x569   :  { %13213 = vmatpush2.bf16.msra.mxu0 %v18446_v41  ;;  %13253 = vmatprep.subr.bf16.mxu1 %v18451_v49  ;;  %v18487_v41 = vld [vmem:[#allocation8 + $0x193c] ss:$48 sps:$4 sm:$0xff]  }
 0x56a   :  { %13214 = vmatprep.subr.bf16.mxu0 %v18454_v44  ;;  %v18490_v49 = vld [vmem:[#allocation8 + $0x12dc] ss:$48 sps:$4 sm:$0xff]   ;;  %v18485_v44 = vld [vmem:[#allocation8 + $0x1938] ss:$48 sps:$4 sm:$0xff]  }
 0x56c   :  { %13254 = vmatpush2.bf16.msra.mxu1 %v18449_v46  ;;  %v18488_v46 = vld [vmem:[#allocation8 + $0x12d8] ss:$48 sps:$4 sm:$0xff]  }
 0x56d   :  { %13215 = vmatpush2.bf16.msra.mxu0 %v18452_v53  ;;  %13255 = vmatprep.subr.bf16.mxu1 %v18457_v57  ;;  %v18493_v53 = vld [vmem:[#allocation8 + $0x18dc] ss:$48 sps:$4 sm:$0xff]  }
 0x56e   :  { %13266 = vmatprep.subr.bf16.mxu0 %v18460_v55  ;;  %v18496_v57 = vld [vmem:[#allocation8 + $0x127c] ss:$48 sps:$4 sm:$0xff]   ;;  %v18491_v55 = vld [vmem:[#allocation8 + $0x18d8] ss:$48 sps:$4 sm:$0xff]  }
 0x570   :  { %v12972_v59 = vpop.f32.mrf.mxu0  ;;  %13217 = vmatmul.mubr.bf16.vlgmr.msra.gmra.mxu0 %v19938_v23  ;;  %13256 = vmatpush2.bf16.msra.mxu1 %v18455_v60  ;;  %v18494_v60 = vld [vmem:[#allocation8 + $0x1278] ss:$48 sps:$4 sm:$0xff]  }
 0x571   :  { %v12973_v0 = vadd.f32 %v12972_v59, %v20088_v4  ;;  %13267 = vmatpush1.bf16.msra.mxu0 %v18458_v54  ;;  %13298 = vmatprep.mubr.bf16.mxu0 %v19942_v27  ;;  %v18467_v4 = vld [vmem:[#allocation8 + $0x1a58] ss:$48 sps:$4 sm:$0xff]   ;;  %v18499_v54 = vld [vmem:[#allocation8 + $0x187c] ss:$48 sps:$4 sm:$0xff]  }
 0x572   :  { %v12974_v12 = vpop.f32.mrf.mxu0  ;;  %13307 = vmatprep.subr.bf16.mxu1 %v18463_v56  ;;  %13268 = vmatprep.subr.bf16.mxu0 %v18466_v58  ;;  %v18502_v56 = vld [vmem:[#allocation8 + $0x121c] ss:$48 sps:$4 sm:$0xff]   ;;  %v18497_v58 = vld [vmem:[#allocation8 + $0x1878] ss:$48 sps:$4 sm:$0xff]  }
 0x573   :  { %v12975_v17 = vadd.f32 %v12974_v12, %v20091_v24  ;;  %v13013_v14 = vpop.f32.mrf.mxu1  ;;  %13258 = vmatmul.mubr.bf16.vlgmr.msra.gmra.mxu1 %v19946_v42  ;;  %v18478_v24 = vld [vmem:[#allocation8 + $0x139c] ss:$48 sps:$4 sm:$0xff]   ;;  %v18500_v59 = vld [vmem:[#allocation8 + $0x1218] ss:$48 sps:$4 sm:$0xff]  }
 0x574   :  { %v20098_v30 = vadd.f32 %v13013_v14, %v12973_v0  ;;  %v12976_v21 = vpop.f32.mrf.mxu0  ;;  %13308 = vmatpush1.bf16.msra.mxu1 %v18461_v62  ;;  %13339 = vmatprep.mubr.bf16.mxu1 %v19948_v45  ;;  %v18505_v62 = vld [vmem:[#allocation8 + $0x181c] ss:$48 sps:$4 sm:$0xff]   ;;  %v18512_v14 = vld [vmem:[#allocation8 + $0x1758] ss:$48 sps:$4 sm:$0xff]  }
 0x575   :  { %v13015_v6 = vpop.f32.mrf.mxu1  ;;  %13269 = vmatpush1.bf16.msra.mxu0 %v18464_v1  ;;  %13309 = vmatprep.subr.bf16.mxu1 %v18469_v2  ;;  %v18508_v0 = vld [vmem:[#allocation8 + $0x17bc] ss:$48 sps:$4 sm:$0xff]   ;;  %v18503_v1 = vld [vmem:[#allocation8 + $0x1818] ss:$48 sps:$4 sm:$0xff]  }
 0x576   :  { %v20101_v29 = vadd.f32 %v13015_v6, %v12975_v17  ;;  %v12977_v37 = vpop.f32.mrf.mxu0  ;;  %13270 = vmatprep.subr.bf16.mxu0 %v18472_v61  ;;  %v18506_v2 = vld [vmem:[#allocation8 + $0x17b8] ss:$48 sps:$4 sm:$0xff]   ;;  %v18511_v12 = vld [vmem:[#allocation8 + $0x1dbc] ss:$48 sps:$4 sm:$0xff]  }
 0x577   :  { %v13017_v31 = vpop.f32.mrf.mxu1  ;;  %v18514_v61 = vld [vmem:[#allocation8 + $0x175c] ss:$48 sps:$4 sm:$0xff]   ;;  %v18509_v17 = vld [vmem:[#allocation8 + $0x1db8] ss:$48 sps:$4 sm:$0xff]  }
 0x578   :  { %13310 = vmatpush1.bf16.msra.mxu1 %v18467_v4  ;;  %v18517_v21 = vld [vmem:[#allocation8 + $0x1d5c] ss:$48 sps:$4 sm:$0xff]   ;;  %v18515_v6 = vld [vmem:[#allocation8 + $0x1d58] ss:$48 sps:$4 sm:$0xff]  }
 0x579   :  { %v13018_v33 = vpop.f32.mrf.mxu1  ;;  %13271 = vmatpush1.bf16.msra.mxu0 %v18470_v28  ;;  %13311 = vmatprep.subr.bf16.mxu1 %v18475_v47  ;;  %v18520_v4 = vld [vmem:[#allocation8 + $0x16fc] ss:$48 sps:$4 sm:$0xff]   ;;  %v18518_v28 = vld [vmem:[#allocation8 + $0x16f8] ss:$48 sps:$4 sm:$0xff]  }
 0x57a   :  { %13272 = vmatprep.subr.bf16.mxu0 %v18478_v24  ;;  %v18523_v47 = vld [vmem:[#allocation8 + $0x1cfc] ss:$48 sps:$4 sm:$0xff]   ;;  %v18521_v24 = vld [vmem:[#allocation8 + $0x1cf8] ss:$48 sps:$4 sm:$0xff]  }
 0x57b   :  { %v18526_v37 = vld [vmem:[#allocation8 + $0x169c] ss:$48 sps:$4 sm:$0xff]   ;;  %v18524_v31 = vld [vmem:[#allocation8 + $0x1698] ss:$48 sps:$4 sm:$0xff]  }
 0x57c   :  { %13312 = vmatpush1.bf16.msra.mxu1 %v18473_v39  ;;  %v18529_v39 = vld [vmem:[#allocation8 + $0x1c9c] ss:$48 sps:$4 sm:$0xff]  }
 0x57d   :  { %13273 = vmatpush1.bf16.msra.mxu0 %v18476_v34  ;;  %13313 = vmatprep.subr.bf16.mxu1 %v18481_v35  ;;  %v18532_v33 = vld [vmem:[#allocation8 + $0x163c] ss:$48 sps:$4 sm:$0xff]   ;;  %v18527_v34 = vld [vmem:[#allocation8 + $0x1c98] ss:$48 sps:$4 sm:$0xff]  }
 0x57e   :  { %13274 = vmatprep.subr.bf16.mxu0 %v18484_v36  ;;  %v18530_v35 = vld [vmem:[#allocation8 + $0x1638] ss:$48 sps:$4 sm:$0xff]   ;;  %v18535_v36 = vld [vmem:[#allocation8 + $0x1c3c] ss:$48 sps:$4 sm:$0xff]  }
 0x580   :  { %13314 = vmatpush1.bf16.msra.mxu1 %v18479_v38  ;;  %v18538_v38 = vld [vmem:[#allocation8 + $0x15dc] ss:$48 sps:$4 sm:$0xff]  }
 0x581   :  { %13275 = vmatpush1.bf16.msra.mxu0 %v18482_v52  ;;  %13315 = vmatprep.subr.bf16.mxu1 %v18487_v41  ;;  %v18533_v52 = vld [vmem:[#allocation8 + $0x1c38] ss:$48 sps:$4 sm:$0xff]  }
 0x582   :  { %13276 = vmatprep.subr.bf16.mxu0 %v18490_v49  ;;  %v18536_v41 = vld [vmem:[#allocation8 + $0x15d8] ss:$48 sps:$4 sm:$0xff]   ;;  %v18541_v49 = vld [vmem:[#allocation8 + $0x1bdc] ss:$48 sps:$4 sm:$0xff]  }
 0x584   :  { %13316 = vmatpush1.bf16.msra.mxu1 %v18485_v44  ;;  %v18544_v44 = vld [vmem:[#allocation8 + $0x157c] ss:$48 sps:$4 sm:$0xff]  }
 0x585   :  { %13277 = vmatpush1.bf16.msra.mxu0 %v18488_v46  ;;  %13317 = vmatprep.subr.bf16.mxu1 %v18493_v53  ;;  %v18539_v46 = vld [vmem:[#allocation8 + $0x1bd8] ss:$48 sps:$4 sm:$0xff]  }
 0x586   :  { %13278 = vmatprep.subr.bf16.mxu0 %v18496_v57  ;;  %v18542_v53 = vld [vmem:[#allocation8 + $0x1578] ss:$48 sps:$4 sm:$0xff]   ;;  %v18547_v57 = vld [vmem:[#allocation8 + $0x1b7c] ss:$48 sps:$4 sm:$0xff]  }
 0x588   :  { %13318 = vmatpush1.bf16.msra.mxu1 %v18491_v55  ;;  %v18550_v55 = vld [vmem:[#allocation8 + $0x151c] ss:$48 sps:$4 sm:$0xff]  }
 0x589   :  { %13279 = vmatpush1.bf16.msra.mxu0 %v18494_v60  ;;  %13319 = vmatprep.subr.bf16.mxu1 %v18499_v54  ;;  %v18545_v60 = vld [vmem:[#allocation8 + $0x1b78] ss:$48 sps:$4 sm:$0xff]  }
 0x58a   :  { %13280 = vmatprep.subr.bf16.mxu0 %v18502_v56  ;;  %v18548_v54 = vld [vmem:[#allocation8 + $0x1518] ss:$48 sps:$4 sm:$0xff]   ;;  %v18553_v56 = vld [vmem:[#allocation8 + $0x1b1c] ss:$48 sps:$4 sm:$0xff]  }
 0x58c   :  { %13320 = vmatpush1.bf16.msra.mxu1 %v18497_v58  ;;  %v18556_v58 = vld [vmem:[#allocation8 + $0x20bc] ss:$48 sps:$4 sm:$0xff]  }
 0x58d   :  { %13281 = vmatpush1.bf16.msra.mxu0 %v18500_v59  ;;  %13321 = vmatprep.subr.bf16.mxu1 %v18505_v62  ;;  %v18551_v59 = vld [vmem:[#allocation8 + $0x1b18] ss:$48 sps:$4 sm:$0xff]  }
 0x58e   :  { %13282 = vmatprep.subr.bf16.mxu0 %v18508_v0  ;;  %v18554_v62 = vld [vmem:[#allocation8 + $0x20b8] ss:$48 sps:$4 sm:$0xff]   ;;  %v18559_v0 = vld [vmem:[#allocation8 + $0x26bc] ss:$48 sps:$4 sm:$0xff]  }
 0x590   :  { %13322 = vmatpush1.bf16.msra.mxu1 %v18503_v1  ;;  %v18562_v1 = vld [vmem:[#allocation8 + $0x205c] ss:$48 sps:$4 sm:$0xff]  }
 0x591   :  { %13283 = vmatpush2.bf16.msra.mxu0 %v18506_v2  ;;  %13323 = vmatprep.subr.bf16.mxu1 %v18511_v12  ;;  %v18557_v12 = vld [vmem:[#allocation8 + $0x26b8] ss:$48 sps:$4 sm:$0xff]  }
 0x592   :  { %13284 = vmatprep.subr.bf16.mxu0 %v18514_v61 }
 0x594   :  { %13324 = vmatpush2.bf16.msra.mxu1 %v18509_v17  ;;  %v18560_v17 = vld [vmem:[#allocation8 + $0x2058] ss:$48 sps:$4 sm:$0xff]  }
 0x595   :  { %13285 = vmatpush2.bf16.msra.mxu0 %v18512_v14  ;;  %13325 = vmatprep.subr.bf16.mxu1 %v18517_v21  ;;  %v18565_v14 = vld [vmem:[#allocation8 + $0x265c] ss:$48 sps:$4 sm:$0xff]  }
 0x596   :  { %13286 = vmatprep.subr.bf16.mxu0 %v18520_v4  ;;  %v18568_v4 = vld [vmem:[#allocation8 + $0x1ffc] ss:$48 sps:$4 sm:$0xff]  }
 0x598   :  { %13326 = vmatpush2.bf16.msra.mxu1 %v18515_v6 }
 0x599   :  { %13287 = vmatpush2.bf16.msra.mxu0 %v18518_v28  ;;  %13327 = vmatprep.subr.bf16.mxu1 %v18523_v47 }
 0x59a   :  { %13288 = vmatprep.subr.bf16.mxu0 %v18526_v37 }
 0x59c   :  { %13328 = vmatpush2.bf16.msra.mxu1 %v18521_v24 }
 0x59d   :  { %13289 = vmatpush2.bf16.msra.mxu0 %v18524_v31  ;;  %13329 = vmatprep.subr.bf16.mxu1 %v18529_v39  ;;  %v18566_v31 = vld [vmem:[#allocation8 + $0x1ff8] ss:$48 sps:$4 sm:$0xff]   ;;  %v18571_v39 = vld [vmem:[#allocation8 + $0x25fc] ss:$48 sps:$4 sm:$0xff]  }
 0x59e   :  { %13290 = vmatprep.subr.bf16.mxu0 %v18532_v33 }
 0x5a0   :  { %13330 = vmatpush2.bf16.msra.mxu1 %v18527_v34 }
 0x5a1   :  { %13291 = vmatpush2.bf16.msra.mxu0 %v18530_v35  ;;  %13331 = vmatprep.subr.bf16.mxu1 %v18535_v36  ;;  %v18569_v36 = vld [vmem:[#allocation8 + $0x25f8] ss:$48 sps:$4 sm:$0xff]  }
 0x5a2   :  { %13292 = vmatprep.subr.bf16.mxu0 %v18538_v38 }
 0x5a4   :  { %13332 = vmatpush2.bf16.msra.mxu1 %v18533_v52  ;;  %v18572_v52 = vld [vmem:[#allocation8 + $0x1f98] ss:$48 sps:$4 sm:$0xff]  }
 0x5a5   :  { %13293 = vmatpush2.bf16.msra.mxu0 %v18536_v41  ;;  %13333 = vmatprep.subr.bf16.mxu1 %v18541_v49  ;;  %v18577_v41 = vld [vmem:[#allocation8 + $0x259c] ss:$48 sps:$4 sm:$0xff]  }
 0x5a6   :  { %13294 = vmatprep.subr.bf16.mxu0 %v18544_v44  ;;  %v18580_v49 = vld [vmem:[#allocation8 + $0x1f3c] ss:$48 sps:$4 sm:$0xff]   ;;  %v18575_v44 = vld [vmem:[#allocation8 + $0x2598] ss:$48 sps:$4 sm:$0xff]  }
 0x5a8   :  { %13334 = vmatpush2.bf16.msra.mxu1 %v18539_v46  ;;  %v18578_v46 = vld [vmem:[#allocation8 + $0x1f38] ss:$48 sps:$4 sm:$0xff]  }
 0x5a9   :  { %13295 = vmatpush2.bf16.msra.mxu0 %v18542_v53  ;;  %13335 = vmatprep.subr.bf16.mxu1 %v18547_v57  ;;  %v18583_v53 = vld [vmem:[#allocation8 + $0x253c] ss:$48 sps:$4 sm:$0xff]  }
 0x5aa   :  { %13296 = vmatprep.subr.bf16.mxu0 %v18550_v55  ;;  %v18586_v57 = vld [vmem:[#allocation8 + $0x1edc] ss:$48 sps:$4 sm:$0xff]   ;;  %v18581_v55 = vld [vmem:[#allocation8 + $0x2538] ss:$48 sps:$4 sm:$0xff]  }
 0x5ac   :  { %13336 = vmatpush2.bf16.msra.mxu1 %v18545_v60  ;;  %v18584_v60 = vld [vmem:[#allocation8 + $0x1ed8] ss:$48 sps:$4 sm:$0xff]  }
 0x5ad   :  { %13297 = vmatpush2.bf16.msra.mxu0 %v18548_v54  ;;  %13337 = vmatprep.subr.bf16.mxu1 %v18553_v56  ;;  %v18589_v54 = vld [vmem:[#allocation8 + $0x24dc] ss:$48 sps:$4 sm:$0xff]  }
 0x5ae   :  { %13348 = vmatprep.subr.bf16.mxu0 %v18556_v58  ;;  %v18592_v56 = vld [vmem:[#allocation8 + $0x1e7c] ss:$48 sps:$4 sm:$0xff]   ;;  %v18587_v58 = vld [vmem:[#allocation8 + $0x24d8] ss:$48 sps:$4 sm:$0xff]  }
 0x5b0   :  { %v13054_v2 = vpop.f32.mrf.mxu0  ;;  %13299 = vmatmul.mubr.bf16.vlgmr.msra.gmra.mxu0 %v19952_v50  ;;  %13338 = vmatpush2.bf16.msra.mxu1 %v18551_v59  ;;  %v18590_v59 = vld [vmem:[#allocation8 + $0x1e78] ss:$48 sps:$4 sm:$0xff]  }
 0x5b1   :  { %v13055_v61 = vadd.f32 %v13054_v2, %v20098_v30  ;;  %13349 = vmatpush1.bf16.msra.mxu0 %v18554_v62  ;;  %13380 = vmatprep.mubr.bf16.mxu0 %v19954_v51  ;;  %v18563_v30 = vld [vmem:[#allocation8 + $0x2658] ss:$48 sps:$4 sm:$0xff]   ;;  %v18595_v62 = vld [vmem:[#allocation8 + $0x247c] ss:$48 sps:$4 sm:$0xff]  }
 0x5b2   :  { %v13056_v21 = vpop.f32.mrf.mxu0  ;;  %13389 = vmatprep.subr.bf16.mxu1 %v18559_v0  ;;  %13350 = vmatprep.subr.bf16.mxu0 %v18562_v1  ;;  %v18598_v0 = vld [vmem:[#allocation8 + $0x1e1c] ss:$48 sps:$4 sm:$0xff]   ;;  %v18593_v1 = vld [vmem:[#allocation8 + $0x2478] ss:$48 sps:$4 sm:$0xff]  }
 0x5b3   :  { %v13057_v6 = vadd.f32 %v13056_v21, %v20101_v29  ;;  %v13095_v28 = vpop.f32.mrf.mxu1  ;;  %13340 = vmatmul.mubr.bf16.vlgmr.msra.gmra.mxu1 %v19958_v5  ;;  %v18574_v29 = vld [vmem:[#allocation8 + $0x1f9c] ss:$48 sps:$4 sm:$0xff]   ;;  %v18596_v2 = vld [vmem:[#allocation8 + $0x1e18] ss:$48 sps:$4 sm:$0xff]  }
 0x5b4   :  { %v20108_v47 = vadd.f32 %v13095_v28, %v13055_v61  ;;  %v13058_v37 = vpop.f32.mrf.mxu0  ;;  %13390 = vmatpush1.bf16.msra.mxu1 %v18557_v12  ;;  %13421 = vmatprep.mubr.bf16.mxu1 %v19960_v9  ;;  %v18601_v12 = vld [vmem:[#allocation8 + $0x241c] ss:$48 sps:$4 sm:$0xff]   ;;  %v18608_v28 = vld [vmem:[#allocation8 + $0x2358] ss:$48 sps:$4 sm:$0xff]  }
 0x5b5   :  { %v13097_v24 = vpop.f32.mrf.mxu1  ;;  %13351 = vmatpush1.bf16.msra.mxu0 %v18560_v17  ;;  %13391 = vmatprep.subr.bf16.mxu1 %v18565_v14  ;;  %v18604_v61 = vld [vmem:[#allocation8 + $0x23bc] ss:$48 sps:$4 sm:$0xff]   ;;  %v18599_v17 = vld [vmem:[#allocation8 + $0x2418] ss:$48 sps:$4 sm:$0xff]  }
 0x5b6   :  { %v20111_v33 = vadd.f32 %v13097_v24, %v13057_v6  ;;  %v13059_v34 = vpop.f32.mrf.mxu0  ;;  %13352 = vmatprep.subr.bf16.mxu0 %v18568_v4  ;;  %v18602_v14 = vld [vmem:[#allocation8 + $0x23b8] ss:$48 sps:$4 sm:$0xff]   ;;  %v18607_v21 = vld [vmem:[#allocation8 + $0x29bc] ss:$48 sps:$4 sm:$0xff]  }
 0x5b7   :  { %v13099_v35 = vpop.f32.mrf.mxu1  ;;  %v18610_v4 = vld [vmem:[#allocation8 + $0x235c] ss:$48 sps:$4 sm:$0xff]   ;;  %v18605_v6 = vld [vmem:[#allocation8 + $0x29b8] ss:$48 sps:$4 sm:$0xff]  }
 0x5b8   :  { %13392 = vmatpush1.bf16.msra.mxu1 %v18563_v30  ;;  %v18613_v37 = vld [vmem:[#allocation8 + $0x295c] ss:$48 sps:$4 sm:$0xff]   ;;  %v18611_v24 = vld [vmem:[#allocation8 + $0x2958] ss:$48 sps:$4 sm:$0xff]  }
 0x5b9   :  { %v13100_v38 = vpop.f32.mrf.mxu1  ;;  %13353 = vmatpush1.bf16.msra.mxu0 %v18566_v31  ;;  %13393 = vmatprep.subr.bf16.mxu1 %v18571_v39  ;;  %v18616_v30 = vld [vmem:[#allocation8 + $0x22fc] ss:$48 sps:$4 sm:$0xff]   ;;  %v18614_v31 = vld [vmem:[#allocation8 + $0x22f8] ss:$48 sps:$4 sm:$0xff]  }
 0x5ba   :  { %13354 = vmatprep.subr.bf16.mxu0 %v18574_v29  ;;  %v18619_v39 = vld [vmem:[#allocation8 + $0x28fc] ss:$48 sps:$4 sm:$0xff]   ;;  %v18617_v29 = vld [vmem:[#allocation8 + $0x28f8] ss:$48 sps:$4 sm:$0xff]  }
 0x5bb   :  { %v18622_v34 = vld [vmem:[#allocation8 + $0x229c] ss:$48 sps:$4 sm:$0xff]   ;;  %v18620_v35 = vld [vmem:[#allocation8 + $0x2298] ss:$48 sps:$4 sm:$0xff]  }
 0x5bc   :  { %13394 = vmatpush1.bf16.msra.mxu1 %v18569_v36  ;;  %v18625_v36 = vld [vmem:[#allocation8 + $0x289c] ss:$48 sps:$4 sm:$0xff]  }
 0x5bd   :  { %13355 = vmatpush1.bf16.msra.mxu0 %v18572_v52  ;;  %13395 = vmatprep.subr.bf16.mxu1 %v18577_v41  ;;  %v18628_v38 = vld [vmem:[#allocation8 + $0x223c] ss:$48 sps:$4 sm:$0xff]   ;;  %v18623_v52 = vld [vmem:[#allocation8 + $0x2898] ss:$48 sps:$4 sm:$0xff]  }
 0x5be   :  { %13356 = vmatprep.subr.bf16.mxu0 %v18580_v49  ;;  %v18626_v41 = vld [vmem:[#allocation8 + $0x2238] ss:$48 sps:$4 sm:$0xff]   ;;  %v18631_v49 = vld [vmem:[#allocation8 + $0x283c] ss:$48 sps:$4 sm:$0xff]  }
 0x5c0   :  { %13396 = vmatpush1.bf16.msra.mxu1 %v18575_v44  ;;  %v18634_v44 = vld [vmem:[#allocation8 + $0x21dc] ss:$48 sps:$4 sm:$0xff]  }
 0x5c1   :  { %13357 = vmatpush1.bf16.msra.mxu0 %v18578_v46  ;;  %13397 = vmatprep.subr.bf16.mxu1 %v18583_v53  ;;  %v18629_v46 = vld [vmem:[#allocation8 + $0x2838] ss:$48 sps:$4 sm:$0xff]  }
 0x5c2   :  { %13358 = vmatprep.subr.bf16.mxu0 %v18586_v57  ;;  %v18632_v53 = vld [vmem:[#allocation8 + $0x21d8] ss:$48 sps:$4 sm:$0xff]   ;;  %v18637_v57 = vld [vmem:[#allocation8 + $0x27dc] ss:$48 sps:$4 sm:$0xff]  }
 0x5c4   :  { %13398 = vmatpush1.bf16.msra.mxu1 %v18581_v55  ;;  %v18640_v55 = vld [vmem:[#allocation8 + $0x217c] ss:$48 sps:$4 sm:$0xff]  }
 0x5c5   :  { %13359 = vmatpush1.bf16.msra.mxu0 %v18584_v60  ;;  %13399 = vmatprep.subr.bf16.mxu1 %v18589_v54  ;;  %v18635_v60 = vld [vmem:[#allocation8 + $0x27d8] ss:$48 sps:$4 sm:$0xff]  }
 0x5c6   :  { %13360 = vmatprep.subr.bf16.mxu0 %v18592_v56  ;;  %v18638_v54 = vld [vmem:[#allocation8 + $0x2178] ss:$48 sps:$4 sm:$0xff]   ;;  %v18643_v56 = vld [vmem:[#allocation8 + $0x277c] ss:$48 sps:$4 sm:$0xff]  }
 0x5c8   :  { %13400 = vmatpush1.bf16.msra.mxu1 %v18587_v58  ;;  %v18646_v58 = vld [vmem:[#allocation8 + $0x211c] ss:$48 sps:$4 sm:$0xff]  }
 0x5c9   :  { %13361 = vmatpush1.bf16.msra.mxu0 %v18590_v59  ;;  %13401 = vmatprep.subr.bf16.mxu1 %v18595_v62  ;;  %v18641_v59 = vld [vmem:[#allocation8 + $0x2778] ss:$48 sps:$4 sm:$0xff]  }
 0x5ca   :  { %13362 = vmatprep.subr.bf16.mxu0 %v18598_v0  ;;  %v18644_v62 = vld [vmem:[#allocation8 + $0x2118] ss:$48 sps:$4 sm:$0xff]   ;;  %v18649_v0 = vld [vmem:[#allocation8 + $0x271c] ss:$48 sps:$4 sm:$0xff]  }
 0x5cc   :  { %13402 = vmatpush1.bf16.msra.mxu1 %v18593_v1  ;;  %v18652_v1 = vld [vmem:[#allocation8 + $0x2cbc] ss:$48 sps:$4 sm:$0xff]  }
 0x5cd   :  { %13363 = vmatpush1.bf16.msra.mxu0 %v18596_v2  ;;  %13403 = vmatprep.subr.bf16.mxu1 %v18601_v12  ;;  %v18647_v2 = vld [vmem:[#allocation8 + $0x2718] ss:$48 sps:$4 sm:$0xff]  }
 0x5ce   :  { %13364 = vmatprep.subr.bf16.mxu0 %v18604_v61  ;;  %v18650_v12 = vld [vmem:[#allocation8 + $0x2cb8] ss:$48 sps:$4 sm:$0xff]   ;;  %v18655_v61 = vld [vmem:[#allocation8 + $0x32bc] ss:$48 sps:$4 sm:$0xff]  }
 0x5d0   :  { %13404 = vmatpush1.bf16.msra.mxu1 %v18599_v17  ;;  %v18658_v17 = vld [vmem:[#allocation8 + $0x2c5c] ss:$48 sps:$4 sm:$0xff]  }
 0x5d1   :  { %13365 = vmatpush2.bf16.msra.mxu0 %v18602_v14  ;;  %13405 = vmatprep.subr.bf16.mxu1 %v18607_v21  ;;  %v18653_v21 = vld [vmem:[#allocation8 + $0x32b8] ss:$48 sps:$4 sm:$0xff]  }
 0x5d2   :  { %13366 = vmatprep.subr.bf16.mxu0 %v18610_v4 }
 0x5d4   :  { %13406 = vmatpush2.bf16.msra.mxu1 %v18605_v6  ;;  %v18656_v6 = vld [vmem:[#allocation8 + $0x2c58] ss:$48 sps:$4 sm:$0xff]  }
 0x5d5   :  { %13367 = vmatpush2.bf16.msra.mxu0 %v18608_v28  ;;  %13407 = vmatprep.subr.bf16.mxu1 %v18613_v37  ;;  %v18661_v28 = vld [vmem:[#allocation8 + $0x325c] ss:$48 sps:$4 sm:$0xff]  }
 0x5d6   :  { %13368 = vmatprep.subr.bf16.mxu0 %v18616_v30  ;;  %v18664_v30 = vld [vmem:[#allocation8 + $0x2bfc] ss:$48 sps:$4 sm:$0xff]  }
 0x5d8   :  { %13408 = vmatpush2.bf16.msra.mxu1 %v18611_v24 }
 0x5d9   :  { %13369 = vmatpush2.bf16.msra.mxu0 %v18614_v31  ;;  %13409 = vmatprep.subr.bf16.mxu1 %v18619_v39 }
 0x5da   :  { %13370 = vmatprep.subr.bf16.mxu0 %v18622_v34  ;;  %v18659_v34 = vld [vmem:[#allocation8 + $0x3258] ss:$48 sps:$4 sm:$0xff]  }
 0x5dc   :  { %13410 = vmatpush2.bf16.msra.mxu1 %v18617_v29 }
 0x5dd   :  { %13371 = vmatpush2.bf16.msra.mxu0 %v18620_v35  ;;  %13411 = vmatprep.subr.bf16.mxu1 %v18625_v36  ;;  %v18662_v36 = vld [vmem:[#allocation8 + $0x2bf8] ss:$48 sps:$4 sm:$0xff]  }
 0x5de   :  { %13372 = vmatprep.subr.bf16.mxu0 %v18628_v38  ;;  %v18667_v38 = vld [vmem:[#allocation8 + $0x31fc] ss:$48 sps:$4 sm:$0xff]  }
 0x5e0   :  { %13412 = vmatpush2.bf16.msra.mxu1 %v18623_v52  ;;  %v18670_v52 = vld [vmem:[#allocation8 + $0x2b9c] ss:$48 sps:$4 sm:$0xff]  }
 0x5e1   :  { %13373 = vmatpush2.bf16.msra.mxu0 %v18626_v41  ;;  %13413 = vmatprep.subr.bf16.mxu1 %v18631_v49  ;;  %v18665_v49 = vld [vmem:[#allocation8 + $0x31f8] ss:$48 sps:$4 sm:$0xff]  }
 0x5e2   :  { %13374 = vmatprep.subr.bf16.mxu0 %v18634_v44 }
 0x5e4   :  { %13414 = vmatpush2.bf16.msra.mxu1 %v18629_v46  ;;  %v18668_v46 = vld [vmem:[#allocation8 + $0x2b98] ss:$48 sps:$4 sm:$0xff]  }
 0x5e5   :  { %13375 = vmatpush2.bf16.msra.mxu0 %v18632_v53  ;;  %13415 = vmatprep.subr.bf16.mxu1 %v18637_v57  ;;  %v18673_v53 = vld [vmem:[#allocation8 + $0x319c] ss:$48 sps:$4 sm:$0xff]  }
 0x5e6   :  { %13376 = vmatprep.subr.bf16.mxu0 %v18640_v55  ;;  %v18676_v57 = vld [vmem:[#allocation8 + $0x2b3c] ss:$48 sps:$4 sm:$0xff]   ;;  %v18671_v55 = vld [vmem:[#allocation8 + $0x3198] ss:$48 sps:$4 sm:$0xff]  }
 0x5e8   :  { %13416 = vmatpush2.bf16.msra.mxu1 %v18635_v60  ;;  %v18674_v60 = vld [vmem:[#allocation8 + $0x2b38] ss:$48 sps:$4 sm:$0xff]  }
 0x5e9   :  { %13377 = vmatpush2.bf16.msra.mxu0 %v18638_v54  ;;  %13417 = vmatprep.subr.bf16.mxu1 %v18643_v56  ;;  %v18679_v54 = vld [vmem:[#allocation8 + $0x313c] ss:$48 sps:$4 sm:$0xff]  }
 0x5ea   :  { %13378 = vmatprep.subr.bf16.mxu0 %v18646_v58  ;;  %v18682_v56 = vld [vmem:[#allocation8 + $0x2adc] ss:$48 sps:$4 sm:$0xff]   ;;  %v18677_v58 = vld [vmem:[#allocation8 + $0x3138] ss:$48 sps:$4 sm:$0xff]  }
 0x5ec   :  { %13418 = vmatpush2.bf16.msra.mxu1 %v18641_v59  ;;  %v18680_v59 = vld [vmem:[#allocation8 + $0x2ad8] ss:$48 sps:$4 sm:$0xff]  }
 0x5ed   :  { %13379 = vmatpush2.bf16.msra.mxu0 %v18644_v62  ;;  %13419 = vmatprep.subr.bf16.mxu1 %v18649_v0  ;;  %v18685_v62 = vld [vmem:[#allocation8 + $0x30dc] ss:$48 sps:$4 sm:$0xff]  }
 0x5ee   :  { %13430 = vmatprep.subr.bf16.mxu0 %v18652_v1  ;;  %v18688_v0 = vld [vmem:[#allocation8 + $0x2a7c] ss:$48 sps:$4 sm:$0xff]   ;;  %v18683_v1 = vld [vmem:[#allocation8 + $0x30d8] ss:$48 sps:$4 sm:$0xff]  }
 0x5f0   :  { %v13136_v14 = vpop.f32.mrf.mxu0  ;;  %13381 = vmatmul.mubr.bf16.vlgmr.msra.gmra.mxu0 %v19964_v11  ;;  %13420 = vmatpush2.bf16.msra.mxu1 %v18647_v2  ;;  %v18686_v2 = vld [vmem:[#allocation8 + $0x2a78] ss:$48 sps:$4 sm:$0xff]  }
 0x5f1   :  { %v20115_v4 = vadd.f32 %v13136_v14, %v20108_v47  ;;  %13431 = vmatpush1.bf16.msra.mxu0 %v18650_v12  ;;  %13462 = vmatprep.mubr.bf16.mxu0 %v19966_v15  ;;  %v18691_v12 = vld [vmem:[#allocation8 + $0x307c] ss:$48 sps:$4 sm:$0xff]   ;;  %v18692_v14 = vld [vmem:[#allocation8 + $0x2a18] ss:$48 sps:$4 sm:$0xff]  }
 0x5f2   :  { %v13138_v37 = vpop.f32.mrf.mxu0  ;;  %13471 = vmatprep.subr.bf16.mxu1 %v18655_v61  ;;  %13432 = vmatprep.subr.bf16.mxu0 %v18658_v17  ;;  %v18694_v61 = vld [vmem:[#allocation8 + $0x2a1c] ss:$48 sps:$4 sm:$0xff]   ;;  %v18689_v17 = vld [vmem:[#allocation8 + $0x3078] ss:$48 sps:$4 sm:$0xff]  }
 0x5f3   :  { %v14251_v24 = vmax.f32 %v20025_v16, %v20115_v4  ;;  %v20121_v31 = vadd.f32 %v13138_v37, %v20111_v33  ;;  %v20123_v39 = vpop.f32.mrf.mxu1  ;;  %13422 = vmatmul.mubr.bf16.vlgmr.msra.gmra.mxu1 %v19970_v40  ;;  %v18698_v37 = vld [vmem:[#allocation8 + $0x2fb8] ss:$48 sps:$4 sm:$0xff]  }
 0x5f4   :  { %v13140_v47 = vpop.f32.mrf.mxu0  ;;  %13472 = vmatpush1.bf16.msra.mxu1 %v18653_v21  ;;  %13503 = vmatprep.mubr.bf16.mxu1 %v19972_v43  ;;  %v18697_v21 = vld [vmem:[#allocation8 + $0x301c] ss:$48 sps:$4 sm:$0xff]  }
 0x5f5   :  { %v14252_v29 = vmax.f32 %v20068_v63, %v20121_v31  ;;  %v20129_v35 = vpop.f32.mrf.mxu1  ;;  %13433 = vmatpush1.bf16.msra.mxu0 %v18656_v6  ;;  %13473 = vmatprep.subr.bf16.mxu1 %v18661_v28  ;;  %v18700_v6 = vld [vmem:[#allocation8 + $0x2fbc] ss:$48 sps:$4 sm:$0xff]   ;;  %v18695_v28 = vld [vmem:[#allocation8 + $0x3018] ss:$48 sps:$4 sm:$0xff]  }
 0x5f6   :  { %v13141_v33 = vpop.f32.mrf.mxu0  ;;  %13434 = vmatprep.subr.bf16.mxu0 %v18664_v30  ;;  %v18703_v30 = vld [vmem:[#allocation8 + $0x35bc] ss:$48 sps:$4 sm:$0xff]  }
 0x5f7   :  { %v13181_v41 = vpop.f32.mrf.mxu1  ;;  %v18706_v47 = vld [vmem:[#allocation8 + $0x2f5c] ss:$48 sps:$4 sm:$0xff]  }
 0x5f8   :  { %13474 = vmatpush1.bf16.msra.mxu1 %v18659_v34  ;;  %v18701_v34 = vld [vmem:[#allocation8 + $0x35b8] ss:$48 sps:$4 sm:$0xff]   ;;  %v18712_v33 = vld [vmem:[#allocation8 + $0x2efc] ss:$48 sps:$4 sm:$0xff]  }
 0x5f9   :  { %v13182_v44 = vpop.f32.mrf.mxu1  ;;  %13435 = vmatpush1.bf16.msra.mxu0 %v18662_v36  ;;  %13475 = vmatprep.subr.bf16.mxu1 %v18667_v38  ;;  %v18704_v36 = vld [vmem:[#allocation8 + $0x2f58] ss:$48 sps:$4 sm:$0xff]   ;;  %v18709_v38 = vld [vmem:[#allocation8 + $0x355c] ss:$48 sps:$4 sm:$0xff]  }
 0x5fa   :  { %13436 = vmatprep.subr.bf16.mxu0 %v18670_v52  ;;  %v18707_v52 = vld [vmem:[#allocation8 + $0x3558] ss:$48 sps:$4 sm:$0xff]   ;;  %v18718_v44 = vld [vmem:[#allocation8 + $0x2e9c] ss:$48 sps:$4 sm:$0xff]  }
 0x5fb   :  { %v18710_v41 = vld [vmem:[#allocation8 + $0x2ef8] ss:$48 sps:$4 sm:$0xff]   ;;  %v14568_v63 = vld [vmem:[#allocation12 + $0x18] sm:$0xff]  ;;  %v14566_v31 = vld [vmem:[#allocation12 + $0x8] sm:$0xff] }
 0x5fc   :  { %13476 = vmatpush1.bf16.msra.mxu1 %v18665_v49  ;;  %v18715_v49 = vld [vmem:[#allocation8 + $0x34fc] ss:$48 sps:$4 sm:$0xff]  }
 0x5fd   :  { %13437 = vmatpush1.bf16.msra.mxu0 %v18668_v46  ;;  %13477 = vmatprep.subr.bf16.mxu1 %v18673_v53  ;;  %v18713_v46 = vld [vmem:[#allocation8 + $0x34f8] ss:$48 sps:$4 sm:$0xff]  }
 0x5fe   :  { %13438 = vmatprep.subr.bf16.mxu0 %v18676_v57  ;;  %v18716_v53 = vld [vmem:[#allocation8 + $0x2e98] ss:$48 sps:$4 sm:$0xff]   ;;  %v18721_v57 = vld [vmem:[#allocation8 + $0x349c] ss:$48 sps:$4 sm:$0xff]  }
 0x5ff   :  { %v14571_v4 = vld [vmem:[#allocation12 + $0x30] sm:$0xff] }
 0x600   :  { %13478 = vmatpush1.bf16.msra.mxu1 %v18671_v55  ;;  %v18724_v55 = vld [vmem:[#allocation8 + $0x2e3c] ss:$48 sps:$4 sm:$0xff]  }
 0x601   :  { %13439 = vmatpush1.bf16.msra.mxu0 %v18674_v60  ;;  %13479 = vmatprep.subr.bf16.mxu1 %v18679_v54  ;;  %v18719_v60 = vld [vmem:[#allocation8 + $0x3498] ss:$48 sps:$4 sm:$0xff]  }
 0x602   :  { %13440 = vmatprep.subr.bf16.mxu0 %v18682_v56  ;;  %v18722_v54 = vld [vmem:[#allocation8 + $0x2e38] ss:$48 sps:$4 sm:$0xff]   ;;  %v18727_v56 = vld [vmem:[#allocation8 + $0x343c] ss:$48 sps:$4 sm:$0xff]  }
 0x604   :  { %13480 = vmatpush1.bf16.msra.mxu1 %v18677_v58  ;;  %v18730_v58 = vld [vmem:[#allocation8 + $0x2ddc] ss:$48 sps:$4 sm:$0xff]  }
 0x605   :  { %13441 = vmatpush1.bf16.msra.mxu0 %v18680_v59  ;;  %13481 = vmatprep.subr.bf16.mxu1 %v18685_v62  ;;  %v18725_v59 = vld [vmem:[#allocation8 + $0x3438] ss:$48 sps:$4 sm:$0xff]  }
 0x606   :  { %13442 = vmatprep.subr.bf16.mxu0 %v18688_v0  ;;  %v18728_v62 = vld [vmem:[#allocation8 + $0x2dd8] ss:$48 sps:$4 sm:$0xff]   ;;  %v18733_v0 = vld [vmem:[#allocation8 + $0x33dc] ss:$48 sps:$4 sm:$0xff]  }
 0x608   :  { %13482 = vmatpush1.bf16.msra.mxu1 %v18683_v1  ;;  %v18736_v1 = vld [vmem:[#allocation8 + $0x2d7c] ss:$48 sps:$4 sm:$0xff]  }
 0x609   :  { %13443 = vmatpush1.bf16.msra.mxu0 %v18686_v2  ;;  %13483 = vmatprep.subr.bf16.mxu1 %v18691_v12  ;;  %v18731_v2 = vld [vmem:[#allocation8 + $0x33d8] ss:$48 sps:$4 sm:$0xff]  }
 0x60a   :  { %13444 = vmatprep.subr.bf16.mxu0 %v18694_v61  ;;  %v18734_v12 = vld [vmem:[#allocation8 + $0x2d78] ss:$48 sps:$4 sm:$0xff]   ;;  %v18739_v61 = vld [vmem:[#allocation8 + $0x337c] ss:$48 sps:$4 sm:$0xff]  }
 0x60c   :  { %13484 = vmatpush1.bf16.msra.mxu1 %v18689_v17  ;;  %v18742_v17 = vld [vmem:[#allocation8 + $0x2d1c] ss:$48 sps:$4 sm:$0xff]  }
 0x60d   :  { %13445 = vmatpush1.bf16.msra.mxu0 %v18692_v14  ;;  %13485 = vmatprep.subr.bf16.mxu1 %v18697_v21  ;;  %v18737_v14 = vld [vmem:[#allocation8 + $0x3378] ss:$48 sps:$4 sm:$0xff]  }
 0x60e   :  { %13446 = vmatprep.subr.bf16.mxu0 %v18700_v6  ;;  %v18740_v21 = vld [vmem:[#allocation8 + $0x2d18] ss:$48 sps:$4 sm:$0xff]   ;;  %v18745_v6 = vld [vmem:[#allocation8 + $0x331c] ss:$48 sps:$4 sm:$0xff]  }
 0x610   :  { %13486 = vmatpush1.bf16.msra.mxu1 %v18695_v28  ;;  %v18748_v28 = vld [vmem:[#allocation8 + $0x2c4] ss:$48 sps:$4 sm:$0xff]  }
 0x611   :  { %13447 = vmatpush2.bf16.msra.mxu0 %v18698_v37  ;;  %13487 = vmatprep.subr.bf16.mxu1 %v18703_v30  ;;  %v18743_v37 = vld [vmem:[#allocation8 + $0x3318] ss:$48 sps:$4 sm:$0xff]   ;;  %v18746_v30 = vld [vmem:[#allocation8 + $0x2c0] ss:$48 sps:$4 sm:$0xff]  }
 0x612   :  { %13448 = vmatprep.subr.bf16.mxu0 %v18706_v47  ;;  %v18751_v47 = vld [vmem:[#allocation8 + $0x8c4] ss:$48 sps:$4 sm:$0xff]  }
 0x614   :  { %13488 = vmatpush2.bf16.msra.mxu1 %v18701_v34  ;;  %v18754_v34 = vld [vmem:[#allocation8 + $0x264] ss:$48 sps:$4 sm:$0xff]  }
 0x615   :  { %13449 = vmatpush2.bf16.msra.mxu0 %v18704_v36  ;;  %13489 = vmatprep.subr.bf16.mxu1 %v18709_v38  ;;  %v18749_v38 = vld [vmem:[#allocation8 + $0x8c0] ss:$48 sps:$4 sm:$0xff]  }
 0x616   :  { %13450 = vmatprep.subr.bf16.mxu0 %v18712_v33 }
 0x618   :  { %13490 = vmatpush2.bf16.msra.mxu1 %v18707_v52  ;;  %v18752_v52 = vld [vmem:[#allocation8 + $0x260] ss:$48 sps:$4 sm:$0xff]  }
 0x619   :  { %13451 = vmatpush2.bf16.msra.mxu0 %v18710_v41  ;;  %13491 = vmatprep.subr.bf16.mxu1 %v18715_v49  ;;  %v18757_v41 = vld [vmem:[#allocation8 + $0x864] ss:$48 sps:$4 sm:$0xff]  }
 0x61a   :  { %13452 = vmatprep.subr.bf16.mxu0 %v18718_v44  ;;  %v18760_v44 = vld [vmem:[#allocation8 + $0x204] ss:$48 sps:$4 sm:$0xff]  }
 0x61c   :  { %13492 = vmatpush2.bf16.msra.mxu1 %v18713_v46 }
 0x61d   :  { %13453 = vmatpush2.bf16.msra.mxu0 %v18716_v53  ;;  %13493 = vmatprep.subr.bf16.mxu1 %v18721_v57 }
 0x61e   :  { %13454 = vmatprep.subr.bf16.mxu0 %v18724_v55 }
 0x620   :  { %13494 = vmatpush2.bf16.msra.mxu1 %v18719_v60 }
 0x621   :  { %13455 = vmatpush2.bf16.msra.mxu0 %v18722_v54  ;;  %13495 = vmatprep.subr.bf16.mxu1 %v18727_v56  ;;  %v18758_v54 = vld [vmem:[#allocation8 + $0x200] ss:$48 sps:$4 sm:$0xff]   ;;  %v18763_v56 = vld [vmem:[#allocation8 + $0x804] ss:$48 sps:$4 sm:$0xff]  }
 0x622   :  { %13456 = vmatprep.subr.bf16.mxu0 %v18730_v58 }
 0x624   :  { %13496 = vmatpush2.bf16.msra.mxu1 %v18725_v59 }
 0x625   :  { %13457 = vmatpush2.bf16.msra.mxu0 %v18728_v62  ;;  %13497 = vmatprep.subr.bf16.mxu1 %v18733_v0  ;;  %v18761_v0 = vld [vmem:[#allocation8 + $0x800] ss:$48 sps:$4 sm:$0xff]  }
 0x626   :  { %13458 = vmatprep.subr.bf16.mxu0 %v18736_v1 }
 0x628   :  { %13498 = vmatpush2.bf16.msra.mxu1 %v18731_v2  ;;  %v18764_v2 = vld [vmem:[#allocation8 + $0x1a0] ss:$48 sps:$4 sm:$0xff]  }
 0x629   :  { %13459 = vmatpush2.bf16.msra.mxu0 %v18734_v12  ;;  %13499 = vmatprep.subr.bf16.mxu1 %v18739_v61  ;;  %v18769_v12 = vld [vmem:[#allocation8 + $0x7a4] ss:$48 sps:$4 sm:$0xff]  }
 0x62a   :  { %13460 = vmatprep.subr.bf16.mxu0 %v18742_v17  ;;  %v18772_v61 = vld [vmem:[#allocation8 + $0x144] ss:$48 sps:$4 sm:$0xff]   ;;  %v18767_v17 = vld [vmem:[#allocation8 + $0x7a0] ss:$48 sps:$4 sm:$0xff]  }
 0x62c   :  { %13500 = vmatpush2.bf16.msra.mxu1 %v18737_v14  ;;  %v18770_v14 = vld [vmem:[#allocation8 + $0x140] ss:$48 sps:$4 sm:$0xff]  }
 0x62d   :  { %13461 = vmatpush2.bf16.msra.mxu0 %v18740_v21  ;;  %13501 = vmatprep.subr.bf16.mxu1 %v18745_v6  ;;  %v18775_v21 = vld [vmem:[#allocation8 + $0x744] ss:$48 sps:$4 sm:$0xff]  }
 0x62e   :  { %13512 = vmatprep.subr.bf16.mxu0 %v18748_v28  ;;  %v18778_v6 = vld [vmem:[#allocation8 + $0xe4] ss:$48 sps:$4 sm:$0xff]   ;;  %v18773_v28 = vld [vmem:[#allocation8 + $0x740] ss:$48 sps:$4 sm:$0xff]  }
 0x630   :  { %v13218_v36 = vpop.f32.mrf.mxu0  ;;  %13463 = vmatmul.mubr.bf16.vlgmr.msra.gmra.mxu0 %v19976_v48  ;;  %13502 = vmatpush2.bf16.msra.mxu1 %v18743_v37  ;;  %v18776_v37 = vld [vmem:[#allocation8 + $0xe0] ss:$48 sps:$4 sm:$0xff]  }
 0x631   :  { %v13219_v33 = vadd.f32 %v13218_v36, %v20123_v39  ;;  %13513 = vmatpush1.bf16.msra.mxu0 %v18746_v30  ;;  %13544 = vmatprep.mubr.bf16.mxu0 %v19928_v8  ;;  %v18755_v39 = vld [vmem:[#allocation8 + $0x860] ss:$48 sps:$4 sm:$0xff]   ;;  %v18781_v30 = vld [vmem:[#allocation8 + $0x6e4] ss:$48 sps:$4 sm:$0xff]  }
 0x632   :  { %v13220_v49 = vpop.f32.mrf.mxu0  ;;  %13553 = vmatprep.subr.bf16.mxu1 %v18751_v47  ;;  %13514 = vmatprep.subr.bf16.mxu0 %v18754_v34  ;;  %v18784_v47 = vld [vmem:[#allocation8 + $0x84] ss:$48 sps:$4 sm:$0xff]   ;;  %v18779_v34 = vld [vmem:[#allocation8 + $0x6e0] ss:$48 sps:$4 sm:$0xff]  }
 0x633   :  { %v13221_v46 = vadd.f32 %v13220_v49, %v20129_v35  ;;  %v13259_v53 = vpop.f32.mrf.mxu1  ;;  %13504 = vmatmul.mubr.bf16.vlgmr.msra.gmra.mxu1 %v19986_v32  ;;  %v18766_v35 = vld [vmem:[#allocation8 + $0x1a4] ss:$48 sps:$4 sm:$0xff]   ;;  %v18782_v36 = vld [vmem:[#allocation8 + $0x80] ss:$48 sps:$4 sm:$0xff]  }
 0x634   :  { %v20136_v57 = vadd.f32 %v13259_v53, %v13219_v33  ;;  %v13222_v55 = vpop.f32.mrf.mxu0  ;;  %13554 = vmatpush1.bf16.msra.mxu1 %v18749_v38  ;;  %13585 = vmatprep.mubr.bf16.mxu1 %v19934_v3  ;;  %v18787_v38 = vld [vmem:[#allocation8 + $0x684] ss:$48 sps:$4 sm:$0xff]   ;;  %v18794_v53 = vld [vmem:[#allocation8 + $0x5c0] ss:$48 sps:$4 sm:$0xff]  }
 0x635   :  { %v13261_v60 = vpop.f32.mrf.mxu1  ;;  %13515 = vmatpush1.bf16.msra.mxu0 %v18752_v52  ;;  %13555 = vmatprep.subr.bf16.mxu1 %v18757_v41  ;;  %v18790_v33 = vld [vmem:[#allocation8 + $0x24] ss:$48 sps:$4 sm:$0xff]   ;;  %v18785_v52 = vld [vmem:[#allocation8 + $0x680] ss:$48 sps:$4 sm:$0xff]  }
 0x636   :  { %v20139_v58 = vadd.f32 %v13261_v60, %v13221_v46  ;;  %v13223_v59 = vpop.f32.mrf.mxu0  ;;  %13516 = vmatprep.subr.bf16.mxu0 %v18760_v44  ;;  %v18788_v41 = vld [vmem:[#allocation8 + $0x20] ss:$48 sps:$4 sm:$0xff]   ;;  %v18793_v49 = vld [vmem:[#allocation8 + $0x624] ss:$48 sps:$4 sm:$0xff]  }
 0x637   :  { %v13263_v62 = vpop.f32.mrf.mxu1  ;;  %v18796_v44 = vld [vmem:[#allocation8 + $0x5c4] ss:$48 sps:$4 sm:$0xff]   ;;  %v18791_v46 = vld [vmem:[#allocation8 + $0x620] ss:$48 sps:$4 sm:$0xff]  }
 0x638   :  { %13556 = vmatpush1.bf16.msra.mxu1 %v18755_v39  ;;  %v18799_v55 = vld [vmem:[#allocation8 + $0xbc4] ss:$48 sps:$4 sm:$0xff]   ;;  %v18797_v60 = vld [vmem:[#allocation8 + $0xbc0] ss:$48 sps:$4 sm:$0xff]  }
 0x639   :  { %v13264_v1 = vpop.f32.mrf.mxu1  ;;  %13517 = vmatpush1.bf16.msra.mxu0 %v18758_v54  ;;  %13557 = vmatprep.subr.bf16.mxu1 %v18763_v56  ;;  %v18802_v39 = vld [vmem:[#allocation8 + $0x564] ss:$48 sps:$4 sm:$0xff]   ;;  %v18800_v54 = vld [vmem:[#allocation8 + $0x560] ss:$48 sps:$4 sm:$0xff]  }
 0x63a   :  { %13518 = vmatprep.subr.bf16.mxu0 %v18766_v35  ;;  %v18805_v56 = vld [vmem:[#allocation8 + $0xb64] ss:$48 sps:$4 sm:$0xff]   ;;  %v18803_v35 = vld [vmem:[#allocation8 + $0xb60] ss:$48 sps:$4 sm:$0xff]  }
 0x63b   :  { %v18808_v59 = vld [vmem:[#allocation8 + $0x504] ss:$48 sps:$4 sm:$0xff]   ;;  %v18806_v62 = vld [vmem:[#allocation8 + $0x500] ss:$48 sps:$4 sm:$0xff]  }
 0x63c   :  { %13558 = vmatpush1.bf16.msra.mxu1 %v18761_v0  ;;  %v18811_v0 = vld [vmem:[#allocation8 + $0xb04] ss:$48 sps:$4 sm:$0xff]  }
 0x63d   :  { %13519 = vmatpush1.bf16.msra.mxu0 %v18764_v2  ;;  %13559 = vmatprep.subr.bf16.mxu1 %v18769_v12  ;;  %v18814_v1 = vld [vmem:[#allocation8 + $0x4a4] ss:$48 sps:$4 sm:$0xff]   ;;  %v18809_v2 = vld [vmem:[#allocation8 + $0xb00] ss:$48 sps:$4 sm:$0xff]  }
 0x63e   :  { %13520 = vmatprep.subr.bf16.mxu0 %v18772_v61  ;;  %v18812_v12 = vld [vmem:[#allocation8 + $0x4a0] ss:$48 sps:$4 sm:$0xff]   ;;  %v18817_v61 = vld [vmem:[#allocation8 + $0xaa4] ss:$48 sps:$4 sm:$0xff]  }
 0x640   :  { %13560 = vmatpush1.bf16.msra.mxu1 %v18767_v17  ;;  %v18820_v17 = vld [vmem:[#allocation8 + $0x444] ss:$48 sps:$4 sm:$0xff]  }
 0x641   :  { %13521 = vmatpush1.bf16.msra.mxu0 %v18770_v14  ;;  %13561 = vmatprep.subr.bf16.mxu1 %v18775_v21  ;;  %v18815_v14 = vld [vmem:[#allocation8 + $0xaa0] ss:$48 sps:$4 sm:$0xff]  }
 0x642   :  { %13522 = vmatprep.subr.bf16.mxu0 %v18778_v6  ;;  %v18818_v21 = vld [vmem:[#allocation8 + $0x440] ss:$48 sps:$4 sm:$0xff]   ;;  %v18823_v6 = vld [vmem:[#allocation8 + $0xa44] ss:$48 sps:$4 sm:$0xff]  }
 0x644   :  { %13562 = vmatpush1.bf16.msra.mxu1 %v18773_v28  ;;  %v18826_v28 = vld [vmem:[#allocation8 + $0x3e4] ss:$48 sps:$4 sm:$0xff]  }
 0x645   :  { %13523 = vmatpush1.bf16.msra.mxu0 %v18776_v37  ;;  %13563 = vmatprep.subr.bf16.mxu1 %v18781_v30  ;;  %v18821_v37 = vld [vmem:[#allocation8 + $0xa40] ss:$48 sps:$4 sm:$0xff]  }
 0x646   :  { %13524 = vmatprep.subr.bf16.mxu0 %v18784_v47  ;;  %v18824_v30 = vld [vmem:[#allocation8 + $0x3e0] ss:$48 sps:$4 sm:$0xff]   ;;  %v18829_v47 = vld [vmem:[#allocation8 + $0x9e4] ss:$48 sps:$4 sm:$0xff]  }
 0x648   :  { %13564 = vmatpush1.bf16.msra.mxu1 %v18779_v34  ;;  %v18832_v34 = vld [vmem:[#allocation8 + $0x384] ss:$48 sps:$4 sm:$0xff]  }
 0x649   :  { %13525 = vmatpush1.bf16.msra.mxu0 %v18782_v36  ;;  %13565 = vmatprep.subr.bf16.mxu1 %v18787_v38  ;;  %v18827_v36 = vld [vmem:[#allocation8 + $0x9e0] ss:$48 sps:$4 sm:$0xff]  }
 0x64a   :  { %13526 = vmatprep.subr.bf16.mxu0 %v18790_v33  ;;  %v18830_v38 = vld [vmem:[#allocation8 + $0x380] ss:$48 sps:$4 sm:$0xff]   ;;  %v18835_v33 = vld [vmem:[#allocation8 + $0x984] ss:$48 sps:$4 sm:$0xff]  }
 0x64c   :  { %13566 = vmatpush1.bf16.msra.mxu1 %v18785_v52  ;;  %v18838_v52 = vld [vmem:[#allocation8 + $0x324] ss:$48 sps:$4 sm:$0xff]  }
 0x64d   :  { %13527 = vmatpush1.bf16.msra.mxu0 %v18788_v41  ;;  %13567 = vmatprep.subr.bf16.mxu1 %v18793_v49  ;;  %v18833_v41 = vld [vmem:[#allocation8 + $0x980] ss:$48 sps:$4 sm:$0xff]  }
 0x64e   :  { %13528 = vmatprep.subr.bf16.mxu0 %v18796_v44  ;;  %v18836_v49 = vld [vmem:[#allocation8 + $0x320] ss:$48 sps:$4 sm:$0xff]   ;;  %v18841_v44 = vld [vmem:[#allocation8 + $0x924] ss:$48 sps:$4 sm:$0xff]  }
 0x650   :  { %13568 = vmatpush1.bf16.msra.mxu1 %v18791_v46  ;;  %v18844_v46 = vld [vmem:[#allocation8 + $0xec4] ss:$48 sps:$4 sm:$0xff]  }
 0x651   :  { %13529 = vmatpush2.bf16.msra.mxu0 %v18794_v53  ;;  %13569 = vmatprep.subr.bf16.mxu1 %v18799_v55  ;;  %v18839_v53 = vld [vmem:[#allocation8 + $0x920] ss:$48 sps:$4 sm:$0xff]  }
 0x652   :  { %13530 = vmatprep.subr.bf16.mxu0 %v18802_v39  ;;  %v18842_v55 = vld [vmem:[#allocation8 + $0xec0] ss:$48 sps:$4 sm:$0xff]   ;;  %v18847_v39 = vld [vmem:[#allocation8 + $0x14c4] ss:$48 sps:$4 sm:$0xff]  }
 0x654   :  { %13570 = vmatpush2.bf16.msra.mxu1 %v18797_v60  ;;  %v18850_v60 = vld [vmem:[#allocation8 + $0xe64] ss:$48 sps:$4 sm:$0xff]  }
 0x655   :  { %13531 = vmatpush2.bf16.msra.mxu0 %v18800_v54  ;;  %13571 = vmatprep.subr.bf16.mxu1 %v18805_v56  ;;  %v18845_v56 = vld [vmem:[#allocation8 + $0x14c0] ss:$48 sps:$4 sm:$0xff]  }
 0x656   :  { %13532 = vmatprep.subr.bf16.mxu0 %v18808_v59 }
 0x658   :  { %13572 = vmatpush2.bf16.msra.mxu1 %v18803_v35  ;;  %v18848_v35 = vld [vmem:[#allocation8 + $0xe60] ss:$48 sps:$4 sm:$0xff]  }
 0x659   :  { %13533 = vmatpush2.bf16.msra.mxu0 %v18806_v62  ;;  %13573 = vmatprep.subr.bf16.mxu1 %v18811_v0  ;;  %v18853_v62 = vld [vmem:[#allocation8 + $0x1464] ss:$48 sps:$4 sm:$0xff]  }
 0x65a   :  { %13534 = vmatprep.subr.bf16.mxu0 %v18814_v1  ;;  %v18856_v1 = vld [vmem:[#allocation8 + $0xe04] ss:$48 sps:$4 sm:$0xff]  }
 0x65c   :  { %13574 = vmatpush2.bf16.msra.mxu1 %v18809_v2 }
 0x65d   :  { %13535 = vmatpush2.bf16.msra.mxu0 %v18812_v12  ;;  %13575 = vmatprep.subr.bf16.mxu1 %v18817_v61 }
 0x65e   :  { %13536 = vmatprep.subr.bf16.mxu0 %v18820_v17 }
 0x660   :  { %13576 = vmatpush2.bf16.msra.mxu1 %v18815_v14 }
 0x661   :  { %13537 = vmatpush2.bf16.msra.mxu0 %v18818_v21  ;;  %13577 = vmatprep.subr.bf16.mxu1 %v18823_v6  ;;  %v18854_v21 = vld [vmem:[#allocation8 + $0xe00] ss:$48 sps:$4 sm:$0xff]   ;;  %v18859_v6 = vld [vmem:[#allocation8 + $0x1404] ss:$48 sps:$4 sm:$0xff]  }
 0x662   :  { %13538 = vmatprep.subr.bf16.mxu0 %v18826_v28 }
 0x664   :  { %13578 = vmatpush2.bf16.msra.mxu1 %v18821_v37 }
 0x665   :  { %13539 = vmatpush2.bf16.msra.mxu0 %v18824_v30  ;;  %13579 = vmatprep.subr.bf16.mxu1 %v18829_v47  ;;  %v18857_v47 = vld [vmem:[#allocation8 + $0x1400] ss:$48 sps:$4 sm:$0xff]  }
 0x666   :  { %13540 = vmatprep.subr.bf16.mxu0 %v18832_v34 }
 0x668   :  { %13580 = vmatpush2.bf16.msra.mxu1 %v18827_v36  ;;  %v18860_v36 = vld [vmem:[#allocation8 + $0xda0] ss:$48 sps:$4 sm:$0xff]  }
 0x669   :  { %13541 = vmatpush2.bf16.msra.mxu0 %v18830_v38  ;;  %13581 = vmatprep.subr.bf16.mxu1 %v18835_v33  ;;  %v18865_v38 = vld [vmem:[#allocation8 + $0x13a4] ss:$48 sps:$4 sm:$0xff]  }
 0x66a   :  { %13542 = vmatprep.subr.bf16.mxu0 %v18838_v52  ;;  %v18868_v33 = vld [vmem:[#allocation8 + $0xd44] ss:$48 sps:$4 sm:$0xff]   ;;  %v18863_v52 = vld [vmem:[#allocation8 + $0x13a0] ss:$48 sps:$4 sm:$0xff]  }
 0x66c   :  { %13582 = vmatpush2.bf16.msra.mxu1 %v18833_v41  ;;  %v18866_v41 = vld [vmem:[#allocation8 + $0xd40] ss:$48 sps:$4 sm:$0xff]  }
 0x66d   :  { %13543 = vmatpush2.bf16.msra.mxu0 %v18836_v49  ;;  %13583 = vmatprep.subr.bf16.mxu1 %v18841_v44  ;;  %v18871_v49 = vld [vmem:[#allocation8 + $0x1344] ss:$48 sps:$4 sm:$0xff]  }
 0x66e   :  { %13594 = vmatprep.subr.bf16.mxu0 %v18844_v46  ;;  %v18874_v44 = vld [vmem:[#allocation8 + $0xce4] ss:$48 sps:$4 sm:$0xff]   ;;  %v18869_v46 = vld [vmem:[#allocation8 + $0x1340] ss:$48 sps:$4 sm:$0xff]  }
 0x670   :  { %v13300_v54 = vpop.f32.mrf.mxu0  ;;  %13545 = vmatmul.mubr.bf16.vlgmr.msra.gmra.mxu0 %v19931_v13  ;;  %13584 = vmatpush2.bf16.msra.mxu1 %v18839_v53  ;;  %v18872_v53 = vld [vmem:[#allocation8 + $0xce0] ss:$48 sps:$4 sm:$0xff]  }
 0x671   :  { %v13301_v59 = vadd.f32 %v13300_v54, %v20136_v57  ;;  %13595 = vmatpush1.bf16.msra.mxu0 %v18842_v55  ;;  %13626 = vmatprep.mubr.bf16.mxu0 %v19936_v20  ;;  %v18851_v57 = vld [vmem:[#allocation8 + $0x1460] ss:$48 sps:$4 sm:$0xff]   ;;  %v18877_v55 = vld [vmem:[#allocation8 + $0x12e4] ss:$48 sps:$4 sm:$0xff]  }
 0x672   :  { %v13302_v0 = vpop.f32.mrf.mxu0  ;;  %13635 = vmatprep.subr.bf16.mxu1 %v18847_v39  ;;  %13596 = vmatprep.subr.bf16.mxu0 %v18850_v60  ;;  %v18880_v39 = vld [vmem:[#allocation8 + $0xc84] ss:$48 sps:$4 sm:$0xff]   ;;  %v18875_v60 = vld [vmem:[#allocation8 + $0x12e0] ss:$48 sps:$4 sm:$0xff]  }
 0x673   :  { %v13303_v2 = vadd.f32 %v13302_v0, %v20139_v58  ;;  %v13341_v12 = vpop.f32.mrf.mxu1  ;;  %13586 = vmatmul.mubr.bf16.vlgmr.msra.gmra.mxu1 %v19938_v23  ;;  %v18862_v58 = vld [vmem:[#allocation8 + $0xda4] ss:$48 sps:$4 sm:$0xff]   ;;  %v18878_v54 = vld [vmem:[#allocation8 + $0xc80] ss:$48 sps:$4 sm:$0xff]  }
 0x674   :  { %v20146_v61 = vadd.f32 %v13341_v12, %v13301_v59  ;;  %v13304_v17 = vpop.f32.mrf.mxu0  ;;  %13636 = vmatpush1.bf16.msra.mxu1 %v18845_v56  ;;  %13667 = vmatprep.mubr.bf16.mxu1 %v19942_v27  ;;  %v18883_v56 = vld [vmem:[#allocation8 + $0x1284] ss:$48 sps:$4 sm:$0xff]   ;;  %v18890_v12 = vld [vmem:[#allocation8 + $0x11c0] ss:$48 sps:$4 sm:$0xff]  }
 0x675   :  { %v13343_v14 = vpop.f32.mrf.mxu1  ;;  %13597 = vmatpush1.bf16.msra.mxu0 %v18848_v35  ;;  %13637 = vmatprep.subr.bf16.mxu1 %v18853_v62  ;;  %v18886_v59 = vld [vmem:[#allocation8 + $0xc24] ss:$48 sps:$4 sm:$0xff]   ;;  %v18881_v35 = vld [vmem:[#allocation8 + $0x1280] ss:$48 sps:$4 sm:$0xff]  }
 0x676   :  { %v20149_v28 = vadd.f32 %v13343_v14, %v13303_v2  ;;  %v13305_v37 = vpop.f32.mrf.mxu0  ;;  %13598 = vmatprep.subr.bf16.mxu0 %v18856_v1  ;;  %v18884_v62 = vld [vmem:[#allocation8 + $0xc20] ss:$48 sps:$4 sm:$0xff]   ;;  %v18889_v0 = vld [vmem:[#allocation8 + $0x1224] ss:$48 sps:$4 sm:$0xff]  }
 0x677   :  { %v13345_v30 = vpop.f32.mrf.mxu1  ;;  %v18892_v1 = vld [vmem:[#allocation8 + $0x11c4] ss:$48 sps:$4 sm:$0xff]   ;;  %v18887_v2 = vld [vmem:[#allocation8 + $0x1220] ss:$48 sps:$4 sm:$0xff]  }
 0x678   :  { %13638 = vmatpush1.bf16.msra.mxu1 %v18851_v57  ;;  %v18895_v17 = vld [vmem:[#allocation8 + $0x17c4] ss:$48 sps:$4 sm:$0xff]   ;;  %v18893_v14 = vld [vmem:[#allocation8 + $0x17c0] ss:$48 sps:$4 sm:$0xff]  }
 0x679   :  { %v13346_v34 = vpop.f32.mrf.mxu1  ;;  %13599 = vmatpush1.bf16.msra.mxu0 %v18854_v21  ;;  %13639 = vmatprep.subr.bf16.mxu1 %v18859_v6  ;;  %v18898_v57 = vld [vmem:[#allocation8 + $0x1164] ss:$48 sps:$4 sm:$0xff]   ;;  %v18896_v21 = vld [vmem:[#allocation8 + $0x1160] ss:$48 sps:$4 sm:$0xff]  }
 0x67a   :  { %13600 = vmatprep.subr.bf16.mxu0 %v18862_v58  ;;  %v18901_v6 = vld [vmem:[#allocation8 + $0x1764] ss:$48 sps:$4 sm:$0xff]   ;;  %v18899_v58 = vld [vmem:[#allocation8 + $0x1760] ss:$48 sps:$4 sm:$0xff]  }
 0x67b   :  { %v18904_v37 = vld [vmem:[#allocation8 + $0x1104] ss:$48 sps:$4 sm:$0xff]   ;;  %v18902_v30 = vld [vmem:[#allocation8 + $0x1100] ss:$48 sps:$4 sm:$0xff]  }
 0x67c   :  { %13640 = vmatpush1.bf16.msra.mxu1 %v18857_v47  ;;  %v18907_v47 = vld [vmem:[#allocation8 + $0x1704] ss:$48 sps:$4 sm:$0xff]  }
 0x67d   :  { %13601 = vmatpush1.bf16.msra.mxu0 %v18860_v36  ;;  %13641 = vmatprep.subr.bf16.mxu1 %v18865_v38  ;;  %v18910_v34 = vld [vmem:[#allocation8 + $0x10a4] ss:$48 sps:$4 sm:$0xff]   ;;  %v18905_v36 = vld [vmem:[#allocation8 + $0x1700] ss:$48 sps:$4 sm:$0xff]  }
 0x67e   :  { %13602 = vmatprep.subr.bf16.mxu0 %v18868_v33  ;;  %v18908_v38 = vld [vmem:[#allocation8 + $0x10a0] ss:$48 sps:$4 sm:$0xff]   ;;  %v18913_v33 = vld [vmem:[#allocation8 + $0x16a4] ss:$48 sps:$4 sm:$0xff]  }
 0x680   :  { %13642 = vmatpush1.bf16.msra.mxu1 %v18863_v52  ;;  %v18916_v52 = vld [vmem:[#allocation8 + $0x1044] ss:$48 sps:$4 sm:$0xff]  }
 0x681   :  { %13603 = vmatpush1.bf16.msra.mxu0 %v18866_v41  ;;  %13643 = vmatprep.subr.bf16.mxu1 %v18871_v49  ;;  %v18911_v41 = vld [vmem:[#allocation8 + $0x16a0] ss:$48 sps:$4 sm:$0xff]  }
 0x682   :  { %13604 = vmatprep.subr.bf16.mxu0 %v18874_v44  ;;  %v18914_v49 = vld [vmem:[#allocation8 + $0x1040] ss:$48 sps:$4 sm:$0xff]   ;;  %v18919_v44 = vld [vmem:[#allocation8 + $0x1644] ss:$48 sps:$4 sm:$0xff]  }
 0x684   :  { %13644 = vmatpush1.bf16.msra.mxu1 %v18869_v46  ;;  %v18922_v46 = vld [vmem:[#allocation8 + $0xfe4] ss:$48 sps:$4 sm:$0xff]  }
 0x685   :  { %13605 = vmatpush1.bf16.msra.mxu0 %v18872_v53  ;;  %13645 = vmatprep.subr.bf16.mxu1 %v18877_v55  ;;  %v18917_v53 = vld [vmem:[#allocation8 + $0x1640] ss:$48 sps:$4 sm:$0xff]  }
 0x686   :  { %13606 = vmatprep.subr.bf16.mxu0 %v18880_v39  ;;  %v18920_v55 = vld [vmem:[#allocation8 + $0xfe0] ss:$48 sps:$4 sm:$0xff]   ;;  %v18925_v39 = vld [vmem:[#allocation8 + $0x15e4] ss:$48 sps:$4 sm:$0xff]  }
 0x688   :  { %13646 = vmatpush1.bf16.msra.mxu1 %v18875_v60  ;;  %v18928_v60 = vld [vmem:[#allocation8 + $0xf84] ss:$48 sps:$4 sm:$0xff]  }
 0x689   :  { %13607 = vmatpush1.bf16.msra.mxu0 %v18878_v54  ;;  %13647 = vmatprep.subr.bf16.mxu1 %v18883_v56  ;;  %v18923_v54 = vld [vmem:[#allocation8 + $0x15e0] ss:$48 sps:$4 sm:$0xff]  }
 0x68a   :  { %13608 = vmatprep.subr.bf16.mxu0 %v18886_v59  ;;  %v18926_v56 = vld [vmem:[#allocation8 + $0xf80] ss:$48 sps:$4 sm:$0xff]   ;;  %v18931_v59 = vld [vmem:[#allocation8 + $0x1584] ss:$48 sps:$4 sm:$0xff]  }
 0x68c   :  { %13648 = vmatpush1.bf16.msra.mxu1 %v18881_v35  ;;  %v18934_v35 = vld [vmem:[#allocation8 + $0xf24] ss:$48 sps:$4 sm:$0xff]  }
 0x68d   :  { %13609 = vmatpush1.bf16.msra.mxu0 %v18884_v62  ;;  %13649 = vmatprep.subr.bf16.mxu1 %v18889_v0  ;;  %v18929_v62 = vld [vmem:[#allocation8 + $0x1580] ss:$48 sps:$4 sm:$0xff]  }
 0x68e   :  { %13610 = vmatprep.subr.bf16.mxu0 %v18892_v1  ;;  %v18932_v0 = vld [vmem:[#allocation8 + $0xf20] ss:$48 sps:$4 sm:$0xff]   ;;  %v18937_v1 = vld [vmem:[#allocation8 + $0x1524] ss:$48 sps:$4 sm:$0xff]  }
 0x690   :  { %13650 = vmatpush1.bf16.msra.mxu1 %v18887_v2  ;;  %v18940_v2 = vld [vmem:[#allocation8 + $0x1ac4] ss:$48 sps:$4 sm:$0xff]  }
 0x691   :  { %13611 = vmatpush2.bf16.msra.mxu0 %v18890_v12  ;;  %13651 = vmatprep.subr.bf16.mxu1 %v18895_v17  ;;  %v18935_v12 = vld [vmem:[#allocation8 + $0x1520] ss:$48 sps:$4 sm:$0xff]  }
 0x692   :  { %13612 = vmatprep.subr.bf16.mxu0 %v18898_v57  ;;  %v18938_v17 = vld [vmem:[#allocation8 + $0x1ac0] ss:$48 sps:$4 sm:$0xff]   ;;  %v18943_v57 = vld [vmem:[#allocation8 + $0x20c4] ss:$48 sps:$4 sm:$0xff]  }
 0x694   :  { %13652 = vmatpush2.bf16.msra.mxu1 %v18893_v14  ;;  %v18946_v14 = vld [vmem:[#allocation8 + $0x1a64] ss:$48 sps:$4 sm:$0xff]  }
 0x695   :  { %13613 = vmatpush2.bf16.msra.mxu0 %v18896_v21  ;;  %13653 = vmatprep.subr.bf16.mxu1 %v18901_v6  ;;  %v18941_v6 = vld [vmem:[#allocation8 + $0x20c0] ss:$48 sps:$4 sm:$0xff]  }
 0x696   :  { %13614 = vmatprep.subr.bf16.mxu0 %v18904_v37 }
 0x698   :  { %13654 = vmatpush2.bf16.msra.mxu1 %v18899_v58  ;;  %v18944_v58 = vld [vmem:[#allocation8 + $0x1a60] ss:$48 sps:$4 sm:$0xff]  }
 0x699   :  { %13615 = vmatpush2.bf16.msra.mxu0 %v18902_v30  ;;  %13655 = vmatprep.subr.bf16.mxu1 %v18907_v47  ;;  %v18949_v30 = vld [vmem:[#allocation8 + $0x2064] ss:$48 sps:$4 sm:$0xff]  }
 0x69a   :  { %13616 = vmatprep.subr.bf16.mxu0 %v18910_v34  ;;  %v18952_v34 = vld [vmem:[#allocation8 + $0x1a04] ss:$48 sps:$4 sm:$0xff]  }
 0x69c   :  { %13656 = vmatpush2.bf16.msra.mxu1 %v18905_v36 }
 0x69d   :  { %13617 = vmatpush2.bf16.msra.mxu0 %v18908_v38  ;;  %13657 = vmatprep.subr.bf16.mxu1 %v18913_v33 }
 0x69e   :  { %13618 = vmatprep.subr.bf16.mxu0 %v18916_v52 }
 0x6a0   :  { %13658 = vmatpush2.bf16.msra.mxu1 %v18911_v41 }
 0x6a1   :  { %13619 = vmatpush2.bf16.msra.mxu0 %v18914_v49  ;;  %13659 = vmatprep.subr.bf16.mxu1 %v18919_v44  ;;  %v18950_v49 = vld [vmem:[#allocation8 + $0x1a00] ss:$48 sps:$4 sm:$0xff]   ;;  %v18955_v44 = vld [vmem:[#allocation8 + $0x2004] ss:$48 sps:$4 sm:$0xff]  }
 0x6a2   :  { %13620 = vmatprep.subr.bf16.mxu0 %v18922_v46 }
 0x6a4   :  { %13660 = vmatpush2.bf16.msra.mxu1 %v18917_v53 }
 0x6a5   :  { %13621 = vmatpush2.bf16.msra.mxu0 %v18920_v55  ;;  %13661 = vmatprep.subr.bf16.mxu1 %v18925_v39  ;;  %v18953_v39 = vld [vmem:[#allocation8 + $0x2000] ss:$48 sps:$4 sm:$0xff]  }
 0x6a6   :  { %13622 = vmatprep.subr.bf16.mxu0 %v18928_v60 }
 0x6a8   :  { %13662 = vmatpush2.bf16.msra.mxu1 %v18923_v54  ;;  %v18956_v54 = vld [vmem:[#allocation8 + $0x19a0] ss:$48 sps:$4 sm:$0xff]  }
 0x6a9   :  { %13623 = vmatpush2.bf16.msra.mxu0 %v18926_v56  ;;  %13663 = vmatprep.subr.bf16.mxu1 %v18931_v59  ;;  %v18961_v56 = vld [vmem:[#allocation8 + $0x1fa4] ss:$48 sps:$4 sm:$0xff]  }
 0x6aa   :  { %13624 = vmatprep.subr.bf16.mxu0 %v18934_v35  ;;  %v18964_v59 = vld [vmem:[#allocation8 + $0x1944] ss:$48 sps:$4 sm:$0xff]   ;;  %v18959_v35 = vld [vmem:[#allocation8 + $0x1fa0] ss:$48 sps:$4 sm:$0xff]  }
 0x6ac   :  { %13664 = vmatpush2.bf16.msra.mxu1 %v18929_v62  ;;  %v18962_v62 = vld [vmem:[#allocation8 + $0x1940] ss:$48 sps:$4 sm:$0xff]  }
 0x6ad   :  { %13625 = vmatpush2.bf16.msra.mxu0 %v18932_v0  ;;  %13665 = vmatprep.subr.bf16.mxu1 %v18937_v1  ;;  %v18967_v0 = vld [vmem:[#allocation8 + $0x1f44] ss:$48 sps:$4 sm:$0xff]  }
 0x6ae   :  { %13676 = vmatprep.subr.bf16.mxu0 %v18940_v2  ;;  %v18970_v1 = vld [vmem:[#allocation8 + $0x18e4] ss:$48 sps:$4 sm:$0xff]   ;;  %v18965_v2 = vld [vmem:[#allocation8 + $0x1f40] ss:$48 sps:$4 sm:$0xff]  }
 0x6b0   :  { %v13382_v21 = vpop.f32.mrf.mxu0  ;;  %13627 = vmatmul.mubr.bf16.vlgmr.msra.gmra.mxu0 %v19946_v42  ;;  %13666 = vmatpush2.bf16.msra.mxu1 %v18935_v12  ;;  %v18968_v12 = vld [vmem:[#allocation8 + $0x18e0] ss:$48 sps:$4 sm:$0xff]  }
 0x6b1   :  { %v13383_v37 = vadd.f32 %v13382_v21, %v20146_v61  ;;  %13677 = vmatpush1.bf16.msra.mxu0 %v18938_v17  ;;  %13708 = vmatprep.mubr.bf16.mxu0 %v19948_v45  ;;  %v18947_v61 = vld [vmem:[#allocation8 + $0x2060] ss:$48 sps:$4 sm:$0xff]   ;;  %v18973_v17 = vld [vmem:[#allocation8 + $0x1ee4] ss:$48 sps:$4 sm:$0xff]  }
 0x6b2   :  { %v13384_v47 = vpop.f32.mrf.mxu0  ;;  %13717 = vmatprep.subr.bf16.mxu1 %v18943_v57  ;;  %13678 = vmatprep.subr.bf16.mxu0 %v18946_v14  ;;  %v18976_v57 = vld [vmem:[#allocation8 + $0x1884] ss:$48 sps:$4 sm:$0xff]   ;;  %v18971_v14 = vld [vmem:[#allocation8 + $0x1ee0] ss:$48 sps:$4 sm:$0xff]  }
 0x6b3   :  { %v13385_v36 = vadd.f32 %v13384_v47, %v20149_v28  ;;  %v13423_v38 = vpop.f32.mrf.mxu1  ;;  %13668 = vmatmul.mubr.bf16.vlgmr.msra.gmra.mxu1 %v19952_v50  ;;  %v18958_v28 = vld [vmem:[#allocation8 + $0x19a4] ss:$48 sps:$4 sm:$0xff]   ;;  %v18974_v21 = vld [vmem:[#allocation8 + $0x1880] ss:$48 sps:$4 sm:$0xff]  }
 0x6b4   :  { %v20156_v33 = vadd.f32 %v13423_v38, %v13383_v37  ;;  %v13386_v52 = vpop.f32.mrf.mxu0  ;;  %13718 = vmatpush1.bf16.msra.mxu1 %v18941_v6  ;;  %13749 = vmatprep.mubr.bf16.mxu1 %v19954_v51  ;;  %v18979_v6 = vld [vmem:[#allocation8 + $0x1e84] ss:$48 sps:$4 sm:$0xff]   ;;  %v18986_v38 = vld [vmem:[#allocation8 + $0x1dc0] ss:$48 sps:$4 sm:$0xff]  }
 0x6b5   :  { %v13425_v41 = vpop.f32.mrf.mxu1  ;;  %13679 = vmatpush1.bf16.msra.mxu0 %v18944_v58  ;;  %13719 = vmatprep.subr.bf16.mxu1 %v18949_v30  ;;  %v18982_v37 = vld [vmem:[#allocation8 + $0x1824] ss:$48 sps:$4 sm:$0xff]   ;;  %v18977_v58 = vld [vmem:[#allocation8 + $0x1e80] ss:$48 sps:$4 sm:$0xff]  }
 0x6b6   :  { %v20159_v46 = vadd.f32 %v13425_v41, %v13385_v36  ;;  %v13387_v53 = vpop.f32.mrf.mxu0  ;;  %13680 = vmatprep.subr.bf16.mxu0 %v18952_v34  ;;  %v18980_v30 = vld [vmem:[#allocation8 + $0x1820] ss:$48 sps:$4 sm:$0xff]   ;;  %v18985_v47 = vld [vmem:[#allocation8 + $0x1e24] ss:$48 sps:$4 sm:$0xff]  }
 0x6b7   :  { %v13427_v55 = vpop.f32.mrf.mxu1  ;;  %v18988_v34 = vld [vmem:[#allocation8 + $0x1dc4] ss:$48 sps:$4 sm:$0xff]   ;;  %v18983_v36 = vld [vmem:[#allocation8 + $0x1e20] ss:$48 sps:$4 sm:$0xff]  }
 0x6b8   :  { %13720 = vmatpush1.bf16.msra.mxu1 %v18947_v61  ;;  %v18991_v52 = vld [vmem:[#allocation8 + $0x23c4] ss:$48 sps:$4 sm:$0xff]   ;;  %v18989_v41 = vld [vmem:[#allocation8 + $0x23c0] ss:$48 sps:$4 sm:$0xff]  }
 0x6b9   :  { %v13428_v60 = vpop.f32.mrf.mxu1  ;;  %13681 = vmatpush1.bf16.msra.mxu0 %v18950_v49  ;;  %13721 = vmatprep.subr.bf16.mxu1 %v18955_v44  ;;  %v18994_v61 = vld [vmem:[#allocation8 + $0x1d64] ss:$48 sps:$4 sm:$0xff]   ;;  %v18992_v49 = vld [vmem:[#allocation8 + $0x1d60] ss:$48 sps:$4 sm:$0xff]  }
 0x6ba   :  { %13682 = vmatprep.subr.bf16.mxu0 %v18958_v28  ;;  %v18997_v44 = vld [vmem:[#allocation8 + $0x2364] ss:$48 sps:$4 sm:$0xff]   ;;  %v18995_v28 = vld [vmem:[#allocation8 + $0x2360] ss:$48 sps:$4 sm:$0xff]  }
 0x6bb   :  { %v19000_v53 = vld [vmem:[#allocation8 + $0x1d04] ss:$48 sps:$4 sm:$0xff]   ;;  %v18998_v55 = vld [vmem:[#allocation8 + $0x1d00] ss:$48 sps:$4 sm:$0xff]  }
 0x6bc   :  { %13722 = vmatpush1.bf16.msra.mxu1 %v18953_v39  ;;  %v19003_v39 = vld [vmem:[#allocation8 + $0x2304] ss:$48 sps:$4 sm:$0xff]  }
 0x6bd   :  { %13683 = vmatpush1.bf16.msra.mxu0 %v18956_v54  ;;  %13723 = vmatprep.subr.bf16.mxu1 %v18961_v56  ;;  %v19006_v60 = vld [vmem:[#allocation8 + $0x1ca4] ss:$48 sps:$4 sm:$0xff]   ;;  %v19001_v54 = vld [vmem:[#allocation8 + $0x2300] ss:$48 sps:$4 sm:$0xff]  }
 0x6be   :  { %13684 = vmatprep.subr.bf16.mxu0 %v18964_v59  ;;  %v19004_v56 = vld [vmem:[#allocation8 + $0x1ca0] ss:$48 sps:$4 sm:$0xff]   ;;  %v19009_v59 = vld [vmem:[#allocation8 + $0x22a4] ss:$48 sps:$4 sm:$0xff]  }
 0x6c0   :  { %13724 = vmatpush1.bf16.msra.mxu1 %v18959_v35  ;;  %v19012_v35 = vld [vmem:[#allocation8 + $0x1c44] ss:$48 sps:$4 sm:$0xff]  }
 0x6c1   :  { %13685 = vmatpush1.bf16.msra.mxu0 %v18962_v62  ;;  %13725 = vmatprep.subr.bf16.mxu1 %v18967_v0  ;;  %v19007_v62 = vld [vmem:[#allocation8 + $0x22a0] ss:$48 sps:$4 sm:$0xff]  }
 0x6c2   :  { %13686 = vmatprep.subr.bf16.mxu0 %v18970_v1  ;;  %v19010_v0 = vld [vmem:[#allocation8 + $0x1c40] ss:$48 sps:$4 sm:$0xff]   ;;  %v19015_v1 = vld [vmem:[#allocation8 + $0x2244] ss:$48 sps:$4 sm:$0xff]  }
 0x6c4   :  { %13726 = vmatpush1.bf16.msra.mxu1 %v18965_v2  ;;  %v19018_v2 = vld [vmem:[#allocation8 + $0x1be4] ss:$48 sps:$4 sm:$0xff]  }
 0x6c5   :  { %13687 = vmatpush1.bf16.msra.mxu0 %v18968_v12  ;;  %13727 = vmatprep.subr.bf16.mxu1 %v18973_v17  ;;  %v19013_v12 = vld [vmem:[#allocation8 + $0x2240] ss:$48 sps:$4 sm:$0xff]  }
 0x6c6   :  { %13688 = vmatprep.subr.bf16.mxu0 %v18976_v57  ;;  %v19016_v17 = vld [vmem:[#allocation8 + $0x1be0] ss:$48 sps:$4 sm:$0xff]   ;;  %v19021_v57 = vld [vmem:[#allocation8 + $0x21e4] ss:$48 sps:$4 sm:$0xff]  }
 0x6c8   :  { %13728 = vmatpush1.bf16.msra.mxu1 %v18971_v14  ;;  %v19024_v14 = vld [vmem:[#allocation8 + $0x1b84] ss:$48 sps:$4 sm:$0xff]  }
 0x6c9   :  { %13689 = vmatpush1.bf16.msra.mxu0 %v18974_v21  ;;  %13729 = vmatprep.subr.bf16.mxu1 %v18979_v6  ;;  %v19019_v21 = vld [vmem:[#allocation8 + $0x21e0] ss:$48 sps:$4 sm:$0xff]  }
 0x6ca   :  { %13690 = vmatprep.subr.bf16.mxu0 %v18982_v37  ;;  %v19022_v6 = vld [vmem:[#allocation8 + $0x1b80] ss:$48 sps:$4 sm:$0xff]   ;;  %v19027_v37 = vld [vmem:[#allocation8 + $0x2184] ss:$48 sps:$4 sm:$0xff]  }
 0x6cc   :  { %13730 = vmatpush1.bf16.msra.mxu1 %v18977_v58  ;;  %v19030_v58 = vld [vmem:[#allocation8 + $0x1b24] ss:$48 sps:$4 sm:$0xff]  }
 0x6cd   :  { %13691 = vmatpush1.bf16.msra.mxu0 %v18980_v30  ;;  %13731 = vmatprep.subr.bf16.mxu1 %v18985_v47  ;;  %v19025_v30 = vld [vmem:[#allocation8 + $0x2180] ss:$48 sps:$4 sm:$0xff]  }
 0x6ce   :  { %13692 = vmatprep.subr.bf16.mxu0 %v18988_v34  ;;  %v19028_v47 = vld [vmem:[#allocation8 + $0x1b20] ss:$48 sps:$4 sm:$0xff]   ;;  %v19033_v34 = vld [vmem:[#allocation8 + $0x2124] ss:$48 sps:$4 sm:$0xff]  }
 0x6d0   :  { %13732 = vmatpush1.bf16.msra.mxu1 %v18983_v36  ;;  %v19036_v36 = vld [vmem:[#allocation8 + $0x26c4] ss:$48 sps:$4 sm:$0xff]  }
 0x6d1   :  { %13693 = vmatpush2.bf16.msra.mxu0 %v18986_v38  ;;  %13733 = vmatprep.subr.bf16.mxu1 %v18991_v52  ;;  %v19031_v38 = vld [vmem:[#allocation8 + $0x2120] ss:$48 sps:$4 sm:$0xff]  }
 0x6d2   :  { %13694 = vmatprep.subr.bf16.mxu0 %v18994_v61  ;;  %v19034_v52 = vld [vmem:[#allocation8 + $0x26c0] ss:$48 sps:$4 sm:$0xff]   ;;  %v19039_v61 = vld [vmem:[#allocation8 + $0x2cc4] ss:$48 sps:$4 sm:$0xff]  }
 0x6d4   :  { %13734 = vmatpush2.bf16.msra.mxu1 %v18989_v41  ;;  %v19042_v41 = vld [vmem:[#allocation8 + $0x2664] ss:$48 sps:$4 sm:$0xff]  }
 0x6d5   :  { %13695 = vmatpush2.bf16.msra.mxu0 %v18992_v49  ;;  %13735 = vmatprep.subr.bf16.mxu1 %v18997_v44  ;;  %v19037_v44 = vld [vmem:[#allocation8 + $0x2cc0] ss:$48 sps:$4 sm:$0xff]  }
 0x6d6   :  { %13696 = vmatprep.subr.bf16.mxu0 %v19000_v53 }
 0x6d8   :  { %13736 = vmatpush2.bf16.msra.mxu1 %v18995_v28  ;;  %v19040_v28 = vld [vmem:[#allocation8 + $0x2660] ss:$48 sps:$4 sm:$0xff]  }
 0x6d9   :  { %13697 = vmatpush2.bf16.msra.mxu0 %v18998_v55  ;;  %13737 = vmatprep.subr.bf16.mxu1 %v19003_v39  ;;  %v19045_v55 = vld [vmem:[#allocation8 + $0x2c64] ss:$48 sps:$4 sm:$0xff]  }
 0x6da   :  { %13698 = vmatprep.subr.bf16.mxu0 %v19006_v60  ;;  %v19048_v60 = vld [vmem:[#allocation8 + $0x2604] ss:$48 sps:$4 sm:$0xff]  }
 0x6dc   :  { %13738 = vmatpush2.bf16.msra.mxu1 %v19001_v54 }
 0x6dd   :  { %13699 = vmatpush2.bf16.msra.mxu0 %v19004_v56  ;;  %13739 = vmatprep.subr.bf16.mxu1 %v19009_v59 }
 0x6de   :  { %13700 = vmatprep.subr.bf16.mxu0 %v19012_v35 }
 0x6e0   :  { %13740 = vmatpush2.bf16.msra.mxu1 %v19007_v62 }
 0x6e1   :  { %13701 = vmatpush2.bf16.msra.mxu0 %v19010_v0  ;;  %13741 = vmatprep.subr.bf16.mxu1 %v19015_v1  ;;  %v19046_v0 = vld [vmem:[#allocation8 + $0x2600] ss:$48 sps:$4 sm:$0xff]   ;;  %v19051_v1 = vld [vmem:[#allocation8 + $0x2c04] ss:$48 sps:$4 sm:$0xff]  }
 0x6e2   :  { %13702 = vmatprep.subr.bf16.mxu0 %v19018_v2 }
 0x6e4   :  { %13742 = vmatpush2.bf16.msra.mxu1 %v19013_v12 }
 0x6e5   :  { %13703 = vmatpush2.bf16.msra.mxu0 %v19016_v17  ;;  %13743 = vmatprep.subr.bf16.mxu1 %v19021_v57  ;;  %v19049_v57 = vld [vmem:[#allocation8 + $0x2c00] ss:$48 sps:$4 sm:$0xff]  }
 0x6e6   :  { %13704 = vmatprep.subr.bf16.mxu0 %v19024_v14 }
 0x6e8   :  { %13744 = vmatpush2.bf16.msra.mxu1 %v19019_v21  ;;  %v19052_v21 = vld [vmem:[#allocation8 + $0x25a0] ss:$48 sps:$4 sm:$0xff]  }
 0x6e9   :  { %13705 = vmatpush2.bf16.msra.mxu0 %v19022_v6  ;;  %13745 = vmatprep.subr.bf16.mxu1 %v19027_v37  ;;  %v19057_v6 = vld [vmem:[#allocation8 + $0x2ba4] ss:$48 sps:$4 sm:$0xff]  }
 0x6ea   :  { %13706 = vmatprep.subr.bf16.mxu0 %v19030_v58  ;;  %v19060_v37 = vld [vmem:[#allocation8 + $0x2544] ss:$48 sps:$4 sm:$0xff]   ;;  %v19055_v58 = vld [vmem:[#allocation8 + $0x2ba0] ss:$48 sps:$4 sm:$0xff]  }
 0x6ec   :  { %13746 = vmatpush2.bf16.msra.mxu1 %v19025_v30  ;;  %v19058_v30 = vld [vmem:[#allocation8 + $0x2540] ss:$48 sps:$4 sm:$0xff]  }
 0x6ed   :  { %13707 = vmatpush2.bf16.msra.mxu0 %v19028_v47  ;;  %13747 = vmatprep.subr.bf16.mxu1 %v19033_v34  ;;  %v19063_v47 = vld [vmem:[#allocation8 + $0x2b44] ss:$48 sps:$4 sm:$0xff]  }
 0x6ee   :  { %13758 = vmatprep.subr.bf16.mxu0 %v19036_v36  ;;  %v19066_v34 = vld [vmem:[#allocation8 + $0x24e4] ss:$48 sps:$4 sm:$0xff]   ;;  %v19061_v36 = vld [vmem:[#allocation8 + $0x2b40] ss:$48 sps:$4 sm:$0xff]  }
 0x6f0   :  { %v13464_v49 = vpop.f32.mrf.mxu0  ;;  %13709 = vmatmul.mubr.bf16.vlgmr.msra.gmra.mxu0 %v19958_v5  ;;  %13748 = vmatpush2.bf16.msra.mxu1 %v19031_v38  ;;  %v19064_v38 = vld [vmem:[#allocation8 + $0x24e0] ss:$48 sps:$4 sm:$0xff]  }
 0x6f1   :  { %v13465_v53 = vadd.f32 %v13464_v49, %v20156_v33  ;;  %13759 = vmatpush1.bf16.msra.mxu0 %v19034_v52  ;;  %13790 = vmatprep.mubr.bf16.mxu0 %v19960_v9  ;;  %v19043_v33 = vld [vmem:[#allocation8 + $0x2c60] ss:$48 sps:$4 sm:$0xff]   ;;  %v19069_v52 = vld [vmem:[#allocation8 + $0x2ae4] ss:$48 sps:$4 sm:$0xff]  }
 0x6f2   :  { %v13466_v39 = vpop.f32.mrf.mxu0  ;;  %13799 = vmatprep.subr.bf16.mxu1 %v19039_v61  ;;  %13760 = vmatprep.subr.bf16.mxu0 %v19042_v41  ;;  %v19072_v61 = vld [vmem:[#allocation8 + $0x2484] ss:$48 sps:$4 sm:$0xff]   ;;  %v19067_v41 = vld [vmem:[#allocation8 + $0x2ae0] ss:$48 sps:$4 sm:$0xff]  }
 0x6f3   :  { %v13467_v54 = vadd.f32 %v13466_v39, %v20159_v46  ;;  %v13505_v56 = vpop.f32.mrf.mxu1  ;;  %13750 = vmatmul.mubr.bf16.vlgmr.msra.gmra.mxu1 %v19964_v11  ;;  %v19054_v46 = vld [vmem:[#allocation8 + $0x25a4] ss:$48 sps:$4 sm:$0xff]   ;;  %v19070_v49 = vld [vmem:[#allocation8 + $0x2480] ss:$48 sps:$4 sm:$0xff]  }
 0x6f4   :  { %v20166_v59 = vadd.f32 %v13505_v56, %v13465_v53  ;;  %v13468_v35 = vpop.f32.mrf.mxu0  ;;  %13800 = vmatpush1.bf16.msra.mxu1 %v19037_v44  ;;  %13831 = vmatprep.mubr.bf16.mxu1 %v19966_v15  ;;  %v19075_v44 = vld [vmem:[#allocation8 + $0x2a84] ss:$48 sps:$4 sm:$0xff]   ;;  %v19082_v56 = vld [vmem:[#allocation8 + $0x29c0] ss:$48 sps:$4 sm:$0xff]  }
 0x6f5   :  { %v13507_v62 = vpop.f32.mrf.mxu1  ;;  %13761 = vmatpush1.bf16.msra.mxu0 %v19040_v28  ;;  %13801 = vmatprep.subr.bf16.mxu1 %v19045_v55  ;;  %v19078_v53 = vld [vmem:[#allocation8 + $0x2424] ss:$48 sps:$4 sm:$0xff]   ;;  %v19073_v28 = vld [vmem:[#allocation8 + $0x2a80] ss:$48 sps:$4 sm:$0xff]  }
 0x6f6   :  { %v20169_v2 = vadd.f32 %v13507_v62, %v13467_v54  ;;  %v13469_v12 = vpop.f32.mrf.mxu0  ;;  %13762 = vmatprep.subr.bf16.mxu0 %v19048_v60  ;;  %v19076_v55 = vld [vmem:[#allocation8 + $0x2420] ss:$48 sps:$4 sm:$0xff]   ;;  %v19081_v39 = vld [vmem:[#allocation8 + $0x2a24] ss:$48 sps:$4 sm:$0xff]  }
 0x6f7   :  { %v13509_v17 = vpop.f32.mrf.mxu1  ;;  %v19084_v60 = vld [vmem:[#allocation8 + $0x29c4] ss:$48 sps:$4 sm:$0xff]   ;;  %v19079_v54 = vld [vmem:[#allocation8 + $0x2a20] ss:$48 sps:$4 sm:$0xff]  }
 0x6f8   :  { %13802 = vmatpush1.bf16.msra.mxu1 %v19043_v33  ;;  %v19087_v35 = vld [vmem:[#allocation8 + $0x2fc4] ss:$48 sps:$4 sm:$0xff]   ;;  %v19085_v62 = vld [vmem:[#allocation8 + $0x2fc0] ss:$48 sps:$4 sm:$0xff]  }
 0x6f9   :  { %v13510_v14 = vpop.f32.mrf.mxu1  ;;  %13763 = vmatpush1.bf16.msra.mxu0 %v19046_v0  ;;  %13803 = vmatprep.subr.bf16.mxu1 %v19051_v1  ;;  %v19090_v33 = vld [vmem:[#allocation8 + $0x2964] ss:$48 sps:$4 sm:$0xff]   ;;  %v19088_v0 = vld [vmem:[#allocation8 + $0x2960] ss:$48 sps:$4 sm:$0xff]  }
 0x6fa   :  { %13764 = vmatprep.subr.bf16.mxu0 %v19054_v46  ;;  %v19093_v1 = vld [vmem:[#allocation8 + $0x2f64] ss:$48 sps:$4 sm:$0xff]   ;;  %v19091_v46 = vld [vmem:[#allocation8 + $0x2f60] ss:$48 sps:$4 sm:$0xff]  }
 0x6fb   :  { %v19096_v12 = vld [vmem:[#allocation8 + $0x2904] ss:$48 sps:$4 sm:$0xff]   ;;  %v19094_v17 = vld [vmem:[#allocation8 + $0x2900] ss:$48 sps:$4 sm:$0xff]  }
 0x6fc   :  { %13804 = vmatpush1.bf16.msra.mxu1 %v19049_v57  ;;  %v19099_v57 = vld [vmem:[#allocation8 + $0x2f04] ss:$48 sps:$4 sm:$0xff]  }
 0x6fd   :  { %13765 = vmatpush1.bf16.msra.mxu0 %v19052_v21  ;;  %13805 = vmatprep.subr.bf16.mxu1 %v19057_v6  ;;  %v19102_v14 = vld [vmem:[#allocation8 + $0x28a4] ss:$48 sps:$4 sm:$0xff]   ;;  %v19097_v21 = vld [vmem:[#allocation8 + $0x2f00] ss:$48 sps:$4 sm:$0xff]  }
 0x6fe   :  { %13766 = vmatprep.subr.bf16.mxu0 %v19060_v37  ;;  %v19100_v6 = vld [vmem:[#allocation8 + $0x28a0] ss:$48 sps:$4 sm:$0xff]   ;;  %v19105_v37 = vld [vmem:[#allocation8 + $0x2ea4] ss:$48 sps:$4 sm:$0xff]  }
 0x700   :  { %13806 = vmatpush1.bf16.msra.mxu1 %v19055_v58  ;;  %v19108_v58 = vld [vmem:[#allocation8 + $0x2844] ss:$48 sps:$4 sm:$0xff]  }
 0x701   :  { %13767 = vmatpush1.bf16.msra.mxu0 %v19058_v30  ;;  %13807 = vmatprep.subr.bf16.mxu1 %v19063_v47  ;;  %v19103_v30 = vld [vmem:[#allocation8 + $0x2ea0] ss:$48 sps:$4 sm:$0xff]  }
 0x702   :  { %13768 = vmatprep.subr.bf16.mxu0 %v19066_v34  ;;  %v19106_v47 = vld [vmem:[#allocation8 + $0x2840] ss:$48 sps:$4 sm:$0xff]   ;;  %v19111_v34 = vld [vmem:[#allocation8 + $0x2e44] ss:$48 sps:$4 sm:$0xff]  }
 0x704   :  { %13808 = vmatpush1.bf16.msra.mxu1 %v19061_v36  ;;  %v19114_v36 = vld [vmem:[#allocation8 + $0x27e4] ss:$48 sps:$4 sm:$0xff]  }
 0x705   :  { %13769 = vmatpush1.bf16.msra.mxu0 %v19064_v38  ;;  %13809 = vmatprep.subr.bf16.mxu1 %v19069_v52  ;;  %v19109_v38 = vld [vmem:[#allocation8 + $0x2e40] ss:$48 sps:$4 sm:$0xff]  }
 0x706   :  { %13770 = vmatprep.subr.bf16.mxu0 %v19072_v61  ;;  %v19112_v52 = vld [vmem:[#allocation8 + $0x27e0] ss:$48 sps:$4 sm:$0xff]   ;;  %v19117_v61 = vld [vmem:[#allocation8 + $0x2de4] ss:$48 sps:$4 sm:$0xff]  }
 0x708   :  { %13810 = vmatpush1.bf16.msra.mxu1 %v19067_v41  ;;  %v19120_v41 = vld [vmem:[#allocation8 + $0x2784] ss:$48 sps:$4 sm:$0xff]  }
 0x709   :  { %13771 = vmatpush1.bf16.msra.mxu0 %v19070_v49  ;;  %13811 = vmatprep.subr.bf16.mxu1 %v19075_v44  ;;  %v19115_v49 = vld [vmem:[#allocation8 + $0x2de0] ss:$48 sps:$4 sm:$0xff]  }
 0x70a   :  { %13772 = vmatprep.subr.bf16.mxu0 %v19078_v53  ;;  %v19118_v44 = vld [vmem:[#allocation8 + $0x2780] ss:$48 sps:$4 sm:$0xff]   ;;  %v19123_v53 = vld [vmem:[#allocation8 + $0x2d84] ss:$48 sps:$4 sm:$0xff]  }
 0x70c   :  { %13812 = vmatpush1.bf16.msra.mxu1 %v19073_v28  ;;  %v19126_v28 = vld [vmem:[#allocation8 + $0x2724] ss:$48 sps:$4 sm:$0xff]  }
 0x70d   :  { %13773 = vmatpush1.bf16.msra.mxu0 %v19076_v55  ;;  %13813 = vmatprep.subr.bf16.mxu1 %v19081_v39  ;;  %v19121_v55 = vld [vmem:[#allocation8 + $0x2d80] ss:$48 sps:$4 sm:$0xff]  }
 0x70e   :  { %13774 = vmatprep.subr.bf16.mxu0 %v19084_v60  ;;  %v19124_v39 = vld [vmem:[#allocation8 + $0x2720] ss:$48 sps:$4 sm:$0xff]   ;;  %v19129_v60 = vld [vmem:[#allocation8 + $0x2d24] ss:$48 sps:$4 sm:$0xff]  }
 0x710   :  { %13814 = vmatpush1.bf16.msra.mxu1 %v19079_v54  ;;  %v19132_v54 = vld [vmem:[#allocation8 + $0x32c4] ss:$48 sps:$4 sm:$0xff]  }
 0x711   :  { %13775 = vmatpush2.bf16.msra.mxu0 %v19082_v56  ;;  %13815 = vmatprep.subr.bf16.mxu1 %v19087_v35  ;;  %v19127_v56 = vld [vmem:[#allocation8 + $0x2d20] ss:$48 sps:$4 sm:$0xff]  }
 0x712   :  { %13776 = vmatprep.subr.bf16.mxu0 %v19090_v33  ;;  %v19130_v35 = vld [vmem:[#allocation8 + $0x32c0] ss:$48 sps:$4 sm:$0xff]   ;;  %v19135_v33 = vld [vmem:[#allocation8 + $0x2cc] ss:$48 sps:$4 sm:$0xff]  }
 0x714   :  { %13816 = vmatpush2.bf16.msra.mxu1 %v19085_v62  ;;  %v19138_v62 = vld [vmem:[#allocation8 + $0x3264] ss:$48 sps:$4 sm:$0xff]  }
 0x715   :  { %13777 = vmatpush2.bf16.msra.mxu0 %v19088_v0  ;;  %13817 = vmatprep.subr.bf16.mxu1 %v19093_v1  ;;  %v19133_v1 = vld [vmem:[#allocation8 + $0x2c8] ss:$48 sps:$4 sm:$0xff]  }
 0x716   :  { %13778 = vmatprep.subr.bf16.mxu0 %v19096_v12  ;;  %v19136_v12 = vld [vmem:[#allocation8 + $0x3260] ss:$48 sps:$4 sm:$0xff]  }
 0x718   :  { %13818 = vmatpush2.bf16.msra.mxu1 %v19091_v46  ;;  %v19141_v46 = vld [vmem:[#allocation8 + $0x26c] ss:$48 sps:$4 sm:$0xff]  }
 0x719   :  { %13779 = vmatpush2.bf16.msra.mxu0 %v19094_v17  ;;  %13819 = vmatprep.subr.bf16.mxu1 %v19099_v57  ;;  %v19144_v57 = vld [vmem:[#allocation8 + $0x3204] ss:$48 sps:$4 sm:$0xff]  }
 0x71a   :  { %13780 = vmatprep.subr.bf16.mxu0 %v19102_v14 }
 0x71c   :  { %13820 = vmatpush2.bf16.msra.mxu1 %v19097_v21 }
 0x71d   :  { %13781 = vmatpush2.bf16.msra.mxu0 %v19100_v6  ;;  %13821 = vmatprep.subr.bf16.mxu1 %v19105_v37  ;;  %v19139_v37 = vld [vmem:[#allocation8 + $0x268] ss:$48 sps:$4 sm:$0xff]  }
 0x71e   :  { %13782 = vmatprep.subr.bf16.mxu0 %v19108_v58 }
 0x720   :  { %13822 = vmatpush2.bf16.msra.mxu1 %v19103_v30  ;;  %v19142_v30 = vld [vmem:[#allocation8 + $0x3200] ss:$48 sps:$4 sm:$0xff]  }
 0x721   :  { %13783 = vmatpush2.bf16.msra.mxu0 %v19106_v47  ;;  %13823 = vmatprep.subr.bf16.mxu1 %v19111_v34  ;;  %v19147_v47 = vld [vmem:[#allocation8 + $0x20c] ss:$48 sps:$4 sm:$0xff]  }
 0x722   :  { %13784 = vmatprep.subr.bf16.mxu0 %v19114_v36 }
 0x724   :  { %13824 = vmatpush2.bf16.msra.mxu1 %v19109_v38  ;;  %v19150_v38 = vld [vmem:[#allocation8 + $0x31a4] ss:$48 sps:$4 sm:$0xff]  }
 0x725   :  { %13785 = vmatpush2.bf16.msra.mxu0 %v19112_v52  ;;  %13825 = vmatprep.subr.bf16.mxu1 %v19117_v61  ;;  %v19145_v61 = vld [vmem:[#allocation8 + $0x208] ss:$48 sps:$4 sm:$0xff]  }
 0x726   :  { %13786 = vmatprep.subr.bf16.mxu0 %v19120_v41 }
 0x728   :  { %13826 = vmatpush2.bf16.msra.mxu1 %v19115_v49  ;;  %v19148_v49 = vld [vmem:[#allocation8 + $0x31a0] ss:$48 sps:$4 sm:$0xff]  }
 0x729   :  { %13787 = vmatpush2.bf16.msra.mxu0 %v19118_v44  ;;  %13827 = vmatprep.subr.bf16.mxu1 %v19123_v53  ;;  %v19153_v44 = vld [vmem:[#allocation8 + $0x1ac] ss:$48 sps:$4 sm:$0xff]   ;;  %v19151_v53 = vld [vmem:[#allocation8 + $0x1a8] ss:$48 sps:$4 sm:$0xff]  }
 0x72a   :  { %13788 = vmatprep.subr.bf16.mxu0 %v19126_v28  ;;  %v19154_v28 = vld [vmem:[#allocation8 + $0x3140] ss:$48 sps:$4 sm:$0xff]  }
 0x72c   :  { %13828 = vmatpush2.bf16.msra.mxu1 %v19121_v55  ;;  %v19159_v55 = vld [vmem:[#allocation8 + $0x14c] ss:$48 sps:$4 sm:$0xff]  }
 0x72d   :  { %13789 = vmatpush2.bf16.msra.mxu0 %v19124_v39  ;;  %13829 = vmatprep.subr.bf16.mxu1 %v19129_v60  ;;  %v19162_v39 = vld [vmem:[#allocation8 + $0x30e4] ss:$48 sps:$4 sm:$0xff]   ;;  %v19157_v60 = vld [vmem:[#allocation8 + $0x148] ss:$48 sps:$4 sm:$0xff]  }
 0x72e   :  { %13840 = vmatprep.subr.bf16.mxu0 %v19132_v54  ;;  %v19160_v54 = vld [vmem:[#allocation8 + $0x30e0] ss:$48 sps:$4 sm:$0xff]  }
 0x730   :  { %v13546_v0 = vpop.f32.mrf.mxu0  ;;  %13791 = vmatmul.mubr.bf16.vlgmr.msra.gmra.mxu0 %v19970_v40  ;;  %13830 = vmatpush2.bf16.msra.mxu1 %v19127_v56  ;;  %v19165_v56 = vld [vmem:[#allocation8 + $0xec] ss:$48 sps:$4 sm:$0xff]  }
 0x731   :  { %13841 = vmatpush1.bf16.msra.mxu0 %v19130_v35  ;;  %13872 = vmatprep.mubr.bf16.mxu0 %v19972_v43  ;;  %v19168_v35 = vld [vmem:[#allocation8 + $0x3084] ss:$48 sps:$4 sm:$0xff]  }
 0x732   :  { %v13548_v17 = vpop.f32.mrf.mxu0  ;;  %13881 = vmatprep.subr.bf16.mxu1 %v19135_v33  ;;  %13842 = vmatprep.subr.bf16.mxu0 %v19138_v62  ;;  %v19163_v33 = vld [vmem:[#allocation8 + $0xe8] ss:$48 sps:$4 sm:$0xff]   ;;  %v19166_v62 = vld [vmem:[#allocation8 + $0x3080] ss:$48 sps:$4 sm:$0xff]  }
 0x733   :  { %v13587_v14 = vpop.f32.mrf.mxu1  ;;  %13832 = vmatmul.mubr.bf16.vlgmr.msra.gmra.mxu1 %v19976_v48 }
 0x734   :  { %v20174_v21 = vadd.f32 %v13587_v14, %v13546_v0  ;;  %v13550_v6 = vpop.f32.mrf.mxu0  ;;  %13882 = vmatpush1.bf16.msra.mxu1 %v19133_v1  ;;  %13913 = vmatprep.mubr.bf16.mxu1 %v19928_v8  ;;  %v19156_v8 = vld [vmem:[#allocation8 + $0x3144] ss:$48 sps:$4 sm:$0xff]   ;;  %v19171_v0 = vld [vmem:[#allocation8 + $0x8c] ss:$48 sps:$4 sm:$0xff]   ;;  %v19175_v14 = vld [vmem:[#allocation8 + $0x28] ss:$48 sps:$4 sm:$0xff]  }
 0x735   :  { %v13589_v58 = vpop.f32.mrf.mxu1  ;;  %13843 = vmatpush1.bf16.msra.mxu0 %v19136_v12  ;;  %13883 = vmatprep.subr.bf16.mxu1 %v19141_v46  ;;  %v19174_v1 = vld [vmem:[#allocation8 + $0x3024] ss:$48 sps:$4 sm:$0xff]   ;;  %v19169_v12 = vld [vmem:[#allocation8 + $0x88] ss:$48 sps:$4 sm:$0xff]   ;;  %v19172_v46 = vld [vmem:[#allocation8 + $0x3020] ss:$48 sps:$4 sm:$0xff]  }
 0x736   :  { %v20177_v34 = vadd.f32 %v13589_v58, %v13548_v17  ;;  %v13551_v36 = vpop.f32.mrf.mxu0  ;;  %13844 = vmatprep.subr.bf16.mxu0 %v19144_v57  ;;  %v19177_v17 = vld [vmem:[#allocation8 + $0x2c] ss:$48 sps:$4 sm:$0xff]   ;;  %v19180_v57 = vld [vmem:[#allocation8 + $0x35c4] ss:$48 sps:$4 sm:$0xff]   ;;  %v19178_v6 = vld [vmem:[#allocation8 + $0x35c0] ss:$48 sps:$4 sm:$0xff]  }
 0x737   :  { %v13591_v52 = vpop.f32.mrf.mxu1  ;;  %v19186_v58 = vld [vmem:[#allocation8 + $0x3564] ss:$48 sps:$4 sm:$0xff]   ;;  %v19189_v36 = vld [vmem:[#allocation8 + $0x56c] ss:$48 sps:$4 sm:$0xff]  }
 0x738   :  { %13884 = vmatpush1.bf16.msra.mxu1 %v19139_v37  ;;  %v19183_v37 = vld [vmem:[#allocation8 + $0x5cc] ss:$48 sps:$4 sm:$0xff]   ;;  %v19187_v52 = vld [vmem:[#allocation8 + $0x568] ss:$48 sps:$4 sm:$0xff]  }
 0x739   :  { %v13592_v41 = vpop.f32.mrf.mxu1  ;;  %13845 = vmatpush1.bf16.msra.mxu0 %v19142_v30  ;;  %13885 = vmatprep.subr.bf16.mxu1 %v19147_v47  ;;  %v19181_v30 = vld [vmem:[#allocation8 + $0x5c8] ss:$48 sps:$4 sm:$0xff]   ;;  %v19184_v47 = vld [vmem:[#allocation8 + $0x3560] ss:$48 sps:$4 sm:$0xff]  }
 0x73a   :  { %13846 = vmatprep.subr.bf16.mxu0 %v19150_v38  ;;  %v19192_v38 = vld [vmem:[#allocation8 + $0x3504] ss:$48 sps:$4 sm:$0xff]   ;;  %v19195_v41 = vld [vmem:[#allocation8 + $0x50c] ss:$48 sps:$4 sm:$0xff]  }
 0x73c   :  { %13886 = vmatpush1.bf16.msra.mxu1 %v19145_v61  ;;  %v19190_v61 = vld [vmem:[#allocation8 + $0x3500] ss:$48 sps:$4 sm:$0xff]  }
 0x73d   :  { %13847 = vmatpush1.bf16.msra.mxu0 %v19148_v49  ;;  %13887 = vmatprep.subr.bf16.mxu1 %v19153_v44  ;;  %v19198_v49 = vld [vmem:[#allocation8 + $0x34a4] ss:$48 sps:$4 sm:$0xff]   ;;  %v19193_v44 = vld [vmem:[#allocation8 + $0x508] ss:$48 sps:$4 sm:$0xff]  }
 0x73e   :  { %13848 = vmatprep.subr.bf16.mxu0 %v19156_v8  ;;  %v19196_v8 = vld [vmem:[#allocation8 + $0x34a0] ss:$48 sps:$4 sm:$0xff]  }
 0x740   :  { %13888 = vmatpush1.bf16.msra.mxu1 %v19151_v53  ;;  %v19201_v53 = vld [vmem:[#allocation8 + $0x4ac] ss:$48 sps:$4 sm:$0xff]  }
 0x741   :  { %13849 = vmatpush1.bf16.msra.mxu0 %v19154_v28  ;;  %13889 = vmatprep.subr.bf16.mxu1 %v19159_v55  ;;  %v19204_v28 = vld [vmem:[#allocation8 + $0x3444] ss:$48 sps:$4 sm:$0xff]   ;;  %v19199_v55 = vld [vmem:[#allocation8 + $0x4a8] ss:$48 sps:$4 sm:$0xff]  }
 0x742   :  { %13850 = vmatprep.subr.bf16.mxu0 %v19162_v39  ;;  %v19202_v39 = vld [vmem:[#allocation8 + $0x3440] ss:$48 sps:$4 sm:$0xff]  }
 0x744   :  { %13890 = vmatpush1.bf16.msra.mxu1 %v19157_v60  ;;  %v19207_v60 = vld [vmem:[#allocation8 + $0x44c] ss:$48 sps:$4 sm:$0xff]  }
 0x745   :  { %13851 = vmatpush1.bf16.msra.mxu0 %v19160_v54  ;;  %13891 = vmatprep.subr.bf16.mxu1 %v19165_v56  ;;  %v19210_v54 = vld [vmem:[#allocation8 + $0x33e4] ss:$48 sps:$4 sm:$0xff]   ;;  %v19205_v56 = vld [vmem:[#allocation8 + $0x448] ss:$48 sps:$4 sm:$0xff]  }
 0x746   :  { %13852 = vmatprep.subr.bf16.mxu0 %v19168_v35  ;;  %v19208_v35 = vld [vmem:[#allocation8 + $0x33e0] ss:$48 sps:$4 sm:$0xff]  }
 0x748   :  { %13892 = vmatpush1.bf16.msra.mxu1 %v19163_v33  ;;  %v19213_v33 = vld [vmem:[#allocation8 + $0x3ec] ss:$48 sps:$4 sm:$0xff]  }
 0x749   :  { %13853 = vmatpush1.bf16.msra.mxu0 %v19166_v62  ;;  %13893 = vmatprep.subr.bf16.mxu1 %v19171_v0  ;;  %v19216_v62 = vld [vmem:[#allocation8 + $0x3384] ss:$48 sps:$4 sm:$0xff]   ;;  %v19211_v0 = vld [vmem:[#allocation8 + $0x3e8] ss:$48 sps:$4 sm:$0xff]  }
 0x74a   :  { %13854 = vmatprep.subr.bf16.mxu0 %v19174_v1  ;;  %v19214_v1 = vld [vmem:[#allocation8 + $0x3380] ss:$48 sps:$4 sm:$0xff]  }
 0x74c   :  { %13894 = vmatpush1.bf16.msra.mxu1 %v19169_v12  ;;  %v19219_v12 = vld [vmem:[#allocation8 + $0x38c] ss:$48 sps:$4 sm:$0xff]  }
 0x74d   :  { %13855 = vmatpush1.bf16.msra.mxu0 %v19172_v46  ;;  %13895 = vmatprep.subr.bf16.mxu1 %v19177_v17  ;;  %v19222_v46 = vld [vmem:[#allocation8 + $0x3324] ss:$48 sps:$4 sm:$0xff]   ;;  %v19217_v17 = vld [vmem:[#allocation8 + $0x388] ss:$48 sps:$4 sm:$0xff]  }
 0x74e   :  { %13856 = vmatprep.subr.bf16.mxu0 %v19180_v57  ;;  %v19220_v57 = vld [vmem:[#allocation8 + $0x3320] ss:$48 sps:$4 sm:$0xff]  }
 0x750   :  { %13896 = vmatpush1.bf16.msra.mxu1 %v19175_v14  ;;  %v19225_v14 = vld [vmem:[#allocation8 + $0x32c] ss:$48 sps:$4 sm:$0xff]  }
 0x751   :  { %13857 = vmatpush2.bf16.msra.mxu0 %v19178_v6  ;;  %13897 = vmatprep.subr.bf16.mxu1 %v19183_v37  ;;  %v19228_v6 = vld [vmem:[#allocation8 + $0x8cc] ss:$48 sps:$4 sm:$0xff]   ;;  %v19223_v37 = vld [vmem:[#allocation8 + $0x328] ss:$48 sps:$4 sm:$0xff]  }
 0x752   :  { %13858 = vmatprep.subr.bf16.mxu0 %v19186_v58  ;;  %v19226_v58 = vld [vmem:[#allocation8 + $0x8c8] ss:$48 sps:$4 sm:$0xff]  }
 0x754   :  { %13898 = vmatpush2.bf16.msra.mxu1 %v19181_v30  ;;  %v19231_v30 = vld [vmem:[#allocation8 + $0xecc] ss:$48 sps:$4 sm:$0xff]  }
 0x755   :  { %13859 = vmatpush2.bf16.msra.mxu0 %v19184_v47  ;;  %13899 = vmatprep.subr.bf16.mxu1 %v19189_v36  ;;  %v19234_v47 = vld [vmem:[#allocation8 + $0x86c] ss:$48 sps:$4 sm:$0xff]  }
 0x756   :  { %13860 = vmatprep.subr.bf16.mxu0 %v19192_v38  ;;  %v19229_v38 = vld [vmem:[#allocation8 + $0xec8] ss:$48 sps:$4 sm:$0xff]  }
 0x758   :  { %13900 = vmatpush2.bf16.msra.mxu1 %v19187_v52 }
 0x759   :  { %13861 = vmatpush2.bf16.msra.mxu0 %v19190_v61  ;;  %13901 = vmatprep.subr.bf16.mxu1 %v19195_v41  ;;  %v19232_v61 = vld [vmem:[#allocation8 + $0x868] ss:$48 sps:$4 sm:$0xff]   ;;  %v19237_v41 = vld [vmem:[#allocation8 + $0xe6c] ss:$48 sps:$4 sm:$0xff]  }
 0x75a   :  { %13862 = vmatprep.subr.bf16.mxu0 %v19198_v49 }
 0x75c   :  { %13902 = vmatpush2.bf16.msra.mxu1 %v19193_v44  ;;  %v19240_v44 = vld [vmem:[#allocation8 + $0x80c] ss:$48 sps:$4 sm:$0xff]  }
 0x75d   :  { %13863 = vmatpush2.bf16.msra.mxu0 %v19196_v8  ;;  %13903 = vmatprep.subr.bf16.mxu1 %v19201_v53 }
 0x75e   :  { %13864 = vmatprep.subr.bf16.mxu0 %v19204_v28 }
 0x760   :  { %13904 = vmatpush2.bf16.msra.mxu1 %v19199_v55 }
 0x761   :  { %13865 = vmatpush2.bf16.msra.mxu0 %v19202_v39  ;;  %13905 = vmatprep.subr.bf16.mxu1 %v19207_v60  ;;  %v19243_v60 = vld [vmem:[#allocation8 + $0xe0c] ss:$48 sps:$4 sm:$0xff]  }
 0x762   :  { %13866 = vmatprep.subr.bf16.mxu0 %v19210_v54 }
 0x764   :  { %13906 = vmatpush2.bf16.msra.mxu1 %v19205_v56 }
 0x765   :  { %13867 = vmatpush2.bf16.msra.mxu0 %v19208_v35  ;;  %13907 = vmatprep.subr.bf16.mxu1 %v19213_v33 }
 0x766   :  { %13868 = vmatprep.subr.bf16.mxu0 %v19216_v62  ;;  %v19244_v62 = vld [vmem:[#allocation8 + $0x7a8] ss:$48 sps:$4 sm:$0xff]  }
 0x768   :  { %13908 = vmatpush2.bf16.msra.mxu1 %v19211_v0  ;;  %v19249_v0 = vld [vmem:[#allocation8 + $0xdac] ss:$48 sps:$4 sm:$0xff]  }
 0x769   :  { %13869 = vmatpush2.bf16.msra.mxu0 %v19214_v1  ;;  %13909 = vmatprep.subr.bf16.mxu1 %v19219_v12  ;;  %v19247_v1 = vld [vmem:[#allocation8 + $0xda8] ss:$48 sps:$4 sm:$0xff]  }
 0x76a   :  { %13870 = vmatprep.subr.bf16.mxu0 %v19222_v46  ;;  %v19250_v12 = vld [vmem:[#allocation8 + $0x748] ss:$48 sps:$4 sm:$0xff]   ;;  %v19255_v46 = vld [vmem:[#allocation8 + $0xd4c] ss:$48 sps:$4 sm:$0xff]  }
 0x76c   :  { %13910 = vmatpush2.bf16.msra.mxu1 %v19217_v17  ;;  %v19258_v17 = vld [vmem:[#allocation8 + $0x6ec] ss:$48 sps:$4 sm:$0xff]  }
 0x76d   :  { %13871 = vmatpush2.bf16.msra.mxu0 %v19220_v57  ;;  %13911 = vmatprep.subr.bf16.mxu1 %v19225_v14  ;;  %v19253_v57 = vld [vmem:[#allocation8 + $0xd48] ss:$48 sps:$4 sm:$0xff]  }
 0x76e   :  { %13922 = vmatprep.subr.bf16.mxu0 %v19228_v6  ;;  %v19256_v14 = vld [vmem:[#allocation8 + $0x6e8] ss:$48 sps:$4 sm:$0xff]   ;;  %v19261_v6 = vld [vmem:[#allocation8 + $0xcec] ss:$48 sps:$4 sm:$0xff]  }
 0x770   :  { %v13628_v36 = vpop.f32.mrf.mxu0  ;;  %13873 = vmatmul.mubr.bf16.vlgmr.msra.gmra.mxu0 %v19986_v32  ;;  %13912 = vmatpush2.bf16.msra.mxu1 %v19223_v37  ;;  %v19264_v37 = vld [vmem:[#allocation8 + $0x68c] ss:$48 sps:$4 sm:$0xff]  }
 0x771   :  { %v13629_v52 = vadd.f32 %v13628_v36, %v20174_v21  ;;  %13923 = vmatpush1.bf16.msra.mxu0 %v19226_v58  ;;  %13954 = vmatprep.mubr.bf16.mxu0 %v19934_v3  ;;  %v19235_v21 = vld [vmem:[#allocation8 + $0xe68] ss:$48 sps:$4 sm:$0xff]   ;;  %v19270_v36 = vld [vmem:[#allocation8 + $0x62c] ss:$48 sps:$4 sm:$0xff]  }
 0x772   :  { %v13630_v49 = vpop.f32.mrf.mxu0  ;;  %13963 = vmatprep.subr.bf16.mxu1 %v19231_v30  ;;  %13924 = vmatprep.subr.bf16.mxu0 %v19234_v47  ;;  %v19238_v3 = vld [vmem:[#allocation8 + $0x808] ss:$48 sps:$4 sm:$0xff]   ;;  %v19267_v47 = vld [vmem:[#allocation8 + $0xc8c] ss:$48 sps:$4 sm:$0xff]  }
 0x773   :  { %v13631_v8 = vadd.f32 %v13630_v49, %v20177_v34  ;;  %v13669_v53 = vpop.f32.mrf.mxu1  ;;  %13914 = vmatmul.mubr.bf16.vlgmr.msra.gmra.mxu1 %v19931_v13  ;;  %v19246_v34 = vld [vmem:[#allocation8 + $0x7ac] ss:$48 sps:$4 sm:$0xff]   ;;  %v19241_v13 = vld [vmem:[#allocation8 + $0xe08] ss:$48 sps:$4 sm:$0xff]  }
 0x774   :  { %v20184_v28 = vadd.f32 %v13669_v53, %v13629_v52  ;;  %v13632_v55 = vpop.f32.mrf.mxu0  ;;  %13964 = vmatpush1.bf16.msra.mxu1 %v19229_v38  ;;  %13995 = vmatprep.mubr.bf16.mxu1 %v19936_v20  ;;  %v19252_v20 = vld [vmem:[#allocation8 + $0x74c] ss:$48 sps:$4 sm:$0xff]   ;;  %v19259_v58 = vld [vmem:[#allocation8 + $0xce8] ss:$48 sps:$4 sm:$0xff]  }
 0x775   :  { %v13671_v39 = vpop.f32.mrf.mxu1  ;;  %13925 = vmatpush1.bf16.msra.mxu0 %v19232_v61  ;;  %13965 = vmatprep.subr.bf16.mxu1 %v19237_v41  ;;  %v19262_v30 = vld [vmem:[#allocation8 + $0x688] ss:$48 sps:$4 sm:$0xff]   ;;  %v19273_v61 = vld [vmem:[#allocation8 + $0xc2c] ss:$48 sps:$4 sm:$0xff]  }
 0x776   :  { %v20187_v54 = vadd.f32 %v13671_v39, %v13631_v8  ;;  %v13633_v56 = vpop.f32.mrf.mxu0  ;;  %13926 = vmatprep.subr.bf16.mxu0 %v19240_v44  ;;  %v19265_v38 = vld [vmem:[#allocation8 + $0xc88] ss:$48 sps:$4 sm:$0xff]   ;;  %v19276_v41 = vld [vmem:[#allocation8 + $0xbcc] ss:$48 sps:$4 sm:$0xff]  }
 0x777   :  { %v13673_v35 = vpop.f32.mrf.mxu1  ;;  %v19268_v52 = vld [vmem:[#allocation8 + $0x628] ss:$48 sps:$4 sm:$0xff]   ;;  %v19279_v8 = vld [vmem:[#allocation8 + $0x11cc] ss:$48 sps:$4 sm:$0xff]  }
 0x778   :  { %13966 = vmatpush1.bf16.msra.mxu1 %v19235_v21  ;;  %v19271_v49 = vld [vmem:[#allocation8 + $0xc28] ss:$48 sps:$4 sm:$0xff]   ;;  %v19282_v53 = vld [vmem:[#allocation8 + $0xb6c] ss:$48 sps:$4 sm:$0xff]  }
 0x779   :  { %v13674_v33 = vpop.f32.mrf.mxu1  ;;  %13927 = vmatpush1.bf16.msra.mxu0 %v19238_v3  ;;  %13967 = vmatprep.subr.bf16.mxu1 %v19243_v60  ;;  %v19274_v44 = vld [vmem:[#allocation8 + $0xbc8] ss:$48 sps:$4 sm:$0xff]   ;;  %v19285_v39 = vld [vmem:[#allocation8 + $0x116c] ss:$48 sps:$4 sm:$0xff]  }
 0x77a   :  { %13928 = vmatprep.subr.bf16.mxu0 %v19246_v34  ;;  %v19277_v55 = vld [vmem:[#allocation8 + $0x11c8] ss:$48 sps:$4 sm:$0xff]   ;;  %v19288_v3 = vld [vmem:[#allocation8 + $0xb0c] ss:$48 sps:$4 sm:$0xff]  }
 0x77b   :  { %v19280_v21 = vld [vmem:[#allocation8 + $0xb68] ss:$48 sps:$4 sm:$0xff]   ;;  %v19291_v34 = vld [vmem:[#allocation8 + $0x110c] ss:$48 sps:$4 sm:$0xff]  }
 0x77c   :  { %13968 = vmatpush1.bf16.msra.mxu1 %v19241_v13  ;;  %v19283_v60 = vld [vmem:[#allocation8 + $0x1168] ss:$48 sps:$4 sm:$0xff]   ;;  %v19294_v35 = vld [vmem:[#allocation8 + $0xaac] ss:$48 sps:$4 sm:$0xff]  }
 0x77d   :  { %13929 = vmatpush1.bf16.msra.mxu0 %v19244_v62  ;;  %13969 = vmatprep.subr.bf16.mxu1 %v19249_v0  ;;  %v19286_v56 = vld [vmem:[#allocation8 + $0xb08] ss:$48 sps:$4 sm:$0xff]   ;;  %v19297_v62 = vld [vmem:[#allocation8 + $0x10ac] ss:$48 sps:$4 sm:$0xff]  }
 0x77e   :  { %13930 = vmatprep.subr.bf16.mxu0 %v19252_v20  ;;  %v19289_v13 = vld [vmem:[#allocation8 + $0x1108] ss:$48 sps:$4 sm:$0xff]   ;;  %v19300_v0 = vld [vmem:[#allocation8 + $0xa4c] ss:$48 sps:$4 sm:$0xff]  }
 0x77f   :  { %v19292_v33 = vld [vmem:[#allocation8 + $0xaa8] ss:$48 sps:$4 sm:$0xff]  }
 0x780   :  { %13970 = vmatpush1.bf16.msra.mxu1 %v19247_v1  ;;  %v19295_v20 = vld [vmem:[#allocation8 + $0x10a8] ss:$48 sps:$4 sm:$0xff]  }
 0x781   :  { %13931 = vmatpush1.bf16.msra.mxu0 %v19250_v12  ;;  %13971 = vmatprep.subr.bf16.mxu1 %v19255_v46  ;;  %v19298_v1 = vld [vmem:[#allocation8 + $0xa48] ss:$48 sps:$4 sm:$0xff]   ;;  %v19303_v12 = vld [vmem:[#allocation8 + $0x104c] ss:$48 sps:$4 sm:$0xff]  }
 0x782   :  { %13932 = vmatprep.subr.bf16.mxu0 %v19258_v17  ;;  %v19306_v46 = vld [vmem:[#allocation8 + $0x9ec] ss:$48 sps:$4 sm:$0xff]   ;;  %v19301_v17 = vld [vmem:[#allocation8 + $0x1048] ss:$48 sps:$4 sm:$0xff]  }
 0x784   :  { %13972 = vmatpush1.bf16.msra.mxu1 %v19253_v57  ;;  %v19304_v57 = vld [vmem:[#allocation8 + $0x9e8] ss:$48 sps:$4 sm:$0xff]  }
 0x785   :  { %13933 = vmatpush1.bf16.msra.mxu0 %v19256_v14  ;;  %13973 = vmatprep.subr.bf16.mxu1 %v19261_v6  ;;  %v19309_v14 = vld [vmem:[#allocation8 + $0xfec] ss:$48 sps:$4 sm:$0xff]  }
 0x786   :  { %13934 = vmatprep.subr.bf16.mxu0 %v19264_v37  ;;  %v19312_v6 = vld [vmem:[#allocation8 + $0x98c] ss:$48 sps:$4 sm:$0xff]   ;;  %v19307_v37 = vld [vmem:[#allocation8 + $0xfe8] ss:$48 sps:$4 sm:$0xff]  }
 0x788   :  { %13974 = vmatpush1.bf16.msra.mxu1 %v19259_v58  ;;  %v19310_v58 = vld [vmem:[#allocation8 + $0x988] ss:$48 sps:$4 sm:$0xff]  }
 0x789   :  { %13935 = vmatpush1.bf16.msra.mxu0 %v19262_v30  ;;  %13975 = vmatprep.subr.bf16.mxu1 %v19267_v47  ;;  %v19315_v30 = vld [vmem:[#allocation8 + $0xf8c] ss:$48 sps:$4 sm:$0xff]  }
 0x78a   :  { %13936 = vmatprep.subr.bf16.mxu0 %v19270_v36  ;;  %v19318_v47 = vld [vmem:[#allocation8 + $0x92c] ss:$48 sps:$4 sm:$0xff]   ;;  %v19313_v36 = vld [vmem:[#allocation8 + $0xf88] ss:$48 sps:$4 sm:$0xff]  }
 0x78c   :  { %13976 = vmatpush1.bf16.msra.mxu1 %v19265_v38  ;;  %v19316_v38 = vld [vmem:[#allocation8 + $0x928] ss:$48 sps:$4 sm:$0xff]  }
 0x78d   :  { %13937 = vmatpush1.bf16.msra.mxu0 %v19268_v52  ;;  %13977 = vmatprep.subr.bf16.mxu1 %v19273_v61  ;;  %v19321_v52 = vld [vmem:[#allocation8 + $0xf2c] ss:$48 sps:$4 sm:$0xff]  }
 0x78e   :  { %13938 = vmatprep.subr.bf16.mxu0 %v19276_v41  ;;  %v19324_v61 = vld [vmem:[#allocation8 + $0x14cc] ss:$48 sps:$4 sm:$0xff]   ;;  %v19319_v41 = vld [vmem:[#allocation8 + $0xf28] ss:$48 sps:$4 sm:$0xff]  }
 0x790   :  { %13978 = vmatpush1.bf16.msra.mxu1 %v19271_v49  ;;  %v19322_v49 = vld [vmem:[#allocation8 + $0x14c8] ss:$48 sps:$4 sm:$0xff]  }
 0x791   :  { %13939 = vmatpush2.bf16.msra.mxu0 %v19274_v44  ;;  %13979 = vmatprep.subr.bf16.mxu1 %v19279_v8  ;;  %v19327_v44 = vld [vmem:[#allocation8 + $0x1acc] ss:$48 sps:$4 sm:$0xff]  }
 0x792   :  { %13940 = vmatprep.subr.bf16.mxu0 %v19282_v53  ;;  %v19330_v8 = vld [vmem:[#allocation8 + $0x146c] ss:$48 sps:$4 sm:$0xff]  }
 0x794   :  { %13980 = vmatpush2.bf16.msra.mxu1 %v19277_v55  ;;  %v19325_v55 = vld [vmem:[#allocation8 + $0x1ac8] ss:$48 sps:$4 sm:$0xff]  }
 0x795   :  { %13941 = vmatpush2.bf16.msra.mxu0 %v19280_v21  ;;  %13981 = vmatprep.subr.bf16.mxu1 %v19285_v39  ;;  %v19328_v39 = vld [vmem:[#allocation8 + $0x1468] ss:$48 sps:$4 sm:$0xff]  }
 0x796   :  { %13942 = vmatprep.subr.bf16.mxu0 %v19288_v3  ;;  %v19333_v3 = vld [vmem:[#allocation8 + $0x1a6c] ss:$48 sps:$4 sm:$0xff]  }
 0x798   :  { %13982 = vmatpush2.bf16.msra.mxu1 %v19283_v60 }
 0x799   :  { %13943 = vmatpush2.bf16.msra.mxu0 %v19286_v56  ;;  %13983 = vmatprep.subr.bf16.mxu1 %v19291_v34  ;;  %v19336_v56 = vld [vmem:[#allocation8 + $0x140c] ss:$48 sps:$4 sm:$0xff]  }
 0x79a   :  { %13944 = vmatprep.subr.bf16.mxu0 %v19294_v35 }
 0x79c   :  { %13984 = vmatpush2.bf16.msra.mxu1 %v19289_v13 }
 0x79d   :  { %13945 = vmatpush2.bf16.msra.mxu0 %v19292_v33  ;;  %13985 = vmatprep.subr.bf16.mxu1 %v19297_v62  ;;  %v19339_v62 = vld [vmem:[#allocation8 + $0x1a0c] ss:$48 sps:$4 sm:$0xff]  }
 0x79e   :  { %13946 = vmatprep.subr.bf16.mxu0 %v19300_v0 }
 0x7a0   :  { %13986 = vmatpush2.bf16.msra.mxu1 %v19295_v20 }
 0x7a1   :  { %13947 = vmatpush2.bf16.msra.mxu0 %v19298_v1  ;;  %13987 = vmatprep.subr.bf16.mxu1 %v19303_v12 }
 0x7a2   :  { %13948 = vmatprep.subr.bf16.mxu0 %v19306_v46  ;;  %v19340_v46 = vld [vmem:[#allocation8 + $0x13a8] ss:$48 sps:$4 sm:$0xff]  }
 0x7a4   :  { %13988 = vmatpush2.bf16.msra.mxu1 %v19301_v17  ;;  %v19345_v17 = vld [vmem:[#allocation8 + $0x19ac] ss:$48 sps:$4 sm:$0xff]  }
 0x7a5   :  { %13949 = vmatpush2.bf16.msra.mxu0 %v19304_v57  ;;  %13989 = vmatprep.subr.bf16.mxu1 %v19309_v14  ;;  %v19343_v57 = vld [vmem:[#allocation8 + $0x19a8] ss:$48 sps:$4 sm:$0xff]  }
 0x7a6   :  { %13950 = vmatprep.subr.bf16.mxu0 %v19312_v6  ;;  %v19346_v14 = vld [vmem:[#allocation8 + $0x1348] ss:$48 sps:$4 sm:$0xff]   ;;  %v19351_v6 = vld [vmem:[#allocation8 + $0x194c] ss:$48 sps:$4 sm:$0xff]  }
 0x7a8   :  { %13990 = vmatpush2.bf16.msra.mxu1 %v19307_v37  ;;  %v19354_v37 = vld [vmem:[#allocation8 + $0x12ec] ss:$48 sps:$4 sm:$0xff]  }
 0x7a9   :  { %13951 = vmatpush2.bf16.msra.mxu0 %v19310_v58  ;;  %13991 = vmatprep.subr.bf16.mxu1 %v19315_v30  ;;  %v19349_v58 = vld [vmem:[#allocation8 + $0x1948] ss:$48 sps:$4 sm:$0xff]  }
 0x7aa   :  { %13952 = vmatprep.subr.bf16.mxu0 %v19318_v47  ;;  %v19352_v30 = vld [vmem:[#allocation8 + $0x12e8] ss:$48 sps:$4 sm:$0xff]   ;;  %v19357_v47 = vld [vmem:[#allocation8 + $0x18ec] ss:$48 sps:$4 sm:$0xff]  }
 0x7ac   :  { %13992 = vmatpush2.bf16.msra.mxu1 %v19313_v36  ;;  %v19360_v36 = vld [vmem:[#allocation8 + $0x128c] ss:$48 sps:$4 sm:$0xff]  }
 0x7ad   :  { %13953 = vmatpush2.bf16.msra.mxu0 %v19316_v38  ;;  %13993 = vmatprep.subr.bf16.mxu1 %v19321_v52  ;;  %v19355_v38 = vld [vmem:[#allocation8 + $0x18e8] ss:$48 sps:$4 sm:$0xff]  }
 0x7ae   :  { %14004 = vmatprep.subr.bf16.mxu0 %v19324_v61  ;;  %v19358_v52 = vld [vmem:[#allocation8 + $0x1288] ss:$48 sps:$4 sm:$0xff]   ;;  %v19363_v61 = vld [vmem:[#allocation8 + $0x188c] ss:$48 sps:$4 sm:$0xff]  }
 0x7b0   :  { %v13710_v53 = vpop.f32.mrf.mxu0  ;;  %13955 = vmatmul.mubr.bf16.vlgmr.msra.gmra.mxu0 %v19938_v23  ;;  %13994 = vmatpush2.bf16.msra.mxu1 %v19319_v41  ;;  %v19366_v41 = vld [vmem:[#allocation8 + $0x122c] ss:$48 sps:$4 sm:$0xff]  }
 0x7b1   :  { %v13711_v21 = vadd.f32 %v13710_v53, %v20184_v28  ;;  %14005 = vmatpush1.bf16.msra.mxu0 %v19322_v49  ;;  %14036 = vmatprep.mubr.bf16.mxu0 %v19942_v27  ;;  %v19331_v28 = vld [vmem:[#allocation8 + $0x1a68] ss:$48 sps:$4 sm:$0xff]   ;;  %v19372_v53 = vld [vmem:[#allocation8 + $0x17cc] ss:$48 sps:$4 sm:$0xff]  }
 0x7b2   :  { %v13712_v60 = vpop.f32.mrf.mxu0  ;;  %14045 = vmatprep.subr.bf16.mxu1 %v19327_v44  ;;  %14006 = vmatprep.subr.bf16.mxu0 %v19330_v8  ;;  %v19334_v27 = vld [vmem:[#allocation8 + $0x1408] ss:$48 sps:$4 sm:$0xff]   ;;  %v19369_v8 = vld [vmem:[#allocation8 + $0x182c] ss:$48 sps:$4 sm:$0xff]  }
 0x7b3   :  { %v13713_v34 = vadd.f32 %v13712_v60, %v20187_v54  ;;  %v13751_v35 = vpop.f32.mrf.mxu1  ;;  %13996 = vmatmul.mubr.bf16.vlgmr.msra.gmra.mxu1 %v19946_v42  ;;  %v19342_v54 = vld [vmem:[#allocation8 + $0x13ac] ss:$48 sps:$4 sm:$0xff]   ;;  %v19337_v42 = vld [vmem:[#allocation8 + $0x1a08] ss:$48 sps:$4 sm:$0xff]  }
 0x7b4   :  { %v20194_v13 = vadd.f32 %v13751_v35, %v13711_v21  ;;  %v13714_v23 = vpop.f32.mrf.mxu0  ;;  %14046 = vmatpush1.bf16.msra.mxu1 %v19325_v55  ;;  %14077 = vmatprep.mubr.bf16.mxu1 %v19948_v45  ;;  %v19348_v45 = vld [vmem:[#allocation8 + $0x134c] ss:$48 sps:$4 sm:$0xff]   ;;  %v19361_v49 = vld [vmem:[#allocation8 + $0x1888] ss:$48 sps:$4 sm:$0xff]  }
 0x7b5   :  { %v13753_v33 = vpop.f32.mrf.mxu1  ;;  %14007 = vmatpush1.bf16.msra.mxu0 %v19328_v39  ;;  %14047 = vmatprep.subr.bf16.mxu1 %v19333_v3  ;;  %v19364_v44 = vld [vmem:[#allocation8 + $0x1228] ss:$48 sps:$4 sm:$0xff]   ;;  %v19375_v39 = vld [vmem:[#allocation8 + $0x1dcc] ss:$48 sps:$4 sm:$0xff]  }
 0x7b6   :  { %v20197_v0 = vadd.f32 %v13753_v33, %v13713_v34  ;;  %v13715_v20 = vpop.f32.mrf.mxu0  ;;  %14008 = vmatprep.subr.bf16.mxu0 %v19336_v56  ;;  %v19367_v55 = vld [vmem:[#allocation8 + $0x1828] ss:$48 sps:$4 sm:$0xff]   ;;  %v19378_v3 = vld [vmem:[#allocation8 + $0x176c] ss:$48 sps:$4 sm:$0xff]  }
 0x7b7   :  { %v13755_v1 = vpop.f32.mrf.mxu1  ;;  %v19370_v21 = vld [vmem:[#allocation8 + $0x17c8] ss:$48 sps:$4 sm:$0xff]   ;;  %v19381_v34 = vld [vmem:[#allocation8 + $0x1d6c] ss:$48 sps:$4 sm:$0xff]  }
 0x7b8   :  { %14048 = vmatpush1.bf16.msra.mxu1 %v19331_v28  ;;  %v19373_v60 = vld [vmem:[#allocation8 + $0x1dc8] ss:$48 sps:$4 sm:$0xff]   ;;  %v19384_v35 = vld [vmem:[#allocation8 + $0x170c] ss:$48 sps:$4 sm:$0xff]  }
 0x7b9   :  { %v13756_v12 = vpop.f32.mrf.mxu1  ;;  %14009 = vmatpush1.bf16.msra.mxu0 %v19334_v27  ;;  %14049 = vmatprep.subr.bf16.mxu1 %v19339_v62  ;;  %v19376_v56 = vld [vmem:[#allocation8 + $0x1768] ss:$48 sps:$4 sm:$0xff]   ;;  %v19387_v33 = vld [vmem:[#allocation8 + $0x1d0c] ss:$48 sps:$4 sm:$0xff]  }
 0x7ba   :  { %14010 = vmatprep.subr.bf16.mxu0 %v19342_v54  ;;  %v19379_v23 = vld [vmem:[#allocation8 + $0x1d68] ss:$48 sps:$4 sm:$0xff]   ;;  %v19390_v27 = vld [vmem:[#allocation8 + $0x16ac] ss:$48 sps:$4 sm:$0xff]  }
 0x7bb   :  { %v19382_v28 = vld [vmem:[#allocation8 + $0x1708] ss:$48 sps:$4 sm:$0xff]   ;;  %v19393_v54 = vld [vmem:[#allocation8 + $0x1cac] ss:$48 sps:$4 sm:$0xff]  }
 0x7bc   :  { %14050 = vmatpush1.bf16.msra.mxu1 %v19337_v42  ;;  %v19385_v62 = vld [vmem:[#allocation8 + $0x1d08] ss:$48 sps:$4 sm:$0xff]   ;;  %v19396_v1 = vld [vmem:[#allocation8 + $0x164c] ss:$48 sps:$4 sm:$0xff]  }
 0x7bd   :  { %14011 = vmatpush1.bf16.msra.mxu0 %v19340_v46  ;;  %14051 = vmatprep.subr.bf16.mxu1 %v19345_v17  ;;  %v19388_v20 = vld [vmem:[#allocation8 + $0x16a8] ss:$48 sps:$4 sm:$0xff]   ;;  %v19399_v46 = vld [vmem:[#allocation8 + $0x1c4c] ss:$48 sps:$4 sm:$0xff]  }
 0x7be   :  { %14012 = vmatprep.subr.bf16.mxu0 %v19348_v45  ;;  %v19391_v42 = vld [vmem:[#allocation8 + $0x1ca8] ss:$48 sps:$4 sm:$0xff]   ;;  %v19402_v17 = vld [vmem:[#allocation8 + $0x15ec] ss:$48 sps:$4 sm:$0xff]  }
 0x7bf   :  { %v19394_v12 = vld [vmem:[#allocation8 + $0x1648] ss:$48 sps:$4 sm:$0xff]  }
 0x7c0   :  { %14052 = vmatpush1.bf16.msra.mxu1 %v19343_v57  ;;  %v19397_v45 = vld [vmem:[#allocation8 + $0x1c48] ss:$48 sps:$4 sm:$0xff]  }
 0x7c1   :  { %14013 = vmatpush1.bf16.msra.mxu0 %v19346_v14  ;;  %14053 = vmatprep.subr.bf16.mxu1 %v19351_v6  ;;  %v19400_v57 = vld [vmem:[#allocation8 + $0x15e8] ss:$48 sps:$4 sm:$0xff]   ;;  %v19405_v14 = vld [vmem:[#allocation8 + $0x1bec] ss:$48 sps:$4 sm:$0xff]  }
 0x7c2   :  { %14014 = vmatprep.subr.bf16.mxu0 %v19354_v37  ;;  %v19408_v6 = vld [vmem:[#allocation8 + $0x158c] ss:$48 sps:$4 sm:$0xff]   ;;  %v19403_v37 = vld [vmem:[#allocation8 + $0x1be8] ss:$48 sps:$4 sm:$0xff]  }
 0x7c4   :  { %14054 = vmatpush1.bf16.msra.mxu1 %v19349_v58  ;;  %v19406_v58 = vld [vmem:[#allocation8 + $0x1588] ss:$48 sps:$4 sm:$0xff]  }
 0x7c5   :  { %14015 = vmatpush1.bf16.msra.mxu0 %v19352_v30  ;;  %14055 = vmatprep.subr.bf16.mxu1 %v19357_v47  ;;  %v19411_v30 = vld [vmem:[#allocation8 + $0x1b8c] ss:$48 sps:$4 sm:$0xff]  }
 0x7c6   :  { %14016 = vmatprep.subr.bf16.mxu0 %v19360_v36  ;;  %v19414_v47 = vld [vmem:[#allocation8 + $0x152c] ss:$48 sps:$4 sm:$0xff]   ;;  %v19409_v36 = vld [vmem:[#allocation8 + $0x1b88] ss:$48 sps:$4 sm:$0xff]  }
 0x7c8   :  { %14056 = vmatpush1.bf16.msra.mxu1 %v19355_v38  ;;  %v19412_v38 = vld [vmem:[#allocation8 + $0x1528] ss:$48 sps:$4 sm:$0xff]  }
 0x7c9   :  { %14017 = vmatpush1.bf16.msra.mxu0 %v19358_v52  ;;  %14057 = vmatprep.subr.bf16.mxu1 %v19363_v61  ;;  %v19417_v52 = vld [vmem:[#allocation8 + $0x1b2c] ss:$48 sps:$4 sm:$0xff]  }
 0x7ca   :  { %14018 = vmatprep.subr.bf16.mxu0 %v19366_v41  ;;  %v19420_v61 = vld [vmem:[#allocation8 + $0x20cc] ss:$48 sps:$4 sm:$0xff]   ;;  %v19415_v41 = vld [vmem:[#allocation8 + $0x1b28] ss:$48 sps:$4 sm:$0xff]  }
 0x7cc   :  { %14058 = vmatpush1.bf16.msra.mxu1 %v19361_v49  ;;  %v19418_v49 = vld [vmem:[#allocation8 + $0x20c8] ss:$48 sps:$4 sm:$0xff]  }
 0x7cd   :  { %14019 = vmatpush1.bf16.msra.mxu0 %v19364_v44  ;;  %14059 = vmatprep.subr.bf16.mxu1 %v19369_v8  ;;  %v19423_v44 = vld [vmem:[#allocation8 + $0x26cc] ss:$48 sps:$4 sm:$0xff]  }
 0x7ce   :  { %14020 = vmatprep.subr.bf16.mxu0 %v19372_v53  ;;  %v19426_v8 = vld [vmem:[#allocation8 + $0x206c] ss:$48 sps:$4 sm:$0xff]  }
 0x7d0   :  { %14060 = vmatpush1.bf16.msra.mxu1 %v19367_v55  ;;  %v19421_v55 = vld [vmem:[#allocation8 + $0x26c8] ss:$48 sps:$4 sm:$0xff]  }
 0x7d1   :  { %14021 = vmatpush2.bf16.msra.mxu0 %v19370_v21  ;;  %14061 = vmatprep.subr.bf16.mxu1 %v19375_v39  ;;  %v19424_v39 = vld [vmem:[#allocation8 + $0x2068] ss:$48 sps:$4 sm:$0xff]  }
 0x7d2   :  { %14022 = vmatprep.subr.bf16.mxu0 %v19378_v3  ;;  %v19429_v3 = vld [vmem:[#allocation8 + $0x266c] ss:$48 sps:$4 sm:$0xff]  }
 0x7d4   :  { %14062 = vmatpush2.bf16.msra.mxu1 %v19373_v60 }
 0x7d5   :  { %14023 = vmatpush2.bf16.msra.mxu0 %v19376_v56  ;;  %14063 = vmatprep.subr.bf16.mxu1 %v19381_v34  ;;  %v19432_v56 = vld [vmem:[#allocation8 + $0x200c] ss:$48 sps:$4 sm:$0xff]  }
 0x7d6   :  { %14024 = vmatprep.subr.bf16.mxu0 %v19384_v35 }
 0x7d8   :  { %14064 = vmatpush2.bf16.msra.mxu1 %v19379_v23 }
 0x7d9   :  { %14025 = vmatpush2.bf16.msra.mxu0 %v19382_v28  ;;  %14065 = vmatprep.subr.bf16.mxu1 %v19387_v33  ;;  %v19435_v33 = vld [vmem:[#allocation8 + $0x260c] ss:$48 sps:$4 sm:$0xff]  }
 0x7da   :  { %14026 = vmatprep.subr.bf16.mxu0 %v19390_v27 }
 0x7dc   :  { %14066 = vmatpush2.bf16.msra.mxu1 %v19385_v62 }
 0x7dd   :  { %14027 = vmatpush2.bf16.msra.mxu0 %v19388_v20  ;;  %14067 = vmatprep.subr.bf16.mxu1 %v19393_v54 }
 0x7de   :  { %14028 = vmatprep.subr.bf16.mxu0 %v19396_v1  ;;  %v19436_v1 = vld [vmem:[#allocation8 + $0x1fa8] ss:$48 sps:$4 sm:$0xff]  }
 0x7e0   :  { %14068 = vmatpush2.bf16.msra.mxu1 %v19391_v42  ;;  %v19441_v42 = vld [vmem:[#allocation8 + $0x25ac] ss:$48 sps:$4 sm:$0xff]  }
 0x7e1   :  { %14029 = vmatpush2.bf16.msra.mxu0 %v19394_v12  ;;  %14069 = vmatprep.subr.bf16.mxu1 %v19399_v46  ;;  %v19439_v12 = vld [vmem:[#allocation8 + $0x25a8] ss:$48 sps:$4 sm:$0xff]  }
 0x7e2   :  { %14030 = vmatprep.subr.bf16.mxu0 %v19402_v17  ;;  %v19442_v46 = vld [vmem:[#allocation8 + $0x1f48] ss:$48 sps:$4 sm:$0xff]   ;;  %v19447_v17 = vld [vmem:[#allocation8 + $0x254c] ss:$48 sps:$4 sm:$0xff]  }
 0x7e4   :  { %14070 = vmatpush2.bf16.msra.mxu1 %v19397_v45  ;;  %v19450_v45 = vld [vmem:[#allocation8 + $0x1eec] ss:$48 sps:$4 sm:$0xff]  }
 0x7e5   :  { %14031 = vmatpush2.bf16.msra.mxu0 %v19400_v57  ;;  %14071 = vmatprep.subr.bf16.mxu1 %v19405_v14  ;;  %v19445_v57 = vld [vmem:[#allocation8 + $0x2548] ss:$48 sps:$4 sm:$0xff]  }
 0x7e6   :  { %14032 = vmatprep.subr.bf16.mxu0 %v19408_v6  ;;  %v19448_v14 = vld [vmem:[#allocation8 + $0x1ee8] ss:$48 sps:$4 sm:$0xff]   ;;  %v19453_v6 = vld [vmem:[#allocation8 + $0x24ec] ss:$48 sps:$4 sm:$0xff]  }
 0x7e8   :  { %14072 = vmatpush2.bf16.msra.mxu1 %v19403_v37  ;;  %v19456_v37 = vld [vmem:[#allocation8 + $0x1e8c] ss:$48 sps:$4 sm:$0xff]  }
 0x7e9   :  { %14033 = vmatpush2.bf16.msra.mxu0 %v19406_v58  ;;  %14073 = vmatprep.subr.bf16.mxu1 %v19411_v30  ;;  %v19451_v58 = vld [vmem:[#allocation8 + $0x24e8] ss:$48 sps:$4 sm:$0xff]  }
 0x7ea   :  { %14034 = vmatprep.subr.bf16.mxu0 %v19414_v47  ;;  %v19454_v30 = vld [vmem:[#allocation8 + $0x1e88] ss:$48 sps:$4 sm:$0xff]   ;;  %v19459_v47 = vld [vmem:[#allocation8 + $0x248c] ss:$48 sps:$4 sm:$0xff]  }
 0x7ec   :  { %14074 = vmatpush2.bf16.msra.mxu1 %v19409_v36  ;;  %v19462_v36 = vld [vmem:[#allocation8 + $0x1e2c] ss:$48 sps:$4 sm:$0xff]  }
 0x7ed   :  { %14035 = vmatpush2.bf16.msra.mxu0 %v19412_v38  ;;  %14075 = vmatprep.subr.bf16.mxu1 %v19417_v52  ;;  %v19457_v38 = vld [vmem:[#allocation8 + $0x2488] ss:$48 sps:$4 sm:$0xff]  }
 0x7ee   :  { %14086 = vmatprep.subr.bf16.mxu0 %v19420_v61  ;;  %v19460_v52 = vld [vmem:[#allocation8 + $0x1e28] ss:$48 sps:$4 sm:$0xff]   ;;  %v19465_v61 = vld [vmem:[#allocation8 + $0x242c] ss:$48 sps:$4 sm:$0xff]  }
 0x7f0   :  { %v13792_v53 = vpop.f32.mrf.mxu0  ;;  %14037 = vmatmul.mubr.bf16.vlgmr.msra.gmra.mxu0 %v19952_v50  ;;  %14076 = vmatpush2.bf16.msra.mxu1 %v19415_v41  ;;  %v19468_v41 = vld [vmem:[#allocation8 + $0x23cc] ss:$48 sps:$4 sm:$0xff]  }
 0x7f1   :  { %v13793_v21 = vadd.f32 %v13792_v53, %v20194_v13  ;;  %14087 = vmatpush1.bf16.msra.mxu0 %v19418_v49  ;;  %14118 = vmatprep.mubr.bf16.mxu0 %v19954_v51  ;;  %v19427_v13 = vld [vmem:[#allocation8 + $0x2668] ss:$48 sps:$4 sm:$0xff]   ;;  %v19474_v53 = vld [vmem:[#allocation8 + $0x236c] ss:$48 sps:$4 sm:$0xff]  }
 0x7f2   :  { %v13794_v60 = vpop.f32.mrf.mxu0  ;;  %14127 = vmatprep.subr.bf16.mxu1 %v19423_v44  ;;  %14088 = vmatprep.subr.bf16.mxu0 %v19426_v8  ;;  %v19430_v51 = vld [vmem:[#allocation8 + $0x2008] ss:$48 sps:$4 sm:$0xff]   ;;  %v19471_v8 = vld [vmem:[#allocation8 + $0x29cc] ss:$48 sps:$4 sm:$0xff]  }
 0x7f3   :  { %v13795_v34 = vadd.f32 %v13794_v60, %v20197_v0  ;;  %v13833_v35 = vpop.f32.mrf.mxu1  ;;  %14078 = vmatmul.mubr.bf16.vlgmr.msra.gmra.mxu1 %v19958_v5  ;;  %v19438_v0 = vld [vmem:[#allocation8 + $0x1fac] ss:$48 sps:$4 sm:$0xff]   ;;  %v19433_v5 = vld [vmem:[#allocation8 + $0x2608] ss:$48 sps:$4 sm:$0xff]  }
 0x7f4   :  { %v20204_v23 = vadd.f32 %v13833_v35, %v13793_v21  ;;  %v13796_v50 = vpop.f32.mrf.mxu0  ;;  %14128 = vmatpush1.bf16.msra.mxu1 %v19421_v55  ;;  %14159 = vmatprep.mubr.bf16.mxu1 %v19960_v9  ;;  %v19444_v9 = vld [vmem:[#allocation8 + $0x1f4c] ss:$48 sps:$4 sm:$0xff]   ;;  %v19463_v49 = vld [vmem:[#allocation8 + $0x2428] ss:$48 sps:$4 sm:$0xff]  }
 0x7f5   :  { %v13835_v28 = vpop.f32.mrf.mxu1  ;;  %14089 = vmatpush1.bf16.msra.mxu0 %v19424_v39  ;;  %14129 = vmatprep.subr.bf16.mxu1 %v19429_v3  ;;  %v19466_v44 = vld [vmem:[#allocation8 + $0x23c8] ss:$48 sps:$4 sm:$0xff]   ;;  %v19477_v39 = vld [vmem:[#allocation8 + $0x296c] ss:$48 sps:$4 sm:$0xff]  }
 0x7f6   :  { %v20207_v27 = vadd.f32 %v13835_v28, %v13795_v34  ;;  %v13797_v62 = vpop.f32.mrf.mxu0  ;;  %14090 = vmatprep.subr.bf16.mxu0 %v19432_v56  ;;  %v19469_v55 = vld [vmem:[#allocation8 + $0x29c8] ss:$48 sps:$4 sm:$0xff]   ;;  %v19480_v3 = vld [vmem:[#allocation8 + $0x230c] ss:$48 sps:$4 sm:$0xff]  }
 0x7f7   :  { %v13837_v20 = vpop.f32.mrf.mxu1  ;;  %v19472_v21 = vld [vmem:[#allocation8 + $0x2368] ss:$48 sps:$4 sm:$0xff]   ;;  %v19483_v34 = vld [vmem:[#allocation8 + $0x290c] ss:$48 sps:$4 sm:$0xff]  }
 0x7f8   :  { %14130 = vmatpush1.bf16.msra.mxu1 %v19427_v13  ;;  %v19475_v60 = vld [vmem:[#allocation8 + $0x2968] ss:$48 sps:$4 sm:$0xff]   ;;  %v19486_v35 = vld [vmem:[#allocation8 + $0x22ac] ss:$48 sps:$4 sm:$0xff]  }
 0x7f9   :  { %v13838_v54 = vpop.f32.mrf.mxu1  ;;  %14091 = vmatpush1.bf16.msra.mxu0 %v19430_v51  ;;  %14131 = vmatprep.subr.bf16.mxu1 %v19435_v33  ;;  %v19478_v56 = vld [vmem:[#allocation8 + $0x2308] ss:$48 sps:$4 sm:$0xff]   ;;  %v19489_v28 = vld [vmem:[#allocation8 + $0x28ac] ss:$48 sps:$4 sm:$0xff]  }
 0x7fa   :  { %14092 = vmatprep.subr.bf16.mxu0 %v19438_v0  ;;  %v19481_v50 = vld [vmem:[#allocation8 + $0x2908] ss:$48 sps:$4 sm:$0xff]   ;;  %v19492_v51 = vld [vmem:[#allocation8 + $0x224c] ss:$48 sps:$4 sm:$0xff]  }
 0x7fb   :  { %v19484_v13 = vld [vmem:[#allocation8 + $0x22a8] ss:$48 sps:$4 sm:$0xff]   ;;  %v19495_v0 = vld [vmem:[#allocation8 + $0x284c] ss:$48 sps:$4 sm:$0xff]  }
 0x7fc   :  { %14132 = vmatpush1.bf16.msra.mxu1 %v19433_v5  ;;  %v19487_v33 = vld [vmem:[#allocation8 + $0x28a8] ss:$48 sps:$4 sm:$0xff]   ;;  %v19498_v20 = vld [vmem:[#allocation8 + $0x21ec] ss:$48 sps:$4 sm:$0xff]  }
 0x7fd   :  { %14093 = vmatpush1.bf16.msra.mxu0 %v19436_v1  ;;  %14133 = vmatprep.subr.bf16.mxu1 %v19441_v42  ;;  %v19490_v62 = vld [vmem:[#allocation8 + $0x2248] ss:$48 sps:$4 sm:$0xff]   ;;  %v19501_v1 = vld [vmem:[#allocation8 + $0x27ec] ss:$48 sps:$4 sm:$0xff]  }
 0x7fe   :  { %14094 = vmatprep.subr.bf16.mxu0 %v19444_v9  ;;  %v19493_v5 = vld [vmem:[#allocation8 + $0x2848] ss:$48 sps:$4 sm:$0xff]   ;;  %v19504_v42 = vld [vmem:[#allocation8 + $0x218c] ss:$48 sps:$4 sm:$0xff]  }
 0x7ff   :  { %v19496_v54 = vld [vmem:[#allocation8 + $0x21e8] ss:$48 sps:$4 sm:$0xff]  }
 0x800   :  { %14134 = vmatpush1.bf16.msra.mxu1 %v19439_v12  ;;  %v19499_v9 = vld [vmem:[#allocation8 + $0x27e8] ss:$48 sps:$4 sm:$0xff]  }
 0x801   :  { %14095 = vmatpush1.bf16.msra.mxu0 %v19442_v46  ;;  %14135 = vmatprep.subr.bf16.mxu1 %v19447_v17  ;;  %v19502_v12 = vld [vmem:[#allocation8 + $0x2188] ss:$48 sps:$4 sm:$0xff]   ;;  %v19507_v46 = vld [vmem:[#allocation8 + $0x278c] ss:$48 sps:$4 sm:$0xff]  }
 0x802   :  { %14096 = vmatprep.subr.bf16.mxu0 %v19450_v45  ;;  %v19510_v17 = vld [vmem:[#allocation8 + $0x212c] ss:$48 sps:$4 sm:$0xff]   ;;  %v19505_v45 = vld [vmem:[#allocation8 + $0x2788] ss:$48 sps:$4 sm:$0xff]  }
 0x804   :  { %14136 = vmatpush1.bf16.msra.mxu1 %v19445_v57  ;;  %v19508_v57 = vld [vmem:[#allocation8 + $0x2128] ss:$48 sps:$4 sm:$0xff]  }
 0x805   :  { %14097 = vmatpush1.bf16.msra.mxu0 %v19448_v14  ;;  %14137 = vmatprep.subr.bf16.mxu1 %v19453_v6  ;;  %v19513_v14 = vld [vmem:[#allocation8 + $0x272c] ss:$48 sps:$4 sm:$0xff]  }
 0x806   :  { %14098 = vmatprep.subr.bf16.mxu0 %v19456_v37  ;;  %v19516_v6 = vld [vmem:[#allocation8 + $0x2ccc] ss:$48 sps:$4 sm:$0xff]   ;;  %v19511_v37 = vld [vmem:[#allocation8 + $0x2728] ss:$48 sps:$4 sm:$0xff]  }
 0x808   :  { %14138 = vmatpush1.bf16.msra.mxu1 %v19451_v58  ;;  %v19514_v58 = vld [vmem:[#allocation8 + $0x2cc8] ss:$48 sps:$4 sm:$0xff]  }
 0x809   :  { %14099 = vmatpush1.bf16.msra.mxu0 %v19454_v30  ;;  %14139 = vmatprep.subr.bf16.mxu1 %v19459_v47  ;;  %v19519_v30 = vld [vmem:[#allocation8 + $0x32cc] ss:$48 sps:$4 sm:$0xff]  }
 0x80a   :  { %14100 = vmatprep.subr.bf16.mxu0 %v19462_v36  ;;  %v19522_v47 = vld [vmem:[#allocation8 + $0x2c6c] ss:$48 sps:$4 sm:$0xff]  }
 0x80c   :  { %14140 = vmatpush1.bf16.msra.mxu1 %v19457_v38  ;;  %v19517_v38 = vld [vmem:[#allocation8 + $0x32c8] ss:$48 sps:$4 sm:$0xff]  }
 0x80d   :  { %14101 = vmatpush1.bf16.msra.mxu0 %v19460_v52  ;;  %14141 = vmatprep.subr.bf16.mxu1 %v19465_v61  ;;  %v19520_v61 = vld [vmem:[#allocation8 + $0x2c68] ss:$48 sps:$4 sm:$0xff]  }
 0x80e   :  { %14102 = vmatprep.subr.bf16.mxu0 %v19468_v41  ;;  %v19525_v41 = vld [vmem:[#allocation8 + $0x326c] ss:$48 sps:$4 sm:$0xff]  }
 0x810   :  { %14142 = vmatpush1.bf16.msra.mxu1 %v19463_v49 }
 0x811   :  { %14103 = vmatpush2.bf16.msra.mxu0 %v19466_v44  ;;  %14143 = vmatprep.subr.bf16.mxu1 %v19471_v8  ;;  %v19528_v44 = vld [vmem:[#allocation8 + $0x2c0c] ss:$48 sps:$4 sm:$0xff]  }
 0x812   :  { %14104 = vmatprep.subr.bf16.mxu0 %v19474_v53 }
 0x814   :  { %14144 = vmatpush2.bf16.msra.mxu1 %v19469_v55 }
 0x815   :  { %14105 = vmatpush2.bf16.msra.mxu0 %v19472_v21  ;;  %14145 = vmatprep.subr.bf16.mxu1 %v19477_v39  ;;  %v19526_v21 = vld [vmem:[#allocation8 + $0x2c08] ss:$48 sps:$4 sm:$0xff]   ;;  %v19531_v39 = vld [vmem:[#allocation8 + $0x320c] ss:$48 sps:$4 sm:$0xff]  }
 0x816   :  { %14106 = vmatprep.subr.bf16.mxu0 %v19480_v3 }
 0x818   :  { %14146 = vmatpush2.bf16.msra.mxu1 %v19475_v60 }
 0x819   :  { %14107 = vmatpush2.bf16.msra.mxu0 %v19478_v56  ;;  %14147 = vmatprep.subr.bf16.mxu1 %v19483_v34  ;;  %v19537_v34 = vld [vmem:[#allocation8 + $0x31ac] ss:$48 sps:$4 sm:$0xff]  }
 0x81a   :  { %14108 = vmatprep.subr.bf16.mxu0 %v19486_v35  ;;  %v19540_v35 = vld [vmem:[#allocation8 + $0x2b4c] ss:$48 sps:$4 sm:$0xff]  }
 0x81c   :  { %14148 = vmatpush2.bf16.msra.mxu1 %v19481_v50  ;;  %v19535_v50 = vld [vmem:[#allocation8 + $0x31a8] ss:$48 sps:$4 sm:$0xff]  }
 0x81d   :  { %14109 = vmatpush2.bf16.msra.mxu0 %v19484_v13  ;;  %14149 = vmatprep.subr.bf16.mxu1 %v19489_v28  ;;  %v19538_v13 = vld [vmem:[#allocation8 + $0x2b48] ss:$48 sps:$4 sm:$0xff]   ;;  %v19543_v28 = vld [vmem:[#allocation8 + $0x314c] ss:$48 sps:$4 sm:$0xff]  }
 0x81e   :  { %14110 = vmatprep.subr.bf16.mxu0 %v19492_v51  ;;  %v19549_v51 = vld [vmem:[#allocation8 + $0x30ec] ss:$48 sps:$4 sm:$0xff]  }
 0x820   :  { %14150 = vmatpush2.bf16.msra.mxu1 %v19487_v33  ;;  %v19552_v33 = vld [vmem:[#allocation8 + $0x2a8c] ss:$48 sps:$4 sm:$0xff]  }
 0x821   :  { %14111 = vmatpush2.bf16.msra.mxu0 %v19490_v62  ;;  %14151 = vmatprep.subr.bf16.mxu1 %v19495_v0  ;;  %v19547_v62 = vld [vmem:[#allocation8 + $0x30e8] ss:$48 sps:$4 sm:$0xff]  }
 0x822   :  { %14112 = vmatprep.subr.bf16.mxu0 %v19498_v20  ;;  %v19550_v0 = vld [vmem:[#allocation8 + $0x2a88] ss:$48 sps:$4 sm:$0xff]   ;;  %v19555_v20 = vld [vmem:[#allocation8 + $0x308c] ss:$48 sps:$4 sm:$0xff]  }
 0x824   :  { %14152 = vmatpush2.bf16.msra.mxu1 %v19493_v5  ;;  %v19558_v5 = vld [vmem:[#allocation8 + $0x2a2c] ss:$48 sps:$4 sm:$0xff]  }
 0x825   :  { %14113 = vmatpush2.bf16.msra.mxu0 %v19496_v54  ;;  %14153 = vmatprep.subr.bf16.mxu1 %v19501_v1  ;;  %v19553_v54 = vld [vmem:[#allocation8 + $0x3088] ss:$48 sps:$4 sm:$0xff]  }
 0x826   :  { %14114 = vmatprep.subr.bf16.mxu0 %v19504_v42  ;;  %v19556_v1 = vld [vmem:[#allocation8 + $0x2a28] ss:$48 sps:$4 sm:$0xff]   ;;  %v19561_v42 = vld [vmem:[#allocation8 + $0x302c] ss:$48 sps:$4 sm:$0xff]  }
 0x828   :  { %14154 = vmatpush2.bf16.msra.mxu1 %v19499_v9  ;;  %v19564_v9 = vld [vmem:[#allocation8 + $0x2fcc] ss:$48 sps:$4 sm:$0xff]  }
 0x829   :  { %14115 = vmatpush2.bf16.msra.mxu0 %v19502_v12  ;;  %14155 = vmatprep.subr.bf16.mxu1 %v19507_v46  ;;  %v19559_v12 = vld [vmem:[#allocation8 + $0x3028] ss:$48 sps:$4 sm:$0xff]  }
 0x82a   :  { %14116 = vmatprep.subr.bf16.mxu0 %v19510_v17  ;;  %v19562_v46 = vld [vmem:[#allocation8 + $0x2fc8] ss:$48 sps:$4 sm:$0xff]   ;;  %v19567_v17 = vld [vmem:[#allocation8 + $0x35cc] ss:$48 sps:$4 sm:$0xff]  }
 0x82c   :  { %14156 = vmatpush2.bf16.msra.mxu1 %v19505_v45  ;;  %v19570_v45 = vld [vmem:[#allocation8 + $0x2f6c] ss:$48 sps:$4 sm:$0xff]  }
 0x82d   :  { %14117 = vmatpush2.bf16.msra.mxu0 %v19508_v57  ;;  %14157 = vmatprep.subr.bf16.mxu1 %v19513_v14  ;;  %v19565_v57 = vld [vmem:[#allocation8 + $0x35c8] ss:$48 sps:$4 sm:$0xff]  }
 0x82e   :  { %14168 = vmatprep.subr.bf16.mxu0 %v19516_v6  ;;  %v19568_v14 = vld [vmem:[#allocation8 + $0x2f68] ss:$48 sps:$4 sm:$0xff]   ;;  %v19573_v6 = vld [vmem:[#allocation8 + $0x356c] ss:$48 sps:$4 sm:$0xff]  }
 0x830   :  { %v13874_v36 = vpop.f32.mrf.mxu0  ;;  %14119 = vmatmul.mubr.bf16.vlgmr.msra.gmra.mxu0 %v19964_v11  ;;  %14158 = vmatpush2.bf16.msra.mxu1 %v19511_v37  ;;  %v19576_v37 = vld [vmem:[#allocation8 + $0x2f0c] ss:$48 sps:$4 sm:$0xff]  }
 0x831   :  { %v20211_v52 = vadd.f32 %v13874_v36, %v20204_v23  ;;  %14169 = vmatpush1.bf16.msra.mxu0 %v19514_v58  ;;  %14200 = vmatprep.mubr.bf16.mxu0 %v19966_v15  ;;  %v19523_v23 = vld [vmem:[#allocation8 + $0x3268] ss:$48 sps:$4 sm:$0xff]   ;;  %v19582_v36 = vld [vmem:[#allocation8 + $0x2eac] ss:$48 sps:$4 sm:$0xff]  }
 0x832   :  { %v13876_v49 = vpop.f32.mrf.mxu0  ;;  %14209 = vmatprep.subr.bf16.mxu1 %v19519_v30  ;;  %14170 = vmatprep.subr.bf16.mxu0 %v19522_v47  ;;  %v19571_v58 = vld [vmem:[#allocation8 + $0x3568] ss:$48 sps:$4 sm:$0xff]   ;;  %v19579_v47 = vld [vmem:[#allocation8 + $0x350c] ss:$48 sps:$4 sm:$0xff]  }
 0x833   :  { %v13877_v8 = vadd.f32 %v13876_v49, %v20207_v27  ;;  %v20215_v53 = vpop.f32.mrf.mxu1  ;;  %14160 = vmatmul.mubr.bf16.vlgmr.msra.gmra.mxu1 %v19970_v40  ;;  %v19534_v27 = vld [vmem:[#allocation8 + $0x2bac] ss:$48 sps:$4 sm:$0xff]   ;;  %v19574_v30 = vld [vmem:[#allocation8 + $0x2f08] ss:$48 sps:$4 sm:$0xff]  }
 0x834   :  { %v13878_v11 = vpop.f32.mrf.mxu0  ;;  %14210 = vmatpush1.bf16.msra.mxu1 %v19517_v38  ;;  %14241 = vmatprep.mubr.bf16.mxu1 %v19972_v43  ;;  %v19529_v43 = vld [vmem:[#allocation8 + $0x3208] ss:$48 sps:$4 sm:$0xff]   ;;  %v19588_v49 = vld [vmem:[#allocation8 + $0x2e4c] ss:$48 sps:$4 sm:$0xff]  }
 0x835   :  { %v14253_v55 = vmax.f32 %v20166_v59, %v13877_v8  ;;  %v20220_v15 = vpop.f32.mrf.mxu1  ;;  %14171 = vmatpush1.bf16.msra.mxu0 %v19520_v61  ;;  %14211 = vmatprep.subr.bf16.mxu1 %v19525_v41  ;;  %v19532_v59 = vld [vmem:[#allocation8 + $0x2ba8] ss:$48 sps:$4 sm:$0xff]   ;;  %v19585_v41 = vld [vmem:[#allocation8 + $0x34ac] ss:$48 sps:$4 sm:$0xff]  }
 0x836   :  { %v13879_v3 = vpop.f32.mrf.mxu0  ;;  %14172 = vmatprep.subr.bf16.mxu0 %v19528_v44  ;;  %v19577_v38 = vld [vmem:[#allocation8 + $0x3508] ss:$48 sps:$4 sm:$0xff]   ;;  %v19591_v11 = vld [vmem:[#allocation8 + $0x344c] ss:$48 sps:$4 sm:$0xff]  }
 0x837   :  { %v20225_v40 = vmax.f32 %v14250_v18, %v14253_v55  ;;  %v13919_v60 = vpop.f32.mrf.mxu1  ;;  %v19544_v18 = vld [vmem:[#allocation8 + $0x2ae8] ss:$48 sps:$4 sm:$0xff]   ;;  %v19600_v3 = vld [vmem:[#allocation8 + $0x2d8c] ss:$48 sps:$4 sm:$0xff]  }
 0x838   :  { %14212 = vmatpush1.bf16.msra.mxu1 %v19523_v23  ;;  %v19580_v61 = vld [vmem:[#allocation8 + $0x2ea8] ss:$48 sps:$4 sm:$0xff]   ;;  %v19594_v23 = vld [vmem:[#allocation8 + $0x2dec] ss:$48 sps:$4 sm:$0xff]  }
 0x839   :  { %v13920_v56 = vpop.f32.mrf.mxu1  ;;  %14173 = vmatpush1.bf16.msra.mxu0 %v19526_v21  ;;  %14213 = vmatprep.subr.bf16.mxu1 %v19531_v39  ;;  %v19583_v44 = vld [vmem:[#allocation8 + $0x34a8] ss:$48 sps:$4 sm:$0xff]   ;;  %v19597_v39 = vld [vmem:[#allocation8 + $0x33ec] ss:$48 sps:$4 sm:$0xff]  }
 0x83a   :  { %14174 = vmatprep.subr.bf16.mxu0 %v19534_v27  ;;  %v19586_v8 = vld [vmem:[#allocation8 + $0x2e48] ss:$48 sps:$4 sm:$0xff]   ;;  %v19606_v56 = vld [vmem:[#allocation8 + $0x2d2c] ss:$48 sps:$4 sm:$0xff]  }
 0x83b   :  { %v19589_v55 = vld [vmem:[#allocation8 + $0x3448] ss:$48 sps:$4 sm:$0xff]  }
 0x83c   :  { %14214 = vmatpush1.bf16.msra.mxu1 %v19529_v43  ;;  %v19592_v21 = vld [vmem:[#allocation8 + $0x2de8] ss:$48 sps:$4 sm:$0xff]   ;;  %v19603_v43 = vld [vmem:[#allocation8 + $0x338c] ss:$48 sps:$4 sm:$0xff]  }
 0x83d   :  { %14175 = vmatpush1.bf16.msra.mxu0 %v19532_v59  ;;  %14215 = vmatprep.subr.bf16.mxu1 %v19537_v34  ;;  %v19595_v27 = vld [vmem:[#allocation8 + $0x33e8] ss:$48 sps:$4 sm:$0xff]  }
 0x83e   :  { %14176 = vmatprep.subr.bf16.mxu0 %v19540_v35  ;;  %v19598_v60 = vld [vmem:[#allocation8 + $0x2d88] ss:$48 sps:$4 sm:$0xff]   ;;  %v19609_v35 = vld [vmem:[#allocation8 + $0x332c] ss:$48 sps:$4 sm:$0xff]  }
 0x83f   :  { %v19601_v59 = vld [vmem:[#allocation8 + $0x3388] ss:$48 sps:$4 sm:$0xff]  }
 0x840   :  { %14216 = vmatpush1.bf16.msra.mxu1 %v19535_v50  ;;  %v19604_v34 = vld [vmem:[#allocation8 + $0x2d28] ss:$48 sps:$4 sm:$0xff]  }
 0x841   :  { %14177 = vmatpush1.bf16.msra.mxu0 %v19538_v13  ;;  %14217 = vmatprep.subr.bf16.mxu1 %v19543_v28  ;;  %v19607_v50 = vld [vmem:[#allocation8 + $0x3328] ss:$48 sps:$4 sm:$0xff]  }
 0x842   :  { %14178 = vmatprep.subr.bf16.mxu0 %v19546_v7 }
 0x844   :  { %14218 = vmatpush1.bf16.msra.mxu1 %v19541_v10 }
 0x845   :  { %14179 = vmatpush1.bf16.msra.mxu0 %v19544_v18  ;;  %14219 = vmatprep.subr.bf16.mxu1 %v19549_v51 }
 0x846   :  { %14180 = vmatprep.subr.bf16.mxu0 %v19552_v33 }
 0x848   :  { %14220 = vmatpush1.bf16.msra.mxu1 %v19547_v62 }
 0x849   :  { %14181 = vmatpush1.bf16.msra.mxu0 %v19550_v0  ;;  %14221 = vmatprep.subr.bf16.mxu1 %v19555_v20 }
 0x84a   :  { %14182 = vmatprep.subr.bf16.mxu0 %v19558_v5 }
 0x84c   :  { %14222 = vmatpush1.bf16.msra.mxu1 %v19553_v54 }
 0x84d   :  { %14183 = vmatpush1.bf16.msra.mxu0 %v19556_v1  ;;  %14223 = vmatprep.subr.bf16.mxu1 %v19561_v42  ;;  %v19613_v1 = vld [vmem:[%s20346_s5 + $0x70] sm:$0xff]  }
 0x84e   :  { %14184 = vmatprep.subr.bf16.mxu0 %v19564_v9  ;;  %v19615_v42 = vld [vmem:[%s20346_s5 + $0xb0] sm:$0xff]  }
 0x84f   :  { %v19614_v9 = vld [vmem:[%s20346_s5 + $0x30] sm:$0xff]  }
 0x850   :  { %14224 = vmatpush1.bf16.msra.mxu1 %v19559_v12  ;;  %v19616_v12 = vld [vmem:[%s20346_s5 + $0x68] sm:$0xff]  }
 0x851   :  { %14185 = vmatpush2.bf16.msra.mxu0 %v19562_v46  ;;  %14225 = vmatprep.subr.bf16.mxu1 %v19567_v17  ;;  %v19618_v46 = vld [vmem:[%s20346_s5 + $0xa8] sm:$0xff]  }
 0x852   :  { %14186 = vmatprep.subr.bf16.mxu0 %v19570_v45  ;;  %v19617_v17 = vld [vmem:[%s20346_s5 + $0x28] sm:$0xff]   ;;  %v19619_v45 = vld [vmem:[%s20346_s5 + $0x60] sm:$0xff]  }
 0x854   :  { %14226 = vmatpush2.bf16.msra.mxu1 %v19565_v57  ;;  %v19621_v57 = vld [vmem:[%s20346_s5 + $0xa0] sm:$0xff]  }
 0x855   :  { %14187 = vmatpush2.bf16.msra.mxu0 %v19568_v14  ;;  %14227 = vmatprep.subr.bf16.mxu1 %v19573_v6  ;;  %v19620_v14 = vld [vmem:[%s20346_s5 + $0x20] sm:$0xff]  }
 0x856   :  { %14188 = vmatprep.subr.bf16.mxu0 %v19576_v37 }
 0x858   :  { %14228 = vmatpush2.bf16.msra.mxu1 %v19571_v58  ;;  %v19622_v58 = vld [vmem:[%s20346_s5 + $0x58] sm:$0xff]  }
 0x859   :  { %14189 = vmatpush2.bf16.msra.mxu0 %v19574_v30  ;;  %14229 = vmatprep.subr.bf16.mxu1 %v19579_v47 }
 0x85a   :  { %14190 = vmatprep.subr.bf16.mxu0 %v19582_v36 }
 0x85c   :  { %14230 = vmatpush2.bf16.msra.mxu1 %v19577_v38  ;;  %v19623_v38 = vld [vmem:[%s20346_s5 + $0x18] sm:$0xff]  }
 0x85d   :  { %14191 = vmatpush2.bf16.msra.mxu0 %v19580_v61  ;;  %14231 = vmatprep.subr.bf16.mxu1 %v19585_v41 }
 0x85e   :  { %14192 = vmatprep.subr.bf16.mxu0 %v19588_v49 }
 0x860   :  { %14232 = vmatpush2.bf16.msra.mxu1 %v19583_v44 }
 0x861   :  { %14193 = vmatpush2.bf16.msra.mxu0 %v19586_v8  ;;  %14233 = vmatprep.subr.bf16.mxu1 %v19591_v11 }
 0x862   :  { %14194 = vmatprep.subr.bf16.mxu0 %v19594_v23  ;;  %v19624_v23 = vld [vmem:[%s20346_s5 + $0x98] sm:$0xff]  }
 0x864   :  { %14234 = vmatpush2.bf16.msra.mxu1 %v19589_v55 }
 0x865   :  { %14195 = vmatpush2.bf16.msra.mxu0 %v19592_v21  ;;  %14235 = vmatprep.subr.bf16.mxu1 %v19597_v39  ;;  %v19625_v21 = vld [vmem:[%s20346_s5 + $0x50] sm:$0xff]  }
 0x866   :  { %14196 = vmatprep.subr.bf16.mxu0 %v19600_v3  ;;  %v19626_v39 = vld [vmem:[%s20346_s5 + $0x10] sm:$0xff]  }
 0x867   :  { %v19627_v3 = vld [vmem:[%s20346_s5 + $0x90] sm:$0xff]  }
 0x868   :  { %14236 = vmatpush2.bf16.msra.mxu1 %v19595_v27  ;;  %v19628_v27 = vld [vmem:[%s20346_s5 + $0x48] sm:$0xff]  }
 0x869   :  { %14197 = vmatpush2.bf16.msra.mxu0 %v19598_v60  ;;  %14237 = vmatprep.subr.bf16.mxu1 %v19603_v43  ;;  %v19629_v60 = vld [vmem:[%s20346_s5 + $0x8] sm:$0xff]  }
 0x86a   :  { %14198 = vmatprep.subr.bf16.mxu0 %v19606_v56  ;;  %v19630_v43 = vld [vmem:[%s20346_s5 + $0x88] sm:$0xff]   ;;  %v19631_v56 = vld [vmem:[%s20346_s5 + $0x40] sm:$0xff]  }
 0x86c   :  { %14238 = vmatpush2.bf16.msra.mxu1 %v19601_v59  ;;  %v19632_v59 = vld [vmem:[%s20346_s5] sm:$0xff]  }
 0x86d   :  { %14199 = vmatpush2.bf16.msra.mxu0 %v19604_v34  ;;  %14239 = vmatprep.subr.bf16.mxu1 %v19609_v35  ;;  %v19633_v34 = vld [vmem:[%s20346_s5 + $0x80] sm:$0xff]  }
 0x870   :  { %v13956_v13 = vpop.f32.mrf.mxu0  ;;  %14201 = vmatmul.mubr.bf16.vlgmr.msra.gmra.mxu0 %v19976_v48  ;;  %14240 = vmatpush2.bf16.msra.mxu1 %v19607_v50  ;;  %v19610_v48 = vld [vmem:[%s20346_s5 + $0x78] sm:$0xff]  }
 0x871   :  { %v13957_v28 = vadd.f32 %v13956_v13, %v20215_v53  ;;  %v19611_v53 = vld [vmem:[%s20346_s5 + $0x38] sm:$0xff]   ;;  %16634 = vmatprep.subr.bf16.mxu0 %v19610_v48 }
 0x872   :  { %v13958_v7 = vpop.f32.mrf.mxu0  ;;  %16635 = vmatpush3.bf16.msra.mxu0 %v19611_v53 }
 0x873   :  { %v13959_v10 = vadd.f32 %v13958_v7, %v20220_v15  ;;  %v13997_v18 = vpop.f32.mrf.mxu1  ;;  %14242 = vmatmul.mubr.bf16.vlgmr.msra.gmra.mxu1 %v19986_v32  ;;  %v19612_v15 = vld [vmem:[%s20346_s5 + $0xb8] sm:$0xff]   ;;  %v19820_v32 = vmov 0.0   ;;  %16636 = vmatprep.subr.bf16.mxu0 %v19613_v1  ;;  %s19822_s5 = smov [#allocation15]  }
 0x874   :  { %v13998_v51 = vadd.f32 %v13997_v18, %v13957_v28  ;;  %v13960_v33 = vpop.f32.mrf.mxu0  ;;  %16674 = vmatprep.subr.bf16.mxu1 %v19820_v32  ;;  %16690 = vmatprep.mubr.msk.bf16.mxu1 %vm19821_vm0, %v19820_v32  ;;  %s14673_s23 = sshll.u32 %s19822_s5, 4  ;;  %s14674_s23 = int_to_ptr.vmem [resolvable:$true] %s14673_s23 }
 0x875   :  { %v13999_v62 = vpop.f32.mrf.mxu1  ;;  %16675 = vmatpush3.bf16.msra.mxu1 %v19612_v15  ;;  %s19779_s2 = scalar_lea.vmem %s14674_s23, 32  ;;  %p19784_p8 = scmp.lt.s32.totalorder %s14674_s23, %s14674_s23 }
 0x876   :  { %v14000_v0 = vadd.f32 %v13999_v62, %v13959_v10  ;;  %v13961_v20 = vpop.f32.mrf.mxu0  ;;  %16676 = vmatprep.subr.bf16.mxu1 %v19820_v32  ;;  %16637 = vmatpush3.bf16.msra.mxu0 %v19614_v9  ;;  %p19780_p7 = scmp.ne.s32.totalorder %s14674_s23, %s19779_s2  ;;  %p19785_p9 = scmp.lt.s32.totalorder %s19779_s2, %s19779_s2 }
 0x877   :  { %v14001_v5 = vpop.f32.mrf.mxu1  ;;  %16638 = vmatprep.subr.bf16.mxu0 %v19616_v12  ;;  %v14259_v20 = vld [vmem:[#allocation9] sm:$0x7] }
 0x878   :  { %v14264_v15 = vrot.slane %v14259_v20, %v1565_v25  ;;  %p19786_p10 = por %p19785_p9, %p19784_p8 }
 0x879   :  { %v14002_v54 = vpop.f32.mrf.mxu1  ;;  %16677 = vmatpush3.bf16.msra.mxu1 %v19615_v42 }
 0x87a   :  { %16678 = vmatprep.subr.bf16.mxu1 %v19820_v32  ;;  %16639 = vmatpush3.bf16.msra.mxu0 %v19617_v17  ;;  %p19787_p11 = pnand %p19786_p10, %p19780_p7 }
 0x87b   :  { %16640 = vmatprep.subr.bf16.mxu0 %v19619_v45 }
 0x87d   :  { %16679 = vmatpush3.bf16.msra.mxu1 %v19618_v46 }
 0x87e   :  { %16680 = vmatprep.subr.bf16.mxu1 %v19820_v32  ;;  %16641 = vmatpush3.bf16.msra.mxu0 %v19620_v14  ;;  %v14268_v14 = vrot.slane %v14259_v20, %v1569_v22 }
 0x87f   :  { %16642 = vmatprep.subr.bf16.mxu0 %v19622_v58 }
 0x881   :  { %16681 = vmatpush3.bf16.msra.mxu1 %v19621_v57 }
 0x882   :  { %16682 = vmatprep.subr.bf16.mxu1 %v19820_v32  ;;  %16643 = vmatpush3.bf16.msra.mxu0 %v19623_v38 }
 0x883   :  { %16644 = vmatprep.subr.bf16.mxu0 %v19625_v21 }
 0x885   :  { %16683 = vmatpush3.bf16.msra.mxu1 %v19624_v23 }
 0x886   :  { %16684 = vmatprep.subr.bf16.mxu1 %v19820_v32  ;;  %16645 = vmatpush3.bf16.msra.mxu0 %v19626_v39 }
 0x887   :  { %16646 = vmatprep.subr.bf16.mxu0 %v19628_v27 }
 0x889   :  { %16685 = vmatpush3.bf16.msra.mxu1 %v19627_v3 }
 0x88a   :  { %16686 = vmatprep.subr.bf16.mxu1 %v19820_v32  ;;  %16647 = vmatpush3.bf16.msra.mxu0 %v19629_v60 }
 0x88b   :  { %16648 = vmatprep.subr.bf16.mxu0 %v19631_v56 }
 0x88d   :  { %16687 = vmatpush3.bf16.msra.mxu1 %v19630_v43 }
 0x88e   :  { %16688 = vmatprep.subr.bf16.mxu1 %v19820_v32  ;;  %16649 = vmatpush3.bf16.msra.mxu0 %v19632_v59 }
 0x88f   :  { %16694 = vmatprep.subr.mxu0 %v19820_v32 }
 0x891   :  { %16689 = vmatpush3.bf16.msra.mxu1 %v19633_v34  ;;  %v16632_v34 = vld [vmem:[#allocation14] ss:$0 sm:$0xff] }
 0x8b0   :  { %v14038_v6 = vpop.f32.mrf.mxu0 }
 0x8b1   :  { %v14039_v37 = vadd.f32 %v14038_v6, %v13998_v51  ;;  %v14276_v6 = vadd.f32 %v14264_v15, %v20225_v40 }
 0x8b2   :  { %v14040_v30 = vpop.f32.mrf.mxu0 }
 0x8b3   :  { %v14041_v47 = vadd.f32 %v14040_v30, %v14000_v0  ;;  %v14079_v36 = vpop.f32.mrf.mxu1  ;;  %v14272_v30 = vrot.slane %v14259_v20, %v1573_v26  ;;  %v14279_v38 = vmax.f32 %v14276_v6, 0.0  ;;  %v14569_v26 = vld [vmem:[#allocation12 + $0x20] sm:$0xff] }
 0x8b4   :  { %v14080_v61 = vadd.f32 %v14079_v36, %v14039_v37  ;;  %v14042_v41 = vpop.f32.mrf.mxu0 }
 0x8b5   :  { %v14081_v49 = vpop.f32.mrf.mxu1 }
 0x8b6   :  { %v14082_v44 = vadd.f32 %v14081_v49, %v14041_v47  ;;  %v14043_v8 = vpop.f32.mrf.mxu0  ;;  %v14282_v49 = vpack.c.bf16 %v14279_v38, %v14279_v38 }
 0x8b7   :  { %v14083_v11 = vpop.f32.mrf.mxu1 }
 0x8b8   :  { %v16607_v11 = vld [vmem:[#allocation11] ss:$0 sm:$0xff] }
 0x8b9   :  { %v14084_v55 = vpop.f32.mrf.mxu1 }
 0x8f0   :  { %v14120_v35 = vpop.f32.mrf.mxu0 }
 0x8f1   :  { %v14121_v33 = vadd.f32 %v14120_v35, %v14080_v61 }
 0x8f2   :  { %v14122_v50 = vpop.f32.mrf.mxu0 }
 0x8f3   :  { %v14161_v13 = vpop.f32.mrf.mxu1  ;;  %v14123_v62 = vadd.f32 %v14122_v50, %v14082_v44  ;;  %v14572_v44 = vld [vmem:[#allocation12 + $0x38] sm:$0xff] }
 0x8f4   :  { %v14124_v28 = vpop.f32.mrf.mxu0  ;;  %v14162_v0 = vadd.f32 %v14161_v13, %v14121_v33 }
 0x8f5   :  { %v14163_v7 = vpop.f32.mrf.mxu1 }
 0x8f6   :  { %v14125_v10 = vpop.f32.mrf.mxu0  ;;  %v14164_v54 = vadd.f32 %v14163_v7, %v14123_v62 }
 0x8f7   :  { %v14165_v18 = vpop.f32.mrf.mxu1 }
 0x8f9   :  { %v14166_v51 = vpop.f32.mrf.mxu1 }
 0x930   :  { %v14202_v5 = vpop.f32.mrf.mxu0 }
 0x931   :  { %v14203_v48 = vadd.f32 %v14202_v5, %v14162_v0 }
 0x932   :  { %v14204_v53 = vpop.f32.mrf.mxu0 }
 0x933   :  { %v14205_v1 = vadd.f32 %v14204_v53, %v14164_v54  ;;  %v14243_v42 = vpop.f32.mrf.mxu1 }
 0x934   :  { %v14244_v9 = vadd.f32 %v14243_v42, %v14203_v48  ;;  %v14206_v12 = vpop.f32.mrf.mxu0 }
 0x935   :  { %v14245_v46 = vpop.f32.mrf.mxu1 }
 0x936   :  { %v14254_v17 = vmax.f32 %v20169_v2, %v14244_v9  ;;  %v14246_v45 = vadd.f32 %v14245_v46, %v14205_v1  ;;  %v14207_v57 = vpop.f32.mrf.mxu0 }
 0x937   :  { %v14247_v37 = vpop.f32.mrf.mxu1 }
 0x938   :  { %v14257_v58 = vmax.f32 %v14251_v24, %v14254_v17  ;;  %v14255_v25 = vmax.f32 %v20211_v52, %v14246_v45  ;;  %v14567_v24 = vld [vmem:[#allocation12 + $0x10] sm:$0xff] }
 0x939   :  { %v14248_v47 = vpop.f32.mrf.mxu1 }
 0x93a   :  { %v14258_v2 = vmax.f32 %v14252_v29, %v14255_v25  ;;  %v14277_v36 = vadd.f32 %v14268_v14, %v14257_v58  ;;  %v14565_v29 = vld [vmem:[#allocation12] sm:$0xff] }
 0x93c   :  { %v14278_v22 = vadd.f32 %v14272_v30, %v14258_v2  ;;  %v14280_v61 = vmax.f32 %v14277_v36, 0.0 }
 0x93e   :  { %v14281_v40 = vmax.f32 %v14278_v22, 0.0  ;;  %v14283_v41 = vpack.c.bf16 %v14280_v61, %v14280_v61 }
 0x940   :  { %v14284_v16 = vpack.c.bf16 %v14281_v40, %v14281_v40  ;;  %14516 = vmatprep.mubr.bf16.mxu0 %v14283_v41 }
 0x941   :  { %14517 = vmatmul.mubr.bf16.vlgmr.msra.gmra.mxu0 %v14282_v49 }
 0x942   :  { %16691 = vmatmul.mubr.bf16.vlgmr.msra.gmra.mxu1 %v14284_v16  ;;  %16695 = vmatpush3.msra.mxu0 %v14572_v44 }
 0x943   :  { %16696 = vmatprep.subr.mxu0 %v19820_v32  ;;  %16710 = vmatprep.mubr.msk.f32.mxu0 %vm19821_vm0, %v19820_v32 }
 0x944   :  { %16697 = vmatpush3.msra.mxu0 %v14571_v4 }
 0x945   :  { %16698 = vmatprep.subr.mxu0 %v19820_v32 }
 0x946   :  { %16699 = vmatpush3.msra.mxu0 %v14570_v19 }
 0x947   :  { %16700 = vmatprep.subr.mxu0 %v19820_v32 }
 0x948   :  { %16701 = vmatpush3.msra.mxu0 %v14569_v26 }
 0x949   :  { %16702 = vmatprep.subr.mxu0 %v19820_v32 }
 0x94a   :  { %16703 = vmatpush3.msra.mxu0 %v14568_v63 }
 0x94b   :  { %16704 = vmatprep.subr.mxu0 %v19820_v32 }
 0x94c   :  { %16705 = vmatpush3.msra.mxu0 %v14567_v24 }
 0x94d   :  { %16706 = vmatprep.subr.mxu0 %v19820_v32 }
 0x94e   :  { %16707 = vmatpush3.msra.mxu0 %v14566_v31 }
 0x94f   :  { %16708 = vmatprep.subr.mxu0 %v19820_v32 }
 0x950   :  { %16709 = vmatpush3.msra.mxu0 %v14565_v29 }
 0xa01   :  { %v16650_v52 = vpop.f32.mrf.mxu0 }
 0xa02   :  { %v14558_v8 = vpop.f32.mrf.mxu1 }
 0xa03   :  { %v16651_v23 = vpop.f32.mrf.mxu0 }
 0xa04   :  { %v16652_v55 = vadd.f32 %v16651_v23, %v16650_v52  ;;  %v16692_v21 = vpop.f32.mrf.mxu1 }
 0xa05   :  { %v16653_v39 = vpop.f32.mrf.mxu0 }
 0xa06   :  { %v14519_v3 = vadd.f32 %v16652_v55, %v16607_v11  ;;  %v14561_v27 = vpop.f32.mrf.mxu1 }
 0xa07   :  { %v16654_v60 = vpop.f32.mrf.mxu0 }
 0xa08   :  { %v14559_v43 = vadd.f32 %v14558_v8, %v14519_v3  ;;  %v16693_v56 = vpop.f32.mrf.mxu1 }
 0xa0a   :  { %v14564_v59 = vmax.f32 %v14559_v43, 0.0 }
 0xa0c   :  { %16711 = vmatmul.mubr.msk.f32.vlgmr.msra.gmra.mxu0 %vm14580_vm1, %v14564_v59 }
 0xacc   :  { %v14650_v35 = vpop.f32.mrf.mxu0 }
 0xacd   :  { %v14651_v32 = vadd.f32 %v16632_v34, %v14650_v35 }
 0xace   :  { %v16712_v50 = vpop.f32.mrf.mxu0 }
 0xacf   :  { %v14655_v13 = vsel %vm14654_vm2, %v14651_v32, -inf }
 0xad0   :  { %14656 = vmax.xlane.f32.xlu0 %v14655_v13 }
 0xb59   :  { %v14657_v28 = vpop.xlane.xlu0 %14656 }
 0xb5a   :  { %v14658_v7 = vsub.f32 %v14651_v32, %v14657_v28 }
 0xb5c   :  { %v14659_v10 = vmul.f32 1.442695, %v14658_v7 }
 0xb5e   :  { %19634 = vpow2.f32 %v14659_v10 }
 0xb6b   :  { %v19635_v18 = vpop.eup %19634 }
 0xb6c   :  { %v14661_v51 = vsel %vm14654_vm2, %v19635_v18, 0.0 }
 0xb6d   :  { %14662 = vadd.xlane.f32.xlu0 %v14661_v51 }
 0xbf6   :  { %v14663_v33 = vpop.xlane.xlu0 %14662 }
 0xbf7   :  { %19636 = vrcp.f32 %v14663_v33 }
 0xc04   :  { %v19637_v62 = vpop.eup %19636 }
 0xc05   :  { %v14665_v0 = vmul.f32 %v19637_v62, %v19635_v18 }
 0xc07   :  { %14666 = vst [vmem:[#allocation15] sm:$0x3] %v14665_v0 }
 0xc08   :  { %19790 = shalt.err (!%p19787_p11)
}
 0xc09   :  { %14676 = dma.vmem_to_hbm [thread:$0]  %s14674_s23, 32, %s20350_s9, [#allocation5]  }
 0xc0a   :  { %19807 = dma.done.wait [#allocation5], 32  }
 0xc0b   :  { %19808 = vsyncadd [#allocation5], 4294967264 }
 0xc0c   :  { %14680 = vsyncpa [#allocation4], 1 }
 0xc0d   :  { %14681 = vsyncpa [#allocation7], 1 }
 0xc0e   :  { %14682 = vsyncpa [#allocation10], 1 }
 0xc0f   :  { %14683 = vsyncpa [#allocation13], 1 }
 0xc10   :  { %14684 = vsyncpa [#allocation5], 1 }

</bundles_post_ra>
